<compile_context>
chip_gen: v6e
topology: v6e:2x2x1
jax: 0.10.0
libtpu: 0.0.40
codegen_flags: <defaults>
</compile_context>

<pallas_src>
import math

import jax
import jax.numpy as jnp
import numpy as np
from jax.experimental import pallas as pl
from jax.experimental.pallas import tpu as pltpu

# ----------------------- configuration (small, consistent with the module) ---
FM = 16            # dim = FM*4 = 64.  Reference einsums require dim == num_heads**2 (=64).
NC = 12            # hyperspectral bands (must be >= 9 for the (9,3,3) Conv3d)
NCLIDAR = 2
CLASSES = 6
# TODO(synk): reference hardcodes patches=11**2 inside CrossHL_attention; generalized to PATCH**2
PATCH = 8
B = 2

DIM = FM * 4                    # 64
HEADS = 8
HD = DIM // HEADS               # 8
SCALE = HD ** -0.5
MLP_DIM = 512
DEPTH = 2
NPATCH = PATCH * PATCH          # 64
NTOK = NPATCH + 1               # 65
NTOKP = 72                      # padded token rows: [patch 0..63, cls, 7 pad]
DOUT3D = NC - 9 + 1             # conv3d output depth (4)
C3 = 8 * DOUT3D                 # conv3d flattened channels == HetConv input channels (32)
HET_G = (FM * 4 // 4) if (8 * (NC - 8)) % FM == 0 else (FM * 4 // 8)   # 16
NFREQ = PATCH * (PATCH // 2 + 1)   # 40 rfft2 bins for an 8x8 grid

BN_EPS = 1e-5
LN_EPS = 1e-6

# -------- row offsets inside the packed constant blobs (all multiples of 8) ---
R_POSC = 0
R_GMAT = R_POSC + NTOKP                       # 72
R_GS = R_GMAT + DIM                           # 136
R_LC = R_GS + 2 * NFREQ                       # 216
R_FCW = R_LC + NPATCH                         # 280
R_WK = R_FCW + DIM                            # 344
R_WV = R_WK + DEPTH * DIM                     # 472
R_WGF = R_WV + DEPTH * DIM                    # 600
R_PT = R_WGF + DEPTH * 2 * NFREQ              # 760
R_MASK = R_PT + HEADS * NTOKP                 # 1336
CMAT_ROWS = R_MASK + HEADS * NTOKP            # 1912

V_B3 = 0
V_BHET = 1
V_BPROJ = 2        # rows 2,3
V_LNG = 4          # rows 4,5
V_LNB = 6          # rows 6,7
V_B1 = 8           # rows 8,9
V_B2 = 10          # rows 10,11
V_ENCG = 12
V_ENCB = 13
V_FCB = 14
CVEC_ROWS = 16


# ----------------------------- in-kernel helpers -----------------------------
def _gelu(x):
    # tanh-form GELU (hits the EUP); torch nn.GELU() is erf-based (<~1e-3 abs delta).
    c = math.sqrt(2.0 / math.pi)
    return 0.5 * x * (1.0 + jnp.tanh(c * (x + 0.044715 * x * x * x)))


# --------------------------------- the fused kernel --------------------------
def crosshl_fused_kernel(xsp_ref, qbd_ref, w3w_ref, whetw_ref, cmat_ref, cvec_ref,
                         wproj_ref, w1_ref, w2_ref, o_ref):
    f32 = jnp.float32
    xin = xsp_ref[0]                                               # (64, NC)

    # --- 3x3 boundary masks for the 8x8 grid (row index p = 8*i + j), built once ---
    ids = jax.lax.broadcasted_iota(jnp.int32, (NPATCH, 1), 0)
    ii = ids >> 3
    jj = ids & 7
    masks = {}
    shifts = {}
    for t in range(9):
        di, dj = t // 3 - 1, t % 3 - 1
        if di == 0 and dj == 0:
            continue
        conds = []
        if di < 0:
            conds.append(ii >= -di)
        if di > 0:
            conds.append(ii <= PATCH - 1 - di)
        if dj < 0:
            conds.append(jj >= -dj)
        if dj > 0:
            conds.append(jj <= PATCH - 1 - dj)
        c = conds[0]
        for extra in conds[1:]:
            c = jnp.logical_and(c, extra)
        masks[t] = jnp.where(c, 1.0, 0.0).astype(f32)              # (64, 1)
        shifts[t] = (-(PATCH * di + dj)) % NPATCH

    # --- conv5: Conv3d(1->8,(9,3,3),pad=(0,1,1)) + BN3d(eval) + ReLU ---
    # weight-first: one matmul yields all 9 tap responses; spatial shift = sublane roll.
    y1 = jnp.dot(xin, w3w_ref[...], preferred_element_type=f32)    # (64, 9*128)
    acc3 = y1[:, 4 * 128:4 * 128 + C3]                             # centre tap (identity)
    for t in range(9):
        if t == 4:
            continue
        ch = y1[:, 128 * t:128 * t + C3]
        acc3 = acc3 + masks[t] * pltpu.roll(ch, shifts[t], 0)
    feat = jnp.maximum(acc3 + cvec_ref[V_B3:V_B3 + 1, :C3], 0.0)   # (64, C3)

    # --- HetConv (grouped 3x3 with the pointwise 1x1 folded into the centre tap) ---
    y2 = jnp.dot(feat, whetw_ref[...], preferred_element_type=f32)  # (64, 9*128)
    acch = y2[:, 4 * 128:4 * 128 + DIM]
    for t in range(9):
        if t == 4:
            continue
        ch = y2[:, 128 * t:128 * t + DIM]
        acch = acch + masks[t] * pltpu.roll(ch, shifts[t], 0)
    tok = jnp.maximum(acch + cvec_ref[V_BHET:V_BHET + 1, :DIM], 0.0)  # (64, DIM)

    # --- tokens: rows 0..63 = patches, row 64 = cls, rows 65..71 = pad (never read back) ---
    posc = cmat_ref[R_POSC:R_POSC + NTOKP, :DIM]
    x = jnp.concatenate([tok, jnp.zeros((NTOKP - NPATCH, DIM), f32)], axis=0) + posc

    gmat = cmat_ref[R_GMAT:R_GMAT + DIM, :DIM]
    gs = cmat_ref[R_GS:R_GS + 2 * NFREQ, :NPATCH]
    lc = cmat_ref[R_LC:R_LC + NPATCH, :2 * NFREQ]
    pt = cmat_ref[R_PT:R_PT + HEADS * NTOKP, :NTOKP]
    msk = cmat_ref[R_MASK:R_MASK + HEADS * NTOKP, :DIM]

    # --- encoder blocks ---
    for d in range(DEPTH):
        res = x
        # (reference computes attention_norm(x1) and immediately overwrites it -> skipped)
        # TODO(synk): reference GlobalFilter does x.view(B, sqrt(N), sqrt(N), C), which is
        # shape-inconsistent for N = P*P + 1; the filter acts on the P*P patch tokens and
        # the cls token passes through unchanged.
        xp = x[:NPATCH, :]                                          # (64, DIM)
        u = jnp.dot(gs, xp, preferred_element_type=f32)             # (2*NFREQ, DIM)
        ur, ui = u[:NFREQ, :], u[NFREQ:, :]
        wgf = cmat_ref[R_WGF + d * 2 * NFREQ:R_WGF + (d + 1) * 2 * NFREQ, :DIM]
        wr, wi = wgf[:NFREQ, :], wgf[NFREQ:, :]
        v = jnp.concatenate([wr * ur - wi * ui, wr * ui + wi * ur], axis=0)
        gf = jnp.dot(lc, v, preferred_element_type=f32)             # (64, DIM)
        xg = jnp.concatenate([gf, x[NPATCH:, :]], axis=0)           # (72, DIM)

        # cross attention (scale folded into qbd); head-h logits live in columns [8h, 8h+8)
        wk = cmat_ref[R_WK + d * DIM:R_WK + (d + 1) * DIM, :DIM]
        wv = cmat_ref[R_WV + d * DIM:R_WV + (d + 1) * DIM, :NTOKP]
        k_lin = jnp.dot(xg, wk, preferred_element_type=f32)         # (72, DIM)
        v_t = jnp.dot(wv, xg, preferred_element_type=f32)           # (DIM, DIM): row h*8+j = value[h,j,:]
        att = jnp.dot(k_lin, qbd_ref[d, 0], preferred_element_type=f32)   # (72, DIM)

        # grouped (per-head) softmax; a single row-wide max is a valid per-group shift
        gmax = jnp.max(att, axis=-1, keepdims=True)
        e = jnp.exp(att - gmax)
        gsum = jnp.dot(e, gmat, preferred_element_type=f32)
        att_sm = e * pl.reciprocal(gsum + 1e-20, approx=True)

        # torch's reshape(B, N, -1) of the contiguous (H, N, C) head outputs interleaves
        # head/token blocks; PT/MASK reproduce that routing for all 8 chunks at once
        # (each chunk padded to 72 rows so every slice below is sublane-aligned).
        sel = jnp.dot(pt, att_sm, preferred_element_type=f32) * msk        # (576, DIM)
        vw = jnp.dot(v_t, wproj_ref[d], preferred_element_type=f32)        # (DIM, 8*128)
        acc = jnp.dot(sel[:NTOKP, :], vw[:, :DIM], preferred_element_type=f32)
        for k in range(1, HEADS):
            acc = acc + jnp.dot(sel[k * NTOKP:(k + 1) * NTOKP, :],
                                vw[:, 128 * k:128 * k + DIM],
                                preferred_element_type=f32)
        x = acc + cvec_ref[V_BPROJ + d:V_BPROJ + d + 1, :DIM] + res

        # ffn_norm (LayerNorm) + MLP(GELU) + residual
        res2 = x
        mu = jnp.mean(x, axis=-1, keepdims=True)
        var = jnp.mean(jnp.square(x - mu), axis=-1, keepdims=True)
        xn = (x - mu) * jax.lax.rsqrt(var + LN_EPS)
        xn = xn * cvec_ref[V_LNG + d:V_LNG + d + 1, :DIM] + cvec_ref[V_LNB + d:V_LNB + d + 1, :DIM]
        h1 = _gelu(jnp.dot(xn, w1_ref[d], preferred_element_type=f32)
                   + cvec_ref[V_B1 + d:V_B1 + d + 1, :MLP_DIM])
        h2 = jnp.dot(h1, w2_ref[d], preferred_element_type=f32) + cvec_ref[V_B2 + d:V_B2 + d + 1, :DIM]
        x = h2 + res2

    # --- encoder_norm on the cls row (row 64) + final Linear ---
    c = x[NPATCH:NPATCH + 1, :]
    mu = jnp.mean(c, axis=-1, keepdims=True)
    var = jnp.mean(jnp.square(c - mu), axis=-1, keepdims=True)
    c = (c - mu) * jax.lax.rsqrt(var + LN_EPS)
    c = c * cvec_ref[V_ENCG:V_ENCG + 1, :DIM] + cvec_ref[V_ENCB:V_ENCB + 1, :DIM]
    fcw = cmat_ref[R_FCW:R_FCW + DIM, :CLASSES]
    o_ref[0] = jnp.dot(c, fcw, preferred_element_type=f32) + cvec_ref[V_FCB:V_FCB + 1, :CLASSES]


# --------------------------- parameter construction --------------------------
def init_params(key):
    ks = iter(jax.random.split(key, 64))

    def nrm(shape, scale=0.05):
        return np.asarray(jax.random.normal(next(ks), shape, dtype=jnp.float32)) * scale

    p = {}

    # ---- raw module parameters (eval-mode BN running stats) ----
    w3 = nrm((8, 1, 9, 3, 3), 0.1)
    b3 = nrm((8,), 0.01)
    g3 = np.ones(8, np.float32); be3 = np.zeros(8, np.float32)
    rm3 = np.zeros(8, np.float32); rv3 = np.ones(8, np.float32)

    wg = nrm((DIM, C3 // HET_G, 3, 3), 0.1)
    bg = nrm((DIM,), 0.01)
    wpw = nrm((DIM, C3, 1, 1), 0.1)
    bpw = nrm((DIM,), 0.01)
    g2 = np.ones(DIM, np.float32); be2 = np.zeros(DIM, np.float32)
    rm2 = np.zeros(DIM, np.float32); rv2 = np.ones(DIM, np.float32)

    pos = nrm((NTOK, DIM), 0.02)
    cls = np.zeros((1, DIM), np.float32)

    # ---- Conv3d folded with BatchNorm3d(eval); taps packed weight-first at lane 128*t ----
    s3 = g3 / np.sqrt(rv3 + BN_EPS)
    w3w = np.zeros((NC, 9 * 128), np.float32)
    for t in range(9):
        ki, kj = t // 3, t % 3
        for o in range(8):
            for dd in range(DOUT3D):
                for kd in range(9):
                    w3w[dd + kd, 128 * t + o * DOUT3D + dd] = w3[o, 0, kd, ki, kj] * s3[o]
    b3f = np.zeros(C3, np.float32)
    for o in range(8):
        for dd in range(DOUT3D):
            b3f[o * DOUT3D + dd] = (b3[o] - rm3[o]) * s3[o] + be3[o]
    p['W3w'] = jnp.asarray(w3w)

    # ---- HetConv folded with BatchNorm2d(eval); pointwise 1x1 folded into centre tap ----
    s2 = g2 / np.sqrt(rv2 + BN_EPS)
    in_per_g = C3 // HET_G
    out_per_g = DIM // HET_G
    whetw = np.zeros((C3, 9 * 128), np.float32)
    for t in range(9):
        kh, kw = t // 3, t % 3
        for co in range(DIM):
            grp = co // out_per_g
            for cl in range(in_per_g):
                whetw[grp * in_per_g + cl, 128 * t + co] = wg[co, cl, kh, kw] * s2[co]
    for co in range(DIM):
        whetw[:, 128 * 4 + co] += wpw[co, :, 0, 0] * s2[co]        # centre tap == identity shift
    bhet = ((bg + bpw) - rm2) * s2 + be2
    p['Whetw'] = jnp.asarray(whetw)

    # ---- positional embedding in the new token layout (patches 0..63, cls at 64, pad 0) ----
    posc = np.zeros((NTOKP, DIM), np.float32)
    posc[:NPATCH] = pos[1:]
    posc[NPATCH] = pos[0] + cls[0]

    # ---- per-head group-sum matrix for the softmax denominator ----
    gmat = np.zeros((DIM, DIM), np.float32)
    for i in range(DIM):
        g = i // HD
        gmat[i, g * HD:(g + 1) * HD] = 1.0

    # ---- GlobalFilter: exact real factorisation of rfft2 / irfft2 (norm='ortho') ----
    gr = np.zeros((NFREQ, NPATCH), np.float32)
    gi = np.zeros((NFREQ, NPATCH), np.float32)
    for k_ in range(NPATCH):
        e_ = np.zeros((PATCH, PATCH), np.float32)
        e_.flat[k_] = 1.0
        spec = np.fft.rfft2(e_, norm='ortho').reshape(-1)
        gr[:, k_] = spec.real
        gi[:, k_] = spec.imag
    lr = np.zeros((NPATCH, NFREQ), np.float32)
    li = np.zeros((NPATCH, NFREQ), np.float32)
    for m in range(NFREQ):
        z = np.zeros((PATCH, PATCH // 2 + 1), np.complex64)
        z.flat[m] = 1.0
        lr[:, m] = np.fft.irfft2(z, s=(PATCH, PATCH), norm='ortho').reshape(-1)
        z = np.zeros((PATCH, PATCH // 2 + 1), np.complex64)
        z.flat[m] = 1.0j
        li[:, m] = np.fft.irfft2(z, s=(PATCH, PATCH), norm='ortho').reshape(-1)
    gs = np.concatenate([gr, gi], axis=0)            # (2*NFREQ, NPATCH)
    lcm = np.concatenate([lr, li], axis=1)           # (NPATCH, 2*NFREQ)

    fcw = nrm((CLASSES, DIM), 0.1).T                 # (DIM, CLASSES)
    fcb = nrm((CLASSES,), 0.001)

    # ---- scatter building the (DIM,DIM) block-diagonal per-head query from Wq(x2) ----
    scat = np.zeros((DIM * HEADS, DIM * DIM), np.float32)
    for h in range(HEADS):
        for j in range(HEADS):
            for dd in range(HD):
                src = h * (HEADS * HD) + j * HD + dd
                dst = (h * HD + dd) * DIM + (h * HEADS + j)
                scat[src, dst] = 1.0

    # ---- per-block transformer parameters ----
    wq_bd = np.zeros((DEPTH, NPATCH, DIM * DIM), np.float32)
    wk_t = np.zeros((DEPTH, DIM, DIM), np.float32)
    wv_n = np.zeros((DEPTH, DIM, NTOKP), np.float32)
    wgf = np.zeros((DEPTH, 2 * NFREQ, DIM), np.float32)
    wproj_w = np.zeros((DEPTH, DIM, HEADS * 128), np.float32)
    bproj = np.zeros((DEPTH, DIM), np.float32)
    ln_g = np.ones((DEPTH, DIM), np.float32)
    ln_b = np.zeros((DEPTH, DIM), np.float32)
    w1 = np.zeros((DEPTH, DIM, MLP_DIM), np.float32)
    b1 = np.zeros((DEPTH, MLP_DIM), np.float32)
    w2 = np.zeros((DEPTH, MLP_DIM, DIM), np.float32)
    b2 = np.zeros((DEPTH, DIM), np.float32)

    for d in range(DEPTH):
        wq = nrm((DIM * HEADS, NPATCH), 0.05)        # torch Wq.weight (dim*H, patches)
        wq_bd[d] = (wq.T @ scat) * SCALE             # attention scale folded in
        wk_t[d] = nrm((DIM, DIM), 0.05).T
        wv_ref = nrm((DIM, NTOK), 0.05)              # torch Wv.weight, token order [cls, p0..p63]
        wv_n[d, :, :NPATCH] = wv_ref[:, 1:]          # re-permute to [p0..p63, cls] + zero pad
        wv_n[d, :, NPATCH] = wv_ref[:, 0]
        # TODO(synk): reference GlobalFilter declares complex_weight of shape (14, 8, dim, 2);
        # for the P x P token grid actually produced here the consistent shape is (P, P//2+1, dim, 2).
        cw = nrm((PATCH, PATCH // 2 + 1, DIM, 2), 0.02)
        wgf[d, :NFREQ] = cw[..., 0].reshape(NFREQ, DIM)
        wgf[d, NFREQ:] = cw[..., 1].reshape(NFREQ, DIM)
        wproj_t = nrm((DIM, DIM * HEADS), 0.05).T    # (512, DIM)
        for k in range(HEADS):
            wproj_w[d, :, 128 * k:128 * k + DIM] = wproj_t[DIM * k:DIM * (k + 1), :]
        bproj[d] = nrm((DIM,), 0.01)
        w1[d] = nrm((MLP_DIM, DIM), 0.05).T
        b1[d] = nrm((MLP_DIM,), 0.001)
        w2[d] = nrm((DIM, MLP_DIM), 0.05).T
        b2[d] = nrm((DIM,), 0.001)

    p['Wq_bd'] = jnp.asarray(wq_bd)
    p['Wproj_w'] = jnp.asarray(wproj_w)
    p['W1'] = jnp.asarray(w1)
    p['W2'] = jnp.asarray(w2)

    # ---- routing constants reproducing torch's reshape(B, N, -1) of the (H, N, C) outputs ----
    pt = np.zeros((HEADS * NTOKP, NTOKP), np.float32)
    mk = np.zeros((HEADS * NTOKP, DIM), np.float32)
    for k in range(HEADS):
        for r in range(NTOK):                        # r = new output row (64 = cls)
            nref = r + 1 if r < NPATCH else 0        # reference output token index
            m = HEADS * nref + k
            h = m // NTOK
            n_old = m % NTOK
            n_new = n_old - 1 if n_old >= 1 else NPATCH
            pt[k * NTOKP + r, n_new] = 1.0
            mk[k * NTOKP + r, h * HD:(h + 1) * HD] = 1.0

    # ---- pack shared matrices into one (CMAT_ROWS, 128) blob ----
    cmat = np.zeros((CMAT_ROWS, 128), np.float32)
    cmat[R_POSC:R_POSC + NTOKP, :DIM] = posc
    cmat[R_GMAT:R_GMAT + DIM, :DIM] = gmat
    cmat[R_GS:R_GS + 2 * NFREQ, :NPATCH] = gs
    cmat[R_LC:R_LC + NPATCH, :2 * NFREQ] = lcm
    cmat[R_FCW:R_FCW + DIM, :CLASSES] = fcw
    for d in range(DEPTH):
        cmat[R_WK + d * DIM:R_WK + (d + 1) * DIM, :DIM] = wk_t[d]
        cmat[R_WV + d * DIM:R_WV + (d + 1) * DIM, :NTOKP] = wv_n[d]
        cmat[R_WGF + d * 2 * NFREQ:R_WGF + (d + 1) * 2 * NFREQ, :DIM] = wgf[d]
    cmat[R_PT:R_PT + HEADS * NTOKP, :NTOKP] = pt
    cmat[R_MASK:R_MASK + HEADS * NTOKP, :DIM] = mk
    p['CMAT'] = jnp.asarray(cmat)

    # ---- pack bias / LayerNorm vectors into one (CVEC_ROWS, MLP_DIM) blob ----
    cvec = np.zeros((CVEC_ROWS, MLP_DIM), np.float32)
    cvec[V_B3, :C3] = b3f
    cvec[V_BHET, :DIM] = bhet
    for d in range(DEPTH):
        cvec[V_BPROJ + d, :DIM] = bproj[d]
        cvec[V_LNG + d, :DIM] = ln_g[d]
        cvec[V_LNB + d, :DIM] = ln_b[d]
        cvec[V_B1 + d, :MLP_DIM] = b1[d]
        cvec[V_B2 + d, :DIM] = b2[d]
    cvec[V_ENCG, :DIM] = 1.0
    cvec[V_ENCB, :DIM] = 0.0
    cvec[V_FCB, :CLASSES] = fcb
    p['CVEC'] = jnp.asarray(cvec)
    return p


# ------------------------------- forward ------------------------------------
def _cspec(shape):
    n = len(shape)
    return pl.BlockSpec(shape, lambda b, _n=n: (0,) * _n)


def crosshl_forward(params, x1, x2):
    x1 = x1.reshape(B, -1, PATCH, PATCH)
    x2 = x2.reshape(B, -1, PATCH * PATCH)
    # F.adaptive_avg_pool1d(..., 1) over the LiDAR channel axis -> (B, P*P)
    x2p = jnp.mean(x2, axis=1)
    # HSI input, spatial-major (row-major p = i*P + j), band on the lane axis
    xsp = jnp.transpose(x1, (0, 2, 3, 1)).reshape(B, NPATCH, NC)
    # per-block block-diagonal query (scale folded in): (DEPTH, B, DIM, DIM)
    # TODO(synk): kept as a tiny XLA pre-op; the (1,4096)->(64,64) unflatten has no cheap
    # in-kernel TPU layout.
    qbd = jnp.einsum('bp,dpq->dbq', x2p, params['Wq_bd']).reshape(DEPTH, B, DIM, DIM)

    in_specs = [
        pl.BlockSpec((1, NPATCH, NC), lambda b: (b, 0, 0)),              # xsp
        pl.BlockSpec((DEPTH, 1, DIM, DIM), lambda b: (0, b, 0, 0)),      # qbd
        _cspec((NC, 9 * 128)),                                           # W3w
        _cspec((C3, 9 * 128)),                                           # Whetw
        _cspec((CMAT_ROWS, 128)),                                        # CMAT blob
        _cspec((CVEC_ROWS, MLP_DIM)),                                    # CVEC blob
        _cspec((DEPTH, DIM, HEADS * 128)),                               # Wproj (value*proj fused)
        _cspec((DEPTH, DIM, MLP_DIM)),                                   # W1
        _cspec((DEPTH, MLP_DIM, DIM)),                                   # W2
    ]
    out_specs = pl.BlockSpec((1, 1, CLASSES), lambda b: (b, 0, 0))

    out = pl.pallas_call(
        crosshl_fused_kernel,
        out_shape=jax.ShapeDtypeStruct((B, 1, CLASSES), jnp.float32),
        grid=(B,),
        in_specs=in_specs,
        out_specs=out_specs,
        compiler_params=pltpu.CompilerParams(dimension_semantics=("parallel",)),
    )(xsp, qbd, params['W3w'], params['Whetw'], params['CMAT'], params['CVEC'],
      params['Wproj_w'], params['W1'], params['W2'])
    return out.reshape(B, CLASSES)


if __name__ == "__main__":
    key = jax.random.PRNGKey(0)
    kp, k1, k2 = jax.random.split(key, 3)
    params = init_params(kp)
    x1 = jax.random.normal(k1, (B, NC, PATCH, PATCH), dtype=jnp.float32)
    x2 = jax.random.normal(k2, (B, NCLIDAR, PATCH, PATCH), dtype=jnp.float32)

    fwd = jax.jit(crosshl_forward)
    out = fwd(params, x1, x2)
    jax.block_until_ready(out)
    assert out.shape == (B, CLASSES), out.shape
    assert bool(jnp.all(jnp.isfinite(out)))
    print("KERNEL_OK")
</pallas_src>

<mosaic_0001>
module attributes {stable_mosaic.version = 11 : i64} {
  func.func @crosshl_fused_kernel(%arg0: i32, %arg1: memref<1x64x12xf32, #tpu.memory_space<vmem>>, %arg2: memref<2x1x64x64xf32, #tpu.memory_space<vmem>>, %arg3: memref<12x1152xf32, #tpu.memory_space<vmem>>, %arg4: memref<32x1152xf32, #tpu.memory_space<vmem>>, %arg5: memref<1912x128xf32, #tpu.memory_space<vmem>>, %arg6: memref<16x512xf32, #tpu.memory_space<vmem>>, %arg7: memref<2x64x1024xf32, #tpu.memory_space<vmem>>, %arg8: memref<2x64x512xf32, #tpu.memory_space<vmem>>, %arg9: memref<2x512x64xf32, #tpu.memory_space<vmem>>, %arg10: memref<1x1x6xf32, #tpu.memory_space<vmem>>) attributes {dimension_semantics = [#tpu.dimension_semantics<parallel>], iteration_bounds = array<i64: 2>, scalar_prefetch = 0 : i64, scratch_operands = 0 : i64, tpu.core_type = #tpu.core_type<tc>, window_params = [{transform_indices = @transform_0, window_bounds = array<i64: 1, 64, 12>}, {transform_indices = @transform_1, window_bounds = array<i64: 2, 1, 64, 64>}, {pipeline_mode = #tpu.pipeline_mode<synchronous>, transform_indices = @transform_2, window_bounds = array<i64: 12, 1152>}, {pipeline_mode = #tpu.pipeline_mode<synchronous>, transform_indices = @transform_3, window_bounds = array<i64: 32, 1152>}, {pipeline_mode = #tpu.pipeline_mode<synchronous>, transform_indices = @transform_4, window_bounds = array<i64: 1912, 128>}, {pipeline_mode = #tpu.pipeline_mode<synchronous>, transform_indices = @transform_5, window_bounds = array<i64: 16, 512>}, {pipeline_mode = #tpu.pipeline_mode<synchronous>, transform_indices = @transform_6, window_bounds = array<i64: 2, 64, 1024>}, {pipeline_mode = #tpu.pipeline_mode<synchronous>, transform_indices = @transform_7, window_bounds = array<i64: 2, 64, 512>}, {pipeline_mode = #tpu.pipeline_mode<synchronous>, transform_indices = @transform_8, window_bounds = array<i64: 2, 512, 64>}, {transform_indices = @transform_9, window_bounds = array<i64: 1, 1, 6>}]} {
    %c0 = arith.constant 0 : index
    %c0_0 = arith.constant 0 : index
    %c0_1 = arith.constant 0 : index
    %0 = vector.load %arg1[%c0, %c0_0, %c0_1] : memref<1x64x12xf32, #tpu.memory_space<vmem>>, vector<1x64x12xf32>
    %1 = vector.shape_cast %0 : vector<1x64x12xf32> to vector<64x12xf32>
    %2 = tpu.iota {dimensions = array<i32: 0>} : vector<64x1xi32>
    %c3_i32 = arith.constant 3 : i32
    %3 = vector.broadcast %c3_i32 : i32 to vector<64x1xi32>
    %4 = arith.shrsi %2, %3 : vector<64x1xi32>
    %c7_i32 = arith.constant 7 : i32
    %5 = vector.broadcast %c7_i32 : i32 to vector<64x1xi32>
    %6 = arith.andi %2, %5 : vector<64x1xi32>
    %c1_i32 = arith.constant 1 : i32
    %7 = vector.broadcast %c1_i32 : i32 to vector<64x1xi32>
    %8 = arith.cmpi sge, %4, %7 : vector<64x1xi32>
    %c1_i32_2 = arith.constant 1 : i32
    %9 = vector.broadcast %c1_i32_2 : i32 to vector<64x1xi32>
    %10 = arith.cmpi sge, %6, %9 : vector<64x1xi32>
    %11 = arith.andi %8, %10 : vector<64x1xi1>
    %cst = arith.constant 1.000000e+00 : f32
    %cst_3 = arith.constant 0.000000e+00 : f32
    %12 = vector.broadcast %cst : f32 to vector<64x1xf32>
    %13 = vector.broadcast %cst_3 : f32 to vector<64x1xf32>
    %14 = arith.select %11, %12, %13 : vector<64x1xi1>, vector<64x1xf32>
    %c1_i32_4 = arith.constant 1 : i32
    %15 = vector.broadcast %c1_i32_4 : i32 to vector<64x1xi32>
    %16 = arith.cmpi sge, %4, %15 : vector<64x1xi32>
    %cst_5 = arith.constant 1.000000e+00 : f32
    %cst_6 = arith.constant 0.000000e+00 : f32
    %17 = vector.broadcast %cst_5 : f32 to vector<64x1xf32>
    %18 = vector.broadcast %cst_6 : f32 to vector<64x1xf32>
    %19 = arith.select %16, %17, %18 : vector<64x1xi1>, vector<64x1xf32>
    %c1_i32_7 = arith.constant 1 : i32
    %20 = vector.broadcast %c1_i32_7 : i32 to vector<64x1xi32>
    %21 = arith.cmpi sge, %4, %20 : vector<64x1xi32>
    %c6_i32 = arith.constant 6 : i32
    %22 = vector.broadcast %c6_i32 : i32 to vector<64x1xi32>
    %23 = arith.cmpi sle, %6, %22 : vector<64x1xi32>
    %24 = arith.andi %21, %23 : vector<64x1xi1>
    %cst_8 = arith.constant 1.000000e+00 : f32
    %cst_9 = arith.constant 0.000000e+00 : f32
    %25 = vector.broadcast %cst_8 : f32 to vector<64x1xf32>
    %26 = vector.broadcast %cst_9 : f32 to vector<64x1xf32>
    %27 = arith.select %24, %25, %26 : vector<64x1xi1>, vector<64x1xf32>
    %c1_i32_10 = arith.constant 1 : i32
    %28 = vector.broadcast %c1_i32_10 : i32 to vector<64x1xi32>
    %29 = arith.cmpi sge, %6, %28 : vector<64x1xi32>
    %cst_11 = arith.constant 1.000000e+00 : f32
    %cst_12 = arith.constant 0.000000e+00 : f32
    %30 = vector.broadcast %cst_11 : f32 to vector<64x1xf32>
    %31 = vector.broadcast %cst_12 : f32 to vector<64x1xf32>
    %32 = arith.select %29, %30, %31 : vector<64x1xi1>, vector<64x1xf32>
    %c6_i32_13 = arith.constant 6 : i32
    %33 = vector.broadcast %c6_i32_13 : i32 to vector<64x1xi32>
    %34 = arith.cmpi sle, %6, %33 : vector<64x1xi32>
    %cst_14 = arith.constant 1.000000e+00 : f32
    %cst_15 = arith.constant 0.000000e+00 : f32
    %35 = vector.broadcast %cst_14 : f32 to vector<64x1xf32>
    %36 = vector.broadcast %cst_15 : f32 to vector<64x1xf32>
    %37 = arith.select %34, %35, %36 : vector<64x1xi1>, vector<64x1xf32>
    %c6_i32_16 = arith.constant 6 : i32
    %38 = vector.broadcast %c6_i32_16 : i32 to vector<64x1xi32>
    %39 = arith.cmpi sle, %4, %38 : vector<64x1xi32>
    %c1_i32_17 = arith.constant 1 : i32
    %40 = vector.broadcast %c1_i32_17 : i32 to vector<64x1xi32>
    %41 = arith.cmpi sge, %6, %40 : vector<64x1xi32>
    %42 = arith.andi %39, %41 : vector<64x1xi1>
    %cst_18 = arith.constant 1.000000e+00 : f32
    %cst_19 = arith.constant 0.000000e+00 : f32
    %43 = vector.broadcast %cst_18 : f32 to vector<64x1xf32>
    %44 = vector.broadcast %cst_19 : f32 to vector<64x1xf32>
    %45 = arith.select %42, %43, %44 : vector<64x1xi1>, vector<64x1xf32>
    %c6_i32_20 = arith.constant 6 : i32
    %46 = vector.broadcast %c6_i32_20 : i32 to vector<64x1xi32>
    %47 = arith.cmpi sle, %4, %46 : vector<64x1xi32>
    %cst_21 = arith.constant 1.000000e+00 : f32
    %cst_22 = arith.constant 0.000000e+00 : f32
    %48 = vector.broadcast %cst_21 : f32 to vector<64x1xf32>
    %49 = vector.broadcast %cst_22 : f32 to vector<64x1xf32>
    %50 = arith.select %47, %48, %49 : vector<64x1xi1>, vector<64x1xf32>
    %c6_i32_23 = arith.constant 6 : i32
    %51 = vector.broadcast %c6_i32_23 : i32 to vector<64x1xi32>
    %52 = arith.cmpi sle, %4, %51 : vector<64x1xi32>
    %c6_i32_24 = arith.constant 6 : i32
    %53 = vector.broadcast %c6_i32_24 : i32 to vector<64x1xi32>
    %54 = arith.cmpi sle, %6, %53 : vector<64x1xi32>
    %55 = arith.andi %52, %54 : vector<64x1xi1>
    %cst_25 = arith.constant 1.000000e+00 : f32
    %cst_26 = arith.constant 0.000000e+00 : f32
    %56 = vector.broadcast %cst_25 : f32 to vector<64x1xf32>
    %57 = vector.broadcast %cst_26 : f32 to vector<64x1xf32>
    %58 = arith.select %55, %56, %57 : vector<64x1xi1>, vector<64x1xf32>
    %c0_27 = arith.constant 0 : index
    %c0_28 = arith.constant 0 : index
    %59 = vector.load %arg3[%c0_27, %c0_28] : memref<12x1152xf32, #tpu.memory_space<vmem>>, vector<12x1152xf32>
    %cst_29 = arith.constant dense<0.000000e+00> : vector<64x1152xf32>
    %60 = tpu.matmul %1, %59, %cst_29 {dimension_numbers = #tpu.dot_dimension_numbers<[1], [0], [0], [1], [0, 0, 1, 1], [], []>} : vector<64x12xf32>, vector<12x1152xf32>, vector<64x1152xf32> -> vector<64x1152xf32>
    %61 = vector.extract_strided_slice %60 {offsets = [0, 512], sizes = [64, 32], strides = [1, 1]} : vector<64x1152xf32> to vector<64x32xf32>
    %62 = vector.extract_strided_slice %60 {offsets = [0, 0], sizes = [64, 32], strides = [1, 1]} : vector<64x1152xf32> to vector<64x32xf32>
    %c9_i32 = arith.constant 9 : i32
    %63 = tpu.dynamic_rotate %62 by %c9_i32 dim 0 : vector<64x32xf32>, i32 -> vector<64x32xf32>
    %64 = vector.broadcast %14 : vector<64x1xf32> to vector<64x32xf32>
    %65 = arith.mulf %64, %63 : vector<64x32xf32>
    %66 = arith.addf %61, %65 : vector<64x32xf32>
    %67 = vector.extract_strided_slice %60 {offsets = [0, 128], sizes = [64, 32], strides = [1, 1]} : vector<64x1152xf32> to vector<64x32xf32>
    %c8_i32 = arith.constant 8 : i32
    %68 = tpu.dynamic_rotate %67 by %c8_i32 dim 0 : vector<64x32xf32>, i32 -> vector<64x32xf32>
    %69 = vector.broadcast %19 : vector<64x1xf32> to vector<64x32xf32>
    %70 = arith.mulf %69, %68 : vector<64x32xf32>
    %71 = arith.addf %66, %70 : vector<64x32xf32>
    %72 = vector.extract_strided_slice %60 {offsets = [0, 256], sizes = [64, 32], strides = [1, 1]} : vector<64x1152xf32> to vector<64x32xf32>
    %c7_i32_30 = arith.constant 7 : i32
    %73 = tpu.dynamic_rotate %72 by %c7_i32_30 dim 0 : vector<64x32xf32>, i32 -> vector<64x32xf32>
    %74 = vector.broadcast %27 : vector<64x1xf32> to vector<64x32xf32>
    %75 = arith.mulf %74, %73 : vector<64x32xf32>
    %76 = arith.addf %71, %75 : vector<64x32xf32>
    %77 = vector.extract_strided_slice %60 {offsets = [0, 384], sizes = [64, 32], strides = [1, 1]} : vector<64x1152xf32> to vector<64x32xf32>
    %c1_i32_31 = arith.constant 1 : i32
    %78 = tpu.dynamic_rotate %77 by %c1_i32_31 dim 0 : vector<64x32xf32>, i32 -> vector<64x32xf32>
    %79 = vector.broadcast %32 : vector<64x1xf32> to vector<64x32xf32>
    %80 = arith.mulf %79, %78 : vector<64x32xf32>
    %81 = arith.addf %76, %80 : vector<64x32xf32>
    %82 = vector.extract_strided_slice %60 {offsets = [0, 640], sizes = [64, 32], strides = [1, 1]} : vector<64x1152xf32> to vector<64x32xf32>
    %c63_i32 = arith.constant 63 : i32
    %83 = tpu.dynamic_rotate %82 by %c63_i32 dim 0 : vector<64x32xf32>, i32 -> vector<64x32xf32>
    %84 = vector.broadcast %37 : vector<64x1xf32> to vector<64x32xf32>
    %85 = arith.mulf %84, %83 : vector<64x32xf32>
    %86 = arith.addf %81, %85 : vector<64x32xf32>
    %87 = vector.extract_strided_slice %60 {offsets = [0, 768], sizes = [64, 32], strides = [1, 1]} : vector<64x1152xf32> to vector<64x32xf32>
    %c57_i32 = arith.constant 57 : i32
    %88 = tpu.dynamic_rotate %87 by %c57_i32 dim 0 : vector<64x32xf32>, i32 -> vector<64x32xf32>
    %89 = vector.broadcast %45 : vector<64x1xf32> to vector<64x32xf32>
    %90 = arith.mulf %89, %88 : vector<64x32xf32>
    %91 = arith.addf %86, %90 : vector<64x32xf32>
    %92 = vector.extract_strided_slice %60 {offsets = [0, 896], sizes = [64, 32], strides = [1, 1]} : vector<64x1152xf32> to vector<64x32xf32>
    %c56_i32 = arith.constant 56 : i32
    %93 = tpu.dynamic_rotate %92 by %c56_i32 dim 0 : vector<64x32xf32>, i32 -> vector<64x32xf32>
    %94 = vector.broadcast %50 : vector<64x1xf32> to vector<64x32xf32>
    %95 = arith.mulf %94, %93 : vector<64x32xf32>
    %96 = arith.addf %91, %95 : vector<64x32xf32>
    %97 = vector.extract_strided_slice %60 {offsets = [0, 1024], sizes = [64, 32], strides = [1, 1]} : vector<64x1152xf32> to vector<64x32xf32>
    %c55_i32 = arith.constant 55 : i32
    %98 = tpu.dynamic_rotate %97 by %c55_i32 dim 0 : vector<64x32xf32>, i32 -> vector<64x32xf32>
    %99 = vector.broadcast %58 : vector<64x1xf32> to vector<64x32xf32>
    %100 = arith.mulf %99, %98 : vector<64x32xf32>
    %101 = arith.addf %96, %100 : vector<64x32xf32>
    %c0_32 = arith.constant 0 : index
    %c0_33 = arith.constant 0 : index
    %102 = vector.load %arg6[%c0_32, %c0_33] : memref<16x512xf32, #tpu.memory_space<vmem>>, vector<1x32xf32>
    %103 = vector.broadcast %102 : vector<1x32xf32> to vector<64x32xf32>
    %104 = arith.addf %101, %103 : vector<64x32xf32>
    %cst_34 = arith.constant 0.000000e+00 : f32
    %105 = vector.broadcast %cst_34 : f32 to vector<64x32xf32>
    %106 = arith.maximumf %104, %105 : vector<64x32xf32>
    %c0_35 = arith.constant 0 : index
    %c0_36 = arith.constant 0 : index
    %107 = vector.load %arg4[%c0_35, %c0_36] : memref<32x1152xf32, #tpu.memory_space<vmem>>, vector<32x1152xf32>
    %cst_37 = arith.constant dense<0.000000e+00> : vector<64x1152xf32>
    %108 = tpu.matmul %106, %107, %cst_37 {dimension_numbers = #tpu.dot_dimension_numbers<[1], [0], [0], [1], [0, 0, 1, 1], [], []>} : vector<64x32xf32>, vector<32x1152xf32>, vector<64x1152xf32> -> vector<64x1152xf32>
    %109 = vector.extract_strided_slice %108 {offsets = [0, 512], sizes = [64, 64], strides = [1, 1]} : vector<64x1152xf32> to vector<64x64xf32>
    %110 = vector.extract_strided_slice %108 {offsets = [0, 0], sizes = [64, 64], strides = [1, 1]} : vector<64x1152xf32> to vector<64x64xf32>
    %c9_i32_38 = arith.constant 9 : i32
    %111 = tpu.dynamic_rotate %110 by %c9_i32_38 dim 0 : vector<64x64xf32>, i32 -> vector<64x64xf32>
    %112 = vector.broadcast %14 : vector<64x1xf32> to vector<64x64xf32>
    %113 = arith.mulf %112, %111 : vector<64x64xf32>
    %114 = arith.addf %109, %113 : vector<64x64xf32>
    %115 = vector.extract_strided_slice %108 {offsets = [0, 128], sizes = [64, 64], strides = [1, 1]} : vector<64x1152xf32> to vector<64x64xf32>
    %c8_i32_39 = arith.constant 8 : i32
    %116 = tpu.dynamic_rotate %115 by %c8_i32_39 dim 0 : vector<64x64xf32>, i32 -> vector<64x64xf32>
    %117 = vector.broadcast %19 : vector<64x1xf32> to vector<64x64xf32>
    %118 = arith.mulf %117, %116 : vector<64x64xf32>
    %119 = arith.addf %114, %118 : vector<64x64xf32>
    %120 = vector.extract_strided_slice %108 {offsets = [0, 256], sizes = [64, 64], strides = [1, 1]} : vector<64x1152xf32> to vector<64x64xf32>
    %c7_i32_40 = arith.constant 7 : i32
    %121 = tpu.dynamic_rotate %120 by %c7_i32_40 dim 0 : vector<64x64xf32>, i32 -> vector<64x64xf32>
    %122 = vector.broadcast %27 : vector<64x1xf32> to vector<64x64xf32>
    %123 = arith.mulf %122, %121 : vector<64x64xf32>
    %124 = arith.addf %119, %123 : vector<64x64xf32>
    %125 = vector.extract_strided_slice %108 {offsets = [0, 384], sizes = [64, 64], strides = [1, 1]} : vector<64x1152xf32> to vector<64x64xf32>
    %c1_i32_41 = arith.constant 1 : i32
    %126 = tpu.dynamic_rotate %125 by %c1_i32_41 dim 0 : vector<64x64xf32>, i32 -> vector<64x64xf32>
    %127 = vector.broadcast %32 : vector<64x1xf32> to vector<64x64xf32>
    %128 = arith.mulf %127, %126 : vector<64x64xf32>
    %129 = arith.addf %124, %128 : vector<64x64xf32>
    %130 = vector.extract_strided_slice %108 {offsets = [0, 640], sizes = [64, 64], strides = [1, 1]} : vector<64x1152xf32> to vector<64x64xf32>
    %c63_i32_42 = arith.constant 63 : i32
    %131 = tpu.dynamic_rotate %130 by %c63_i32_42 dim 0 : vector<64x64xf32>, i32 -> vector<64x64xf32>
    %132 = vector.broadcast %37 : vector<64x1xf32> to vector<64x64xf32>
    %133 = arith.mulf %132, %131 : vector<64x64xf32>
    %134 = arith.addf %129, %133 : vector<64x64xf32>
    %135 = vector.extract_strided_slice %108 {offsets = [0, 768], sizes = [64, 64], strides = [1, 1]} : vector<64x1152xf32> to vector<64x64xf32>
    %c57_i32_43 = arith.constant 57 : i32
    %136 = tpu.dynamic_rotate %135 by %c57_i32_43 dim 0 : vector<64x64xf32>, i32 -> vector<64x64xf32>
    %137 = vector.broadcast %45 : vector<64x1xf32> to vector<64x64xf32>
    %138 = arith.mulf %137, %136 : vector<64x64xf32>
    %139 = arith.addf %134, %138 : vector<64x64xf32>
    %140 = vector.extract_strided_slice %108 {offsets = [0, 896], sizes = [64, 64], strides = [1, 1]} : vector<64x1152xf32> to vector<64x64xf32>
    %c56_i32_44 = arith.constant 56 : i32
    %141 = tpu.dynamic_rotate %140 by %c56_i32_44 dim 0 : vector<64x64xf32>, i32 -> vector<64x64xf32>
    %142 = vector.broadcast %50 : vector<64x1xf32> to vector<64x64xf32>
    %143 = arith.mulf %142, %141 : vector<64x64xf32>
    %144 = arith.addf %139, %143 : vector<64x64xf32>
    %145 = vector.extract_strided_slice %108 {offsets = [0, 1024], sizes = [64, 64], strides = [1, 1]} : vector<64x1152xf32> to vector<64x64xf32>
    %c55_i32_45 = arith.constant 55 : i32
    %146 = tpu.dynamic_rotate %145 by %c55_i32_45 dim 0 : vector<64x64xf32>, i32 -> vector<64x64xf32>
    %147 = vector.broadcast %58 : vector<64x1xf32> to vector<64x64xf32>
    %148 = arith.mulf %147, %146 : vector<64x64xf32>
    %149 = arith.addf %144, %148 : vector<64x64xf32>
    %c1 = arith.constant 1 : index
    %c0_46 = arith.constant 0 : index
    %150 = vector.load %arg6[%c1, %c0_46] : memref<16x512xf32, #tpu.memory_space<vmem>>, vector<1x64xf32>
    %151 = vector.broadcast %150 : vector<1x64xf32> to vector<64x64xf32>
    %152 = arith.addf %149, %151 : vector<64x64xf32>
    %cst_47 = arith.constant 0.000000e+00 : f32
    %153 = vector.broadcast %cst_47 : f32 to vector<64x64xf32>
    %154 = arith.maximumf %152, %153 : vector<64x64xf32>
    %c0_48 = arith.constant 0 : index
    %c0_49 = arith.constant 0 : index
    %155 = vector.load %arg5[%c0_48, %c0_49] : memref<1912x128xf32, #tpu.memory_space<vmem>>, vector<72x64xf32>
    %cst_50 = arith.constant 0.000000e+00 : f32
    %156 = vector.broadcast %cst_50 : f32 to vector<8x64xf32>
    %157 = tpu.concatenate %154, %156 in 0 : vector<64x64xf32>, vector<8x64xf32> -> vector<72x64xf32>
    %158 = arith.addf %157, %155 : vector<72x64xf32>
    %c72 = arith.constant 72 : index
    %c0_51 = arith.constant 0 : index
    %159 = vector.load %arg5[%c72, %c0_51] : memref<1912x128xf32, #tpu.memory_space<vmem>>, vector<64x64xf32>
    %c136 = arith.constant 136 : index
    %c0_52 = arith.constant 0 : index
    %160 = vector.load %arg5[%c136, %c0_52] : memref<1912x128xf32, #tpu.memory_space<vmem>>, vector<80x64xf32>
    %c216 = arith.constant 216 : index
    %c0_53 = arith.constant 0 : index
    %161 = vector.load %arg5[%c216, %c0_53] : memref<1912x128xf32, #tpu.memory_space<vmem>>, vector<64x80xf32>
    %c760 = arith.constant 760 : index
    %c0_54 = arith.constant 0 : index
    %162 = vector.load %arg5[%c760, %c0_54] : memref<1912x128xf32, #tpu.memory_space<vmem>>, vector<576x72xf32>
    %c1336 = arith.constant 1336 : index
    %c0_55 = arith.constant 0 : index
    %163 = vector.load %arg5[%c1336, %c0_55] : memref<1912x128xf32, #tpu.memory_space<vmem>>, vector<576x64xf32>
    %164 = vector.extract_strided_slice %158 {offsets = [0, 0], sizes = [64, 64], strides = [1, 1]} : vector<72x64xf32> to vector<64x64xf32>
    %cst_56 = arith.constant dense<0.000000e+00> : vector<80x64xf32>
    %165 = tpu.matmul %160, %164, %cst_56 {dimension_numbers = #tpu.dot_dimension_numbers<[1], [0], [0], [1], [0, 0, 1, 1], [], []>} : vector<80x64xf32>, vector<64x64xf32>, vector<80x64xf32> -> vector<80x64xf32>
    %166 = vector.extract_strided_slice %165 {offsets = [0, 0], sizes = [40, 64], strides = [1, 1]} : vector<80x64xf32> to vector<40x64xf32>
    %167 = vector.extract_strided_slice %165 {offsets = [40, 0], sizes = [40, 64], strides = [1, 1]} : vector<80x64xf32> to vector<40x64xf32>
    %c600 = arith.constant 600 : index
    %c0_57 = arith.constant 0 : index
    %168 = vector.load %arg5[%c600, %c0_57] : memref<1912x128xf32, #tpu.memory_space<vmem>>, vector<80x64xf32>
    %169 = vector.extract_strided_slice %168 {offsets = [0, 0], sizes = [40, 64], strides = [1, 1]} : vector<80x64xf32> to vector<40x64xf32>
    %170 = vector.extract_strided_slice %168 {offsets = [40, 0], sizes = [40, 64], strides = [1, 1]} : vector<80x64xf32> to vector<40x64xf32>
    %171 = arith.mulf %169, %166 : vector<40x64xf32>
    %172 = arith.mulf %170, %167 : vector<40x64xf32>
    %173 = arith.subf %171, %172 : vector<40x64xf32>
    %174 = arith.mulf %169, %167 : vector<40x64xf32>
    %175 = arith.mulf %170, %166 : vector<40x64xf32>
    %176 = arith.addf %174, %175 : vector<40x64xf32>
    %177 = tpu.concatenate %173, %176 in 0 : vector<40x64xf32>, vector<40x64xf32> -> vector<80x64xf32>
    %cst_58 = arith.constant dense<0.000000e+00> : vector<64x64xf32>
    %178 = tpu.matmul %161, %177, %cst_58 {dimension_numbers = #tpu.dot_dimension_numbers<[1], [0], [0], [1], [0, 0, 1, 1], [], []>} : vector<64x80xf32>, vector<80x64xf32>, vector<64x64xf32> -> vector<64x64xf32>
    %179 = vector.extract_strided_slice %158 {offsets = [64, 0], sizes = [8, 64], strides = [1, 1]} : vector<72x64xf32> to vector<8x64xf32>
    %180 = tpu.concatenate %178, %179 in 0 : vector<64x64xf32>, vector<8x64xf32> -> vector<72x64xf32>
    %c344 = arith.constant 344 : index
    %c0_59 = arith.constant 0 : index
    %181 = vector.load %arg5[%c344, %c0_59] : memref<1912x128xf32, #tpu.memory_space<vmem>>, vector<64x64xf32>
    %c472 = arith.constant 472 : index
    %c0_60 = arith.constant 0 : index
    %182 = vector.load %arg5[%c472, %c0_60] : memref<1912x128xf32, #tpu.memory_space<vmem>>, vector<64x72xf32>
    %cst_61 = arith.constant dense<0.000000e+00> : vector<72x64xf32>
    %183 = tpu.matmul %180, %181, %cst_61 {dimension_numbers = #tpu.dot_dimension_numbers<[1], [0], [0], [1], [0, 0, 1, 1], [], []>} : vector<72x64xf32>, vector<64x64xf32>, vector<72x64xf32> -> vector<72x64xf32>
    %cst_62 = arith.constant dense<0.000000e+00> : vector<64x64xf32>
    %184 = tpu.matmul %182, %180, %cst_62 {dimension_numbers = #tpu.dot_dimension_numbers<[1], [0], [0], [1], [0, 0, 1, 1], [], []>} : vector<64x72xf32>, vector<72x64xf32>, vector<64x64xf32> -> vector<64x64xf32>
    %c0_63 = arith.constant 0 : index
    %c0_64 = arith.constant 0 : index
    %c0_65 = arith.constant 0 : index
    %c0_66 = arith.constant 0 : index
    %185 = vector.load %arg2[%c0_63, %c0_64, %c0_65, %c0_66] : memref<2x1x64x64xf32, #tpu.memory_space<vmem>>, vector<1x1x64x64xf32>
    %186 = vector.shape_cast %185 : vector<1x1x64x64xf32> to vector<64x64xf32>
    %cst_67 = arith.constant dense<0.000000e+00> : vector<72x64xf32>
    %187 = tpu.matmul %183, %186, %cst_67 {dimension_numbers = #tpu.dot_dimension_numbers<[1], [0], [0], [1], [0, 0, 1, 1], [], []>} : vector<72x64xf32>, vector<64x64xf32>, vector<72x64xf32> -> vector<72x64xf32>
    %cst_68 = arith.constant dense<0xFF800000> : vector<72xf32>
    %188 = vector.multi_reduction <maximumf>, %187, %cst_68 [1] : vector<72x64xf32> to vector<72xf32>
    %189 = vector.shape_cast %188 : vector<72xf32> to vector<72x1xf32>
    %190 = vector.broadcast %189 : vector<72x1xf32> to vector<72x64xf32>
    %191 = arith.subf %187, %190 : vector<72x64xf32>
    %192 = math.exp %191 : vector<72x64xf32>
    %cst_69 = arith.constant dense<0.000000e+00> : vector<72x64xf32>
    %193 = tpu.matmul %192, %159, %cst_69 {dimension_numbers = #tpu.dot_dimension_numbers<[1], [0], [0], [1], [0, 0, 1, 1], [], []>} : vector<72x64xf32>, vector<64x64xf32>, vector<72x64xf32> -> vector<72x64xf32>
    %cst_70 = arith.constant 9.99999968E-21 : f32
    %194 = vector.broadcast %cst_70 : f32 to vector<72x64xf32>
    %195 = arith.addf %193, %194 : vector<72x64xf32>
    %196 = tpu.reciprocal %195 {approx = true} : vector<72x64xf32> -> vector<72x64xf32>
    %197 = arith.mulf %192, %196 : vector<72x64xf32>
    %cst_71 = arith.constant dense<0.000000e+00> : vector<576x64xf32>
    %198 = tpu.matmul %162, %197, %cst_71 {dimension_numbers = #tpu.dot_dimension_numbers<[1], [0], [0], [1], [0, 0, 1, 1], [], []>} : vector<576x72xf32>, vector<72x64xf32>, vector<576x64xf32> -> vector<576x64xf32>
    %199 = arith.mulf %198, %163 : vector<576x64xf32>
    %c0_72 = arith.constant 0 : index
    %c0_73 = arith.constant 0 : index
    %c0_74 = arith.constant 0 : index
    %200 = vector.load %arg7[%c0_72, %c0_73, %c0_74] : memref<2x64x1024xf32, #tpu.memory_space<vmem>>, vector<1x64x1024xf32>
    %201 = vector.shape_cast %200 : vector<1x64x1024xf32> to vector<64x1024xf32>
    %cst_75 = arith.constant dense<0.000000e+00> : vector<64x1024xf32>
    %202 = tpu.matmul %184, %201, %cst_75 {dimension_numbers = #tpu.dot_dimension_numbers<[1], [0], [0], [1], [0, 0, 1, 1], [], []>} : vector<64x64xf32>, vector<64x1024xf32>, vector<64x1024xf32> -> vector<64x1024xf32>
    %203 = vector.extract_strided_slice %199 {offsets = [0, 0], sizes = [72, 64], strides = [1, 1]} : vector<576x64xf32> to vector<72x64xf32>
    %204 = vector.extract_strided_slice %202 {offsets = [0, 0], sizes = [64, 64], strides = [1, 1]} : vector<64x1024xf32> to vector<64x64xf32>
    %cst_76 = arith.constant dense<0.000000e+00> : vector<72x64xf32>
    %205 = tpu.matmul %203, %204, %cst_76 {dimension_numbers = #tpu.dot_dimension_numbers<[1], [0], [0], [1], [0, 0, 1, 1], [], []>} : vector<72x64xf32>, vector<64x64xf32>, vector<72x64xf32> -> vector<72x64xf32>
    %206 = vector.extract_strided_slice %199 {offsets = [72, 0], sizes = [72, 64], strides = [1, 1]} : vector<576x64xf32> to vector<72x64xf32>
    %207 = vector.extract_strided_slice %202 {offsets = [0, 128], sizes = [64, 64], strides = [1, 1]} : vector<64x1024xf32> to vector<64x64xf32>
    %cst_77 = arith.constant dense<0.000000e+00> : vector<72x64xf32>
    %208 = tpu.matmul %206, %207, %cst_77 {dimension_numbers = #tpu.dot_dimension_numbers<[1], [0], [0], [1], [0, 0, 1, 1], [], []>} : vector<72x64xf32>, vector<64x64xf32>, vector<72x64xf32> -> vector<72x64xf32>
    %209 = arith.addf %205, %208 : vector<72x64xf32>
    %210 = vector.extract_strided_slice %199 {offsets = [144, 0], sizes = [72, 64], strides = [1, 1]} : vector<576x64xf32> to vector<72x64xf32>
    %211 = vector.extract_strided_slice %202 {offsets = [0, 256], sizes = [64, 64], strides = [1, 1]} : vector<64x1024xf32> to vector<64x64xf32>
    %cst_78 = arith.constant dense<0.000000e+00> : vector<72x64xf32>
    %212 = tpu.matmul %210, %211, %cst_78 {dimension_numbers = #tpu.dot_dimension_numbers<[1], [0], [0], [1], [0, 0, 1, 1], [], []>} : vector<72x64xf32>, vector<64x64xf32>, vector<72x64xf32> -> vector<72x64xf32>
    %213 = arith.addf %209, %212 : vector<72x64xf32>
    %214 = vector.extract_strided_slice %199 {offsets = [216, 0], sizes = [72, 64], strides = [1, 1]} : vector<576x64xf32> to vector<72x64xf32>
    %215 = vector.extract_strided_slice %202 {offsets = [0, 384], sizes = [64, 64], strides = [1, 1]} : vector<64x1024xf32> to vector<64x64xf32>
    %cst_79 = arith.constant dense<0.000000e+00> : vector<72x64xf32>
    %216 = tpu.matmul %214, %215, %cst_79 {dimension_numbers = #tpu.dot_dimension_numbers<[1], [0], [0], [1], [0, 0, 1, 1], [], []>} : vector<72x64xf32>, vector<64x64xf32>, vector<72x64xf32> -> vector<72x64xf32>
    %217 = arith.addf %213, %216 : vector<72x64xf32>
    %218 = vector.extract_strided_slice %199 {offsets = [288, 0], sizes = [72, 64], strides = [1, 1]} : vector<576x64xf32> to vector<72x64xf32>
    %219 = vector.extract_strided_slice %202 {offsets = [0, 512], sizes = [64, 64], strides = [1, 1]} : vector<64x1024xf32> to vector<64x64xf32>
    %cst_80 = arith.constant dense<0.000000e+00> : vector<72x64xf32>
    %220 = tpu.matmul %218, %219, %cst_80 {dimension_numbers = #tpu.dot_dimension_numbers<[1], [0], [0], [1], [0, 0, 1, 1], [], []>} : vector<72x64xf32>, vector<64x64xf32>, vector<72x64xf32> -> vector<72x64xf32>
    %221 = arith.addf %217, %220 : vector<72x64xf32>
    %222 = vector.extract_strided_slice %199 {offsets = [360, 0], sizes = [72, 64], strides = [1, 1]} : vector<576x64xf32> to vector<72x64xf32>
    %223 = vector.extract_strided_slice %202 {offsets = [0, 640], sizes = [64, 64], strides = [1, 1]} : vector<64x1024xf32> to vector<64x64xf32>
    %cst_81 = arith.constant dense<0.000000e+00> : vector<72x64xf32>
    %224 = tpu.matmul %222, %223, %cst_81 {dimension_numbers = #tpu.dot_dimension_numbers<[1], [0], [0], [1], [0, 0, 1, 1], [], []>} : vector<72x64xf32>, vector<64x64xf32>, vector<72x64xf32> -> vector<72x64xf32>
    %225 = arith.addf %221, %224 : vector<72x64xf32>
    %226 = vector.extract_strided_slice %199 {offsets = [432, 0], sizes = [72, 64], strides = [1, 1]} : vector<576x64xf32> to vector<72x64xf32>
    %227 = vector.extract_strided_slice %202 {offsets = [0, 768], sizes = [64, 64], strides = [1, 1]} : vector<64x1024xf32> to vector<64x64xf32>
    %cst_82 = arith.constant dense<0.000000e+00> : vector<72x64xf32>
    %228 = tpu.matmul %226, %227, %cst_82 {dimension_numbers = #tpu.dot_dimension_numbers<[1], [0], [0], [1], [0, 0, 1, 1], [], []>} : vector<72x64xf32>, vector<64x64xf32>, vector<72x64xf32> -> vector<72x64xf32>
    %229 = arith.addf %225, %228 : vector<72x64xf32>
    %230 = vector.extract_strided_slice %199 {offsets = [504, 0], sizes = [72, 64], strides = [1, 1]} : vector<576x64xf32> to vector<72x64xf32>
    %231 = vector.extract_strided_slice %202 {offsets = [0, 896], sizes = [64, 64], strides = [1, 1]} : vector<64x1024xf32> to vector<64x64xf32>
    %cst_83 = arith.constant dense<0.000000e+00> : vector<72x64xf32>
    %232 = tpu.matmul %230, %231, %cst_83 {dimension_numbers = #tpu.dot_dimension_numbers<[1], [0], [0], [1], [0, 0, 1, 1], [], []>} : vector<72x64xf32>, vector<64x64xf32>, vector<72x64xf32> -> vector<72x64xf32>
    %233 = arith.addf %229, %232 : vector<72x64xf32>
    %c2 = arith.constant 2 : index
    %c0_84 = arith.constant 0 : index
    %234 = vector.load %arg6[%c2, %c0_84] : memref<16x512xf32, #tpu.memory_space<vmem>>, vector<1x64xf32>
    %235 = vector.broadcast %234 : vector<1x64xf32> to vector<72x64xf32>
    %236 = arith.addf %233, %235 : vector<72x64xf32>
    %237 = arith.addf %236, %158 : vector<72x64xf32>
    %cst_85 = arith.constant dense<0.000000e+00> : vector<72xf32>
    %238 = vector.multi_reduction <add>, %237, %cst_85 [1] : vector<72x64xf32> to vector<72xf32>
    %239 = vector.shape_cast %238 : vector<72xf32> to vector<72x1xf32>
    %cst_86 = arith.constant 6.400000e+01 : f32
    %240 = vector.broadcast %cst_86 : f32 to vector<72x1xf32>
    %241 = arith.divf %239, %240 : vector<72x1xf32>
    %242 = vector.broadcast %241 : vector<72x1xf32> to vector<72x64xf32>
    %243 = arith.subf %237, %242 : vector<72x64xf32>
    %244 = arith.mulf %243, %243 : vector<72x64xf32>
    %cst_87 = arith.constant dense<0.000000e+00> : vector<72xf32>
    %245 = vector.multi_reduction <add>, %244, %cst_87 [1] : vector<72x64xf32> to vector<72xf32>
    %246 = vector.shape_cast %245 : vector<72xf32> to vector<72x1xf32>
    %cst_88 = arith.constant 6.400000e+01 : f32
    %247 = vector.broadcast %cst_88 : f32 to vector<72x1xf32>
    %248 = arith.divf %246, %247 : vector<72x1xf32>
    %249 = vector.broadcast %241 : vector<72x1xf32> to vector<72x64xf32>
    %250 = arith.subf %237, %249 : vector<72x64xf32>
    %cst_89 = arith.constant 9.99999997E-7 : f32
    %251 = vector.broadcast %cst_89 : f32 to vector<72x1xf32>
    %252 = arith.addf %248, %251 : vector<72x1xf32>
    %253 = math.rsqrt %252 : vector<72x1xf32>
    %254 = vector.broadcast %253 : vector<72x1xf32> to vector<72x64xf32>
    %255 = arith.mulf %250, %254 : vector<72x64xf32>
    %c4 = arith.constant 4 : index
    %c0_90 = arith.constant 0 : index
    %256 = vector.load %arg6[%c4, %c0_90] : memref<16x512xf32, #tpu.memory_space<vmem>>, vector<1x64xf32>
    %257 = vector.broadcast %256 : vector<1x64xf32> to vector<72x64xf32>
    %258 = arith.mulf %255, %257 : vector<72x64xf32>
    %c6 = arith.constant 6 : index
    %c0_91 = arith.constant 0 : index
    %259 = vector.load %arg6[%c6, %c0_91] : memref<16x512xf32, #tpu.memory_space<vmem>>, vector<1x64xf32>
    %260 = vector.broadcast %259 : vector<1x64xf32> to vector<72x64xf32>
    %261 = arith.addf %258, %260 : vector<72x64xf32>
    %c0_92 = arith.constant 0 : index
    %c0_93 = arith.constant 0 : index
    %c0_94 = arith.constant 0 : index
    %262 = vector.load %arg8[%c0_92, %c0_93, %c0_94] : memref<2x64x512xf32, #tpu.memory_space<vmem>>, vector<1x64x512xf32>
    %263 = vector.shape_cast %262 : vector<1x64x512xf32> to vector<64x512xf32>
    %cst_95 = arith.constant dense<0.000000e+00> : vector<72x512xf32>
    %264 = tpu.matmul %261, %263, %cst_95 {dimension_numbers = #tpu.dot_dimension_numbers<[1], [0], [0], [1], [0, 0, 1, 1], [], []>} : vector<72x64xf32>, vector<64x512xf32>, vector<72x512xf32> -> vector<72x512xf32>
    %c8 = arith.constant 8 : index
    %c0_96 = arith.constant 0 : index
    %265 = vector.load %arg6[%c8, %c0_96] : memref<16x512xf32, #tpu.memory_space<vmem>>, vector<1x512xf32>
    %266 = vector.broadcast %265 : vector<1x512xf32> to vector<72x512xf32>
    %267 = arith.addf %264, %266 : vector<72x512xf32>
    %cst_97 = arith.constant 5.000000e-01 : f32
    %268 = vector.broadcast %cst_97 : f32 to vector<72x512xf32>
    %269 = arith.mulf %268, %267 : vector<72x512xf32>
    %cst_98 = arith.constant 4.471500e-02 : f32
    %270 = vector.broadcast %cst_98 : f32 to vector<72x512xf32>
    %271 = arith.mulf %270, %267 : vector<72x512xf32>
    %272 = arith.mulf %271, %267 : vector<72x512xf32>
    %273 = arith.mulf %272, %267 : vector<72x512xf32>
    %274 = arith.addf %267, %273 : vector<72x512xf32>
    %cst_99 = arith.constant 0.797884583 : f32
    %275 = vector.broadcast %cst_99 : f32 to vector<72x512xf32>
    %276 = arith.mulf %275, %274 : vector<72x512xf32>
    %277 = math.tanh %276 : vector<72x512xf32>
    %cst_100 = arith.constant 1.000000e+00 : f32
    %278 = vector.broadcast %cst_100 : f32 to vector<72x512xf32>
    %279 = arith.addf %278, %277 : vector<72x512xf32>
    %280 = arith.mulf %269, %279 : vector<72x512xf32>
    %c0_101 = arith.constant 0 : index
    %c0_102 = arith.constant 0 : index
    %c0_103 = arith.constant 0 : index
    %281 = vector.load %arg9[%c0_101, %c0_102, %c0_103] : memref<2x512x64xf32, #tpu.memory_space<vmem>>, vector<1x512x64xf32>
    %282 = vector.shape_cast %281 : vector<1x512x64xf32> to vector<512x64xf32>
    %cst_104 = arith.constant dense<0.000000e+00> : vector<72x64xf32>
    %283 = tpu.matmul %280, %282, %cst_104 {dimension_numbers = #tpu.dot_dimension_numbers<[1], [0], [0], [1], [0, 0, 1, 1], [], []>} : vector<72x512xf32>, vector<512x64xf32>, vector<72x64xf32> -> vector<72x64xf32>
    %c10 = arith.constant 10 : index
    %c0_105 = arith.constant 0 : index
    %284 = vector.load %arg6[%c10, %c0_105] : memref<16x512xf32, #tpu.memory_space<vmem>>, vector<1x64xf32>
    %285 = vector.broadcast %284 : vector<1x64xf32> to vector<72x64xf32>
    %286 = arith.addf %283, %285 : vector<72x64xf32>
    %287 = arith.addf %286, %237 : vector<72x64xf32>
    %288 = vector.extract_strided_slice %287 {offsets = [0, 0], sizes = [64, 64], strides = [1, 1]} : vector<72x64xf32> to vector<64x64xf32>
    %cst_106 = arith.constant dense<0.000000e+00> : vector<80x64xf32>
    %289 = tpu.matmul %160, %288, %cst_106 {dimension_numbers = #tpu.dot_dimension_numbers<[1], [0], [0], [1], [0, 0, 1, 1], [], []>} : vector<80x64xf32>, vector<64x64xf32>, vector<80x64xf32> -> vector<80x64xf32>
    %290 = vector.extract_strided_slice %289 {offsets = [0, 0], sizes = [40, 64], strides = [1, 1]} : vector<80x64xf32> to vector<40x64xf32>
    %291 = vector.extract_strided_slice %289 {offsets = [40, 0], sizes = [40, 64], strides = [1, 1]} : vector<80x64xf32> to vector<40x64xf32>
    %c680 = arith.constant 680 : index
    %c0_107 = arith.constant 0 : index
    %292 = vector.load %arg5[%c680, %c0_107] : memref<1912x128xf32, #tpu.memory_space<vmem>>, vector<80x64xf32>
    %293 = vector.extract_strided_slice %292 {offsets = [0, 0], sizes = [40, 64], strides = [1, 1]} : vector<80x64xf32> to vector<40x64xf32>
    %294 = vector.extract_strided_slice %292 {offsets = [40, 0], sizes = [40, 64], strides = [1, 1]} : vector<80x64xf32> to vector<40x64xf32>
    %295 = arith.mulf %293, %290 : vector<40x64xf32>
    %296 = arith.mulf %294, %291 : vector<40x64xf32>
    %297 = arith.subf %295, %296 : vector<40x64xf32>
    %298 = arith.mulf %293, %291 : vector<40x64xf32>
    %299 = arith.mulf %294, %290 : vector<40x64xf32>
    %300 = arith.addf %298, %299 : vector<40x64xf32>
    %301 = tpu.concatenate %297, %300 in 0 : vector<40x64xf32>, vector<40x64xf32> -> vector<80x64xf32>
    %cst_108 = arith.constant dense<0.000000e+00> : vector<64x64xf32>
    %302 = tpu.matmul %161, %301, %cst_108 {dimension_numbers = #tpu.dot_dimension_numbers<[1], [0], [0], [1], [0, 0, 1, 1], [], []>} : vector<64x80xf32>, vector<80x64xf32>, vector<64x64xf32> -> vector<64x64xf32>
    %303 = vector.extract_strided_slice %287 {offsets = [64, 0], sizes = [8, 64], strides = [1, 1]} : vector<72x64xf32> to vector<8x64xf32>
    %304 = tpu.concatenate %302, %303 in 0 : vector<64x64xf32>, vector<8x64xf32> -> vector<72x64xf32>
    %c408 = arith.constant 408 : index
    %c0_109 = arith.constant 0 : index
    %305 = vector.load %arg5[%c408, %c0_109] : memref<1912x128xf32, #tpu.memory_space<vmem>>, vector<64x64xf32>
    %c536 = arith.constant 536 : index
    %c0_110 = arith.constant 0 : index
    %306 = vector.load %arg5[%c536, %c0_110] : memref<1912x128xf32, #tpu.memory_space<vmem>>, vector<64x72xf32>
    %cst_111 = arith.constant dense<0.000000e+00> : vector<72x64xf32>
    %307 = tpu.matmul %304, %305, %cst_111 {dimension_numbers = #tpu.dot_dimension_numbers<[1], [0], [0], [1], [0, 0, 1, 1], [], []>} : vector<72x64xf32>, vector<64x64xf32>, vector<72x64xf32> -> vector<72x64xf32>
    %cst_112 = arith.constant dense<0.000000e+00> : vector<64x64xf32>
    %308 = tpu.matmul %306, %304, %cst_112 {dimension_numbers = #tpu.dot_dimension_numbers<[1], [0], [0], [1], [0, 0, 1, 1], [], []>} : vector<64x72xf32>, vector<72x64xf32>, vector<64x64xf32> -> vector<64x64xf32>
    %c1_113 = arith.constant 1 : index
    %c0_114 = arith.constant 0 : index
    %c0_115 = arith.constant 0 : index
    %c0_116 = arith.constant 0 : index
    %309 = vector.load %arg2[%c1_113, %c0_114, %c0_115, %c0_116] : memref<2x1x64x64xf32, #tpu.memory_space<vmem>>, vector<1x1x64x64xf32>
    %310 = vector.shape_cast %309 : vector<1x1x64x64xf32> to vector<64x64xf32>
    %cst_117 = arith.constant dense<0.000000e+00> : vector<72x64xf32>
    %311 = tpu.matmul %307, %310, %cst_117 {dimension_numbers = #tpu.dot_dimension_numbers<[1], [0], [0], [1], [0, 0, 1, 1], [], []>} : vector<72x64xf32>, vector<64x64xf32>, vector<72x64xf32> -> vector<72x64xf32>
    %cst_118 = arith.constant dense<0xFF800000> : vector<72xf32>
    %312 = vector.multi_reduction <maximumf>, %311, %cst_118 [1] : vector<72x64xf32> to vector<72xf32>
    %313 = vector.shape_cast %312 : vector<72xf32> to vector<72x1xf32>
    %314 = vector.broadcast %313 : vector<72x1xf32> to vector<72x64xf32>
    %315 = arith.subf %311, %314 : vector<72x64xf32>
    %316 = math.exp %315 : vector<72x64xf32>
    %cst_119 = arith.constant dense<0.000000e+00> : vector<72x64xf32>
    %317 = tpu.matmul %316, %159, %cst_119 {dimension_numbers = #tpu.dot_dimension_numbers<[1], [0], [0], [1], [0, 0, 1, 1], [], []>} : vector<72x64xf32>, vector<64x64xf32>, vector<72x64xf32> -> vector<72x64xf32>
    %cst_120 = arith.constant 9.99999968E-21 : f32
    %318 = vector.broadcast %cst_120 : f32 to vector<72x64xf32>
    %319 = arith.addf %317, %318 : vector<72x64xf32>
    %320 = tpu.reciprocal %319 {approx = true} : vector<72x64xf32> -> vector<72x64xf32>
    %321 = arith.mulf %316, %320 : vector<72x64xf32>
    %cst_121 = arith.constant dense<0.000000e+00> : vector<576x64xf32>
    %322 = tpu.matmul %162, %321, %cst_121 {dimension_numbers = #tpu.dot_dimension_numbers<[1], [0], [0], [1], [0, 0, 1, 1], [], []>} : vector<576x72xf32>, vector<72x64xf32>, vector<576x64xf32> -> vector<576x64xf32>
    %323 = arith.mulf %322, %163 : vector<576x64xf32>
    %c1_122 = arith.constant 1 : index
    %c0_123 = arith.constant 0 : index
    %c0_124 = arith.constant 0 : index
    %324 = vector.load %arg7[%c1_122, %c0_123, %c0_124] : memref<2x64x1024xf32, #tpu.memory_space<vmem>>, vector<1x64x1024xf32>
    %325 = vector.shape_cast %324 : vector<1x64x1024xf32> to vector<64x1024xf32>
    %cst_125 = arith.constant dense<0.000000e+00> : vector<64x1024xf32>
    %326 = tpu.matmul %308, %325, %cst_125 {dimension_numbers = #tpu.dot_dimension_numbers<[1], [0], [0], [1], [0, 0, 1, 1], [], []>} : vector<64x64xf32>, vector<64x1024xf32>, vector<64x1024xf32> -> vector<64x1024xf32>
    %327 = vector.extract_strided_slice %323 {offsets = [0, 0], sizes = [72, 64], strides = [1, 1]} : vector<576x64xf32> to vector<72x64xf32>
    %328 = vector.extract_strided_slice %326 {offsets = [0, 0], sizes = [64, 64], strides = [1, 1]} : vector<64x1024xf32> to vector<64x64xf32>
    %cst_126 = arith.constant dense<0.000000e+00> : vector<72x64xf32>
    %329 = tpu.matmul %327, %328, %cst_126 {dimension_numbers = #tpu.dot_dimension_numbers<[1], [0], [0], [1], [0, 0, 1, 1], [], []>} : vector<72x64xf32>, vector<64x64xf32>, vector<72x64xf32> -> vector<72x64xf32>
    %330 = vector.extract_strided_slice %323 {offsets = [72, 0], sizes = [72, 64], strides = [1, 1]} : vector<576x64xf32> to vector<72x64xf32>
    %331 = vector.extract_strided_slice %326 {offsets = [0, 128], sizes = [64, 64], strides = [1, 1]} : vector<64x1024xf32> to vector<64x64xf32>
    %cst_127 = arith.constant dense<0.000000e+00> : vector<72x64xf32>
    %332 = tpu.matmul %330, %331, %cst_127 {dimension_numbers = #tpu.dot_dimension_numbers<[1], [0], [0], [1], [0, 0, 1, 1], [], []>} : vector<72x64xf32>, vector<64x64xf32>, vector<72x64xf32> -> vector<72x64xf32>
    %333 = arith.addf %329, %332 : vector<72x64xf32>
    %334 = vector.extract_strided_slice %323 {offsets = [144, 0], sizes = [72, 64], strides = [1, 1]} : vector<576x64xf32> to vector<72x64xf32>
    %335 = vector.extract_strided_slice %326 {offsets = [0, 256], sizes = [64, 64], strides = [1, 1]} : vector<64x1024xf32> to vector<64x64xf32>
    %cst_128 = arith.constant dense<0.000000e+00> : vector<72x64xf32>
    %336 = tpu.matmul %334, %335, %cst_128 {dimension_numbers = #tpu.dot_dimension_numbers<[1], [0], [0], [1], [0, 0, 1, 1], [], []>} : vector<72x64xf32>, vector<64x64xf32>, vector<72x64xf32> -> vector<72x64xf32>
    %337 = arith.addf %333, %336 : vector<72x64xf32>
    %338 = vector.extract_strided_slice %323 {offsets = [216, 0], sizes = [72, 64], strides = [1, 1]} : vector<576x64xf32> to vector<72x64xf32>
    %339 = vector.extract_strided_slice %326 {offsets = [0, 384], sizes = [64, 64], strides = [1, 1]} : vector<64x1024xf32> to vector<64x64xf32>
    %cst_129 = arith.constant dense<0.000000e+00> : vector<72x64xf32>
    %340 = tpu.matmul %338, %339, %cst_129 {dimension_numbers = #tpu.dot_dimension_numbers<[1], [0], [0], [1], [0, 0, 1, 1], [], []>} : vector<72x64xf32>, vector<64x64xf32>, vector<72x64xf32> -> vector<72x64xf32>
    %341 = arith.addf %337, %340 : vector<72x64xf32>
    %342 = vector.extract_strided_slice %323 {offsets = [288, 0], sizes = [72, 64], strides = [1, 1]} : vector<576x64xf32> to vector<72x64xf32>
    %343 = vector.extract_strided_slice %326 {offsets = [0, 512], sizes = [64, 64], strides = [1, 1]} : vector<64x1024xf32> to vector<64x64xf32>
    %cst_130 = arith.constant dense<0.000000e+00> : vector<72x64xf32>
    %344 = tpu.matmul %342, %343, %cst_130 {dimension_numbers = #tpu.dot_dimension_numbers<[1], [0], [0], [1], [0, 0, 1, 1], [], []>} : vector<72x64xf32>, vector<64x64xf32>, vector<72x64xf32> -> vector<72x64xf32>
    %345 = arith.addf %341, %344 : vector<72x64xf32>
    %346 = vector.extract_strided_slice %323 {offsets = [360, 0], sizes = [72, 64], strides = [1, 1]} : vector<576x64xf32> to vector<72x64xf32>
    %347 = vector.extract_strided_slice %326 {offsets = [0, 640], sizes = [64, 64], strides = [1, 1]} : vector<64x1024xf32> to vector<64x64xf32>
    %cst_131 = arith.constant dense<0.000000e+00> : vector<72x64xf32>
    %348 = tpu.matmul %346, %347, %cst_131 {dimension_numbers = #tpu.dot_dimension_numbers<[1], [0], [0], [1], [0, 0, 1, 1], [], []>} : vector<72x64xf32>, vector<64x64xf32>, vector<72x64xf32> -> vector<72x64xf32>
    %349 = arith.addf %345, %348 : vector<72x64xf32>
    %350 = vector.extract_strided_slice %323 {offsets = [432, 0], sizes = [72, 64], strides = [1, 1]} : vector<576x64xf32> to vector<72x64xf32>
    %351 = vector.extract_strided_slice %326 {offsets = [0, 768], sizes = [64, 64], strides = [1, 1]} : vector<64x1024xf32> to vector<64x64xf32>
    %cst_132 = arith.constant dense<0.000000e+00> : vector<72x64xf32>
    %352 = tpu.matmul %350, %351, %cst_132 {dimension_numbers = #tpu.dot_dimension_numbers<[1], [0], [0], [1], [0, 0, 1, 1], [], []>} : vector<72x64xf32>, vector<64x64xf32>, vector<72x64xf32> -> vector<72x64xf32>
    %353 = arith.addf %349, %352 : vector<72x64xf32>
    %354 = vector.extract_strided_slice %323 {offsets = [504, 0], sizes = [72, 64], strides = [1, 1]} : vector<576x64xf32> to vector<72x64xf32>
    %355 = vector.extract_strided_slice %326 {offsets = [0, 896], sizes = [64, 64], strides = [1, 1]} : vector<64x1024xf32> to vector<64x64xf32>
    %cst_133 = arith.constant dense<0.000000e+00> : vector<72x64xf32>
    %356 = tpu.matmul %354, %355, %cst_133 {dimension_numbers = #tpu.dot_dimension_numbers<[1], [0], [0], [1], [0, 0, 1, 1], [], []>} : vector<72x64xf32>, vector<64x64xf32>, vector<72x64xf32> -> vector<72x64xf32>
    %357 = arith.addf %353, %356 : vector<72x64xf32>
    %c3 = arith.constant 3 : index
    %c0_134 = arith.constant 0 : index
    %358 = vector.load %arg6[%c3, %c0_134] : memref<16x512xf32, #tpu.memory_space<vmem>>, vector<1x64xf32>
    %359 = vector.broadcast %358 : vector<1x64xf32> to vector<72x64xf32>
    %360 = arith.addf %357, %359 : vector<72x64xf32>
    %361 = arith.addf %360, %287 : vector<72x64xf32>
    %cst_135 = arith.constant dense<0.000000e+00> : vector<72xf32>
    %362 = vector.multi_reduction <add>, %361, %cst_135 [1] : vector<72x64xf32> to vector<72xf32>
    %363 = vector.shape_cast %362 : vector<72xf32> to vector<72x1xf32>
    %cst_136 = arith.constant 6.400000e+01 : f32
    %364 = vector.broadcast %cst_136 : f32 to vector<72x1xf32>
    %365 = arith.divf %363, %364 : vector<72x1xf32>
    %366 = vector.broadcast %365 : vector<72x1xf32> to vector<72x64xf32>
    %367 = arith.subf %361, %366 : vector<72x64xf32>
    %368 = arith.mulf %367, %367 : vector<72x64xf32>
    %cst_137 = arith.constant dense<0.000000e+00> : vector<72xf32>
    %369 = vector.multi_reduction <add>, %368, %cst_137 [1] : vector<72x64xf32> to vector<72xf32>
    %370 = vector.shape_cast %369 : vector<72xf32> to vector<72x1xf32>
    %cst_138 = arith.constant 6.400000e+01 : f32
    %371 = vector.broadcast %cst_138 : f32 to vector<72x1xf32>
    %372 = arith.divf %370, %371 : vector<72x1xf32>
    %373 = vector.broadcast %365 : vector<72x1xf32> to vector<72x64xf32>
    %374 = arith.subf %361, %373 : vector<72x64xf32>
    %cst_139 = arith.constant 9.99999997E-7 : f32
    %375 = vector.broadcast %cst_139 : f32 to vector<72x1xf32>
    %376 = arith.addf %372, %375 : vector<72x1xf32>
    %377 = math.rsqrt %376 : vector<72x1xf32>
    %378 = vector.broadcast %377 : vector<72x1xf32> to vector<72x64xf32>
    %379 = arith.mulf %374, %378 : vector<72x64xf32>
    %c5 = arith.constant 5 : index
    %c0_140 = arith.constant 0 : index
    %380 = vector.load %arg6[%c5, %c0_140] : memref<16x512xf32, #tpu.memory_space<vmem>>, vector<1x64xf32>
    %381 = vector.broadcast %380 : vector<1x64xf32> to vector<72x64xf32>
    %382 = arith.mulf %379, %381 : vector<72x64xf32>
    %c7 = arith.constant 7 : index
    %c0_141 = arith.constant 0 : index
    %383 = vector.load %arg6[%c7, %c0_141] : memref<16x512xf32, #tpu.memory_space<vmem>>, vector<1x64xf32>
    %384 = vector.broadcast %383 : vector<1x64xf32> to vector<72x64xf32>
    %385 = arith.addf %382, %384 : vector<72x64xf32>
    %c1_142 = arith.constant 1 : index
    %c0_143 = arith.constant 0 : index
    %c0_144 = arith.constant 0 : index
    %386 = vector.load %arg8[%c1_142, %c0_143, %c0_144] : memref<2x64x512xf32, #tpu.memory_space<vmem>>, vector<1x64x512xf32>
    %387 = vector.shape_cast %386 : vector<1x64x512xf32> to vector<64x512xf32>
    %cst_145 = arith.constant dense<0.000000e+00> : vector<72x512xf32>
    %388 = tpu.matmul %385, %387, %cst_145 {dimension_numbers = #tpu.dot_dimension_numbers<[1], [0], [0], [1], [0, 0, 1, 1], [], []>} : vector<72x64xf32>, vector<64x512xf32>, vector<72x512xf32> -> vector<72x512xf32>
    %c9 = arith.constant 9 : index
    %c0_146 = arith.constant 0 : index
    %389 = vector.load %arg6[%c9, %c0_146] : memref<16x512xf32, #tpu.memory_space<vmem>>, vector<1x512xf32>
    %390 = vector.broadcast %389 : vector<1x512xf32> to vector<72x512xf32>
    %391 = arith.addf %388, %390 : vector<72x512xf32>
    %cst_147 = arith.constant 5.000000e-01 : f32
    %392 = vector.broadcast %cst_147 : f32 to vector<72x512xf32>
    %393 = arith.mulf %392, %391 : vector<72x512xf32>
    %cst_148 = arith.constant 4.471500e-02 : f32
    %394 = vector.broadcast %cst_148 : f32 to vector<72x512xf32>
    %395 = arith.mulf %394, %391 : vector<72x512xf32>
    %396 = arith.mulf %395, %391 : vector<72x512xf32>
    %397 = arith.mulf %396, %391 : vector<72x512xf32>
    %398 = arith.addf %391, %397 : vector<72x512xf32>
    %cst_149 = arith.constant 0.797884583 : f32
    %399 = vector.broadcast %cst_149 : f32 to vector<72x512xf32>
    %400 = arith.mulf %399, %398 : vector<72x512xf32>
    %401 = math.tanh %400 : vector<72x512xf32>
    %cst_150 = arith.constant 1.000000e+00 : f32
    %402 = vector.broadcast %cst_150 : f32 to vector<72x512xf32>
    %403 = arith.addf %402, %401 : vector<72x512xf32>
    %404 = arith.mulf %393, %403 : vector<72x512xf32>
    %c1_151 = arith.constant 1 : index
    %c0_152 = arith.constant 0 : index
    %c0_153 = arith.constant 0 : index
    %405 = vector.load %arg9[%c1_151, %c0_152, %c0_153] : memref<2x512x64xf32, #tpu.memory_space<vmem>>, vector<1x512x64xf32>
    %406 = vector.shape_cast %405 : vector<1x512x64xf32> to vector<512x64xf32>
    %cst_154 = arith.constant dense<0.000000e+00> : vector<72x64xf32>
    %407 = tpu.matmul %404, %406, %cst_154 {dimension_numbers = #tpu.dot_dimension_numbers<[1], [0], [0], [1], [0, 0, 1, 1], [], []>} : vector<72x512xf32>, vector<512x64xf32>, vector<72x64xf32> -> vector<72x64xf32>
    %c11 = arith.constant 11 : index
    %c0_155 = arith.constant 0 : index
    %408 = vector.load %arg6[%c11, %c0_155] : memref<16x512xf32, #tpu.memory_space<vmem>>, vector<1x64xf32>
    %409 = vector.broadcast %408 : vector<1x64xf32> to vector<72x64xf32>
    %410 = arith.addf %407, %409 : vector<72x64xf32>
    %411 = arith.addf %410, %361 : vector<72x64xf32>
    %412 = vector.extract_strided_slice %411 {offsets = [64, 0], sizes = [1, 64], strides = [1, 1]} : vector<72x64xf32> to vector<1x64xf32>
    %cst_156 = arith.constant dense<0.000000e+00> : vector<1xf32>
    %413 = vector.multi_reduction <add>, %412, %cst_156 [1] : vector<1x64xf32> to vector<1xf32>
    %414 = vector.shape_cast %413 : vector<1xf32> to vector<1x1xf32>
    %cst_157 = arith.constant 6.400000e+01 : f32
    %415 = vector.broadcast %cst_157 : f32 to vector<1x1xf32>
    %416 = arith.divf %414, %415 : vector<1x1xf32>
    %417 = vector.broadcast %416 : vector<1x1xf32> to vector<1x64xf32>
    %418 = arith.subf %412, %417 : vector<1x64xf32>
    %419 = arith.mulf %418, %418 : vector<1x64xf32>
    %cst_158 = arith.constant dense<0.000000e+00> : vector<1xf32>
    %420 = vector.multi_reduction <add>, %419, %cst_158 [1] : vector<1x64xf32> to vector<1xf32>
    %421 = vector.shape_cast %420 : vector<1xf32> to vector<1x1xf32>
    %cst_159 = arith.constant 6.400000e+01 : f32
    %422 = vector.broadcast %cst_159 : f32 to vector<1x1xf32>
    %423 = arith.divf %421, %422 : vector<1x1xf32>
    %424 = vector.broadcast %416 : vector<1x1xf32> to vector<1x64xf32>
    %425 = arith.subf %412, %424 : vector<1x64xf32>
    %cst_160 = arith.constant 9.99999997E-7 : f32
    %426 = vector.broadcast %cst_160 : f32 to vector<1x1xf32>
    %427 = arith.addf %423, %426 : vector<1x1xf32>
    %428 = math.rsqrt %427 : vector<1x1xf32>
    %429 = vector.broadcast %428 : vector<1x1xf32> to vector<1x64xf32>
    %430 = arith.mulf %425, %429 : vector<1x64xf32>
    %c12 = arith.constant 12 : index
    %c0_161 = arith.constant 0 : index
    %431 = vector.load %arg6[%c12, %c0_161] : memref<16x512xf32, #tpu.memory_space<vmem>>, vector<1x64xf32>
    %432 = arith.mulf %430, %431 : vector<1x64xf32>
    %c13 = arith.constant 13 : index
    %c0_162 = arith.constant 0 : index
    %433 = vector.load %arg6[%c13, %c0_162] : memref<16x512xf32, #tpu.memory_space<vmem>>, vector<1x64xf32>
    %434 = arith.addf %432, %433 : vector<1x64xf32>
    %c280 = arith.constant 280 : index
    %c0_163 = arith.constant 0 : index
    %435 = vector.load %arg5[%c280, %c0_163] : memref<1912x128xf32, #tpu.memory_space<vmem>>, vector<64x6xf32>
    %cst_164 = arith.constant dense<0.000000e+00> : vector<1x6xf32>
    %436 = tpu.matmul %434, %435, %cst_164 {dimension_numbers = #tpu.dot_dimension_numbers<[1], [0], [0], [1], [0, 0, 1, 1], [], []>} : vector<1x64xf32>, vector<64x6xf32>, vector<1x6xf32> -> vector<1x6xf32>
    %c14 = arith.constant 14 : index
    %c0_165 = arith.constant 0 : index
    %437 = vector.load %arg6[%c14, %c0_165] : memref<16x512xf32, #tpu.memory_space<vmem>>, vector<1x6xf32>
    %438 = arith.addf %436, %437 : vector<1x6xf32>
    %c0_166 = arith.constant 0 : index
    %c0_167 = arith.constant 0 : index
    %c0_168 = arith.constant 0 : index
    %439 = vector.load %arg10[%c0_166, %c0_167, %c0_168] : memref<1x1x6xf32, #tpu.memory_space<vmem>>, vector<1x1x6xf32>
    %440 = vector.shape_cast %439 : vector<1x1x6xf32> to vector<1x6xf32>
    %441 = vector.shape_cast %438 : vector<1x6xf32> to vector<1x1x6xf32>
    tpu.vector_store %arg10[%c0_166, %c0_167, %c0_168], %441 {strides = array<i32>} : memref<1x1x6xf32, #tpu.memory_space<vmem>>, vector<1x1x6xf32>,
    return
  }
  func.func @transform_0(%arg0: i32) -> (i32, i32, i32) {
    %c0_i32 = arith.constant 0 : i32
    %c0_i32_0 = arith.constant 0 : i32
    %c0_i32_1 = arith.constant 0 : i32
    return %arg0, %c0_i32, %c0_i32_0 : i32, i32, i32
  }
  func.func @transform_1(%arg0: i32) -> (i32, i32, i32, i32) {
    %c0_i32 = arith.constant 0 : i32
    %c0_i32_0 = arith.constant 0 : i32
    %c0_i32_1 = arith.constant 0 : i32
    %c0_i32_2 = arith.constant 0 : i32
    return %c0_i32, %arg0, %c0_i32_0, %c0_i32_1 : i32, i32, i32, i32
  }
  func.func @transform_2(%arg0: i32) -> (i32, i32) {
    %c0_i32 = arith.constant 0 : i32
    %c0_i32_0 = arith.constant 0 : i32
    %c0_i32_1 = arith.constant 0 : i32
    return %c0_i32, %c0_i32_0 : i32, i32
  }
  func.func @transform_3(%arg0: i32) -> (i32, i32) {
    %c0_i32 = arith.constant 0 : i32
    %c0_i32_0 = arith.constant 0 : i32
    %c0_i32_1 = arith.constant 0 : i32
    return %c0_i32, %c0_i32_0 : i32, i32
  }
  func.func @transform_4(%arg0: i32) -> (i32, i32) {
    %c0_i32 = arith.constant 0 : i32
    %c0_i32_0 = arith.constant 0 : i32
    %c0_i32_1 = arith.constant 0 : i32
    return %c0_i32, %c0_i32_0 : i32, i32
  }
  func.func @transform_5(%arg0: i32) -> (i32, i32) {
    %c0_i32 = arith.constant 0 : i32
    %c0_i32_0 = arith.constant 0 : i32
    %c0_i32_1 = arith.constant 0 : i32
    return %c0_i32, %c0_i32_0 : i32, i32
  }
  func.func @transform_6(%arg0: i32) -> (i32, i32, i32) {
    %c0_i32 = arith.constant 0 : i32
    %c0_i32_0 = arith.constant 0 : i32
    %c0_i32_1 = arith.constant 0 : i32
    %c0_i32_2 = arith.constant 0 : i32
    return %c0_i32, %c0_i32_0, %c0_i32_1 : i32, i32, i32
  }
  func.func @transform_7(%arg0: i32) -> (i32, i32, i32) {
    %c0_i32 = arith.constant 0 : i32
    %c0_i32_0 = arith.constant 0 : i32
    %c0_i32_1 = arith.constant 0 : i32
    %c0_i32_2 = arith.constant 0 : i32
    return %c0_i32, %c0_i32_0, %c0_i32_1 : i32, i32, i32
  }
  func.func @transform_8(%arg0: i32) -> (i32, i32, i32) {
    %c0_i32 = arith.constant 0 : i32
    %c0_i32_0 = arith.constant 0 : i32
    %c0_i32_1 = arith.constant 0 : i32
    %c0_i32_2 = arith.constant 0 : i32
    return %c0_i32, %c0_i32_0, %c0_i32_1 : i32, i32, i32
  }
  func.func @transform_9(%arg0: i32) -> (i32, i32, i32) {
    %c0_i32 = arith.constant 0 : i32
    %c0_i32_0 = arith.constant 0 : i32
    %c0_i32_1 = arith.constant 0 : i32
    return %arg0, %c0_i32, %c0_i32_0 : i32, i32, i32
  }
}

</mosaic_0001>

<bundles_post_ra>
// kernel: crosshl_forward.1
= control target key start
LH: loop header
LB: loop body
LE: loop exit
PB: predicated region body
PF: predicated region fallthrough
CT: control target
= control target key end

     0   :  { %14 = vsyncpa [#allocation4], 0  ;;  %s22521_s0 = inlined_call_operand.vmem [shape: f32[2,64,12], index: 0, kind: input, shape index: {}]   ;;  %s22522_s1 = inlined_call_operand.vmem [shape: f32[2,2,64,64], index: 1, kind: input, shape index: {}]   ;;  %s22523_s2 = inlined_call_operand.vmem [shape: f32[12,1152], index: 2, kind: input, shape index: {}]   ;;  %s22524_s3 = inlined_call_operand.vmem [shape: f32[32,1152], index: 3, kind: input, shape index: {}]   ;;  %s22525_s4 = inlined_call_operand.vmem [shape: f32[1912,128], index: 4, kind: input, shape index: {}]   ;;  %s22526_s5 = inlined_call_operand.vmem [shape: f32[16,512], index: 5, kind: input, shape index: {}]   ;;  %s22527_s6 = inlined_call_operand.vmem [shape: f32[2,64,1024], index: 6, kind: input, shape index: {}]   ;;  %s22528_s7 = inlined_call_operand.vmem [shape: f32[2,64,512], index: 7, kind: input, shape index: {}]   ;;  %s22529_s8 = inlined_call_operand.vmem [shape: f32[2,512,64], index: 8, kind: input, shape index: {}]   ;;  %s22530_s9 = inlined_call_operand.hbm [shape: f32[2,1,6], index: 9, kind: output, shape index: {}]  }
   0x1   :  { %16 = vsyncpa [#allocation4 + $0x1], 0  ;;  %s15019_s30 = smov 0   ;;  %s15021_s10 = smov 0  }
   0x2   :  { %s15023_s11 = smov 0   ;;  %s15025_s12 = smov 0  }
   0x3 LB: > { %s15040_s13 = sadd.s32 4294967295, %s14964_s12   ;;  %s11321_s14 = sadd.s32 4294967294, %s14964_s12   ;;  %s14964_s12 = sphi %s15025_s12, %s23223_s12   ;;  %s14960_s11 = sphi %s15023_s11, %s23222_s11   ;;  %s14956_s10 = sphi %s15021_s10, %s23221_s10   ;;  %s14952_s30 = sphi %s15019_s30, %s23220_s30  }
   0x4   : > { %s15044_s15 = sadd.s32 1, %s14964_s12   ;;  %s55_s16 = sadd.s32 1, %s14960_s11 }
   0x5   : > { %s52_s17 = ssub.s32 %s14964_s12, %s15044_s15  ;;  %p62_p0 = scmp.ne.s32.totalorder %s14960_s11, %s14956_s10 }
   0x6   : > { %p53_p1 = scmp.eq.s32.totalorder %s52_s17, 0  ;;  %p63_p2 = scmp.eq.s32.totalorder %s14964_s12, 0 }
   0x7   : > { %p239_p3 = scmp.eq.s32.totalorder %s15040_s13, 1  ;;  %p244_p4 = scmp.ne.s32.totalorder %s14956_s10, %s14952_s30 }
   0x8   : > { %s15056_s18 = scalar_select %p53_p1, %s14960_s11, %s55_s16  }
   0x9   : > { %p64_p5 = por %p63_p2, %p62_p0  ;;  %p15058_p6 = por %p239_p3, %p62_p0 }
   0xa   : > { %p245_p7 = scmp.eq.s32.totalorder %s11321_s14, 1  ;;  %p11323_p9 = scmp.ge.s32.totalorder %s14964_s12, 2 }
   0xc   : > { %p15062_p8 = por %p245_p7, %p244_p4  ;;  %282 = sbr.rel (%p11323_p9) target bundleno = 29 (0x1d), region = 44 }
  0x11   : > { %293 = sbr.rel (!%p64_p5) target bundleno = 29 (0x1d), region = 52  ;;  %s295_s21 = sand.u32 (%p64_p5), 1, %s14960_s11  }
  0x12   : > { %s12088_s22 = sshll.u32 (%p64_p5), %s14964_s12, 6  ;;  %s11324_s23 = sshll.u32 (%p64_p5), %s295_s21, 7 }
  0x13   : > { %s15074_s26 = scalar_lea.vmem (%p64_p5), %s22522_s1, %s12088_s22  ;;  %s297_s27 = scalar_lea.vmem (%p64_p5), [#allocation2], %s11324_s23 }
  0x14   : > { %v359_v0 = vld [vmem:[%s15074_s26] sm:$0xff] (%p64_p5)  ;;  %v361_v1 = vld [vmem:[%s15074_s26 + $0x8] sm:$0xff] (%p64_p5)  ;;  %v363_v2 = vld [vmem:[%s15074_s26 + $0x10] sm:$0xff] (%p64_p5) }
  0x15   : > { %360 = vst [vmem:[%s297_s27] sm:$0xff] (%p64_p5), %v359_v0  ;;  %362 = vst [vmem:[%s297_s27 + $0x8] sm:$0xff] (%p64_p5), %v361_v1  ;;  %v365_v3 = vld [vmem:[%s15074_s26 + $0x18] sm:$0xff] (%p64_p5)  ;;  %v367_v4 = vld [vmem:[%s15074_s26 + $0x20] sm:$0xff] (%p64_p5) }
  0x16   : > { %364 = vst [vmem:[%s297_s27 + $0x10] sm:$0xff] %v363_v2  ;;  %v369_v5 = vld [vmem:[%s15074_s26 + $0x28] sm:$0xff]  ;;  %366 = vst [vmem:[%s297_s27 + $0x18] sm:$0xff] %v365_v3  ;;  %v371_v6 = vld [vmem:[%s15074_s26 + $0x30] sm:$0xff] }
  0x17   : > { %368 = vst [vmem:[%s297_s27 + $0x20] sm:$0xff] %v367_v4  ;;  %370 = vst [vmem:[%s297_s27 + $0x28] sm:$0xff] %v369_v5  ;;  %v373_v7 = vld [vmem:[%s15074_s26 + $0x38] sm:$0xff]  ;;  %v375_v8 = vld [vmem:[%s15074_s26 + $0x80] sm:$0xff] }
  0x18   : > { %372 = vst [vmem:[%s297_s27 + $0x30] sm:$0xff] %v371_v6  ;;  %374 = vst [vmem:[%s297_s27 + $0x38] sm:$0xff] %v373_v7  ;;  %v377_v9 = vld [vmem:[%s15074_s26 + $0x88] sm:$0xff]  ;;  %v379_v10 = vld [vmem:[%s15074_s26 + $0x90] sm:$0xff] }
  0x19   : > { %376 = vst [vmem:[%s297_s27 + $0x40] sm:$0xff] %v375_v8  ;;  %v381_v11 = vld [vmem:[%s15074_s26 + $0x98] sm:$0xff]  ;;  %378 = vst [vmem:[%s297_s27 + $0x48] sm:$0xff] %v377_v9  ;;  %v383_v12 = vld [vmem:[%s15074_s26 + $0xa0] sm:$0xff] }
  0x1a   : > { %380 = vst [vmem:[%s297_s27 + $0x50] sm:$0xff] %v379_v10  ;;  %382 = vst [vmem:[%s297_s27 + $0x58] sm:$0xff] %v381_v11  ;;  %v385_v13 = vld [vmem:[%s15074_s26 + $0xa8] sm:$0xff]  ;;  %v387_v14 = vld [vmem:[%s15074_s26 + $0xb0] sm:$0xff] }
  0x1b   : > { %384 = vst [vmem:[%s297_s27 + $0x60] sm:$0xff] %v383_v12  ;;  %386 = vst [vmem:[%s297_s27 + $0x68] sm:$0xff] %v385_v13  ;;  %v389_v15 = vld [vmem:[%s15074_s26 + $0xb8] sm:$0xff] }
  0x1c   : > { %388 = vst [vmem:[%s297_s27 + $0x70] sm:$0xff] %v387_v14  ;;  %390 = vst [vmem:[%s297_s27 + $0x78] sm:$0xff] %v389_v15 }
  0x1d PF: > { %p11327_p10 = scmp.ge.s32.totalorder %s14964_s12, 1  ;;  %p395_p11 = scmp.lt.s32.totalorder %s14964_s12, 3 }
  0x1f   : > { %p396_p12 = pnand %p11327_p10, %p395_p11 }
  0x21   : > { %399 = sbr.rel (%p396_p12) target bundleno = 6309 (0x18a5), region = 90 }
  0x26   : > { %v617_v16 = vld [vmem:[%s22523_s2 + $0x50] sm:$0xf]  ;;  %vm650_vm0 = vcmask 1043456   ;;  %v619_v17 = vld [vmem:[%s22523_s2 + $0x60] sm:$0xf]  ;;  %v608_v18 = vld [vmem:[%s22523_s2 + $0x8] sm:$0xff]  ;;  %v454_v61 = vlaneseq }
  0x27   : > { %11331 = vmatprep.subr.msk.mxu0 %vm650_vm0, %v617_v16  ;;  %11341 = vmatprep.subr.msk.mxu1 %vm650_vm0, %v619_v17  ;;  %v616_v19 = vld [vmem:[%s22523_s2 + $0x48] sm:$0xf]  ;;  %v618_v20 = vld [vmem:[%s22523_s2 + $0x58] sm:$0xf]  ;;  %v607_v22 = vld [vmem:[%s22523_s2] sm:$0xff]  ;;  %p441_p13 = scmp.lt.s32.totalorder %s15040_s13, 1 }
  0x28   : > { %v610_v21 = vld [vmem:[%s22523_s2 + $0x18] sm:$0xff]  ;;  %11332 = vmatpush1.msk.msra.mxu0 %vm650_vm0, %v616_v19  ;;  %11342 = vmatpush1.msk.msra.mxu1 %vm650_vm0, %v618_v20  ;;  %v609_v23 = vld [vmem:[%s22523_s2 + $0x10] sm:$0xff]  ;;  %v623_v25 = vld [vmem:[%s22523_s2 + $0x80] sm:$0xf]  ;;  %v22619_v26 = vmov 0.0   ;;  %vm625_vm1 = vcmask 97280  }
  0x29   : > { %708 = vmatprep.subr.mxu0 %v608_v18  ;;  %821 = vmatprep.subr.mxu1 %v610_v21  ;;  %v621_v24 = vld [vmem:[%s22523_s2 + $0x70] sm:$0xf]  ;;  %s442_s24 = scalar_select %p441_p13, %s15040_s13, 1  ;;  %v620_v28 = vld [vmem:[%s22523_s2 + $0x68] sm:$0xf]  ;;  %v614_v31 = vld [vmem:[%s22523_s2 + $0x38] sm:$0xff] }
  0x2a   : > { %709 = vmatpush1.msra.mxu0 %v607_v22  ;;  %742 = vmatprep.mubr.f32.mxu0 %v22619_v26  ;;  %v622_v29 = vld [vmem:[%s22523_s2 + $0x78] sm:$0xf]  ;;  %v612_v30 = vld [vmem:[%s22523_s2 + $0x28] sm:$0xff]  ;;  %v611_v33 = vld [vmem:[%s22523_s2 + $0x20] sm:$0xff]  ;;  %v15329_v62 = vshrl.u32 %v454_v61, 7  ;;  %v22703_v14 = vmov 0 }
  0x2b   : > { %822 = vmatpush1.msra.mxu1 %v609_v23  ;;  %855 = vmatprep.mubr.f32.mxu1 %v22619_v26  ;;  %s12089_s25 = sshll.u32 %s442_s24, 6  ;;  %v613_v34 = vld [vmem:[%s22523_s2 + $0x30] sm:$0xff]  ;;  %v624_v35 = vld [vmem:[%s22523_s2 + $0x88] sm:$0xf]  ;;  %v615_v42 = vld [vmem:[%s22523_s2 + $0x40] sm:$0xff]  ;;  %v22707_v21 = vmov 0 }
  0x2c   : > { %11351 = vmatprep.subr.msk.mxu0 %vm650_vm0, %v621_v24  ;;  %11361 = vmatprep.subr.msk.mxu1 %vm650_vm0, %v623_v25  ;;  %s15137_s28 = scalar_lea.vmem %s22521_s0, %s12089_s25  ;;  %v1506_v43 = vld [vmem:[%s22524_s3 + $0xe0] sm:$0xff]  ;;  %v1508_v44 = vld [vmem:[%s22524_s3 + $0xf0] sm:$0xff]  ;;  %v1505_v45 = vld [vmem:[%s22524_s3 + $0xd8] sm:$0xff]  ;;  %22702 = vst [vmem:[#allocation6_spill] sm:$0xff] %v15329_v62  ;;  %v15332_v63 = vadd.s32 16, %v15329_v62  ;;  %v15335_v0 = vadd.s32 8, %v15329_v62 }
  0x2d   : > { %v15140_v27 = vld [vmem:[%s15137_s28] sm:$0xff]  ;;  %v15161_v32 = vld [vmem:[%s15137_s28 + $0x8] sm:$0xff]  ;;  %v15181_v36 = vld [vmem:[%s15137_s28 + $0x10] sm:$0xff]  ;;  %v15338_v1 = vadd.s32 24, %v15329_v62  ;;  %v15347_v6 = vadd.s32 32, %v15329_v62  ;;  %v15358_v13 = vadd.s32 40, %v15329_v62 }
  0x2e   : > { %11333 = vmatmul.mubr.msk.f32.vlgmr.msra.gmra.mxu0 %vm625_vm1, %v15140_v27  ;;  %11343 = vmatmul.mubr.msk.f32.vlgmr.msra.gmra.mxu1 %vm625_vm1, %v15140_v27  ;;  %v15191_v37 = vld [vmem:[%s15137_s28 + $0x18] sm:$0xff]  ;;  %v450_v38 = vld [vmem:[%s15137_s28 + $0x20] sm:$0xff]  ;;  %v451_v39 = vld [vmem:[%s15137_s28 + $0x28] sm:$0xff]  ;;  %v22562_v2 = vshra.s32 %v15332_v63, 3  ;;  %v473_v5 = vand.u32 7, %v15332_v63  ;;  %v22565_v7 = vshra.s32 %v15335_v0, 3 }
  0x2f   : > { %748 = vmatprep.mubr.f32.mxu0 %v22619_v26  ;;  %861 = vmatprep.mubr.f32.mxu1 %v22619_v26  ;;  %v452_v40 = vld [vmem:[%s15137_s28 + $0x30] sm:$0xff]  ;;  %v453_v41 = vld [vmem:[%s15137_s28 + $0x38] sm:$0xff]  ;;  %v1507_v46 = vld [vmem:[%s22524_s3 + $0xe8] sm:$0xff]  ;;  %v472_v8 = vand.u32 7, %v15335_v0  ;;  %v22561_v9 = vshra.s32 %v15338_v1, 3  ;;  %v474_v12 = vand.u32 7, %v15338_v1 }
  0x30   : > { %11352 = vmatpush1.msk.msra.mxu0 %vm650_vm0, %v620_v28  ;;  %11362 = vmatpush1.msk.msra.mxu1 %vm650_vm0, %v622_v29  ;;  %v1497_v47 = vld [vmem:[%s22524_s3 + $0x98] sm:$0xff]  ;;  %v1499_v48 = vld [vmem:[%s22524_s3 + $0xa8] sm:$0xff]  ;;  %v1496_v49 = vld [vmem:[%s22524_s3 + $0x90] sm:$0xff]  ;;  %vm15368_vm3 = vcmp.ge.s32.totalorder %v22562_v2, 1  ;;  %v22554_v18 = vshra.s32 %v15347_v6, 3  ;;  %v475_v19 = vand.u32 7, %v15347_v6 }
  0x31   : > { %934 = vmatprep.subr.mxu0 %v612_v30  ;;  %1047 = vmatprep.subr.mxu1 %v614_v31  ;;  %v1498_v50 = vld [vmem:[%s22524_s3 + $0xa0] sm:$0xff]  ;;  %v1488_v51 = vld [vmem:[%s22524_s3 + $0x50] sm:$0xff]  ;;  %v1487_v53 = vld [vmem:[%s22524_s3 + $0x48] sm:$0xff]  ;;  %vm15362_vm2 = vcmp.le.s32.totalorder %v472_v8, 6  ;;  %v15379_v20 = vadd.s32 48, %v15329_v62  ;;  %vm15381_vm4 = vcmp.ge.s32.totalorder %v473_v5, 1 }
  0x32   : > { %11334 = vmatmul.mubr.msk.f32.gmra.mxu0 %vm625_vm1, %v15161_v32  ;;  %11344 = vmatmul.mubr.msk.f32.gmra.mxu1 %vm625_vm1, %v15161_v32  ;;  %v1490_v52 = vld [vmem:[%s22524_s3 + $0x60] sm:$0xff]  ;;  %v1489_v54 = vld [vmem:[%s22524_s3 + $0x58] sm:$0xff]  ;;  %v1479_v55 = vld [vmem:[%s22524_s3 + $0x8] sm:$0xff]  ;;  %v22704_v14 = vsel %vm15362_vm2, 4294967295, %v22703_v14  ;;  %v22708_v21 = vsel %vm15381_vm4, 4294967295, %v22707_v21  ;;  %vm15387_vm5 = vcmp.ge.s32.totalorder %v22565_v7, 1 }
  0x33   : > { %754 = vmatprep.mubr.f32.mxu0 %v22619_v26  ;;  %867 = vmatprep.mubr.f32.mxu1 %v22619_v26  ;;  %v1481_v56 = vld [vmem:[%s22524_s3 + $0x18] sm:$0xff]  ;;  %v1478_v57 = vld [vmem:[%s22524_s3] sm:$0xff]  ;;  %v1480_v58 = vld [vmem:[%s22524_s3 + $0x10] sm:$0xff]  ;;  %vm15391_vm6 = vcmp.le.s32.totalorder %v473_v5, 6  ;;  %v22711_v23 = vmov 0  ;;  %vm15397_vm7 = vcmp.ge.s32.totalorder %v22561_v9, 1 }
  0x34   : > { %935 = vmatpush1.msra.mxu0 %v611_v33  ;;  %1048 = vmatpush1.msra.mxu1 %v613_v34  ;;  %v1510_v59 = vld [vmem:[%s22524_s3 + $0x100] sm:$0xff]  ;;  %v1512_v60 = vld [vmem:[%s22524_s3 + $0x110] sm:$0xff]  ;;  %v22712_v23 = vsel %vm15391_vm6, 4294967295, %v22711_v23  ;;  %v22553_v28 = vshra.s32 %v15358_v13, 3  ;;  %v476_v29 = vand.u32 7, %v15358_v13  ;;  %v15412_v30 = vadd.s32 56, %v15329_v62 }
  0x35   : > { %12999 = vmatprep.subr.msk.mxu0 %vm650_vm0, %v624_v35  ;;  %1563 = vmatprep.subr.mxu1 %v1506_v43  ;;  %vm15414_vm9 = vcmp.ge.s32.totalorder %v474_v12, 1  ;;  %v22716_v31 = vmov 0  ;;  %vm15418_vm10 = vcmp.le.s32.totalorder %v474_v12, 6  ;;  %vm15436_vm13 = vcmp.ge.s32.totalorder %v22554_v18, 1  ;;  %s17264_s28 = sand.u32 1, %s14956_s10   ;;  %s12085_s14 = sshll.u32 %s15040_s13, 4 }
  0x36   : > { %11335 = vmatmul.mubr.msk.f32.gmra.mxu0 %vm625_vm1, %v15181_v36  ;;  %11345 = vmatmul.mubr.msk.f32.gmra.mxu1 %vm625_vm1, %v15181_v36  ;;  %22715 = vst [vmem:[#allocation7_spill] sm:$0xff] %v15412_v30  ;;  %v22717_v31 = vsel %vm15414_vm9, 4294967295, %v22716_v31  ;;  %vm15442_vm14 = vcmp.ge.s32.totalorder %v475_v19, 1  ;;  %vm15446_vm15 = vcmp.le.s32.totalorder %v475_v19, 6  ;;  %vm15464_vm11 = vcmp.ge.s32.totalorder %v22553_v28, 1  ;;  %s11328_s22 = sshll.u32 %s17264_s28, 7  ;;  %s22484_s23 = scalar_lea.hbm %s22530_s9, %s12085_s14 }
  0x37   : > { %760 = vmatprep.mubr.f32.mxu0 %v22619_v26  ;;  %873 = vmatprep.mubr.f32.mxu1 %v22619_v26  ;;  %v22549_v43 = vshra.s32 %v15412_v30, 3  ;;  %vm15474_vm12 = vcmp.le.s32.totalorder %v476_v29, 6  ;;  %v15555_v12 = vsel %vm15387_vm5, 1.0, %v22619_v26  ;;  %v15611_v18 = vsel %vm15397_vm7, 1.0, %v22619_v26  ;;  %s17280_s27 = scalar_lea.vmem [#allocation2], %s11328_s22  ;;  %s440_s16 = scalar_lea.vmem [#allocation3], %s17264_s28 }
  0x38   : > { %22752 = vst [vmem:[#allocation12_spill] sm:$0xff] %v15555_v12  ;;  %22765 = vst [vmem:[#allocation18_spill] sm:$0xff] %v15611_v18  ;;  %v22824_v61 = vshra.s32 %v15347_v6, 3  ;;  %v22839_v5 = vshra.s32 %v15358_v13, 3  ;;  %s11248_s17 = sshll.u32 %s440_s16, 4  ;;  %s11236_s24 = scalar_lea.sflag [#allocation4], %s17264_s28  ;;  %s11249_s17 = int_to_ptr.vmem [resolvable:$true] %s11248_s17 }
  0x39   : > { %s14904_s25 = scalar_lea.vmem %s11249_s17, 16  ;;  %s14968_s13 = smov [#allocation3]  }
  0x3a   : > { %11336 = vmatmul.mubr.msk.f32.gmra.mxu0 %vm625_vm1, %v15191_v37  ;;  %11346 = vmatmul.mubr.msk.f32.gmra.mxu1 %vm625_vm1, %v15191_v37  ;;  %p14905_p0 = scmp.ne.s32.totalorder %s11249_s17, %s14904_s25  ;;  %s14908_s26 = sshll.u32 %s14968_s13, 4  ;;  %s14909_s26 = int_to_ptr.vmem [resolvable:$false] %s14908_s26 }
  0x3b   : > { %766 = vmatprep.mubr.f32.mxu0 %v22619_v26  ;;  %879 = vmatprep.mubr.f32.mxu1 %v22619_v26  ;;  %p14911_p3 = scmp.lt.s32.totalorder %s11249_s17, %s14909_s26 }
  0x3c   : > { %p14906_p1 = pnand %p14905_p0, %p15058_p6 }
  0x3e   : > { %11337 = vmatmul.mubr.msk.f32.gmra.mxu0 %vm625_vm1, %v450_v38  ;;  %11347 = vmatmul.mubr.msk.f32.gmra.mxu1 %vm625_vm1, %v450_v38  ;;  %p14907_p2 = pneg %p14906_p1 }
  0x3f   : > { %772 = vmatprep.mubr.f32.mxu0 %v22619_v26  ;;  %885 = vmatprep.mubr.f32.mxu1 %v22619_v26 }
  0x42   : > { %11338 = vmatmul.mubr.msk.f32.gmra.mxu0 %vm625_vm1, %v451_v39  ;;  %11348 = vmatmul.mubr.msk.f32.gmra.mxu1 %vm625_vm1, %v451_v39 }
  0x43   : > { %778 = vmatprep.mubr.f32.mxu0 %v22619_v26  ;;  %891 = vmatprep.mubr.f32.mxu1 %v22619_v26 }
  0x46   : > { %11339 = vmatmul.mubr.msk.f32.gmra.mxu0 %vm625_vm1, %v452_v40  ;;  %11349 = vmatmul.mubr.msk.f32.gmra.mxu1 %vm625_vm1, %v452_v40 }
  0x47   : > { %784 = vmatprep.mubr.f32.mxu0 %v22619_v26  ;;  %897 = vmatprep.mubr.f32.mxu1 %v22619_v26 }
  0x4a   : > { %11340 = vmatmul.mubr.msk.f32.gmra.mxu0 %vm625_vm1, %v453_v41  ;;  %11350 = vmatmul.mubr.msk.f32.gmra.mxu1 %vm625_vm1, %v453_v41 }
  0x4b   : > { %968 = vmatprep.mubr.f32.mxu0 %v22619_v26  ;;  %1081 = vmatprep.mubr.f32.mxu1 %v22619_v26 }
  0x4e   : > { %11353 = vmatmul.mubr.msk.f32.vlgmr.msra.gmra.mxu0 %vm625_vm1, %v15140_v27  ;;  %11363 = vmatmul.mubr.msk.f32.vlgmr.msra.gmra.mxu1 %vm625_vm1, %v15140_v27 }
  0x4f   : > { %974 = vmatprep.mubr.f32.mxu0 %v22619_v26  ;;  %1087 = vmatprep.mubr.f32.mxu1 %v22619_v26 }
  0x50   : > { %13000 = vmatpush3.msk.msra.mxu0 %vm650_vm0, %v624_v35  ;;  %1564 = vmatpush1.msra.mxu1 %v1505_v45  ;;  %v22720_v35 = vmov 0  ;;  %vm15470_vm0 = vcmp.ge.s32.totalorder %v476_v29, 1  ;;  %v22728_v45 = vmov 0 }
  0x51   : > { %13001 = vmatprep.subr.mxu0 %v615_v42  ;;  %1565 = vmatprep.subr.mxu1 %v1497_v47  ;;  %v22721_v35 = vsel %vm15436_vm13, 4294967295, %v22720_v35  ;;  %v22729_v45 = vsel %vm15470_vm0, 4294967295, %v22728_v45  ;;  %vm15520_vm13 = vcmp.ge.s32.totalorder %v22549_v43, 1  ;;  %vm22753_vm0 = vmand %vm15387_vm5, %vm15362_vm2 }
  0x52   : > { %11354 = vmatmul.mubr.msk.f32.gmra.mxu0 %vm625_vm1, %v15161_v32  ;;  %11364 = vmatmul.mubr.msk.f32.gmra.mxu1 %vm625_vm1, %v15161_v32  ;;  %v15563_v19 = vsel %vm22753_vm0, 1.0, %v22619_v26  ;;  %vm22758_vm0 = vmand %vm15368_vm3, %vm15391_vm6 }
  0x53   : > { %980 = vmatprep.mubr.f32.mxu0 %v22619_v26  ;;  %1093 = vmatprep.mubr.f32.mxu1 %v22619_v26  ;;  %22754 = vst [vmem:[#allocation13_spill] sm:$0xff] %v15563_v19 }
  0x54   : > { %13002 = vmatpush3.msra.mxu0 %v615_v42  ;;  %1566 = vmatpush1.msra.mxu1 %v1496_v49  ;;  %v22726_v42 = vmov 0  ;;  %v22811_v49 = vshra.s32 %v15338_v1, 3 }
  0x55   : > { %1676 = vmatprep.subr.mxu0 %v1508_v44  ;;  %1567 = vmatprep.subr.mxu1 %v1488_v51  ;;  %v22727_v42 = vsel %vm15464_vm11, 4294967295, %v22726_v42  ;;  %v478_v44 = vand.u32 7, %v15412_v30  ;;  %v471_v51 = vand.u32 7, %v15329_v62 }
  0x56   : > { %11355 = vmatmul.mubr.msk.f32.gmra.mxu0 %vm625_vm1, %v15181_v36  ;;  %11365 = vmatmul.mubr.msk.f32.gmra.mxu1 %vm625_vm1, %v15181_v36 }
  0x57   : > { %986 = vmatprep.mubr.f32.mxu0 %v22619_v26  ;;  %1099 = vmatprep.mubr.f32.mxu1 %v22619_v26  ;;  %vm15528_vm8 = vcmp.le.s32.totalorder %v478_v44, 6  ;;  %vm15548_vm11 = vcmp.ge.s32.totalorder %v471_v51, 1  ;;  %vm15596_vm2 = vcmp.le.s32.totalorder %v471_v51, 6 }
  0x58   : > { %1568 = vmatpush1.msra.mxu1 %v1487_v53  ;;  %v22737_v53 = vmov 0  ;;  %v15807_v22 = vsel %vm15548_vm11, 1.0, %v22619_v26 }
  0x59   : > { %1569 = vmatprep.subr.mxu1 %v1479_v55  ;;  %22827 = vst [vmem:[#allocation42_spill] sm:$0xff] %v15807_v22 }
  0x5a   : > { %11356 = vmatmul.mubr.msk.f32.gmra.mxu0 %vm625_vm1, %v15191_v37  ;;  %11366 = vmatmul.mubr.msk.f32.gmra.mxu1 %vm625_vm1, %v15191_v37 }
  0x5b   : > { %992 = vmatprep.mubr.f32.mxu0 %v22619_v26  ;;  %1105 = vmatprep.mubr.f32.mxu1 %v22619_v26 }
  0x5c   : > { %1570 = vmatpush1.msra.mxu1 %v1478_v57  ;;  %v22742_v57 = vmov 0 }
  0x5d   : > { %1789 = vmatprep.subr.mxu1 %v1510_v59 }
  0x5e   : > { %11357 = vmatmul.mubr.msk.f32.gmra.mxu0 %vm625_vm1, %v450_v38  ;;  %11367 = vmatmul.mubr.msk.f32.gmra.mxu1 %vm625_vm1, %v450_v38 }
  0x5f   : > { %998 = vmatprep.mubr.f32.mxu0 %v22619_v26  ;;  %1111 = vmatprep.mubr.f32.mxu1 %v22619_v26 }
  0x62   : > { %11358 = vmatmul.mubr.msk.f32.gmra.mxu0 %vm625_vm1, %v451_v39  ;;  %11368 = vmatmul.mubr.msk.f32.gmra.mxu1 %vm625_vm1, %v451_v39 }
  0x63   : > { %1004 = vmatprep.mubr.f32.mxu0 %v22619_v26  ;;  %1117 = vmatprep.mubr.f32.mxu1 %v22619_v26 }
  0x66   : > { %11359 = vmatmul.mubr.msk.f32.gmra.mxu0 %vm625_vm1, %v452_v40  ;;  %11369 = vmatmul.mubr.msk.f32.gmra.mxu1 %vm625_vm1, %v452_v40 }
  0x67   : > { %1010 = vmatprep.mubr.f32.mxu0 %v22619_v26  ;;  %1123 = vmatprep.mubr.f32.mxu1 %v22619_v26 }
  0x6a   : > { %11360 = vmatmul.mubr.msk.f32.gmra.mxu0 %vm625_vm1, %v453_v41  ;;  %11370 = vmatmul.mubr.msk.f32.gmra.mxu1 %vm625_vm1, %v453_v41 }
  0x6b   : > { %13003 = vmatprep.mubr.msk.f32.mxu0 %vm625_vm1, %v15140_v27  ;;  %1603 = vmatprep.mubr.f32.mxu1 %v22619_v26 }
  0x6e   : > { %13004 = vmatmul.mubr.msk.f32.vlgmr.msra.gmra.mxu0 %vm625_vm1, %v15161_v32  ;;  %v22718_v32 = vmov 0 }
  0x6f   : > { %13006 = vmatprep.mubr.msk.f32.mxu0 %vm625_vm1, %v15181_v36  ;;  %1677 = vmatpush1.msra.mxu0 %v1507_v46  ;;  %v22719_v32 = vsel %vm15418_vm10, 4294967295, %v22718_v32  ;;  %v22552_v36 = vshra.s32 %v15379_v20, 3  ;;  %v22730_v46 = vmov 0  ;;  %vm15524_vm10 = vcmp.ge.s32.totalorder %v478_v44, 1 }
  0x70   : > { %1678 = vmatprep.subr.mxu0 %v1499_v48  ;;  %v22731_v46 = vsel %vm15474_vm12, 4294967295, %v22730_v46  ;;  %v22743_v57 = vsel %vm15524_vm10, 4294967295, %v22742_v57  ;;  %vm22769_vm10 = vnez %v22721_v35  ;;  %v22790_v35 = vshra.s32 %v15335_v0, 3 }
  0x71   : > { %1679 = vmatpush1.msra.mxu0 %v1498_v50  ;;  %22732 = vst [vmem:[#allocation8_spill] sm:$0xff] %v22731_v46  ;;  %vm15492_vm9 = vcmp.ge.s32.totalorder %v22552_v36, 1  ;;  %v463_v50 = vshra.s32 %v15329_v62, 3  ;;  %22744 = vst [vmem:[#allocation10_spill] sm:$0xff] %v22743_v57  ;;  %v22761_v36 = vmov 0  ;;  %v15624_v15 = vsel %vm22769_vm10, 1.0, %v22619_v26 }
  0x72   : > { %13007 = vmatmul.mubr.msk.f32.gmra.mxu0 %vm625_vm1, %v15191_v37  ;;  %1680 = vmatprep.subr.mxu0 %v1490_v52  ;;  %v477_v37 = vand.u32 7, %v15379_v20  ;;  %v22735_v52 = vmov 0  ;;  %v22762_v36 = vsel %vm15596_vm2, 4294967295, %v22761_v36  ;;  %22770 = vst [vmem:[#allocation20_spill] sm:$0xff] %v15624_v15 }
  0x73   : > { %13009 = vmatprep.mubr.msk.f32.mxu0 %vm625_vm1, %v450_v38  ;;  %1681 = vmatpush1.msra.mxu0 %v1489_v54  ;;  %v22722_v38 = vmov 0  ;;  %vm15544_vm12 = vcmp.ge.s32.totalorder %v463_v50, 1 }
  0x74   : > { %1682 = vmatprep.subr.mxu0 %v1481_v56  ;;  %v22723_v38 = vsel %vm15442_vm14, 4294967295, %v22722_v38  ;;  %vm15502_vm14 = vcmp.le.s32.totalorder %v477_v37, 6 }
  0x75   : > { %1683 = vmatpush1.msra.mxu0 %v1480_v58  ;;  %v22738_v53 = vsel %vm15502_vm14, 4294967295, %v22737_v53  ;;  %v22745_v58 = vmov 0 }
  0x76   : > { %13010 = vmatmul.mubr.msk.f32.gmra.mxu0 %vm625_vm1, %v451_v39  ;;  %1902 = vmatprep.subr.mxu0 %v1512_v60  ;;  %v22724_v39 = vmov 0  ;;  %22739 = vst [vmem:[#allocation9_spill] sm:$0xff] %v22738_v53  ;;  %v22746_v58 = vsel %vm15528_vm8, 4294967295, %v22745_v58  ;;  %vm22777_vm8 = vnez %v22727_v42  ;;  %v15717_v42 = vsel %vm15520_vm13, 1.0, %v22619_v26 }
  0x77   : > { %13012 = vmatprep.mubr.msk.f32.mxu0 %vm625_vm1, %v452_v40  ;;  %v22725_v39 = vsel %vm15446_vm15, 4294967295, %v22724_v39  ;;  %22747 = vst [vmem:[#allocation11_spill] sm:$0xff] %v22746_v58  ;;  %vm15567_vm15 = vcmp.ge.s32.totalorder %v472_v8, 1  ;;  %v15586_v8 = vsel %vm22758_vm0, 1.0, %v22619_v26  ;;  %vm22763_vm0 = vmand %vm15368_vm3, %vm15381_vm4  ;;  %v15649_v7 = vsel %vm22777_vm8, 1.0, %v22619_v26 }
  0x78   : > { %22759 = vst [vmem:[#allocation15_spill] sm:$0xff] %v15586_v8  ;;  %v15606_v28 = vsel %vm22763_vm0, 1.0, %v22619_v26  ;;  %vm22771_vm0 = vnez %v22717_v31  ;;  %22778 = vst [vmem:[#allocation23_spill] sm:$0xff] %v15649_v7 }
  0x79   : > { %22764 = vst [vmem:[#allocation17_spill] sm:$0xff] %v15606_v28  ;;  %vm22772_vm4 = vmand %vm15397_vm7, %vm22771_vm0 }
  0x7a   : > { %13013 = vmatmul.mubr.msk.f32.gmra.mxu0 %vm625_vm1, %v453_v41  ;;  %vm15498_vm1 = vcmp.ge.s32.totalorder %v477_v37, 1  ;;  %v15578_v37 = vsel %vm15368_vm3, 1.0, %v22619_v26  ;;  %v15636_v9 = vsel %vm22772_vm4, 1.0, %v22619_v26  ;;  %22800 = vst [vmem:[#allocation33_spill] sm:$0xff] %v15717_v42 }
  0x7b   : > { %1716 = vmatprep.mubr.f32.mxu0 %v22619_v26  ;;  %v22736_v52 = vsel %vm15498_vm1, 4294967295, %v22735_v52  ;;  %22757 = vst [vmem:[#allocation14_spill] sm:$0xff] %v15578_v37  ;;  %vm22766_vm1 = vnez %v22719_v32  ;;  %22773 = vst [vmem:[#allocation21_spill] sm:$0xff] %v15636_v9 }
  0x7c   : > { %vm22767_vm6 = vmand %vm15397_vm7, %vm22766_vm1  ;;  %vm15659_vm7 = vcmp.le.s32.totalorder %v463_v50, 6  ;;  %v15682_v50 = vsel %vm15492_vm9, 1.0, %v22619_v26 }
  0x7d   : > { %v15619_v51 = vsel %vm22767_vm6, 1.0, %v22619_v26  ;;  %vm22774_vm6 = vnez %v22725_v39  ;;  %22789 = vst [vmem:[#allocation28_spill] sm:$0xff] %v15682_v50  ;;  %v15843_v22 = vsel %vm15659_vm7, 1.0, %v22619_v26 }
  0x7e   : > { %22768 = vst [vmem:[#allocation19_spill] sm:$0xff] %v15619_v51  ;;  %vm22775_vm1 = vmand %vm22769_vm10, %vm22774_vm6  ;;  %vm22786_vm6 = vnez %v22731_v46 }
  0x7f   : > { %v15644_v2 = vsel %vm22775_vm1, 1.0, %v22619_v26  ;;  %vm22783_vm1 = vnez %v22723_v38  ;;  %vm22787_vm0 = vmand %vm22777_vm8, %vm22786_vm6  ;;  %22836 = vst [vmem:[#allocation49_spill] sm:$0xff] %v15843_v22 }
  0x80   : > { %22776 = vst [vmem:[#allocation22_spill] sm:$0xff] %v15644_v2  ;;  %vm22784_vm3 = vmand %vm22769_vm10, %vm22783_vm1  ;;  %v15876_v13 = vsel %vm22783_vm1, 1.0, %v22619_v26 }
  0x81   : > { %v15669_v2 = vsel %vm22784_vm3, 1.0, %v22619_v26  ;;  %vm15690_vm3 = vcmp.le.s32.totalorder %v22790_v35, 6  ;;  %vm22798_vm10 = vmand %vm15492_vm9, %vm15502_vm14  ;;  %v22801_v35 = vshra.s32 %v15332_v63, 3  ;;  %v15744_v63 = vsel %vm15544_vm12, 1.0, %v22619_v26  ;;  %22847 = vst [vmem:[#allocation55_spill] sm:$0xff] %v15876_v13 }
  0x82   : > { %22785 = vst [vmem:[#allocation26_spill] sm:$0xff] %v15669_v2  ;;  %v15712_v0 = vsel %vm22798_vm10, 1.0, %v22619_v26  ;;  %vm22807_vm10 = vnez %v22746_v58  ;;  %22810 = vst [vmem:[#allocation36_spill] sm:$0xff] %v15744_v63  ;;  %v22853_v63 = vshra.s32 %v15379_v20, 3 }
  0x83   : > { %22799 = vst [vmem:[#allocation32_spill] sm:$0xff] %v15712_v0  ;;  %vm22808_vm14 = vmand %vm15520_vm13, %vm22807_vm10 }
  0x84   : > { %v15739_v0 = vsel %vm22808_vm14, 1.0, %v22619_v26  ;;  %vm22814_vm14 = vnez %v22743_v57 }
  0x85   : > { %22809 = vst [vmem:[#allocation35_spill] sm:$0xff] %v15739_v0  ;;  %vm22815_vm10 = vmand %vm15520_vm13, %vm22814_vm14 }
  0x86   : > { %v15762_v0 = vsel %vm22815_vm10, 1.0, %v22619_v26  ;;  %vm22820_vm13 = vmand %vm15544_vm12, %vm15596_vm2 }
  0x87   : > { %22816 = vst [vmem:[#allocation37_spill] sm:$0xff] %v15762_v0  ;;  %v15784_v56 = vsel %vm22820_vm13, 1.0, %v22619_v26  ;;  %vm22822_vm10 = vmand %vm15387_vm5, %vm15567_vm15  ;;  %vm22830_vm5 = vnez %v22708_v21  ;;  %vm22837_vm13 = vnez %v22717_v31 }
  0x88   : > { %22821 = vst [vmem:[#allocation40_spill] sm:$0xff] %v15784_v56  ;;  %v15817_v56 = vsel %vm15596_vm2, 1.0, %v22619_v26  ;;  %v15822_v6 = vsel %vm22830_vm5, 1.0, %v22619_v26  ;;  %vm22862_vm2 = vnez %v22736_v52 }
  0x89   : > { %22829 = vst [vmem:[#allocation44_spill] sm:$0xff] %v15817_v56  ;;  %22831 = vst [vmem:[#allocation45_spill] sm:$0xff] %v15822_v6 }
  0xee   : > { %v15341_v3 = vpop.f32.mrf.mxu0  ;;  %v15343_v4 = vpop.f32.mrf.mxu1 }
  0xef   : > { %v1235_v38 = vrot.slane %v15341_v3, 7 }
  0xf0   : > { %v15352_v10 = vpop.f32.mrf.mxu0  ;;  %v15354_v11 = vpop.f32.mrf.mxu1 }
  0xf1   : > { %v22894_v7 = vrot.slane %v15354_v11, 7 }
  0xf2   : > { %v15372_v16 = vpop.f32.mrf.mxu0  ;;  %v15374_v17 = vpop.f32.mrf.mxu1 }
  0xf4   : > { %v15405_v25 = vpop.f32.mrf.mxu0  ;;  %v15407_v27 = vpop.f32.mrf.mxu1 }
  0xf5   : > { %v1318_v57 = vrot.slane %v15407_v27, 7 }
  0xf6   : > { %v15430_v33 = vpop.f32.mrf.mxu0  ;;  %v15432_v34 = vpop.f32.mrf.mxu1 }
  0xf8   : > { %v15458_v40 = vpop.f32.mrf.mxu0  ;;  %v15460_v41 = vpop.f32.mrf.mxu1 }
  0xfa   : > { %v15482_v47 = vpop.f32.mrf.mxu0  ;;  %v15484_v48 = vpop.f32.mrf.mxu1 }
  0xfc   : > { %v15510_v54 = vpop.f32.mrf.mxu0  ;;  %v15512_v55 = vpop.f32.mrf.mxu1 }
  0xfe   : > { %v15536_v59 = vpop.f32.mrf.mxu0  ;;  %v15538_v60 = vpop.f32.mrf.mxu1 }
 0x100   : > { %v15588_v44 = vpop.f32.mrf.mxu0  ;;  %v15590_v43 = vpop.f32.mrf.mxu1 }
 0x101   : > { %22760 = vst [vmem:[#allocation16_spill] sm:$0xff] %v15588_v44  ;;  %v22781_v44 = vmov 0 }
 0x102   : > { %v15651_v30 = vpop.f32.mrf.mxu0  ;;  %v15653_v24 = vpop.f32.mrf.mxu1  ;;  %v22782_v44 = vsel %vm15659_vm7, 4294967295, %v22781_v44 }
 0x103   : > { %22779 = vst [vmem:[#allocation24_spill] sm:$0xff] %v15651_v30  ;;  %22780 = vst [vmem:[#allocation25_spill] sm:$0xff] %v15653_v24  ;;  %v15677_v30 = vsel %vm22787_vm0, 1.0, %v22619_v26  ;;  %vm22793_vm0 = vnez %v22729_v45 }
 0x104   : > { %22788 = vst [vmem:[#allocation27_spill] sm:$0xff] %v15677_v30  ;;  %vm22794_vm4 = vmand %vm22777_vm8, %vm22793_vm0  ;;  %v15702_v50 = vpop.f32.mrf.mxu0  ;;  %v15704_v24 = vpop.f32.mrf.mxu1  ;;  %vm15721_vm8 = vcmp.le.s32.totalorder %v22801_v35, 6  ;;  %vm15800_vm0 = vcmp.le.s32.totalorder %v22824_v61, 6 }
 0x105   : > { %v15700_v30 = vsel %vm22794_vm4, 1.0, %v22619_v26  ;;  %22796 = vst [vmem:[#allocation30_spill] sm:$0xff] %v15702_v50  ;;  %22797 = vst [vmem:[#allocation31_spill] sm:$0xff] %v15704_v24  ;;  %vm22804_vm4 = vnez %v22736_v52  ;;  %v15848_v24 = vsel %vm22837_vm13, 1.0, %v22619_v26  ;;  %v22891_v52 = vrot.slane %v15343_v4, 1 }
 0x106   : > { %22795 = vst [vmem:[#allocation29_spill] sm:$0xff] %v15700_v30  ;;  %vm22805_vm6 = vmand %vm15492_vm9, %vm22804_vm4  ;;  %v15766_v42 = vpop.f32.mrf.mxu0  ;;  %vm22851_vm4 = vnez %v22729_v45 }
 0x107   : > { %v15731_v50 = vsel %vm22805_vm6, 1.0, %v22619_v26  ;;  %vm15752_vm6 = vcmp.le.s32.totalorder %v22811_v49, 6  ;;  %vm22818_vm9 = vmand %vm15544_vm12, %vm15548_vm11  ;;  %v15792_v49 = vsel %vm22822_vm10, 1.0, %v22619_v26  ;;  %22838 = vst [vmem:[#allocation50_spill] sm:$0xff] %v15848_v24  ;;  %vm22848_vm10 = vnez %v22712_v23 }
 0x108   : > { %22806 = vst [vmem:[#allocation34_spill] sm:$0xff] %v15731_v50  ;;  %v15768_v50 = vpop.f32.mrf.mxu1  ;;  %v15776_v1 = vsel %vm22818_vm9, 1.0, %v22619_v26  ;;  %22823 = vst [vmem:[#allocation41_spill] sm:$0xff] %v15792_v49  ;;  %v15828_v61 = vpop.f32.mrf.mxu0  ;;  %v15906_v13 = vsel %vm22851_vm4, 1.0, %v22619_v26  ;;  %v22854_v24 = vmov 0  ;;  %v15952_v31 = vsel %vm15752_vm6, 1.0, %v22619_v26 }
 0x109   : > { %22817 = vst [vmem:[#allocation38_spill] sm:$0xff] %v15768_v50  ;;  %22819 = vst [vmem:[#allocation39_spill] sm:$0xff] %v15776_v1  ;;  %v15812_v50 = vsel %vm15567_vm15, 1.0, %v22619_v26  ;;  %v1320_v23 = vrot.slane %v15512_v55, 7 }
 0x10a   : > { %vm568_vm9 = vmand %vm15690_vm3, %vm15567_vm15  ;;  %22828 = vst [vmem:[#allocation43_spill] sm:$0xff] %v15812_v50  ;;  %v15830_v29 = vpop.f32.mrf.mxu1 }
 0x10b   : > { %vm569_vm12 = vmand %vm15721_vm8, %vm22830_vm5  ;;  %22832 = vst [vmem:[#allocation46_spill] sm:$0xff] %v15828_v61  ;;  %v22840_v61 = vmov 0  ;;  %vm22858_vm5 = vnez %v22719_v32 }
 0x10c   : > { %22833 = vst [vmem:[#allocation47_spill] sm:$0xff] %v15830_v29  ;;  %vm22834_vm15 = vmand %vm15659_vm7, %vm15548_vm11  ;;  %vm15856_vm11 = vcmp.le.s32.totalorder %v22839_v5, 6  ;;  %v15871_v29 = vsel %vm15690_vm3, 1.0, %v22619_v26  ;;  %v15882_v5 = vpop.f32.mrf.mxu0  ;;  %v15922_v21 = vsel %vm22858_vm5, 1.0, %v22619_v26 }
 0x10d   : > { %v15838_v56 = vsel %vm22834_vm15, 1.0, %v22619_v26  ;;  %v22841_v61 = vsel %vm15856_vm11, 4294967295, %v22840_v61  ;;  %vm22843_vm15 = vnez %v22704_v14  ;;  %22846 = vst [vmem:[#allocation54_spill] sm:$0xff] %v15871_v29  ;;  %v15893_v29 = vsel %vm22848_vm10, 1.0, %v22619_v26  ;;  %22852 = vst [vmem:[#allocation58_spill] sm:$0xff] %v15906_v13 }
 0x10e   : > { %22835 = vst [vmem:[#allocation48_spill] sm:$0xff] %v15838_v56  ;;  %22842 = vst [vmem:[#allocation51_spill] sm:$0xff] %v22841_v61  ;;  %v15863_v22 = vsel %vm22843_vm15, 1.0, %v22619_v26  ;;  %v15866_v56 = vsel %vm568_vm9, 1.0, %v22619_v26  ;;  %vm15910_vm9 = vcmp.le.s32.totalorder %v22853_v63, 6  ;;  %v15935_v63 = vsel %vm22862_vm2, 1.0, %v22619_v26 }
 0x10f   : > { %22844 = vst [vmem:[#allocation52_spill] sm:$0xff] %v15863_v22  ;;  %22845 = vst [vmem:[#allocation53_spill] sm:$0xff] %v15866_v56  ;;  %v15884_v22 = vpop.f32.mrf.mxu1  ;;  %v15901_v56 = vsel %vm569_vm12, 1.0, %v22619_v26  ;;  %v22855_v24 = vsel %vm15910_vm9, 4294967295, %v22854_v24  ;;  %v1236_v13 = vrot.slane %v15372_v16, 7  ;;  %v1242_v27 = vrot.slane %v15882_v5, 7 }
 0x110   : > { %22849 = vst [vmem:[#allocation56_spill] sm:$0xff] %v15893_v29  ;;  %22850 = vst [vmem:[#allocation57_spill] sm:$0xff] %v15901_v56  ;;  %v15917_v29 = vsel %vm15721_vm8, 1.0, %v22619_v26  ;;  %v15970_v56 = vsel %vm22814_vm14, 1.0, %v22619_v26  ;;  %vm22877_vm14 = vnez %v22738_v53  ;;  %v22896_v61 = vrot.slane %v15766_v42, 7 }
 0x111   : > { %22856 = vst [vmem:[#allocation59_spill] sm:$0xff] %v22855_v24  ;;  %22857 = vst [vmem:[#allocation60_spill] sm:$0xff] %v15917_v29  ;;  %v15941_v29 = vpop.f32.mrf.mxu0  ;;  %v16015_v45 = vsel %vm22877_vm14, 1.0, %v22619_v26  ;;  %vm22885_vm14 = vnez %v22782_v44  ;;  %v1286_v44 = vrot.slane %v15432_v34, 1  ;;  %v1287_v34 = vrot.slane %v15484_v48, 1 }
 0x112   : > { %22859 = vst [vmem:[#allocation61_spill] sm:$0xff] %v15922_v21  ;;  %vm22860_vm12 = vmand %vm15752_vm6, %vm22837_vm13  ;;  %v15943_v21 = vpop.f32.mrf.mxu1  ;;  %v16100_v48 = vmul.f32 %v15405_v25, %v15578_v37 }
 0x113   : > { %v15930_v20 = vsel %vm22860_vm12, 1.0, %v22619_v26  ;;  %22863 = vst [vmem:[#allocation63_spill] sm:$0xff] %v15935_v63  ;;  %22864 = vst [vmem:[#allocation64_spill] sm:$0xff] %v15943_v21  ;;  %vm22866_vm12 = vnez %v22725_v39  ;;  %v1285_v21 = vrot.slane %v15374_v17, 1 }
 0x114   : > { %22861 = vst [vmem:[#allocation62_spill] sm:$0xff] %v15930_v20  ;;  %22865 = vst [vmem:[#allocation65_spill] sm:$0xff] %v15952_v31  ;;  %v15957_v20 = vsel %vm22866_vm12, 1.0, %v22619_v26  ;;  %v15986_v31 = vpop.f32.mrf.mxu1 }
 0x115   : > { %22867 = vst [vmem:[#allocation66_spill] sm:$0xff] %v15957_v20  ;;  %vm22868_vm7 = vmand %vm15800_vm0, %vm22783_vm1  ;;  %v15978_v20 = vsel %vm15800_vm0, 1.0, %v22619_v26  ;;  %vm22872_vm1 = vnez %v22731_v46  ;;  %v16010_v46 = vsel %vm15856_vm11, 1.0, %v22619_v26 }
 0x116   : > { %v15965_v63 = vsel %vm22868_vm7, 1.0, %v22619_v26  ;;  %22870 = vst [vmem:[#allocation68_spill] sm:$0xff] %v15978_v20  ;;  %22871 = vst [vmem:[#allocation69_spill] sm:$0xff] %v15986_v31  ;;  %v15991_v16 = vsel %vm22872_vm1, 1.0, %v22619_v26  ;;  %v16019_v3 = vpop.f32.mrf.mxu1 }
 0x117   : > { %22869 = vst [vmem:[#allocation67_spill] sm:$0xff] %v15965_v63  ;;  %v970_v63 = vpop.f32.mrf.mxu0  ;;  %22873 = vst [vmem:[#allocation70_spill] sm:$0xff] %v15991_v16 }
 0x118   : > { %vm22874_vm13 = vmand %vm15856_vm11, %vm22851_vm4  ;;  %22876 = vst [vmem:[#allocation72_spill] sm:$0xff] %v16010_v46  ;;  %vm22886_vm11 = vnez %v22762_v36  ;;  %v22898_v46 = vmov 0.0  }
 0x119   : > { %v15999_v17 = vsel %vm22874_vm13, 1.0, %v22619_v26  ;;  %22878 = vst [vmem:[#allocation73_spill] sm:$0xff] %v16015_v45  ;;  %22880 = vst [vmem:[#allocation75_spill] sm:$0xff] %v16019_v3  ;;  %vm22881_vm13 = vnez %v22746_v58  ;;  %v1238_v45 = vrot.slane %v15482_v47, 7  ;;  %v1269_v47 = vmul.f32 %v15352_v10, %v15555_v12 }
 0x11a   : > { %22875 = vst [vmem:[#allocation71_spill] sm:$0xff] %v15999_v17  ;;  %v16017_v17 = vpop.f32.mrf.mxu0  ;;  %v16028_v5 = vsel %vm22881_vm13, 1.0, %v22619_v26  ;;  %vm22883_vm7 = vmand %vm15910_vm9, %vm22862_vm2  ;;  %vm22892_vm2 = vcmp.lt.s32.totalorder %v15329_v62, 7 }
 0x11b   : > { %22879 = vst [vmem:[#allocation74_spill] sm:$0xff] %v16017_v17  ;;  %22882 = vst [vmem:[#allocation76_spill] sm:$0xff] %v16028_v5  ;;  %v16036_v53 = vsel %vm22883_vm7, 1.0, %v22619_v26  ;;  %v16073_v5 = vpop.f32.mrf.mxu1 }
 0x11c   : > { %22884 = vst [vmem:[#allocation77_spill] sm:$0xff] %v16036_v53  ;;  %vm22887_vm1 = vmand %vm22885_vm14, %vm22886_vm11  ;;  %v1299_v53 = vsel %vm22892_vm2, %v22891_v52, %v1285_v21  ;;  %vm22893_vm14 = vcmp.lt.s32.totalorder %v15329_v62, 1  ;;  %v1319_v52 = vrot.slane %v15460_v41, 7  ;;  %v976_v36 = vpop.f32.mrf.mxu0 }
 0x11d   : > { %v16044_v3 = vsel %vm22887_vm1, 1.0, %v22619_v26  ;;  %vm22889_vm4 = vmand %vm15690_vm3, %vm22843_vm15  ;;  %v1250_v24 = vsel %vm22893_vm14, %v1235_v38, %v1236_v13  ;;  %v16116_v10 = vmul.f32 %v1299_v53, %v15563_v19  ;;  %v22925_v19 = vld [vmem:[#allocation29_spill] sm:$0xff] }
 0x11e   : > { %22888 = vst [vmem:[#allocation78_spill] sm:$0xff] %v16044_v3  ;;  %v16052_v58 = vsel %vm22889_vm4, 1.0, %v22619_v26  ;;  %vm595_vm11 = vmand %vm15800_vm0, %vm22866_vm12  ;;  %v1237_v26 = vrot.slane %v15430_v33, 7  ;;  %v16103_v30 = vpop.f32.mrf.mxu0  ;;  %v1254_v35 = vmul.f32 %v1250_v24, %v15606_v28 }
 0x11f   : > { %22890 = vst [vmem:[#allocation79_spill] sm:$0xff] %v16052_v58  ;;  %vm22895_vm3 = vmmov %vm22893_vm14  ;;  %v16113_v32 = vsel %vm595_vm11, 1.0, %v22898_v46 }
 0x120   : > { %v1331_v14 = vsel %vm22895_vm3, %v22894_v7, %v1318_v57  ;;  %vm22897_vm15 = vmmov %vm22895_vm3  ;;  %22903 = vst [vmem:[#allocation82_spill] sm:$0xff] %v16113_v32  ;;  %v982_v37 = vpop.f32.mrf.mxu0  ;;  %v22928_v32 = vld [vmem:[#allocation30_spill] sm:$0xff] }
 0x121   : > { %v1244_v16 = vsel %vm22897_vm15, %v22896_v61, %v1242_v27  ;;  %vm22899_vm7 = vmand %vm15721_vm8, %vm22848_vm10  ;;  %v16105_v61 = vpop.f32.mrf.mxu1  ;;  %v16121_v55 = vmul.f32 %v1331_v14, %v15812_v50  ;;  %v1288_v14 = vrot.slane %v15538_v60, 1 }
 0x122   : > { %v16086_v33 = vsel %vm22899_vm7, 1.0, %v22898_v46  ;;  %vm22901_vm1 = vmand %vm15752_vm6, %vm22858_vm5  ;;  %v1252_v0 = vmul.f32 %v1244_v16, %v15776_v1  ;;  %v16144_v16 = vmul.f32 %v15458_v40, %v15611_v18  ;;  %v16149_v1 = vpop.f32.mrf.mxu0 }
 0x123   : > { %22900 = vst [vmem:[#allocation80_spill] sm:$0xff] %v16086_v33  ;;  %v16094_v41 = vsel %vm22901_vm1, 1.0, %v22898_v46  ;;  %vm22904_vm8 = vmmov %vm22892_vm2  ;;  %v16129_v12 = vpop.f32.mrf.mxu1 }
 0x124   : > { %22902 = vst [vmem:[#allocation81_spill] sm:$0xff] %v16094_v41  ;;  %v1298_v25 = vsel %vm22904_vm8, %v1285_v21, %v1286_v44  ;;  %vm22905_vm6 = vmmov %vm22895_vm3  ;;  %v1239_v21 = vrot.slane %v15536_v59, 7  ;;  %v1321_v59 = vrot.slane %v15590_v43, 7  ;;  %v22942_v41 = vld [vmem:[#allocation34_spill] sm:$0xff] }
 0x125   : > { %v1330_v7 = vsel %vm22905_vm6, %v1318_v57, %v1319_v52  ;;  %vm22906_vm10 = vmmov %vm22892_vm2  ;;  %v16151_v60 = vpop.f32.mrf.mxu1 }
 0x126   : > { %v1297_v39 = vsel %vm22906_vm10, %v1286_v44, %v1287_v34  ;;  %vm22907_vm0 = vmmov %vm22895_vm3  ;;  %v16140_v44 = vmul.f32 %v1298_v25, %v15586_v8  ;;  %v988_v8 = vpop.f32.mrf.mxu0 }
 0x127   : > { %v1249_v53 = vsel %vm22907_vm0, %v1236_v13, %v1237_v26  ;;  %vm22908_vm5 = vmmov %vm22907_vm0  ;;  %v16163_v25 = vmul.f32 %v1297_v39, %v15619_v51  ;;  %v22915_v39 = vld [vmem:[#allocation16_spill] sm:$0xff] }
 0x128   : > { %v1251_v24 = vsel %vm22908_vm5, %v1242_v27, %v1235_v38  ;;  %vm22909_vm12 = vmmov %vm22907_vm0  ;;  %v16155_v38 = vmul.f32 %v15510_v54, %v15624_v15  ;;  %v16159_v27 = vmul.f32 %v1330_v7, %v15822_v6  ;;  %v1255_v40 = vmul.f32 %v1249_v53, %v15636_v9  ;;  %v22911_v15 = vld [vmem:[#allocation25_spill] sm:$0xff]  ;;  %v22914_v53 = vld [vmem:[#allocation23_spill] sm:$0xff] }
 0x129   : > { %v1248_v57 = vsel %vm22909_vm12, %v1237_v26, %v1238_v45  ;;  %vm22910_vm4 = vmmov %vm22907_vm0  ;;  %v1253_v43 = vmul.f32 %v1251_v24, %v15792_v49  ;;  %v1296_v54 = vsel %vm22892_vm2, %v1287_v34, %v1288_v14  ;;  %v1289_v28 = vrot.slane %v22911_v15, 1  ;;  %v22912_v26 = vld [vmem:[#allocation50_spill] sm:$0xff]  ;;  %v16183_v34 = vpop.f32.mrf.mxu0  ;;  %v16185_v15 = vpop.f32.mrf.mxu1  ;;  %v22927_v6 = vld [vmem:[#allocation28_spill] sm:$0xff] }
 0x12a   : > { %v1329_v13 = vsel %vm22910_vm4, %v1319_v52, %v1320_v23  ;;  %v1260_v52 = vadd.f32 %v1252_v0, %v970_v63  ;;  %v1256_v18 = vmul.f32 %v1248_v57, %v15669_v2  ;;  %vm22913_vm14 = vmmov %vm22907_vm0  ;;  %v16177_v51 = vmul.f32 %v22915_v39, %v22914_v53  ;;  %v22917_v0 = vld [vmem:[#allocation36_spill] sm:$0xff]  ;;  %v22919_v2 = vld [vmem:[#allocation31_spill] sm:$0xff] }
 0x12b   : > { %v16171_v50 = vmul.f32 %v1329_v13, %v22912_v26  ;;  %v1247_v7 = vsel %vm22913_vm14, %v1238_v45, %v1239_v21  ;;  %vm22916_vm11 = vmmov %vm22907_vm0  ;;  %v1268_v24 = vmul.f32 %v15941_v29, %v22917_v0  ;;  %v1261_v57 = vadd.f32 %v1253_v43, %v976_v36  ;;  %v22918_v13 = vld [vmem:[#allocation24_spill] sm:$0xff]  ;;  %v22924_v49 = vld [vmem:[#allocation22_spill] sm:$0xff]  ;;  %v994_v0 = vpop.f32.mrf.mxu0 }
 0x12c   : > { %v1328_v63 = vsel %vm22916_vm11, %v1320_v23, %v1321_v59  ;;  %v1240_v26 = vrot.slane %v22918_v13, 7  ;;  %v22920_v45 = vrot.slane %v15343_v4, 1  ;;  %v22921_v39 = vrot.slane %v15884_v22, 1  ;;  %vm22922_vm3 = vmmov %vm22892_vm2  ;;  %v22923_v23 = vld [vmem:[#allocation64_spill] sm:$0xff] }
 0x12d   : > { %v16197_v29 = vmul.f32 %v1296_v54, %v22924_v49  ;;  %v1276_v36 = vadd.f32 %v1268_v24, %v1260_v52  ;;  %v1350_v43 = vrot.slane %v16103_v30, 1  ;;  %v16201_v13 = vmul.f32 %v1247_v7, %v22925_v19  ;;  %vm22926_vm15 = vmmov %vm22892_vm2  ;;  %v22930_v54 = vld [vmem:[#allocation40_spill] sm:$0xff]  ;;  %v16215_v7 = vpop.f32.mrf.mxu1  ;;  %v16217_v19 = vpop.f32.mrf.mxu0 }
 0x12e   : > { %v1300_v53 = vsel %vm22922_vm3, %v22921_v39, %v22920_v45  ;;  %v1295_v4 = vsel %vm22926_vm15, %v1288_v14, %v1289_v28  ;;  %v16207_v46 = vmul.f32 %v22928_v32, %v22927_v6  ;;  %v1351_v45 = vrot.slane %v16149_v1, 1  ;;  %v22929_v39 = vld [vmem:[#allocation55_spill] sm:$0xff]  ;;  %vm22932_vm7 = vmmov %vm22907_vm0  ;;  %v22933_v6 = vld [vmem:[#allocation38_spill] sm:$0xff] }
 0x12f   : > { %v16211_v9 = vmul.f32 %v1328_v63, %v22929_v39  ;;  %v1301_v52 = vmul.f32 %v1300_v53, %v22930_v54  ;;  %v22643_v30 = vrot.slane %v16017_v17, 1  ;;  %v1277_v24 = vadd.f32 %v1269_v47, %v1261_v57  ;;  %vm22936_vm1 = vmmov %vm22907_vm0  ;;  %v1000_v57 = vpop.f32.mrf.mxu0 }
 0x130   : > { %v1262_v49 = vadd.f32 %v1254_v35, %v982_v37  ;;  %v22931_v14 = vrot.slane %v22919_v2, 7  ;;  %v1290_v1 = vrot.slane %v22933_v6, 1  ;;  %v22934_v63 = vrot.slane %v15354_v11, 7  ;;  %vm22937_vm8 = vmmov %vm22907_vm0  ;;  %v22939_v11 = vld [vmem:[#allocation27_spill] sm:$0xff] }
 0x131   : > { %v22935_v39 = vrot.slane %v22923_v23, 7  ;;  %v1246_v37 = vsel %vm22937_vm8, %v1239_v21, %v1240_v26  ;;  %v1309_v47 = vadd.f32 %v1301_v52, %v1276_v36  ;;  %vm22938_vm6 = vmmov %vm22892_vm2  ;;  %v1382_v6 = vrot.slane %v16073_v5, 7  ;;  %v22941_v36 = vld [vmem:[#allocation42_spill] sm:$0xff]  ;;  %v16250_v5 = vpop.f32.mrf.mxu0 }
 0x132   : > { %v1327_v32 = vsel %vm22932_vm7, %v1321_v59, %v22931_v14  ;;  %v1363_v59 = vsel %vm22938_vm6, %v22643_v30, %v1350_v43  ;;  %v16239_v14 = vmul.f32 %v1295_v4, %v22939_v11  ;;  %vm22940_vm10 = vmmov %vm22892_vm2  ;;  %v1352_v21 = vrot.slane %v16183_v34, 1  ;;  %v16248_v30 = vpop.f32.mrf.mxu1  ;;  %v22944_v11 = vld [vmem:[#allocation44_spill] sm:$0xff]  ;;  %v22945_v34 = vld [vmem:[#allocation58_spill] sm:$0xff] }
 0x133   : > { %v1332_v53 = vsel %vm22936_vm1, %v22935_v39, %v22934_v63  ;;  %v1362_v39 = vsel %vm22940_vm10, %v1350_v43, %v1351_v45  ;;  %v1383_v63 = vrot.slane %v16129_v12, 7  ;;  %v1310_v35 = vadd.f32 %v16116_v10, %v1277_v24  ;;  %vm22943_vm0 = vmmov %vm22892_vm2 }
 0x134   : > { %v1333_v52 = vmul.f32 %v1332_v53, %v22941_v36  ;;  %v1278_v54 = vadd.f32 %v16100_v48, %v1262_v49  ;;  %v16253_v4 = vmul.f32 %v1246_v37, %v22942_v41  ;;  %v1294_v43 = vsel %vm22943_vm0, %v1289_v28, %v1290_v1  ;;  %v22947_v53 = vld [vmem:[#allocation47_spill] sm:$0xff]  ;;  %vm22949_vm5 = vmmov %vm22936_vm1  ;;  %v22950_v36 = vld [vmem:[#allocation52_spill] sm:$0xff]  ;;  %v16267_v41 = vpop.f32.mrf.mxu0 }
 0x135   : > { %v1365_v12 = vmul.f32 %v1363_v59, %v22944_v11  ;;  %v1263_v17 = vadd.f32 %v1255_v40, %v988_v8  ;;  %v16259_v33 = vmul.f32 %v1327_v32, %v22945_v34  ;;  %v1323_v10 = vrot.slane %v22947_v53, 7  ;;  %vm22951_vm12 = vmmov %vm22936_vm1  ;;  %v22953_v59 = vld [vmem:[#allocation33_spill] sm:$0xff]  ;;  %v22957_v34 = vld [vmem:[#allocation48_spill] sm:$0xff] }
 0x136   : > { %v1341_v24 = vadd.f32 %v1333_v52, %v1309_v47  ;;  %v22948_v49 = vrot.slane %v15986_v31, 7  ;;  %v1366_v37 = vmul.f32 %v1362_v39, %v22950_v36  ;;  %v1394_v28 = vsel %vm22951_vm12, %v1382_v6, %v1383_v63  ;;  %vm22952_vm4 = vmmov %vm22943_vm0  ;;  %v22954_v47 = vld [vmem:[#allocation46_spill] sm:$0xff]  ;;  %v1109_v39 = vpop.f32.mrf.mxu1  ;;  %v16280_v36 = vpop.f32.mrf.mxu0 }
 0x137   : > { %22946 = vst [vmem:[#allocation25_spill] sm:$0xff] %v16259_v33  ;;  %v1361_v8 = vsel %vm22952_vm4, %v1351_v45, %v1352_v21  ;;  %v1384_v40 = vrot.slane %v16185_v15, 7  ;;  %v1264_v32 = vadd.f32 %v1256_v18, %v994_v0  ;;  %v16276_v52 = vmul.f32 %v22954_v47, %v22953_v59  ;;  %vm22956_vm2 = vmmov %vm22936_vm1  ;;  %v22958_v47 = vld [vmem:[#allocation32_spill] sm:$0xff] }
 0x138   : > { %v1395_v48 = vsel %vm22949_vm5, %v22948_v49, %v1382_v6  ;;  %v1342_v53 = vadd.f32 %v16121_v55, %v1310_v35  ;;  %v1311_v49 = vadd.f32 %v16140_v44, %v1278_v54  ;;  %v22955_v11 = vrot.slane %v15766_v42, 7  ;;  %v22959_v44 = vld [vmem:[#allocation53_spill] sm:$0xff]  ;;  %v22960_v35 = vld [vmem:[#allocation56_spill] sm:$0xff]  ;;  %v1012_v33 = vpop.f32.mrf.mxu0  ;;  %vm22962_vm14 = vmmov %vm22936_vm1 }
 0x139   : > { %v1373_v45 = vadd.f32 %v1365_v12, %v1341_v24  ;;  %v1397_v15 = vmul.f32 %v1395_v48, %v22957_v34  ;;  %v1279_v18 = vadd.f32 %v16144_v16, %v1263_v17  ;;  %v1353_v0 = vrot.slane %v16217_v19, 1  ;;  %vm22964_vm11 = vmmov %vm22943_vm0  ;;  %v22968_v24 = vld [vmem:[#allocation49_spill] sm:$0xff] }
 0x13a   : > { %v1245_v6 = vsel %vm22956_vm2, %v1240_v26, %v22955_v11  ;;  %v16290_v59 = vmul.f32 %v1294_v43, %v22958_v47  ;;  %v1374_v55 = vadd.f32 %v1366_v37, %v1342_v53  ;;  %v1398_v54 = vmul.f32 %v1394_v28, %v22959_v44  ;;  %vm22965_vm3 = vmmov %vm22936_vm1  ;;  %v16313_v37 = vpop.f32.mrf.mxu1 }
 0x13b   : > { %v1367_v31 = vmul.f32 %v1361_v8, %v22960_v35  ;;  %v22961_v42 = vrot.slane %v22919_v2, 7  ;;  %v22963_v11 = vrot.slane %v15884_v22, 1  ;;  %v1393_v19 = vsel %vm22965_vm3, %v1383_v63, %v1384_v40  ;;  %vm22967_vm15 = vmmov %vm22936_vm1 }
 0x13c   : > { %v1280_v16 = vadd.f32 %v16155_v38, %v1264_v32  ;;  %v22966_v43 = vrot.slane %v22923_v23, 7  ;;  %v1343_v2 = vadd.f32 %v16159_v27, %v1311_v49  ;;  %v1413_v48 = vmul.f32 %v16105_v61, %v22968_v24  ;;  %v22969_v38 = vld [vmem:[#allocation54_spill] sm:$0xff]  ;;  %vm22970_vm7 = vmmov %vm22943_vm0  ;;  %v22971_v32 = vld [vmem:[#allocation57_spill] sm:$0xff] }
 0x13d   : > { %v1326_v26 = vsel %vm22962_vm14, %v22961_v42, %v1323_v10  ;;  %v1293_v17 = vsel %vm22964_vm11, %v1290_v1, %v22963_v11  ;;  %v1385_v22 = vrot.slane %v16248_v30, 7  ;;  %v16315_v1 = vpop.f32.mrf.mxu0  ;;  %v1405_v28 = vadd.f32 %v1397_v15, %v1373_v45  ;;  %v22972_v15 = vld [vmem:[#allocation37_spill] sm:$0xff]  ;;  %v22978_v24 = vld [vmem:[#allocation62_spill] sm:$0xff]  ;;  %vm22979_vm8 = vmmov %vm22943_vm0 }
 0x13e   : > { %v1325_v12 = vsel %vm22967_vm15, %v1323_v10, %v22966_v43  ;;  %v1312_v63 = vadd.f32 %v16163_v25, %v1279_v18  ;;  %v1414_v23 = vmul.f32 %v16151_v60, %v22969_v38  ;;  %v1360_v10 = vsel %vm22970_vm7, %v1352_v21, %v1353_v0  ;;  %v22973_v60 = vld [vmem:[#allocation35_spill] sm:$0xff]  ;;  %v22974_v21 = vld [vmem:[#allocation61_spill] sm:$0xff]  ;;  %vm22980_vm6 = vmmov %vm22936_vm1 }
 0x13f   : > { %v1406_v8 = vadd.f32 %v1398_v54, %v1374_v55  ;;  %v1375_v27 = vadd.f32 %v1367_v31, %v1343_v2  ;;  %v1399_v53 = vmul.f32 %v1393_v19, %v22971_v32  ;;  %v1265_v61 = vadd.f32 %v16201_v13, %v1000_v57  ;;  %v16324_v30 = vpop.f32.mrf.mxu0  ;;  %v22975_v54 = vld [vmem:[#allocation63_spill] sm:$0xff]  ;;  %v1115_v57 = vpop.f32.mrf.mxu1  ;;  %v22976_v19 = vld [vmem:[#allocation60_spill] sm:$0xff]  ;;  %vm22983_vm5 = vmmov %vm22943_vm0 }
 0x140   : > { %v1313_v49 = vadd.f32 %v16197_v29, %v1280_v16  ;;  %v1354_v45 = vrot.slane %v16250_v5, 1  ;;  %v1386_v25 = vrot.slane %v16313_v37, 7  ;;  %v1259_v18 = vmul.f32 %v1245_v6, %v22972_v15  ;;  %vm22988_vm4 = vmmov %vm22943_vm0  ;;  %v23053_v32 = vld [vmem:[#allocation20_spill] sm:$0xff] }
 0x141   : > { %v16331_v42 = vmul.f32 %v1293_v17, %v22973_v60  ;;  %v1368_v55 = vmul.f32 %v1360_v10, %v22974_v21  ;;  %v1392_v31 = vsel %vm22936_vm1, %v1384_v40, %v1385_v22  ;;  %v16337_v13 = vmul.f32 %v1326_v26, %v22975_v54  ;;  %v16339_v11 = vpop.f32.mrf.mxu0  ;;  %v22977_v40 = vld [vmem:[#allocation65_spill] sm:$0xff]  ;;  %vm22991_vm2 = vmmov %vm22936_vm1 }
 0x142   : > { %v1421_v29 = vadd.f32 %v1413_v48, %v1405_v28  ;;  %v1344_v5 = vadd.f32 %v16171_v50, %v1312_v63  ;;  %v1415_v6 = vmul.f32 %v16215_v7, %v22976_v19  ;;  %v16345_v17 = vmul.f32 %v1325_v12, %v15970_v56  ;;  %vm22992_vm14 = vmmov %vm22943_vm0  ;;  %v23038_v19 = vld [vmem:[#allocation13_spill] sm:$0xff] }
 0x143   : > { %v1422_v16 = vadd.f32 %v1414_v23, %v1406_v8  ;;  %v1407_v43 = vadd.f32 %v1399_v53, %v1375_v27  ;;  %v1281_v2 = vadd.f32 %v16177_v51, %v1265_v61  ;;  %v1416_v37 = vmul.f32 %v1109_v39, %v22977_v40  ;;  %v13008_v26 = vpop.f32.mrf.mxu0  ;;  %v16361_v39 = vpop.f32.mrf.mxu1  ;;  %v22981_v53 = vld [vmem:[#allocation66_spill] sm:$0xff]  ;;  %vm22993_vm11 = vmmov %vm22943_vm0 }
 0x144   : > { %v1345_v10 = vadd.f32 %v16211_v9, %v1313_v49  ;;  %v1400_v21 = vmul.f32 %v1392_v31, %v22978_v24  ;;  %v1359_v50 = vsel %vm22979_vm8, %v1353_v0, %v1354_v45  ;;  %v1391_v7 = vsel %vm22980_vm6, %v1385_v22, %v1386_v25  ;;  %v22984_v31 = vld [vmem:[#allocation7_spill] sm:$0xff]  ;;  %vm22996_vm3 = vmmov %vm22943_vm0  ;;  %v23048_v24 = vld [vmem:[#allocation21_spill] sm:$0xff] }
 0x145   : > { %v1376_v48 = vadd.f32 %v1368_v55, %v1344_v5  ;;  %v1266_v12 = vadd.f32 %v16253_v4, %v16267_v41  ;;  %v16358_v28 = vmul.f32 %v1115_v57, %v15978_v20  ;;  %v1355_v51 = vrot.slane %v16280_v36, 1  ;;  %v1206_v9 = vpop.f32.mrf.mxu0  ;;  %v22982_v41 = vld [vmem:[#allocation67_spill] sm:$0xff]  ;;  %vm22999_vm15 = vmmov %vm22943_vm0 }
 0x146   : > { %v1267_v63 = vadd.f32 %v1259_v18, %v1012_v33  ;;  %v22648_v23 = vrot.slane %v16324_v30, 1  ;;  %v1432_v8 = vrot.slane %v13008_v26, 1  ;;  %v1431_v0 = vrot.slane %v1206_v9, 1  ;;  %vm23001_vm7 = vmmov %vm22943_vm0 }
 0x147   : > { %vm1514_vm10 = vcmask 261120   ;;  %v1423_v27 = vadd.f32 %v1415_v6, %v1407_v43  ;;  %v1314_v22 = vadd.f32 %v16239_v14, %v1281_v2  ;;  %v1369_v61 = vmul.f32 %v1359_v50, %v22981_v53  ;;  %v13011_v49 = vpop.f32.mrf.mxu0  ;;  %v1121_v43 = vpop.f32.mrf.mxu1 }
 0x148   : > { %v1401_v4 = vmul.f32 %v1391_v7, %v22982_v41  ;;  %v1387_v55 = vrot.slane %v16361_v39, 7  ;;  %v1441_v36 = vsel %vm22943_vm0, %v1431_v0, %v1432_v8  ;;  %v1442_v33 = vsel %vm22983_vm5, %v22648_v23, %v1431_v0  ;;  %v16390_v0 = vld [vmem:[%s22526_s5] ss:$0 sm:$0xff]  ;;  %v23035_v41 = vld [vmem:[#allocation14_spill] sm:$0xff] }
 0x149   : > { %v1434_v18 = vrot.slane %v13011_v49, 1  ;;  %v22985_v57 = vshra.s32 %v22984_v31, 3  ;;  %v1408_v5 = vadd.f32 %v1400_v21, %v1376_v48  ;;  %v1282_v6 = vadd.f32 %v16207_v46, %v1266_v12  ;;  %v1216_v50 = vpop.f32.mrf.mxu0  ;;  %v22989_v46 = vld [vmem:[#allocation25_spill] sm:$0xff]  ;;  %v22990_v12 = vld [vmem:[#allocation72_spill] sm:$0xff] }
 0x14a   : > { %v1445_v2 = vmul.f32 %v1442_v33, %v16044_v3  ;;  %v1446_v26 = vmul.f32 %v1441_v36, %v16052_v58  ;;  %v1358_v7 = vsel %vm22988_vm4, %v1354_v45, %v1355_v51  ;;  %v1283_v39 = vadd.f32 %v16276_v52, %v1267_v63  ;;  %vm23011_vm4 = vmmov %vm22991_vm2 }
 0x14b   : > { %vm16376_vm12 = vcmp.le.s32.totalorder %v22985_v57, 6  ;;  %v1356_v9 = vrot.slane %v16315_v1, 1  ;;  %v1433_v21 = vrot.slane %v1216_v50, 1  ;;  %v1346_v48 = vadd.f32 %v22989_v46, %v1314_v22  ;;  %v16396_v31 = vpop.f32.mrf.mxu0  ;;  %v22994_v22 = vld [vmem:[#allocation70_spill] sm:$0xff] }
 0x14c   : > { %v16394_v49 = vmul.f32 %v1121_v43, %v22990_v12  ;;  %v1453_v36 = vadd.f32 %v1445_v2, %v1421_v29  ;;  %v1454_v33 = vadd.f32 %v1446_v26, %v1422_v16  ;;  %v1377_v45 = vadd.f32 %v1369_v61, %v1345_v10  ;;  %v1125_v43 = vpop.f32.mrf.mxu1  ;;  %v22995_v16 = vld [vmem:[#allocation80_spill] sm:$0xff]  ;;  %v22997_v61 = vld [vmem:[#allocation74_spill] sm:$0xff] }
 0x14d   : > { %v1390_v52 = vsel %vm22991_vm2, %v1386_v25, %v1387_v55  ;;  %v1439_v1 = vsel %vm22992_vm14, %v1433_v21, %v1434_v18  ;;  %v1440_v63 = vsel %vm22993_vm11, %v1432_v8, %v1433_v21  ;;  %v1315_v57 = vadd.f32 %v16290_v59, %v1282_v6  ;;  %v1226_v26 = vpop.f32.mrf.mxu0  ;;  %vm23017_vm14 = vmmov %vm22996_vm3  ;;  %v23032_v12 = vld [vmem:[#allocation12_spill] sm:$0xff] }
 0x14e   : > { %v1370_v50 = vmul.f32 %v1358_v7, %v22994_v22  ;;  %v1462_v29 = vadd.f32 %v16390_v0, %v1453_v36  ;;  %v1447_v2 = vmul.f32 %v1440_v63, %v22995_v16  ;;  %v1316_v10 = vadd.f32 %v16331_v42, %v1283_v39  ;;  %v23000_v7 = vld [vmem:[#allocation81_spill] sm:$0xff]  ;;  %v23046_v22 = vld [vmem:[#allocation15_spill] sm:$0xff] }
 0x14f   : > { %v1357_v25 = vsel %vm22996_vm3, %v1355_v51, %v1356_v9  ;;  %v22998_v46 = vrot.slane %v22997_v61, 1  ;;  %v1435_v21 = vrot.slane %v1226_v26, 1  ;;  %v1463_v59 = vadd.f32 %v16390_v0, %v1454_v33  ;;  %v1509_v51 = vld [vmem:[%s22524_s3 + $0xf8] sm:$0xff]  ;;  %v23004_v33 = vld [vmem:[#allocation51_spill] sm:$0xff] }
 0x150   : > { %v16416_v6 = vmax.f32 %v1462_v29, 0.0  ;;  %v1448_v36 = vmul.f32 %v1439_v1, %v23000_v7  ;;  %v1455_v23 = vadd.f32 %v1447_v2, %v1423_v27  ;;  %v1424_v63 = vadd.f32 %v1416_v37, %v1408_v5  ;;  %v23006_v1 = vld [vmem:[#allocation71_spill] sm:$0xff]  ;;  %v23007_v37 = vld [vmem:[#allocation73_spill] sm:$0xff] }
 0x151   : > { %v1364_v8 = vsel %vm22999_vm15, %v1356_v9, %v22998_v46  ;;  %v1409_v3 = vadd.f32 %v1401_v4, %v1377_v45  ;;  %v1388_v58 = vrot.slane %v1125_v43, 7  ;;  %v1438_v42 = vsel %vm23001_vm7, %v1434_v18, %v1435_v21  ;;  %v23002_v9 = vld [vmem:[#allocation8_spill] sm:$0xff]  ;;  %v1511_v18 = vld [vmem:[%s22524_s3 + $0x108] sm:$0xff]  ;;  %vm23025_vm15 = vmmov %vm23001_vm7 }
 0x152   : > { %v1347_v39 = vadd.f32 %v16337_v13, %v1315_v57  ;;  %vm23003_vm1 = vnez %v23002_v9  ;;  %vm23005_vm8 = vnez %v23004_v33  ;;  %v1378_v29 = vadd.f32 %v1370_v50, %v1346_v48  ;;  %11380 = vmatmul.mubr.msk.f32.vlgmr.msra.gmra.mxu1 %vm1514_vm10, %v16416_v6  ;;  %v1501_v13 = vld [vmem:[%s22524_s3 + $0xb8] sm:$0xff]  ;;  %v23009_v48 = vld [vmem:[#allocation10_spill] sm:$0xff]  ;;  %11388 = vmatmul.mubr.msk.f32.vlgmr.msra.gmra.mxu0 %vm1514_vm10, %v16416_v6  ;;  %v1492_v33 = vld [vmem:[%s22524_s3 + $0x70] sm:$0xff] }
 0x153   : > { %vm596_vm6 = vmand %vm23005_vm8, %vm23003_vm1  ;;  %v1402_v27 = vmul.f32 %v1390_v52, %v23006_v1  ;;  %v1371_v4 = vmul.f32 %v1357_v25, %v23007_v37  ;;  %v1348_v5 = vadd.f32 %v16345_v17, %v1316_v10  ;;  %v23008_v45 = vld [vmem:[#allocation76_spill] sm:$0xff]  ;;  %vm23010_vm0 = vnez %v23009_v48  ;;  %v1503_v17 = vld [vmem:[%s22524_s3 + $0xc8] sm:$0xff]  ;;  %1790 = vmatpush1.msra.mxu1 %v1509_v51 }
 0x154   : > { %v1372_v57 = vmul.f32 %v1364_v8, %v23008_v45  ;;  %vm574_vm5 = vmand %vm16376_vm12, %vm23010_vm0  ;;  %v1389_v52 = vsel %vm23011_vm4, %v1387_v55, %v1388_v58  ;;  %v1436_v50 = vrot.slane %v16396_v31, 1  ;;  %v23012_v43 = vmov 0.0   ;;  %v23013_v25 = vld [vmem:[#allocation82_spill] sm:$0xff]  ;;  %v23014_v31 = vld [vmem:[#allocation69_spill] sm:$0xff]  ;;  %1903 = vmatpush1.msra.mxu0 %v1511_v18  ;;  %1791 = vmatprep.subr.mxu1 %v1501_v13 }
 0x155   : > { %1609 = vmatprep.mubr.f32.mxu1 %v23012_v43  ;;  %v16454_v2 = vmax.f32 %v1463_v59, 0.0  ;;  %v1456_v26 = vadd.f32 %v1448_v36, %v1424_v63  ;;  %v1464_v10 = vadd.f32 %v16390_v0, %v1455_v23  ;;  %v1449_v61 = vmul.f32 %v1438_v42, %v23013_v25  ;;  %1722 = vmatprep.mubr.f32.mxu0 %v23012_v43  ;;  %v23019_v36 = vld [vmem:[#allocation9_spill] sm:$0xff]  ;;  %vm23033_vm1 = vmmov %vm22991_vm2 }
 0x156   : > { %v1425_v55 = vadd.f32 %v16358_v28, %v1409_v3  ;;  %v23015_v46 = vrot.slane %v23014_v31, 7  ;;  %v16470_v59 = vsel %vm596_vm6, 1.0, %v23012_v43  ;;  %v1437_v23 = vsel %vm23017_vm14, %v1435_v21, %v1436_v50  ;;  %v1500_v3 = vld [vmem:[%s22524_s3 + $0xb0] sm:$0xff]  ;;  %v23022_v42 = vld [vmem:[#allocation77_spill] sm:$0xff]  ;;  %1904 = vmatprep.subr.mxu0 %v1503_v17  ;;  %vm23034_vm8 = vmmov %vm23033_vm1 }
 0x157   : > { %23016 = vst [vmem:[#allocation16_spill] sm:$0xff] %v16470_v59  ;;  %v1410_v28 = vadd.f32 %v1402_v27, %v1378_v29  ;;  %vm23020_vm11 = vnez %v23019_v36  ;;  %v1379_v21 = vadd.f32 %v1371_v4, %v1347_v39  ;;  %v1403_v51 = vmul.f32 %v1389_v52, %v23022_v42  ;;  %11381 = vmatmul.mubr.msk.f32.gmra.mxu1 %vm1514_vm10, %v16454_v2  ;;  %v1502_v9 = vld [vmem:[%s22524_s3 + $0xc0] sm:$0xff]  ;;  %v1127_v4 = vpop.f32.mrf.mxu1  ;;  %v1493_v31 = vld [vmem:[%s22524_s3 + $0x78] sm:$0xff]  ;;  %vm23036_vm6 = vmmov %vm23001_vm7 }
 0x158   : > { %v1396_v8 = vsel %vm22991_vm2, %v1388_v58, %v23015_v46  ;;  %v16483_v58 = vsel %vm574_vm5, 1.0, %v23012_v43  ;;  %vm597_vm3 = vmand %vm15910_vm9, %vm23020_vm11  ;;  %v1380_v29 = vadd.f32 %v1372_v57, %v1348_v5  ;;  %v1429_v27 = vrot.slane %v16339_v11, 1  ;;  %11389 = vmatmul.mubr.msk.f32.gmra.mxu0 %vm1514_vm10, %v16454_v2  ;;  %1615 = vmatprep.mubr.f32.mxu1 %v23012_v43  ;;  %v1494_v18 = vld [vmem:[%s22524_s3 + $0x80] sm:$0xff] }
 0x159   : > { %23018 = vst [vmem:[#allocation24_spill] sm:$0xff] %v16483_v58  ;;  %v16502_v39 = vsel %vm15910_vm9, 1.0, %v23012_v43  ;;  %v1465_v13 = vadd.f32 %v16390_v0, %v1456_v26  ;;  %v16511_v5 = vmax.f32 %v1464_v10, 0.0  ;;  %v1450_v11 = vmul.f32 %v1437_v23, %v16470_v59  ;;  %1728 = vmatprep.mubr.f32.mxu0 %v23012_v43  ;;  %1792 = vmatpush1.msra.mxu1 %v1500_v3  ;;  %v1491_v26 = vld [vmem:[%s22524_s3 + $0x68] sm:$0xff]  ;;  %vm598_vm9 = vmand %vm16376_vm12, %vm22881_vm13 }
 0x15a   : > { %23023 = vst [vmem:[#allocation31_spill] sm:$0xff] %v16502_v39  ;;  %v1457_v57 = vadd.f32 %v1449_v61, %v1425_v55  ;;  %v1404_v48 = vmul.f32 %v1396_v8, %v16483_v58  ;;  %v16522_v52 = vsel %vm597_vm3, 1.0, %v23012_v43  ;;  %v1444_v17 = vsel %vm23025_vm15, %v1436_v50, %v1429_v27  ;;  %1905 = vmatpush1.msra.mxu0 %v1502_v9  ;;  %v1483_v50 = vld [vmem:[%s22524_s3 + $0x28] sm:$0xff]  ;;  %v1485_v8 = vld [vmem:[%s22524_s3 + $0x38] sm:$0xff]  ;;  %vm23037_vm0 = vmmov %vm23033_vm1 }
 0x15b   : > { %23024 = vst [vmem:[#allocation64_spill] sm:$0xff] %v16522_v52  ;;  %1793 = vmatprep.subr.mxu1 %v1492_v33  ;;  %v1426_v10 = vadd.f32 %v16394_v49, %v1410_v28  ;;  %v1411_v61 = vadd.f32 %v1403_v51, %v1379_v21  ;;  %v1419_v55 = vmul.f32 %v1127_v4, %v16502_v39  ;;  %v16542_v46 = vsel %vm16376_vm12, 1.0, %v23012_v43  ;;  %v1482_v21 = vld [vmem:[%s22524_s3 + $0x20] sm:$0xff]  ;;  %v23027_v51 = vld [vmem:[#allocation75_spill] sm:$0xff]  ;;  %v1513_v4 = vld [vmem:[%s22524_s3 + $0x118] sm:$0xff] }
 0x15c   : > { %11382 = vmatmul.mubr.msk.f32.gmra.mxu1 %vm1514_vm10, %v16511_v5  ;;  %1906 = vmatprep.subr.mxu0 %v1494_v18  ;;  %v1412_v49 = vadd.f32 %v1404_v48, %v1380_v29  ;;  %v16554_v3 = vmax.f32 %v1465_v13, 0.0  ;;  %v1451_v28 = vmul.f32 %v1444_v17, %v16522_v52  ;;  %v1466_v63 = vadd.f32 %v16390_v0, %v1457_v57  ;;  %v1484_v29 = vld [vmem:[%s22524_s3 + $0x30] sm:$0xff]  ;;  %vm23031_vm12 = vmmov %vm23001_vm7 }
 0x15d   : > { %11390 = vmatmul.mubr.msk.f32.gmra.mxu0 %vm1514_vm10, %v16511_v5  ;;  %1621 = vmatprep.mubr.f32.mxu1 %v23012_v43  ;;  %v1458_v36 = vadd.f32 %v1450_v11, %v1426_v10  ;;  %v1420_v9 = vmul.f32 %v23027_v51, %v16542_v46  ;;  %v1427_v33 = vadd.f32 %v1419_v55, %v1411_v61  ;;  %v16578_v18 = vsel %vm598_vm9, 1.0, %v23012_v43  ;;  %v23039_v58 = vld [vmem:[#allocation43_spill] sm:$0xff]  ;;  %vm23041_vm5 = vmmov %vm23037_vm0 }
 0x15e   : > { %1734 = vmatprep.mubr.f32.mxu0 %v23012_v43  ;;  %1794 = vmatpush1.msra.mxu1 %v1491_v26  ;;  %23028 = vst [vmem:[#allocation30_spill] sm:$0xff] %v16578_v18  ;;  %v23029_v13 = vrot.slane %v16324_v30, 1  ;;  %v16588_v14 = vmax.f32 %v1466_v63, 0.0  ;;  %vm2525_vm13 = vcmask 523264   ;;  %vm23044_vm4 = vmmov %vm23037_vm0 }
 0x15f   : > { %1907 = vmatpush1.msra.mxu0 %v1493_v31  ;;  %1795 = vmatprep.subr.mxu1 %v1483_v50  ;;  %v1428_v57 = vadd.f32 %v1420_v9, %v1412_v49  ;;  %v1459_v48 = vadd.f32 %v1451_v28, %v1427_v33  ;;  %v1467_v17 = vadd.f32 %v16390_v0, %v1458_v36  ;;  %v1495_v50 = vld [vmem:[%s22524_s3 + $0x88] sm:$0xff]  ;;  %v1486_v49 = vld [vmem:[%s22524_s3 + $0x40] sm:$0xff]  ;;  %vm23049_vm14 = vmmov %vm23037_vm0 }
 0x160   : > { %11383 = vmatmul.mubr.msk.f32.gmra.mxu1 %vm1514_vm10, %v16554_v3  ;;  %1908 = vmatprep.subr.mxu0 %v1485_v8  ;;  %v1443_v11 = vsel %vm23001_vm7, %v1429_v27, %v23029_v13  ;;  %vm23050_vm11 = vmmov %vm23037_vm0 }
 0x161   : > { %11391 = vmatmul.mubr.msk.f32.gmra.mxu0 %vm1514_vm10, %v16554_v3  ;;  %1627 = vmatprep.mubr.f32.mxu1 %v23012_v43  ;;  %v1452_v30 = vmul.f32 %v1443_v11, %v16578_v18  ;;  %v1468_v26 = vadd.f32 %v16390_v0, %v1459_v48  ;;  %v1475_v10 = vmax.f32 %v1467_v17, 0.0  ;;  %vm23056_vm3 = vmmov %vm23037_vm0 }
 0x162   : > { %1740 = vmatprep.mubr.f32.mxu0 %v23012_v43  ;;  %1796 = vmatpush1.msra.mxu1 %v1482_v21  ;;  %vm23061_vm9 = vmmov %vm23037_vm0 }
 0x163   : > { %1909 = vmatpush1.msra.mxu0 %v1484_v29  ;;  %13015 = vmatprep.subr.mxu1 %v1513_v4  ;;  %v1460_v27 = vadd.f32 %v1452_v30, %v1428_v57  ;;  %v1476_v55 = vmax.f32 %v1468_v26, 0.0 }
 0x164   : > { %11384 = vmatmul.mubr.msk.f32.gmra.mxu1 %vm1514_vm10, %v16588_v14 }
 0x165   : > { %11392 = vmatmul.mubr.msk.f32.gmra.mxu0 %vm1514_vm10, %v16588_v14  ;;  %1633 = vmatprep.mubr.f32.mxu1 %v23012_v43  ;;  %v1469_v61 = vadd.f32 %v16390_v0, %v1460_v27  ;;  %v1504_v0 = vld [vmem:[%s22524_s3 + $0xd0] sm:$0xff] }
 0x166   : > { %1746 = vmatprep.mubr.f32.mxu0 %v23012_v43 }
 0x167   : > { %v1477_v31 = vmax.f32 %v1469_v61, 0.0 }
 0x168   : > { %11385 = vmatmul.mubr.msk.f32.gmra.mxu1 %vm1514_vm10, %v1475_v10 }
 0x169   : > { %11393 = vmatmul.mubr.msk.f32.gmra.mxu0 %vm1514_vm10, %v1475_v10  ;;  %1639 = vmatprep.mubr.f32.mxu1 %v23012_v43 }
 0x16a   : > { %1752 = vmatprep.mubr.f32.mxu0 %v23012_v43 }
 0x16c   : > { %11386 = vmatmul.mubr.msk.f32.gmra.mxu1 %vm1514_vm10, %v1476_v55 }
 0x16d   : > { %11394 = vmatmul.mubr.msk.f32.gmra.mxu0 %vm1514_vm10, %v1476_v55  ;;  %1645 = vmatprep.mubr.f32.mxu1 %v23012_v43 }
 0x16e   : > { %1758 = vmatprep.mubr.f32.mxu0 %v23012_v43 }
 0x170   : > { %11387 = vmatmul.mubr.msk.f32.gmra.mxu1 %vm1514_vm10, %v1477_v31 }
 0x171   : > { %11395 = vmatmul.mubr.msk.f32.gmra.mxu0 %vm1514_vm10, %v1477_v31  ;;  %1829 = vmatprep.mubr.f32.mxu1 %v23012_v43 }
 0x172   : > { %1942 = vmatprep.mubr.f32.mxu0 %v23012_v43 }
 0x174   : > { %11396 = vmatmul.mubr.msk.f32.vlgmr.msra.gmra.mxu1 %vm1514_vm10, %v16416_v6 }
 0x175   : > { %11404 = vmatmul.mubr.msk.f32.vlgmr.msra.gmra.mxu0 %vm1514_vm10, %v16416_v6  ;;  %1835 = vmatprep.mubr.f32.mxu1 %v23012_v43 }
 0x176   : > { %1948 = vmatprep.mubr.f32.mxu0 %v23012_v43  ;;  %13016 = vmatpush3.msra.mxu1 %v1513_v4 }
 0x177   : > { %13017 = vmatprep.subr.mxu1 %v1504_v0 }
 0x178   : > { %11397 = vmatmul.mubr.msk.f32.gmra.mxu1 %vm1514_vm10, %v16454_v2 }
 0x179   : > { %11405 = vmatmul.mubr.msk.f32.gmra.mxu0 %vm1514_vm10, %v16454_v2  ;;  %1841 = vmatprep.mubr.f32.mxu1 %v23012_v43 }
 0x17a   : > { %1954 = vmatprep.mubr.f32.mxu0 %v23012_v43  ;;  %13018 = vmatpush3.msra.mxu1 %v1504_v0 }
 0x17b   : > { %13019 = vmatprep.subr.mxu1 %v1495_v50 }
 0x17c   : > { %11398 = vmatmul.mubr.msk.f32.gmra.mxu1 %vm1514_vm10, %v16511_v5 }
 0x17d   : > { %11406 = vmatmul.mubr.msk.f32.gmra.mxu0 %vm1514_vm10, %v16511_v5  ;;  %1847 = vmatprep.mubr.f32.mxu1 %v23012_v43 }
 0x17e   : > { %1960 = vmatprep.mubr.f32.mxu0 %v23012_v43  ;;  %13020 = vmatpush3.msra.mxu1 %v1495_v50 }
 0x17f   : > { %13021 = vmatprep.subr.mxu1 %v1486_v49 }
 0x180   : > { %11399 = vmatmul.mubr.msk.f32.gmra.mxu1 %vm1514_vm10, %v16554_v3 }
 0x181   : > { %11407 = vmatmul.mubr.msk.f32.gmra.mxu0 %vm1514_vm10, %v16554_v3  ;;  %1853 = vmatprep.mubr.f32.mxu1 %v23012_v43 }
 0x182   : > { %1966 = vmatprep.mubr.f32.mxu0 %v23012_v43  ;;  %13022 = vmatpush3.msra.mxu1 %v1486_v49 }
 0x184   : > { %11400 = vmatmul.mubr.msk.f32.gmra.mxu1 %vm1514_vm10, %v16588_v14 }
 0x185   : > { %11408 = vmatmul.mubr.msk.f32.gmra.mxu0 %vm1514_vm10, %v16588_v14  ;;  %1859 = vmatprep.mubr.f32.mxu1 %v23012_v43 }
 0x186   : > { %1972 = vmatprep.mubr.f32.mxu0 %v23012_v43 }
 0x188   : > { %11401 = vmatmul.mubr.msk.f32.gmra.mxu1 %vm1514_vm10, %v1475_v10 }
 0x189   : > { %11409 = vmatmul.mubr.msk.f32.gmra.mxu0 %vm1514_vm10, %v1475_v10  ;;  %1865 = vmatprep.mubr.f32.mxu1 %v23012_v43 }
 0x18a   : > { %1978 = vmatprep.mubr.f32.mxu0 %v23012_v43 }
 0x18c   : > { %11402 = vmatmul.mubr.msk.f32.gmra.mxu1 %vm1514_vm10, %v1476_v55 }
 0x18d   : > { %11410 = vmatmul.mubr.msk.f32.gmra.mxu0 %vm1514_vm10, %v1476_v55  ;;  %1871 = vmatprep.mubr.f32.mxu1 %v23012_v43 }
 0x18e   : > { %1984 = vmatprep.mubr.f32.mxu0 %v23012_v43 }
 0x190   : > { %11403 = vmatmul.mubr.msk.f32.gmra.mxu1 %vm1514_vm10, %v1477_v31 }
 0x191   : > { %11411 = vmatmul.mubr.msk.f32.gmra.mxu0 %vm1514_vm10, %v1477_v31  ;;  %13023 = vmatprep.mubr.msk.f32.mxu1 %vm1514_vm10, %v16416_v6  ;;  %v2363_v6 = vld [vmem:[%s22525_s4 + $0x88] sm:$0xff] }
 0x192   : > { %13051 = vmatprep.mubr.msk.f32.mxu0 %vm2525_vm13, %v2363_v6 }
 0x194   : > { %13024 = vmatmul.mubr.msk.f32.vlgmr.msra.gmra.mxu1 %vm1514_vm10, %v16454_v2 }
 0x195   : > { %13026 = vmatprep.mubr.msk.f32.mxu1 %vm1514_vm10, %v16511_v5 }
 0x198   : > { %13027 = vmatmul.mubr.msk.f32.gmra.mxu1 %vm1514_vm10, %v16554_v3 }
 0x199   : > { %13029 = vmatprep.mubr.msk.f32.mxu1 %vm1514_vm10, %v16588_v14 }
 0x19c   : > { %13030 = vmatmul.mubr.msk.f32.gmra.mxu1 %vm1514_vm10, %v1475_v10 }
 0x19d   : > { %13032 = vmatprep.mubr.msk.f32.mxu1 %vm1514_vm10, %v1476_v55 }
 0x1a0   : > { %13033 = vmatmul.mubr.msk.f32.gmra.mxu1 %vm1514_vm10, %v1477_v31  ;;  %vm23030_vm10 = vmmov %vm22991_vm2 }
 0x1a1   : > { %vm23047_vm2 = vmmov %vm23036_vm6 }
 0x1a2   : > { %vm23060_vm15 = vmmov %vm23047_vm2 }
 0x1a3   : > { %vm23062_vm7 = vmmov %vm23047_vm2 }
 0x212   : > { %v1605_v2 = vpop.f32.mrf.mxu1  ;;  %v16678_v5 = vpop.f32.mrf.mxu0 }
 0x213   : > { %v2096_v28 = vrot.slane %v1605_v2, 7  ;;  %v22651_v21 = vrot.slane %v16678_v5, 1 }
 0x214   : > { %v1607_v8 = vpop.f32.mrf.mxu1  ;;  %v16680_v23 = vpop.f32.mrf.mxu0 }
 0x215   : > { %v22658_v59 = vrot.slane %v16680_v23, 7  ;;  %v2129_v20 = vmul.f32 %v1607_v8, %v23032_v12 }
 0x217   : > { %v1611_v3 = vpop.f32.mrf.mxu1 }
 0x218   : > { %v2097_v36 = vrot.slane %v1611_v3, 7  ;;  %v1724_v63 = vpop.f32.mrf.mxu0 }
 0x219   : > { %v2145_v51 = vrot.slane %v1724_v63, 1  ;;  %v1613_v9 = vpop.f32.mrf.mxu1 }
 0x21a   : > { %v1726_v33 = vpop.f32.mrf.mxu0  ;;  %v2110_v29 = vsel %vm23030_vm10, %v2096_v28, %v2097_v36  ;;  %v2130_v12 = vmul.f32 %v1613_v9, %v23035_v41  ;;  %vm23064_vm10 = vmmov %vm23037_vm0 }
 0x21b   : > { %v2158_v4 = vsel %vm23031_vm12, %v22651_v21, %v2145_v51  ;;  %v2177_v63 = vrot.slane %v1726_v33, 7  ;;  %vm23067_vm12 = vmmov %vm23047_vm2 }
 0x21c   : > { %v1617_v13 = vpop.f32.mrf.mxu1 }
 0x21d   : > { %v1730_v11 = vpop.f32.mrf.mxu0  ;;  %v2098_v25 = vrot.slane %v1617_v13, 7  ;;  %v2190_v42 = vsel %vm23033_vm1, %v22658_v59, %v2177_v63  ;;  %vm23073_vm1 = vmmov %vm23037_vm0 }
 0x21e   : > { %v1619_v57 = vpop.f32.mrf.mxu1  ;;  %v2146_v52 = vrot.slane %v1730_v11, 1  ;;  %v16744_v13 = vmul.f32 %v2190_v42, %v23039_v58  ;;  %v23045_v58 = vld [vmem:[#allocation41_spill] sm:$0xff] }
 0x21f   : > { %v1732_v48 = vpop.f32.mrf.mxu0 }
 0x220   : > { %v16689_v17 = vpop.f32.mrf.mxu1  ;;  %v2178_v18 = vrot.slane %v1732_v48, 7  ;;  %v2157_v8 = vsel %vm23036_vm6, %v2145_v51, %v2146_v52  ;;  %v23042_v51 = vld [vmem:[#allocation17_spill] sm:$0xff]  ;;  %vm23077_vm6 = vmmov %vm23037_vm0 }
 0x221   : > { %v16691_v14 = vpop.f32.mrf.mxu0  ;;  %v2099_v40 = vrot.slane %v16689_v17, 7  ;;  %v2109_v17 = vsel %vm23037_vm0, %v2097_v36, %v2098_v25  ;;  %v2114_v9 = vmul.f32 %v2110_v29, %v23042_v51  ;;  %v2162_v53 = vmul.f32 %v2157_v8, %v23046_v22  ;;  %v23051_v51 = vld [vmem:[#allocation39_spill] sm:$0xff]  ;;  %v23052_v22 = vld [vmem:[#allocation45_spill] sm:$0xff] }
 0x222   : > { %v1625_v30 = vpop.f32.mrf.mxu1  ;;  %v2147_v1 = vrot.slane %v16691_v14, 1  ;;  %v2161_v14 = vmul.f32 %v2158_v4, %v23038_v19  ;;  %v2189_v36 = vsel %vm23044_vm4, %v2177_v63, %v2178_v18  ;;  %v16766_v29 = vmul.f32 %v2109_v17, %v23048_v24  ;;  %vm23080_vm4 = vmmov %vm23047_vm2 }
 0x223   : > { %v16693_v27 = vpop.f32.mrf.mxu0  ;;  %v16777_v8 = vmul.f32 %v2189_v36, %v23052_v22 }
 0x224   : > { %v16695_v26 = vpop.f32.mrf.mxu1  ;;  %v2179_v59 = vrot.slane %v16693_v27, 7  ;;  %v23043_v27 = vld [vmem:[#allocation18_spill] sm:$0xff] }
 0x225   : > { %v16697_v10 = vpop.f32.mrf.mxu0  ;;  %v16754_v45 = vmul.f32 %v1619_v57, %v23043_v27  ;;  %v2100_v19 = vrot.slane %v16695_v26, 7  ;;  %v2108_v57 = vsel %vm23049_vm14, %v2098_v25, %v2099_v40  ;;  %vm23083_vm14 = vmmov %vm23037_vm0 }
 0x226   : > { %v16699_v61 = vpop.f32.mrf.mxu1  ;;  %v2188_v63 = vsel %vm23050_vm11, %v2178_v18, %v2179_v59  ;;  %v2148_v26 = vrot.slane %v16697_v10, 1  ;;  %v16785_v18 = vmul.f32 %v1625_v30, %v23053_v32  ;;  %vm23086_vm11 = vmmov %vm23037_vm0 }
 0x227   : > { %v16701_v55 = vpop.f32.mrf.mxu0  ;;  %v2107_v36 = vsel %vm23056_vm3, %v2099_v40, %v2100_v19  ;;  %vm23087_vm3 = vmmov %vm23047_vm2 }
 0x228   : > { %v16703_v31 = vpop.f32.mrf.mxu1  ;;  %v2155_v30 = vsel %vm23060_vm15, %v2147_v1, %v2148_v26  ;;  %vm23088_vm15 = vmmov %vm23047_vm2 }
 0x229   : > { %v16705_v0 = vpop.f32.mrf.mxu0  ;;  %v2101_v24 = vrot.slane %v16703_v31, 7  ;;  %v23058_v31 = vld [vmem:[#allocation50_spill] sm:$0xff] }
 0x22a   : > { %v16707_v50 = vpop.f32.mrf.mxu1  ;;  %v2149_v17 = vrot.slane %v16705_v0, 1  ;;  %v23059_v0 = vld [vmem:[#allocation23_spill] sm:$0xff] }
 0x22b   : > { %v16709_v49 = vpop.f32.mrf.mxu0  ;;  %v16802_v22 = vmul.f32 %v16699_v61, %v23059_v0 }
 0x22c   : > { %v16711_v6 = vpop.f32.mrf.mxu1 }
 0x22d   : > { %v16713_v2 = vpop.f32.mrf.mxu0  ;;  %v23040_v37 = vrot.slane %v16711_v6, 7 }
 0x22e   : > { %v16715_v3 = vpop.f32.mrf.mxu1 }
 0x22f   : > { %v16717_v21 = vpop.f32.mrf.mxu0 }
 0x230   : > { %v1647_v43 = vpop.f32.mrf.mxu1 }
 0x231   : > { %v2103_v16 = vrot.slane %v1647_v43, 7  ;;  %v16720_v7 = vpop.f32.mrf.mxu0 }
 0x232   : > { %v1649_v39 = vpop.f32.mrf.mxu1 }
 0x233   : > { %v16727_v33 = vpop.f32.mrf.mxu0  ;;  %v2111_v11 = vsel %vm23034_vm8, %v2103_v16, %v2096_v28  ;;  %v2104_v41 = vsel %vm23041_vm5, %v23040_v37, %v2103_v16  ;;  %v2156_v16 = vsel %vm23047_vm2, %v2146_v52, %v2147_v1  ;;  %v2180_v52 = vrot.slane %v16701_v55, 7  ;;  %vm23074_vm8 = vmmov %vm23047_vm2 }
 0x234   : > { %v1831_v43 = vpop.f32.mrf.mxu1  ;;  %v2113_v42 = vmul.f32 %v2111_v11, %v23045_v58  ;;  %v2112_v27 = vmul.f32 %v2104_v41, %v23051_v51  ;;  %v23055_v41 = vld [vmem:[#allocation26_spill] sm:$0xff]  ;;  %v16798_v51 = vmul.f32 %v2188_v63, %v23058_v31  ;;  %v2154_v63 = vsel %vm23062_vm7, %v2148_v26, %v2149_v17  ;;  %vm23079_vm5 = vmmov %vm23037_vm0 }
 0x235   : > { %v16738_v48 = vpop.f32.mrf.mxu0  ;;  %v2181_v1 = vrot.slane %v16709_v49, 7  ;;  %v23066_v26 = vrot.slane %v16678_v5, 1  ;;  %v2183_v0 = vrot.slane %v16727_v33, 7  ;;  %v23068_v49 = vld [vmem:[#allocation22_spill] sm:$0xff]  ;;  %vm23091_vm7 = vmmov %vm23037_vm0 }
 0x236   : > { %v16750_v28 = vpop.f32.mrf.mxu1 }
 0x237   : > { %v16759_v4 = vpop.f32.mrf.mxu0  ;;  %v22660_v33 = vrot.slane %v16750_v28, 1 }
 0x238   : > { %v1837_v37 = vpop.f32.mrf.mxu1 }
 0x239   : > { %v2121_v11 = vadd.f32 %v2113_v42, %v1837_v37  ;;  %v16774_v58 = vpop.f32.mrf.mxu0  ;;  %v16790_v42 = vmul.f32 %v2108_v57, %v23055_v41  ;;  %v23057_v37 = vld [vmem:[#allocation19_spill] sm:$0xff]  ;;  %v2120_v57 = vadd.f32 %v2112_v27, %v1831_v43  ;;  %v2150_v43 = vrot.slane %v16713_v2, 1 }
 0x23a   : > { %v16782_v25 = vpop.f32.mrf.mxu1  ;;  %v16795_v55 = vmul.f32 %v2156_v16, %v23057_v37  ;;  %v2187_v16 = vsel %vm23061_vm9, %v2179_v59, %v2180_v52  ;;  %v23063_v37 = vld [vmem:[#allocation29_spill] sm:$0xff]  ;;  %v2182_v59 = vrot.slane %v16717_v21, 7  ;;  %v23069_v2 = vld [vmem:[#allocation55_spill] sm:$0xff]  ;;  %vm23089_vm9 = vmmov %vm23037_vm0 }
 0x23b   : > { %v2137_v10 = vadd.f32 %v2129_v20, %v2121_v11  ;;  %v16787_v38 = vpop.f32.mrf.mxu0  ;;  %v2151_v20 = vrot.slane %v16720_v7, 1  ;;  %v16816_v31 = vmul.f32 %v2107_v36, %v23063_v37  ;;  %v2106_v7 = vsel %vm23064_vm10, %v2100_v19, %v2101_v24  ;;  %v23070_v21 = vld [vmem:[#allocation27_spill] sm:$0xff]  ;;  %vm23093_vm10 = vmmov %vm23037_vm0 }
 0x23c   : > { %23054 = vst [vmem:[#allocation38_spill] sm:$0xff] %v16787_v38  ;;  %v1843_v32 = vpop.f32.mrf.mxu1  ;;  %v2209_v19 = vrot.slane %v16782_v25, 1  ;;  %v16833_v37 = vmul.f32 %v2155_v30, %v23068_v49  ;;  %v16841_v5 = vmul.f32 %v2154_v63, %v23070_v21  ;;  %v23071_v38 = vld [vmem:[#allocation28_spill] sm:$0xff]  ;;  %v23072_v30 = vld [vmem:[#allocation34_spill] sm:$0xff] }
 0x23d   : > { %v16807_v11 = vadd.f32 %v2161_v14, %v2137_v10  ;;  %v2122_v40 = vadd.f32 %v2114_v9, %v1843_v32  ;;  %v16809_v41 = vpop.f32.mrf.mxu0  ;;  %v23065_v14 = vld [vmem:[#allocation36_spill] sm:$0xff]  ;;  %v2159_v36 = vsel %vm23067_vm12, %v2151_v20, %v23066_v26  ;;  %v16845_v26 = vmul.f32 %v16707_v50, %v23071_v38  ;;  %vm23095_vm12 = vmmov %vm23047_vm2 }
 0x23e   : > { %v1845_v61 = vpop.f32.mrf.mxu1  ;;  %v2128_v9 = vmul.f32 %v1649_v39, %v23065_v14  ;;  %v16836_v39 = vmul.f32 %v2187_v16, %v23069_v2  ;;  %v2118_v49 = vmul.f32 %v2106_v7, %v23072_v30  ;;  %v2186_v16 = vsel %vm23073_vm1, %v2180_v52, %v2181_v1  ;;  %vm23096_vm1 = vmmov %vm23047_vm2 }
 0x23f   : > { %v2138_v27 = vadd.f32 %v2130_v12, %v2122_v40  ;;  %v16823_v10 = vpop.f32.mrf.mxu0  ;;  %v2185_v50 = vsel %vm23037_vm0, %v2181_v1, %v2182_v59  ;;  %v23078_v7 = vrot.slane %v16680_v23, 7  ;;  %v2241_v2 = vrot.slane %v16774_v58, 7  ;;  %v23081_v23 = vld [vmem:[#allocation58_spill] sm:$0xff] }
 0x240   : > { %v1849_v32 = vpop.f32.mrf.mxu1  ;;  %v2136_v12 = vadd.f32 %v2128_v9, %v2120_v57  ;;  %v23075_v57 = vld [vmem:[#allocation40_spill] sm:$0xff]  ;;  %v2210_v21 = vrot.slane %v1845_v61, 1  ;;  %v23084_v61 = vld [vmem:[#allocation42_spill] sm:$0xff] }
 0x241   : > { %v2170_v40 = vadd.f32 %v2162_v53, %v2138_v27  ;;  %v16838_v14 = vpop.f32.mrf.mxu0  ;;  %v2153_v53 = vsel %vm23074_vm8, %v2149_v17, %v2150_v43  ;;  %v2160_v9 = vmul.f32 %v2159_v36, %v23075_v57  ;;  %v23076_v27 = vrot.slane %v16711_v6, 7  ;;  %vm23098_vm8 = vmmov %vm23096_vm1 }
 0x242   : > { %v16848_v25 = vpop.f32.mrf.mxu1  ;;  %v2191_v52 = vsel %vm23079_vm5, %v2183_v0, %v23078_v7  ;;  %v2222_v17 = vsel %vm23080_vm4, %v22660_v33, %v2209_v19  ;;  %v16878_v57 = vmul.f32 %v2186_v16, %v23081_v23  ;;  %v2152_v7 = vsel %vm23047_vm2, %v2150_v43, %v2151_v20  ;;  %vm23104_vm5 = vmmov %vm23096_vm1 }
 0x243   : > { %v16856_v63 = vpop.f32.mrf.mxu0  ;;  %v2105_v38 = vsel %vm23077_vm6, %v2101_v24, %v23076_v27  ;;  %v2168_v6 = vadd.f32 %v2160_v9, %v2136_v12  ;;  %v2123_v24 = vadd.f32 %v16766_v29, %v1849_v32  ;;  %v2211_v30 = vrot.slane %v16848_v25, 1  ;;  %v23082_v27 = vld [vmem:[#allocation33_spill] sm:$0xff]  ;;  %v23085_v25 = vld [vmem:[#allocation44_spill] sm:$0xff]  ;;  %vm23101_vm6 = vmmov %vm23096_vm1 }
 0x244   : > { %v1855_v36 = vpop.f32.mrf.mxu1  ;;  %v16882_v58 = vmul.f32 %v16715_v3, %v23082_v27  ;;  %v2240_v33 = vrot.slane %v16738_v48, 7  ;;  %v2184_v29 = vsel %vm23083_vm14, %v2182_v59, %v2183_v0  ;;  %v2192_v32 = vmul.f32 %v2191_v52, %v23084_v61  ;;  %v23106_v48 = vld [vmem:[#allocation73_spill] sm:$0xff]  ;;  %vm23107_vm4 = vmmov %vm23037_vm0 }
 0x245   : > { %v16875_v1 = vpop.f32.mrf.mxu0  ;;  %v2224_v9 = vmul.f32 %v2222_v17, %v23085_v25  ;;  %v2242_v16 = vrot.slane %v16809_v41, 7  ;;  %v16895_v3 = vmul.f32 %v2153_v53, %v22958_v47  ;;  %v16898_v27 = vmul.f32 %v2185_v50, %v22975_v54  ;;  %vm23108_vm2 = vmmov %vm23037_vm0 }
 0x246   : > { %v1857_v12 = vpop.f32.mrf.mxu1  ;;  %v2254_v20 = vsel %vm23086_vm11, %v2240_v33, %v2241_v2  ;;  %v2119_v59 = vmul.f32 %v2105_v38, %v22972_v15  ;;  %v2200_v0 = vadd.f32 %v2192_v32, %v2168_v6  ;;  %v2221_v41 = vsel %vm23087_vm3, %v2209_v19, %v2210_v21  ;;  %vm23110_vm14 = vmmov %vm23096_vm1 }
 0x247   : > { %v16892_v23 = vpop.f32.mrf.mxu0  ;;  %v2139_v52 = vadd.f32 %v16754_v45, %v2123_v24  ;;  %v2220_v47 = vsel %vm23088_vm15, %v2210_v21, %v2211_v30  ;;  %v2167_v54 = vmul.f32 %v2152_v7, %v22973_v60  ;;  %v16914_v50 = vmul.f32 %v2184_v29, %v15970_v56  ;;  %v23090_v60 = vld [vmem:[#allocation52_spill] sm:$0xff]  ;;  %vm23112_vm11 = vmmov %vm23037_vm0 }
 0x248   : > { %v1861_v43 = vpop.f32.mrf.mxu1  ;;  %v2243_v17 = vrot.slane %v16838_v14, 7  ;;  %v2124_v15 = vadd.f32 %v16790_v42, %v1855_v36  ;;  %v16920_v19 = vmul.f32 %v16759_v4, %v16542_v46  ;;  %v2256_v45 = vmul.f32 %v2254_v20, %v22957_v34  ;;  %vm23120_vm3 = vmmov %vm23096_vm1 }
 0x249   : > { %v16910_v53 = vpop.f32.mrf.mxu0  ;;  %v2232_v6 = vadd.f32 %v2224_v9, %v2200_v0  ;;  %v2253_v21 = vsel %vm23089_vm9, %v2241_v2, %v2242_v16  ;;  %v2225_v56 = vmul.f32 %v2221_v41, %v23090_v60  ;;  %v2226_v7 = vmul.f32 %v2220_v47, %v22960_v35  ;;  %vm23121_vm15 = vmmov %vm23096_vm1 }
 0x24a   : > { %v1863_v38 = vpop.f32.mrf.mxu1  ;;  %v2244_v14 = vrot.slane %v16875_v1, 7  ;;  %v2125_v42 = vadd.f32 %v16816_v31, %v1861_v43  ;;  %v2201_v46 = vadd.f32 %v16744_v13, %v16807_v11  ;;  %v2202_v34 = vadd.f32 %v16777_v8, %v2170_v40  ;;  %v23092_v13 = vld [vmem:[#allocation54_spill] sm:$0xff]  ;;  %v23094_v43 = vld [vmem:[#allocation57_spill] sm:$0xff]  ;;  %vm23123_vm9 = vmmov %vm23096_vm1 }
 0x24b   : > { %v16925_v24 = vpop.f32.mrf.mxu0  ;;  %v2171_v4 = vadd.f32 %v16795_v55, %v2139_v52  ;;  %v2212_v29 = vrot.slane %v1857_v12, 1  ;;  %v2252_v61 = vsel %vm23091_vm7, %v2242_v16, %v2243_v17  ;;  %v2140_v35 = vadd.f32 %v16785_v18, %v2124_v15  ;;  %vm23125_vm7 = vmmov %vm23096_vm1 }
 0x24c   : > { %v1867_v36 = vpop.f32.mrf.mxu1  ;;  %v2213_v32 = vrot.slane %v1863_v38, 1  ;;  %v16940_v31 = vadd.f32 %v2256_v45, %v2232_v6  ;;  %v2257_v9 = vmul.f32 %v2253_v21, %v22959_v44  ;;  %v16945_v8 = vmul.f32 %v16823_v10, %v23092_v13 }
 0x24d   : > { %v16935_v2 = vpop.f32.mrf.mxu0  ;;  %v2126_v1 = vadd.f32 %v2118_v49, %v1867_v36  ;;  %v2233_v40 = vadd.f32 %v2225_v56, %v2201_v46  ;;  %v2234_v12 = vadd.f32 %v2226_v7, %v2202_v34  ;;  %v2251_v16 = vsel %vm23093_vm10, %v2243_v17, %v2244_v14  ;;  %vm23126_vm10 = vmmov %vm23096_vm1 }
 0x24e   : > { %v1869_v25 = vpop.f32.mrf.mxu1  ;;  %v2141_v18 = vadd.f32 %v16802_v22, %v2125_v42  ;;  %v2203_v20 = vadd.f32 %v16798_v51, %v2171_v4  ;;  %v2258_v0 = vmul.f32 %v2252_v61, %v23094_v43  ;;  %v2219_v44 = vsel %vm23095_vm12, %v2211_v30, %v2212_v29  ;;  %v23097_v22 = vld [vmem:[#allocation62_spill] sm:$0xff]  ;;  %vm23130_vm12 = vmmov %vm23096_vm1 }
 0x24f   : > { %v2214_v55 = vrot.slane %v1869_v25, 1  ;;  %v16947_v11 = vpop.f32.mrf.mxu0  ;;  %v2172_v52 = vadd.f32 %v16833_v37, %v2140_v35  ;;  %v2218_v47 = vsel %vm23096_vm1, %v2212_v29, %v2213_v32  ;;  %v2142_v15 = vadd.f32 %v16845_v26, %v2126_v1  ;;  %v23100_v26 = vld [vmem:[#allocation66_spill] sm:$0xff] }
 0x250   : > { %v1873_v49 = vpop.f32.mrf.mxu1  ;;  %v2259_v45 = vmul.f32 %v2251_v16, %v23097_v22  ;;  %v2266_v30 = vadd.f32 %v2258_v0, %v2234_v12  ;;  %v2173_v37 = vadd.f32 %v16841_v5, %v2141_v18  ;;  %v2245_v56 = vrot.slane %v16910_v53, 7  ;;  %v23102_v4 = vld [vmem:[#allocation70_spill] sm:$0xff]  ;;  %v23114_v22 = vld [vmem:[#allocation71_spill] sm:$0xff] }
 0x251   : > { %v2127_v10 = vadd.f32 %v2119_v59, %v1873_v49  ;;  %v1986_v41 = vpop.f32.mrf.mxu0  ;;  %v2217_v51 = vsel %vm23098_vm8, %v2213_v32, %v2214_v55  ;;  %v23099_v59 = vld [vmem:[#allocation61_spill] sm:$0xff]  ;;  %v2228_v42 = vmul.f32 %v2218_v47, %v23100_v26  ;;  %v2246_v36 = vrot.slane %v16935_v2, 7  ;;  %v23105_v32 = vld [vmem:[#allocation76_spill] sm:$0xff] }
 0x252   : > { %v2247_v17 = vrot.slane %v1986_v41, 7  ;;  %v1875_v38 = vpop.f32.mrf.mxu1  ;;  %v2227_v60 = vmul.f32 %v2219_v44, %v23099_v59  ;;  %v2229_v29 = vmul.f32 %v2217_v51, %v23102_v4  ;;  %v23103_v53 = vrot.slane %v16750_v28, 1  ;;  %v23115_v59 = vld [vmem:[#allocation65_spill] sm:$0xff]  ;;  %v23118_v4 = vld [vmem:[#allocation68_spill] sm:$0xff] }
 0x253   : > { %v2143_v6 = vadd.f32 %v16882_v58, %v2127_v10  ;;  %v2215_v21 = vrot.slane %v1875_v38, 1  ;;  %v2174_v58 = vadd.f32 %v16895_v3, %v2142_v15  ;;  %v2205_v13 = vadd.f32 %v16878_v57, %v2173_v37  ;;  %v23111_v10 = vld [vmem:[#allocation60_spill] sm:$0xff]  ;;  %v23113_v15 = vld [vmem:[#allocation67_spill] sm:$0xff]  ;;  %v23116_v37 = vld [vmem:[#allocation30_spill] sm:$0xff] }
 0x254   : > { %v16967_v7 = vpop.f32.mrf.mxu1  ;;  %v2255_v5 = vsel %vm23037_vm0, %v2247_v17, %v2240_v33  ;;  %v2235_v25 = vadd.f32 %v2227_v60, %v2203_v20  ;;  %v2250_v28 = vsel %vm23107_vm4, %v2244_v14, %v2245_v56  ;;  %v2249_v16 = vsel %vm23108_vm2, %v2245_v56, %v2246_v36 }
 0x255   : > { %v2175_v46 = vadd.f32 %v2167_v54, %v2143_v6  ;;  %v2216_v34 = vsel %vm23101_vm6, %v2214_v55, %v2215_v21  ;;  %v2223_v61 = vsel %vm23104_vm5, %v2215_v21, %v23103_v53  ;;  %v2204_v54 = vadd.f32 %v16836_v39, %v2172_v52  ;;  %v23109_v39 = vld [vmem:[#allocation24_spill] sm:$0xff] }
 0x256   : > { %v2057_v35 = vpop.f32.mrf.mxu1  ;;  %v2231_v1 = vmul.f32 %v2223_v61, %v23105_v32  ;;  %v2230_v55 = vmul.f32 %v2216_v34, %v23106_v48  ;;  %v2289_v33 = vrot.slane %v16967_v7, 1  ;;  %v2263_v18 = vmul.f32 %v2255_v5, %v23109_v39  ;;  %v23117_v7 = vld [vmem:[#allocation77_spill] sm:$0xff] }
 0x257   : > { %v2207_v2 = vadd.f32 %v16914_v50, %v2175_v46  ;;  %v2288_v3 = vrot.slane %v2057_v35, 1  ;;  %v2236_v49 = vadd.f32 %v2228_v42, %v2204_v54  ;;  %v2206_v43 = vadd.f32 %v16898_v27, %v2174_v58  ;;  %v17011_v42 = vld [vmem:[%s22526_s5 + $0x1] ss:$0 sm:$0xff] }
 0x258   : > { %v13028_v12 = vpop.f32.mrf.mxu1  ;;  %v2237_v20 = vadd.f32 %v2229_v29, %v2205_v13  ;;  %v2265_v44 = vadd.f32 %v2257_v9, %v2233_v40  ;;  %v2274_v41 = vmul.f32 %v16856_v63, %v23111_v10  ;;  %v2248_v14 = vsel %vm23112_vm11, %v2246_v36, %v2247_v17  ;;  %v1988_v36 = vpop.f32.mrf.mxu0  ;;  %v23119_v29 = vld [vmem:[#allocation72_spill] sm:$0xff]  ;;  %v23124_v48 = vld [vmem:[#allocation81_spill] sm:$0xff]  ;;  %v23129_v10 = vld [vmem:[#allocation79_spill] sm:$0xff] }
 0x259   : > { %v2239_v50 = vadd.f32 %v2231_v1, %v2207_v2  ;;  %v2302_v57 = vsel %vm23110_vm14, %v2288_v3, %v2289_v33  ;;  %v2267_v47 = vadd.f32 %v2259_v45, %v2235_v25  ;;  %v2260_v38 = vmul.f32 %v2250_v28, %v23113_v15  ;;  %v23122_v25 = vld [vmem:[#allocation31_spill] sm:$0xff]  ;;  %v23131_v15 = vld [vmem:[#allocation82_spill] sm:$0xff] }
 0x25a   : > { %v2067_v0 = vpop.f32.mrf.mxu1  ;;  %v2261_v51 = vmul.f32 %v2249_v16, %v23114_v22  ;;  %v2238_v6 = vadd.f32 %v2230_v55, %v2206_v43  ;;  %v2282_v21 = vadd.f32 %v2274_v41, %v2266_v30  ;;  %v2275_v60 = vmul.f32 %v16892_v23, %v23115_v59  ;;  %v23127_v43 = vld [vmem:[#allocation80_spill] sm:$0xff] }
 0x25b   : > { %v2271_v52 = vadd.f32 %v2263_v18, %v2239_v50  ;;  %v2311_v9 = vmul.f32 %v2302_v57, %v23116_v37  ;;  %v2268_v63 = vadd.f32 %v2260_v38, %v2236_v49  ;;  %v2262_v17 = vmul.f32 %v2248_v14, %v23117_v7  ;;  %v23128_v57 = vld [vmem:[#allocation64_spill] sm:$0xff]  ;;  %v23135_v37 = vld [vmem:[#allocation78_spill] sm:$0xff] }
 0x25c   : > { %v13031_v27 = vpop.f32.mrf.mxu1  ;;  %v2269_v56 = vadd.f32 %v2261_v51, %v2237_v20  ;;  %v2290_v26 = vrot.slane %v2067_v0, 1  ;;  %v2291_v30 = vrot.slane %v13028_v12, 1  ;;  %v2283_v58 = vadd.f32 %v2275_v60, %v2267_v47  ;;  %v2344_v12 = vld [vmem:[%s22525_s4 + $0x38] sm:$0xff] }
 0x25d   : > { %v2287_v40 = vadd.f32 %v16920_v19, %v2271_v52  ;;  %v2293_v46 = vrot.slane %v13031_v27, 1  ;;  %v2276_v19 = vmul.f32 %v16925_v24, %v23118_v4  ;;  %v2277_v5 = vmul.f32 %v16947_v11, %v23119_v29  ;;  %v23132_v22 = vld [vmem:[#allocation16_spill] sm:$0xff]  ;;  %v23134_v27 = vld [vmem:[#allocation38_spill] sm:$0xff] }
 0x25e   : > { %v2077_v45 = vpop.f32.mrf.mxu1  ;;  %v2270_v53 = vadd.f32 %v2262_v17, %v2238_v6  ;;  %v2278_v13 = vmul.f32 %v1988_v36, %v23122_v25  ;;  %v2300_v24 = vsel %vm23123_vm9, %v2290_v26, %v2291_v30  ;;  %v2301_v49 = vsel %vm23126_vm10, %v2289_v33, %v2290_v26  ;;  %v23133_v6 = vld [vmem:[#allocation49_spill] sm:$0xff]  ;;  %v2343_v26 = vld [vmem:[%s22525_s4 + $0x30] sm:$0xff]  ;;  %v2338_v25 = vld [vmem:[%s22525_s4 + $0x8] sm:$0xff] }
 0x25f   : > { %v2292_v34 = vrot.slane %v2077_v45, 1  ;;  %v2319_v23 = vadd.f32 %v2311_v9, %v2287_v40  ;;  %v2284_v1 = vadd.f32 %v2276_v19, %v2268_v63  ;;  %v2285_v28 = vadd.f32 %v2277_v5, %v2269_v56  ;;  %v2341_v4 = vld [vmem:[%s22525_s4 + $0x20] sm:$0xff] }
 0x260   : > { %v13034_v61 = vpop.f32.mrf.mxu1  ;;  %v2286_v50 = vadd.f32 %v2278_v13, %v2270_v53  ;;  %v2305_v41 = vmul.f32 %v2300_v24, %v23129_v10  ;;  %v2272_v59 = vmul.f32 %v23134_v27, %v23133_v6  ;;  %v2281_v60 = vadd.f32 %v16945_v8, %v2265_v44  ;;  %v2340_v53 = vld [vmem:[%s22525_s4 + $0x18] sm:$0xff]  ;;  %v2337_v24 = vld [vmem:[%s22525_s4] sm:$0xff]  ;;  %v2847_v10 = vld [vmem:[%s22525_s4 + $0x188] sm:$0xff] }
 0x261   : > { %v2298_v35 = vsel %vm23120_vm3, %v2292_v34, %v2293_v46  ;;  %v2299_v54 = vsel %vm23121_vm15, %v2291_v30, %v2292_v34  ;;  %v2295_v2 = vrot.slane %v13034_v61, 1  ;;  %v2328_v32 = vadd.f32 %v17011_v42, %v2319_v23 }
 0x262   : > { %v2307_v55 = vmul.f32 %v2298_v35, %v23124_v48  ;;  %v2087_v11 = vpop.f32.mrf.mxu1  ;;  %v2306_v20 = vmul.f32 %v2299_v54, %v23127_v43  ;;  %v2304_v9 = vmul.f32 %v2301_v49, %v23135_v37  ;;  %v2280_v17 = vadd.f32 %v2272_v59, %v16940_v31  ;;  %v2370_v49 = vld [vmem:[%s22525_s4 + $0xc0] sm:$0xff]  ;;  %v2371_v43 = vld [vmem:[%s22525_s4 + $0xc8] sm:$0xff]  ;;  %v2679_v37 = vld [vmem:[%s22525_s4 + $0x298] sm:$0xff] }
 0x263   : > { %v2303_v16 = vsel %vm23125_vm7, %v2295_v2, %v2288_v3  ;;  %v2294_v39 = vrot.slane %v2087_v11, 1  ;;  %v2336_v18 = vmax.f32 %v2328_v32, 0.0  ;;  %v2313_v45 = vadd.f32 %v2305_v41, %v2281_v60  ;;  %v2364_v11 = vld [vmem:[%s22525_s4 + $0x90] sm:$0xff]  ;;  %v2846_v41 = vld [vmem:[%s22525_s4 + $0x180] sm:$0xff] }
 0x264   : > { %v2310_v0 = vmul.f32 %v2303_v16, %v23128_v57  ;;  %v2315_v33 = vadd.f32 %v2307_v55, %v2283_v58  ;;  %v2314_v7 = vadd.f32 %v2306_v20, %v2282_v21  ;;  %v2312_v34 = vadd.f32 %v2304_v9, %v2280_v17  ;;  %v2366_v16 = vld [vmem:[%s22525_s4 + $0xa0] sm:$0xff]  ;;  %v2372_v20 = vld [vmem:[%s22525_s4 + $0xd0] sm:$0xff]  ;;  %v2373_v57 = vld [vmem:[%s22525_s4 + $0xd8] sm:$0xff] }
 0x265   : > { %v2296_v14 = vsel %vm23130_vm12, %v2294_v39, %v2295_v2  ;;  %v2297_v52 = vsel %vm23096_vm1, %v2293_v46, %v2294_v39  ;;  %v17040_v47 = vadd.f32 %v2344_v12, %v2336_v18  ;;  %v2342_v46 = vld [vmem:[%s22525_s4 + $0x28] sm:$0xff]  ;;  %v2322_v5 = vadd.f32 %v17011_v42, %v2313_v45  ;;  %v2339_v2 = vld [vmem:[%s22525_s4 + $0x10] sm:$0xff]  ;;  %v2365_v12 = vld [vmem:[%s22525_s4 + $0x98] sm:$0xff] }
 0x266   : > { %v2318_v3 = vadd.f32 %v2310_v0, %v2286_v50  ;;  %v2308_v38 = vmul.f32 %v2297_v52, %v23131_v15  ;;  %v2309_v51 = vmul.f32 %v2296_v14, %v23132_v22  ;;  %v2324_v30 = vadd.f32 %v17011_v42, %v2315_v33  ;;  %v2367_v39 = vld [vmem:[%s22525_s4 + $0xa8] sm:$0xff]  ;;  %v2368_v18 = vld [vmem:[%s22525_s4 + $0xb0] sm:$0xff]  ;;  %v2369_v50 = vld [vmem:[%s22525_s4 + $0xb8] sm:$0xff] }
 0x267   : > { %13035 = vmatprep.subr.mxu0 %v17040_v47  ;;  %v2323_v58 = vadd.f32 %v17011_v42, %v2314_v7  ;;  %v2321_v54 = vadd.f32 %v17011_v42, %v2312_v34  ;;  %vm2711_vm8 = vcmask 654336   ;;  %v2848_v0 = vld [vmem:[%s22525_s4 + $0x190] sm:$0xff]  ;;  %v2845_v14 = vld [vmem:[%s22525_s4 + $0x178] sm:$0xff]  ;;  %v2680_v60 = vld [vmem:[%s22525_s4 + $0x2a0] sm:$0xff]  ;;  %vm14967_vm6 = vmmov 0  }
 0x268   : > { %13036 = vmatpush3.msra.mxu0 %v17040_v47  ;;  %v2327_v40 = vadd.f32 %v17011_v42, %v2318_v3  ;;  %v2317_v63 = vadd.f32 %v2309_v51, %v2285_v28  ;;  %v2316_v56 = vadd.f32 %v2308_v38, %v2284_v1  ;;  %v2332_v29 = vmax.f32 %v2324_v30, 0.0  ;;  %13086 = vmatprep.mubr.msk.f32.mxu1 %vm2711_vm8, %v2373_v57  ;;  %v2844_v52 = vld [vmem:[%s22525_s4 + $0x170] sm:$0xff]  ;;  %v2843_v3 = vld [vmem:[%s22525_s4 + $0x168] sm:$0xff] }
 0x269   : > { %v2331_v35 = vmax.f32 %v2323_v58, 0.0  ;;  %v2330_v1 = vmax.f32 %v2322_v5, 0.0  ;;  %v2329_v13 = vmax.f32 %v2321_v54, 0.0  ;;  %v23136_v28 = vmov 0.0   ;;  %v2674_v7 = vld [vmem:[%s22525_s4 + $0x270] sm:$0xff]  ;;  %v2673_v17 = vld [vmem:[%s22525_s4 + $0x268] sm:$0xff] }
 0x26a   : > { %v2335_v36 = vmax.f32 %v2327_v40, 0.0  ;;  %v2326_v8 = vadd.f32 %v17011_v42, %v2317_v63  ;;  %v2325_v44 = vadd.f32 %v17011_v42, %v2316_v56  ;;  %v17084_v32 = vadd.f32 %v2340_v53, %v2332_v29  ;;  %v2675_v40 = vld [vmem:[%s22525_s4 + $0x278] sm:$0xff]  ;;  %v2677_v34 = vld [vmem:[%s22525_s4 + $0x288] sm:$0xff]  ;;  %v2676_v29 = vld [vmem:[%s22525_s4 + $0x280] sm:$0xff] }
 0x26b   : > { %v17091_v42 = vadd.f32 %v2339_v2, %v2331_v35  ;;  %v17098_v48 = vadd.f32 %v2338_v25, %v2330_v1  ;;  %v17102_v55 = vadd.f32 %v2337_v24, %v2329_v13  ;;  %vm2994_vm0 = vcmask 588800  }
 0x26c   : > { %v17061_v21 = vadd.f32 %v2343_v26, %v2335_v36  ;;  %v2334_v31 = vmax.f32 %v2326_v8, 0.0  ;;  %v2333_v23 = vmax.f32 %v2325_v44, 0.0  ;;  %v2678_v26 = vld [vmem:[%s22525_s4 + $0x290] sm:$0xff]  ;;  %vm11133_vm5 = vcmask 516096  }
 0x26d   : > { %vm11233_vm4 = vcmask 40960  }
 0x26e   : > { %13037 = vmatprep.subr.mxu0 %v17061_v21  ;;  %v17068_v19 = vadd.f32 %v2342_v46, %v2334_v31  ;;  %v17076_v61 = vadd.f32 %v2341_v4, %v2333_v23  ;;  %v2672_v46 = vld [vmem:[%s22525_s4 + $0x260] sm:$0xff]  ;;  %v2671_v4 = vld [vmem:[%s22525_s4 + $0x258] sm:$0xff] }
 0x26f   : > { %13038 = vmatpush3.msra.mxu0 %v17061_v21 }
 0x270   : > { %13039 = vmatprep.subr.mxu0 %v17068_v19 }
 0x271   : > { %13040 = vmatpush3.msra.mxu0 %v17068_v19 }
 0x272   : > { %13041 = vmatprep.subr.mxu0 %v17076_v61 }
 0x273   : > { %13042 = vmatpush3.msra.mxu0 %v17076_v61 }
 0x274   : > { %13043 = vmatprep.subr.mxu0 %v17084_v32 }
 0x275   : > { %13044 = vmatpush3.msra.mxu0 %v17084_v32 }
 0x276   : > { %13045 = vmatprep.subr.mxu0 %v17091_v42 }
 0x277   : > { %13046 = vmatpush3.msra.mxu0 %v17091_v42 }
 0x278   : > { %13047 = vmatprep.subr.mxu0 %v17098_v48 }
 0x279   : > { %13048 = vmatpush3.msra.mxu0 %v17098_v48 }
 0x27a   : > { %13049 = vmatprep.subr.mxu0 %v17102_v55 }
 0x27b   : > { %13050 = vmatpush3.msra.mxu0 %v17102_v55 }
 0x27c   : > { %13052 = vmatmul.mubr.msk.f32.vlgmr.msra.gmra.mxu0 %vm2525_vm13, %v2364_v11  ;;  %13098 = vmatprep.subr.mxu0 %v23136_v28 }
 0x27d   : > { %13054 = vmatprep.mubr.msk.f32.mxu0 %vm2525_vm13, %v2365_v12  ;;  %13099 = vmatpush3.msra.mxu0 %v2848_v0 }
 0x27e   : > { %13100 = vmatprep.subr.mxu0 %v23136_v28 }
 0x27f   : > { %13101 = vmatpush3.msra.mxu0 %v2847_v10 }
 0x280   : > { %13055 = vmatmul.mubr.msk.f32.gmra.mxu0 %vm2525_vm13, %v2366_v16  ;;  %13102 = vmatprep.subr.mxu0 %v23136_v28 }
 0x281   : > { %13057 = vmatprep.mubr.msk.f32.mxu0 %vm2525_vm13, %v2367_v39  ;;  %13103 = vmatpush3.msra.mxu0 %v2846_v41  ;;  %v2374_v41 = vld [vmem:[%s22525_s4 + $0xe0] sm:$0xff] }
 0x282   : > { %13104 = vmatprep.subr.mxu0 %v23136_v28 }
 0x283   : > { %13105 = vmatpush3.msra.mxu0 %v2845_v14  ;;  %v2375_v14 = vld [vmem:[%s22525_s4 + $0xe8] sm:$0xff] }
 0x284   : > { %13058 = vmatmul.mubr.msk.f32.gmra.mxu0 %vm2525_vm13, %v2368_v18  ;;  %13106 = vmatprep.subr.mxu0 %v23136_v28 }
 0x285   : > { %13060 = vmatprep.mubr.msk.f32.mxu0 %vm2525_vm13, %v2369_v50  ;;  %13107 = vmatpush3.msra.mxu0 %v2844_v52  ;;  %v2376_v52 = vld [vmem:[%s22525_s4 + $0xf0] sm:$0xff] }
 0x286   : > { %13108 = vmatprep.subr.mxu0 %v23136_v28 }
 0x287   : > { %13109 = vmatpush3.msra.mxu0 %v2843_v3  ;;  %v2377_v3 = vld [vmem:[%s22525_s4 + $0xf8] sm:$0xff] }
 0x288   : > { %13061 = vmatmul.mubr.msk.f32.gmra.mxu0 %vm2525_vm13, %v2370_v49  ;;  %13110 = vmatprep.subr.mxu0 %v23136_v28 }
 0x289   : > { %13063 = vmatprep.mubr.msk.f32.mxu0 %vm2525_vm13, %v2371_v43 }
 0x28c   : > { %13064 = vmatmul.mubr.msk.f32.gmra.mxu0 %vm2525_vm13, %v2372_v20 }
 0x28d   : > { %13114 = vmatprep.mubr.msk.f32.mxu0 %vm14967_vm6, %v23136_v28 }
 0x33c   : > { %v13053_v15 = vpop.f32.mrf.mxu0 }
 0x33d   : > { %v2702_v5 = vmul.f32 %v13053_v15, %v2677_v34  ;;  %v2682_v49 = vmul.f32 %v13053_v15, %v2672_v46  ;;  %v2378_v15 = vld [vmem:[%s22525_s4 + $0x100] sm:$0xff] }
 0x33e   : > { %v2622_v38 = vpop.f32.mrf.mxu0 }
 0x33f   : > { %v2701_v54 = vmul.f32 %v2676_v29, %v2622_v38  ;;  %v2681_v57 = vmul.f32 %v2671_v4, %v2622_v38  ;;  %v2379_v38 = vld [vmem:[%s22525_s4 + $0x108] sm:$0xff] }
 0x340   : > { %v13056_v22 = vpop.f32.mrf.mxu0 }
 0x341   : > { %v2704_v36 = vmul.f32 %v13056_v22, %v2679_v37  ;;  %v2684_v11 = vmul.f32 %v13056_v22, %v2674_v7  ;;  %v2380_v22 = vld [vmem:[%s22525_s4 + $0x110] sm:$0xff] }
 0x342   : > { %v2632_v51 = vpop.f32.mrf.mxu0 }
 0x343   : > { %v2703_v31 = vmul.f32 %v2678_v26, %v2632_v51  ;;  %v2683_v39 = vmul.f32 %v2673_v17, %v2632_v51  ;;  %v2842_v51 = vld [vmem:[%s22525_s4 + $0x160] sm:$0xff] }
 0x344   : > { %v13059_v33 = vpop.f32.mrf.mxu0  ;;  %13111 = vmatpush3.msra.mxu0 %v2842_v51 }
 0x345   : > { %v2696_v53 = vmul.f32 %v13059_v33, %v2671_v4  ;;  %v2686_v43 = vmul.f32 %v13059_v33, %v2676_v29  ;;  %13112 = vmatprep.subr.mxu0 %v23136_v28  ;;  %v2841_v33 = vld [vmem:[%s22525_s4 + $0x158] sm:$0xff]  ;;  %v2856_v4 = vld [vmem:[%s22525_s4 + $0x210] sm:$0xff]  ;;  %v3125_v29 = vld [vmem:[%s17280_s27 + $0x8] sm:$0xff] }
 0x346   : > { %v2642_v6 = vpop.f32.mrf.mxu0  ;;  %13113 = vmatpush3.msra.mxu0 %v2841_v33 }
 0x347   : > { %v2705_v56 = vmul.f32 %v2680_v60, %v2642_v6  ;;  %v2706_v25 = vadd.f32 %v2701_v54, %v2696_v53  ;;  %v2685_v13 = vmul.f32 %v2675_v40, %v2642_v6  ;;  %v2691_v10 = vsub.f32 %v2681_v57, %v2686_v43  ;;  %13214 = vmatprep.subr.mxu0 %v23136_v28  ;;  %v17243_v6 = vld [vmem:[%s22525_s4 + $0x40] sm:$0xff] }
 0x348   : > { %v13062_v27 = vpop.f32.mrf.mxu0 }
 0x349   : > { %v2698_v8 = vmul.f32 %v13062_v27, %v2673_v17  ;;  %v2688_v12 = vmul.f32 %v13062_v27, %v2678_v26  ;;  %v2849_v27 = vld [vmem:[%s22525_s4 + $0x1d8] sm:$0xff]  ;;  %v2850_v17 = vld [vmem:[%s22525_s4 + $0x1e0] sm:$0xff]  ;;  %v2851_v26 = vld [vmem:[%s22525_s4 + $0x1e8] sm:$0xff] }
 0x34a   : > { %v2652_v59 = vpop.f32.mrf.mxu0 }
 0x34b   : > { %v2697_v23 = vmul.f32 %v2672_v46, %v2652_v59  ;;  %v2708_v35 = vadd.f32 %v2703_v31, %v2698_v8  ;;  %v2687_v18 = vmul.f32 %v2677_v34, %v2652_v59  ;;  %v2693_v20 = vsub.f32 %v2683_v39, %v2688_v12  ;;  %v2852_v8 = vld [vmem:[%s22525_s4 + $0x1f0] sm:$0xff]  ;;  %v3128_v46 = vld [vmem:[%s17280_s27 + $0x20] sm:$0xff]  ;;  %v2855_v31 = vld [vmem:[%s22525_s4 + $0x208] sm:$0xff] }
 0x34c   : > { %v13065_v9 = vpop.f32.mrf.mxu0  ;;  %v2854_v34 = vld [vmem:[%s22525_s4 + $0x200] sm:$0xff] }
 0x34d   : > { %v2700_v63 = vmul.f32 %v13065_v9, %v2675_v40  ;;  %v2690_v2 = vmul.f32 %v13065_v9, %v2680_v60  ;;  %v2707_v1 = vadd.f32 %v2702_v5, %v2697_v23  ;;  %v2692_v0 = vsub.f32 %v2682_v49, %v2687_v18  ;;  %v3127_v23 = vld [vmem:[%s17280_s27 + $0x18] sm:$0xff]  ;;  %v3124_v5 = vld [vmem:[%s17280_s27] sm:$0xff] }
 0x34e   : > { %v2662_v45 = vpop.f32.mrf.mxu0 }
 0x34f   : > { %v2710_v44 = vadd.f32 %v2705_v56, %v2700_v63  ;;  %v2699_v30 = vmul.f32 %v2674_v7, %v2662_v45  ;;  %v2689_v24 = vmul.f32 %v2679_v37, %v2662_v45  ;;  %v2695_v16 = vsub.f32 %v2685_v13, %v2690_v2  ;;  %v3131_v45 = vld [vmem:[%s17280_s27 + $0x38] sm:$0xff] }
 0x351   : > { %13066 = vmatprep.subr.mxu1 %v2710_v44  ;;  %v2709_v58 = vadd.f32 %v2704_v36, %v2699_v30  ;;  %v2694_v50 = vsub.f32 %v2684_v11, %v2689_v24  ;;  %v3130_v36 = vld [vmem:[%s17280_s27 + $0x30] sm:$0xff]  ;;  %v3129_v30 = vld [vmem:[%s17280_s27 + $0x28] sm:$0xff] }
 0x352   : > { %13067 = vmatpush3.msra.mxu1 %v2710_v44  ;;  %v2853_v44 = vld [vmem:[%s22525_s4 + $0x1f8] sm:$0xff] }
 0x353   : > { %13068 = vmatprep.subr.mxu1 %v2709_v58 }
 0x354   : > { %13069 = vmatpush3.msra.mxu1 %v2709_v58  ;;  %v3126_v58 = vld [vmem:[%s17280_s27 + $0x10] sm:$0xff] }
 0x355   : > { %13070 = vmatprep.subr.mxu1 %v2708_v35 }
 0x356   : > { %13071 = vmatpush3.msra.mxu1 %v2708_v35 }
 0x357   : > { %13072 = vmatprep.subr.mxu1 %v2707_v1 }
 0x358   : > { %13073 = vmatpush3.msra.mxu1 %v2707_v1 }
 0x359   : > { %13074 = vmatprep.subr.mxu1 %v2706_v25 }
 0x35a   : > { %13075 = vmatpush3.msra.mxu1 %v2706_v25 }
 0x35b   : > { %13076 = vmatprep.subr.mxu1 %v2695_v16 }
 0x35c   : > { %13077 = vmatpush3.msra.mxu1 %v2695_v16 }
 0x35d   : > { %13078 = vmatprep.subr.mxu1 %v2694_v50 }
 0x35e   : > { %13079 = vmatpush3.msra.mxu1 %v2694_v50 }
 0x35f   : > { %13080 = vmatprep.subr.mxu1 %v2693_v20 }
 0x360   : > { %13081 = vmatpush3.msra.mxu1 %v2693_v20 }
 0x361   : > { %13082 = vmatprep.subr.mxu1 %v2692_v0 }
 0x362   : > { %13083 = vmatpush3.msra.mxu1 %v2692_v0 }
 0x363   : > { %13084 = vmatprep.subr.mxu1 %v2691_v10 }
 0x364   : > { %13085 = vmatpush3.msra.mxu1 %v2691_v10 }
 0x365   : > { %13087 = vmatmul.mubr.msk.f32.vlgmr.msra.gmra.mxu1 %vm2711_vm8, %v2374_v41  ;;  %13141 = vmatprep.subr.mxu1 %v17243_v6 }
 0x366   : > { %13089 = vmatprep.mubr.msk.f32.mxu1 %vm2711_vm8, %v2375_v14  ;;  %13142 = vmatpush3.msra.mxu1 %v17243_v6 }
 0x369   : > { %13090 = vmatmul.mubr.msk.f32.gmra.mxu1 %vm2711_vm8, %v2376_v52 }
 0x36a   : > { %13092 = vmatprep.mubr.msk.f32.mxu1 %vm2711_vm8, %v2377_v3 }
 0x36d   : > { %13093 = vmatmul.mubr.msk.f32.gmra.mxu1 %vm2711_vm8, %v2378_v15 }
 0x36e   : > { %13095 = vmatprep.mubr.msk.f32.mxu1 %vm2711_vm8, %v2379_v38 }
 0x371   : > { %13096 = vmatmul.mubr.msk.f32.gmra.mxu1 %vm2711_vm8, %v2380_v22 }
 0x372   : > { %13159 = vmatprep.mubr.msk.f32.mxu1 %vm2994_vm0, %v2849_v27 }
 0x425   : > { %v13088_v59 = vpop.f32.mrf.mxu1 }
 0x427   : > { %v2802_v60 = vpop.f32.mrf.mxu1 }
 0x428   : > { %13115 = vmatmul.mubr.msk.f32.vlgmr.msra.gmra.mxu0 %vm2525_vm13, %v2802_v60 }
 0x429   : > { %v13091_v37 = vpop.f32.mrf.mxu1  ;;  %13117 = vmatprep.mubr.msk.f32.mxu0 %vm14967_vm6, %v23136_v28 }
 0x42b   : > { %v2812_v9 = vpop.f32.mrf.mxu1 }
 0x42c   : > { %13118 = vmatmul.mubr.msk.f32.gmra.mxu0 %vm2525_vm13, %v13088_v59 }
 0x42d   : > { %v13094_v40 = vpop.f32.mrf.mxu1  ;;  %13120 = vmatprep.mubr.msk.f32.mxu0 %vm14967_vm6, %v23136_v28 }
 0x42f   : > { %v2822_v63 = vpop.f32.mrf.mxu1 }
 0x430   : > { %13121 = vmatmul.mubr.msk.f32.gmra.mxu0 %vm2525_vm13, %v2812_v9 }
 0x431   : > { %v13097_v56 = vpop.f32.mrf.mxu1  ;;  %13123 = vmatprep.mubr.msk.f32.mxu0 %vm14967_vm6, %v23136_v28 }
 0x432   : > { %13143 = vmatprep.subr.mxu1 %v13097_v56 }
 0x433   : > { %v2832_v7 = vpop.f32.mrf.mxu1  ;;  %13144 = vmatpush3.msra.mxu1 %v13097_v56 }
 0x434   : > { %13124 = vmatmul.mubr.msk.f32.gmra.mxu0 %vm2525_vm13, %v13091_v37  ;;  %13145 = vmatprep.subr.mxu1 %v2832_v7 }
 0x435   : > { %13146 = vmatpush3.msra.mxu1 %v2832_v7  ;;  %13126 = vmatprep.mubr.msk.f32.mxu0 %vm14967_vm6, %v23136_v28 }
 0x436   : > { %13147 = vmatprep.subr.mxu1 %v13094_v40 }
 0x437   : > { %13148 = vmatpush3.msra.mxu1 %v13094_v40 }
 0x438   : > { %13127 = vmatmul.mubr.msk.f32.gmra.mxu0 %vm2525_vm13, %v2822_v63  ;;  %13149 = vmatprep.subr.mxu1 %v2822_v63 }
 0x439   : > { %13150 = vmatpush3.msra.mxu1 %v2822_v63  ;;  %13129 = vmatprep.mubr.msk.f32.mxu0 %vm14967_vm6, %v23136_v28 }
 0x43a   : > { %13151 = vmatprep.subr.mxu1 %v13091_v37 }
 0x43b   : > { %13152 = vmatpush3.msra.mxu1 %v13091_v37 }
 0x43c   : > { %13130 = vmatmul.mubr.msk.f32.gmra.mxu0 %vm2525_vm13, %v13094_v40  ;;  %13153 = vmatprep.subr.mxu1 %v2812_v9 }
 0x43d   : > { %13154 = vmatpush3.msra.mxu1 %v2812_v9  ;;  %13132 = vmatprep.mubr.msk.f32.mxu0 %vm14967_vm6, %v23136_v28 }
 0x43e   : > { %13155 = vmatprep.subr.mxu1 %v13088_v59 }
 0x43f   : > { %13156 = vmatpush3.msra.mxu1 %v13088_v59 }
 0x440   : > { %13133 = vmatmul.mubr.msk.f32.gmra.mxu0 %vm2525_vm13, %v2832_v7  ;;  %13157 = vmatprep.subr.mxu1 %v2802_v60 }
 0x441   : > { %13158 = vmatpush3.msra.mxu1 %v2802_v60  ;;  %13135 = vmatprep.mubr.msk.f32.mxu0 %vm14967_vm6, %v23136_v28 }
 0x442   : > { %13160 = vmatmul.mubr.msk.f32.vlgmr.msra.gmra.mxu1 %vm2994_vm0, %v2850_v17  ;;  %13171 = vmatprep.subr.mxu1 %v23136_v28  ;;  %v2362_v17 = vld [vmem:[%s22525_s4 + $0x80] sm:$0xff] }
 0x443   : > { %13162 = vmatprep.mubr.msk.f32.mxu1 %vm2994_vm0, %v2851_v26  ;;  %13172 = vmatpush3.msra.mxu1 %v3131_v45 }
 0x444   : > { %13136 = vmatmul.mubr.msk.f32.gmra.mxu0 %vm2525_vm13, %v13097_v56  ;;  %13173 = vmatprep.subr.mxu1 %v23136_v28 }
 0x445   : > { %13138 = vmatprep.mubr.msk.f32.mxu0 %vm14967_vm6, %v23136_v28  ;;  %13174 = vmatpush3.msra.mxu1 %v3130_v36  ;;  %v2361_v36 = vld [vmem:[%s22525_s4 + $0x78] sm:$0xff] }
 0x446   : > { %13163 = vmatmul.mubr.msk.f32.gmra.mxu1 %vm2994_vm0, %v2852_v8  ;;  %13175 = vmatprep.subr.mxu1 %v23136_v28 }
 0x447   : > { %13165 = vmatprep.mubr.msk.f32.mxu1 %vm2994_vm0, %v2853_v44  ;;  %13176 = vmatpush3.msra.mxu1 %v3129_v30  ;;  %v2360_v44 = vld [vmem:[%s22525_s4 + $0x70] sm:$0xff] }
 0x448   : > { %13139 = vmatmul.mubr.msk.f32.gmra.mxu0 %vm2525_vm13, %v17243_v6  ;;  %13177 = vmatprep.subr.mxu1 %v23136_v28 }
 0x449   : > { %13178 = vmatpush3.msra.mxu1 %v3128_v46  ;;  %13230 = vmatprep.mubr.msk.f32.mxu0 %vm14967_vm6, %v23136_v28 }
 0x44a   : > { %13166 = vmatmul.mubr.msk.f32.gmra.mxu1 %vm2994_vm0, %v2854_v34  ;;  %13179 = vmatprep.subr.mxu1 %v23136_v28  ;;  %v2359_v34 = vld [vmem:[%s22525_s4 + $0x68] sm:$0xff] }
 0x44b   : > { %13168 = vmatprep.mubr.msk.f32.mxu1 %vm2994_vm0, %v2855_v31  ;;  %13180 = vmatpush3.msra.mxu1 %v3127_v23  ;;  %v2358_v23 = vld [vmem:[%s22525_s4 + $0x60] sm:$0xff] }
 0x44c   : > { %13181 = vmatprep.subr.mxu1 %v23136_v28  ;;  %13215 = vmatpush3.msra.mxu0 %v2362_v17 }
 0x44d   : > { %13182 = vmatpush3.msra.mxu1 %v3126_v58  ;;  %13216 = vmatprep.subr.mxu0 %v23136_v28 }
 0x44e   : > { %13169 = vmatmul.mubr.msk.f32.gmra.mxu1 %vm2994_vm0, %v2856_v4  ;;  %13183 = vmatprep.subr.mxu1 %v23136_v28 }
 0x44f   : > { %13184 = vmatpush3.msra.mxu1 %v3125_v29  ;;  %13187 = vmatprep.mubr.msk.f32.mxu1 %vm14967_vm6, %v23136_v28  ;;  %v2357_v29 = vld [vmem:[%s22525_s4 + $0x58] sm:$0xff] }
 0x450   : > { %13185 = vmatprep.subr.mxu1 %v23136_v28  ;;  %13217 = vmatpush3.msra.mxu0 %v2361_v36  ;;  %v4223_v36 = vld [vmem:[%s22527_s6 + $0x100] sm:$0xff] }
 0x451   : > { %13186 = vmatpush3.msra.mxu1 %v3124_v5  ;;  %13218 = vmatprep.subr.mxu0 %v23136_v28 }
 0x452   : > { %13219 = vmatpush3.msra.mxu0 %v2360_v44  ;;  %v4216_v44 = vld [vmem:[%s22527_s6 + $0xc8] sm:$0xff] }
 0x453   : > { %13220 = vmatprep.subr.mxu0 %v23136_v28 }
 0x454   : > { %13221 = vmatpush3.msra.mxu0 %v2359_v34 }
 0x455   : > { %13222 = vmatprep.subr.mxu0 %v23136_v28 }
 0x456   : > { %13223 = vmatpush3.msra.mxu0 %v2358_v23  ;;  %v4208_v23 = vld [vmem:[%s22527_s6 + $0x88] sm:$0xff] }
 0x457   : > { %13224 = vmatprep.subr.mxu0 %v23136_v28 }
 0x458   : > { %13225 = vmatpush3.msra.mxu0 %v2357_v29  ;;  %v4200_v29 = vld [vmem:[%s22527_s6 + $0x48] sm:$0xff] }
 0x459   : > { %13226 = vmatprep.subr.mxu0 %v23136_v28 }
 0x4e8   : > { %v2950_v53 = vpop.f32.mrf.mxu0 }
 0x4e9   : > { %13188 = vmatmul.mubr.msk.f32.vlgmr.msra.gmra.mxu1 %vm2525_vm13, %v2950_v53  ;;  %v2356_v53 = vld [vmem:[%s22525_s4 + $0x50] sm:$0xff] }
 0x4ea   : > { %v13116_v35 = vpop.f32.mrf.mxu0  ;;  %13190 = vmatprep.mubr.msk.f32.mxu1 %vm14967_vm6, %v23136_v28  ;;  %13227 = vmatpush3.msra.mxu0 %v2356_v53 }
 0x4eb   : > { %13228 = vmatprep.subr.mxu0 %v23136_v28 }
 0x4ec   : > { %v2955_v54 = vpop.f32.mrf.mxu0 }
 0x4ed   : > { %13191 = vmatmul.mubr.msk.f32.gmra.mxu1 %vm2525_vm13, %v2955_v54 }
 0x4ee   : > { %v13119_v2 = vpop.f32.mrf.mxu0  ;;  %13193 = vmatprep.mubr.msk.f32.mxu1 %vm14967_vm6, %v23136_v28 }
 0x4ef   : > { %v2355_v2 = vld [vmem:[%s22525_s4 + $0x48] sm:$0xff] }
 0x4f0   : > { %v2960_v1 = vpop.f32.mrf.mxu0  ;;  %13229 = vmatpush3.msra.mxu0 %v2355_v2  ;;  %v4192_v2 = vld [vmem:[%s22527_s6 + $0x8] sm:$0xff] }
 0x4f1   : > { %13194 = vmatmul.mubr.msk.f32.gmra.mxu1 %vm2525_vm13, %v2960_v1 }
 0x4f2   : > { %v13122_v25 = vpop.f32.mrf.mxu0  ;;  %13196 = vmatprep.mubr.msk.f32.mxu1 %vm14967_vm6, %v23136_v28 }
 0x4f4   : > { %v2965_v13 = vpop.f32.mrf.mxu0 }
 0x4f5   : > { %13197 = vmatmul.mubr.msk.f32.gmra.mxu1 %vm2525_vm13, %v2965_v13 }
 0x4f6   : > { %v13125_v24 = vpop.f32.mrf.mxu0  ;;  %13199 = vmatprep.mubr.msk.f32.mxu1 %vm14967_vm6, %v23136_v28 }
 0x4f7   : > { %v4248_v24 = vld [vmem:[%s22527_s6 + $0x1c8] sm:$0xff] }
 0x4f8   : > { %v2970_v11 = vpop.f32.mrf.mxu0  ;;  %4295 = vmatprep.subr.mxu0 %v4248_v24  ;;  %v4250_v24 = vld [vmem:[%s22527_s6 + $0x1d8] sm:$0xff] }
 0x4f9   : > { %13200 = vmatmul.mubr.msk.f32.gmra.mxu1 %vm2525_vm13, %v2970_v11 }
 0x4fa   : > { %v13128_v12 = vpop.f32.mrf.mxu0  ;;  %13202 = vmatprep.mubr.msk.f32.mxu1 %vm14967_vm6, %v23136_v28 }
 0x4fc   : > { %v2975_v16 = vpop.f32.mrf.mxu0 }
 0x4fd   : > { %13203 = vmatmul.mubr.msk.f32.gmra.mxu1 %vm2525_vm13, %v2975_v16 }
 0x4fe   : > { %v13131_v39 = vpop.f32.mrf.mxu0  ;;  %13205 = vmatprep.mubr.msk.f32.mxu1 %vm14967_vm6, %v23136_v28 }
 0x500   : > { %v2980_v18 = vpop.f32.mrf.mxu0 }
 0x501   : > { %13206 = vmatmul.mubr.msk.f32.gmra.mxu1 %vm2525_vm13, %v2980_v18 }
 0x502   : > { %v13134_v50 = vpop.f32.mrf.mxu0  ;;  %13208 = vmatprep.mubr.msk.f32.mxu1 %vm14967_vm6, %v23136_v28  ;;  %v17356_v0 = vpop.f32.mrf.mxu1 }
 0x504   : > { %v2985_v49 = vpop.f32.mrf.mxu0  ;;  %v17358_v10 = vpop.f32.mrf.mxu1 }
 0x505   : > { %13209 = vmatmul.mubr.msk.f32.gmra.mxu1 %vm2525_vm13, %v2985_v49 }
 0x506   : > { %v13137_v43 = vpop.f32.mrf.mxu0  ;;  %13211 = vmatprep.mubr.msk.f32.mxu1 %vm14967_vm6, %v23136_v28  ;;  %v17360_v41 = vpop.f32.mrf.mxu1 }
 0x508   : > { %v2990_v20 = vpop.f32.mrf.mxu0  ;;  %v17362_v14 = vpop.f32.mrf.mxu1 }
 0x509   : > { %13212 = vmatmul.mubr.msk.f32.gmra.mxu1 %vm2525_vm13, %v2990_v20 }
 0x50a   : > { %v13140_v57 = vpop.f32.mrf.mxu0  ;;  %v17364_v52 = vpop.f32.mrf.mxu1 }
 0x50c   : > { %v17366_v3 = vpop.f32.mrf.mxu1 }
 0x50e   : > { %v17368_v15 = vpop.f32.mrf.mxu1 }
 0x510   : > { %v17370_v38 = vpop.f32.mrf.mxu1 }
 0x5a9   : > { %v17372_v22 = vpop.f32.mrf.mxu1 }
 0x5aa   : > { %v3269_v51 = vsel %vm2525_vm13, %v17372_v22, -inf }
 0x5ab   : > { %3270 = vmax.xlane.f32.xlu0 %v3269_v51  ;;  %v13189_v33 = vpop.f32.mrf.mxu1 }
 0x5ad   : > { %v17376_v6 = vpop.f32.mrf.mxu1 }
 0x5ae   : > { %v3272_v27 = vsel %vm2525_vm13, %v17376_v6, -inf }
 0x5af   : > { %3273 = vmax.xlane.f32.xlu0 %v3272_v27  ;;  %v13192_v59 = vpop.f32.mrf.mxu1 }
 0x5b0   : > { %v4247_v59 = vld [vmem:[%s22527_s6 + $0x1c0] sm:$0xff] }
 0x5b1   : > { %v17380_v60 = vpop.f32.mrf.mxu1 }
 0x5b2   : > { %v3275_v37 = vsel %vm2525_vm13, %v17380_v60, -inf }
 0x5b3   : > { %3276 = vmax.xlane.f32.xlu1 %v3275_v37  ;;  %v13195_v9 = vpop.f32.mrf.mxu1 }
 0x5b4   : > { %v4239_v9 = vld [vmem:[%s22527_s6 + $0x180] sm:$0xff] }
 0x5b5   : > { %v17384_v40 = vpop.f32.mrf.mxu1 }
 0x5b6   : > { %v3278_v63 = vsel %vm2525_vm13, %v17384_v40, -inf }
 0x5b7   : > { %3279 = vmax.xlane.f32.xlu1 %v3278_v63  ;;  %v13198_v56 = vpop.f32.mrf.mxu1  ;;  %v4232_v63 = vld [vmem:[%s22527_s6 + $0x148] sm:$0xff] }
 0x5b9   : > { %v17388_v7 = vpop.f32.mrf.mxu1 }
 0x5ba   : > { %v3281_v26 = vsel %vm2525_vm13, %v17388_v7, -inf }
 0x5bb   : > { %3282 = vmax.xlane.f32.xlu0 %v3281_v26  ;;  %v13201_v45 = vpop.f32.mrf.mxu1  ;;  %v4224_v26 = vld [vmem:[%s22527_s6 + $0x108] sm:$0xff] }
 0x5bd   : > { %v17399_v8 = vpop.f32.mrf.mxu1 }
 0x5be   : > { %v3284_v30 = vsel %vm2525_vm13, %v17399_v8, -inf }
 0x5bf   : > { %3285 = vmax.xlane.f32.xlu1 %v3284_v30  ;;  %v13204_v46 = vpop.f32.mrf.mxu1 }
 0x5c0   : > { %v4215_v46 = vld [vmem:[%s22527_s6 + $0xc0] sm:$0xff] }
 0x5c1   : > { %v17411_v31 = vpop.f32.mrf.mxu1 }
 0x5c2   : > { %v3287_v58 = vsel %vm2525_vm13, %v17411_v31, -inf }
 0x5c3   : > { %3288 = vmax.xlane.f32.xlu0 %v3287_v58  ;;  %v13207_v4 = vpop.f32.mrf.mxu1 }
 0x5c5   : > { %v17423_v5 = vpop.f32.mrf.mxu1 }
 0x5c6   : > { %v3290_v35 = vsel %vm2525_vm13, %v17423_v5, -inf }
 0x5c7   : > { %3291 = vmax.xlane.f32.xlu1 %v3290_v35  ;;  %v13210_v54 = vpop.f32.mrf.mxu1  ;;  %v4199_v35 = vld [vmem:[%s22527_s6 + $0x40] sm:$0xff] }
 0x5c9   : > { %v17435_v1 = vpop.f32.mrf.mxu1 }
 0x5ca   : > { %v3293_v25 = vsel %vm2525_vm13, %v17435_v1, -inf }
 0x5cb   : > { %3294 = vmax.xlane.f32.xlu0 %v3293_v25  ;;  %v13213_v13 = vpop.f32.mrf.mxu1 }
 0x634   : > { %v3271_v11 = vpop.xlane.xlu0 %3270 }
 0x635   : > { %v3296_v12 = vsub.f32 %v17372_v22, %v3271_v11 }
 0x637   : > { %v3305_v16 = vmul.f32 1.442695, %v3296_v12 }
 0x638   : > { %v3274_v39 = vpop.xlane.xlu0 %3273 }
 0x639   : > { %14479 = vpow2.f32 %v3305_v16  ;;  %v3297_v18 = vsub.f32 %v17376_v6, %v3274_v39 }
 0x63b   : > { %v3307_v50 = vmul.f32 1.442695, %v3297_v18 }
 0x63c   : > { %v3277_v49 = vpop.xlane.xlu1 %3276 }
 0x63d   : > { %14481 = vpow2.f32 %v3307_v50  ;;  %v3298_v43 = vsub.f32 %v17380_v60, %v3277_v49  ;;  %v4240_v60 = vld [vmem:[%s22527_s6 + $0x188] sm:$0xff]  ;;  %v4249_v49 = vld [vmem:[%s22527_s6 + $0x1d0] sm:$0xff] }
 0x63f   : > { %v3309_v20 = vmul.f32 1.442695, %v3298_v43  ;;  %v4242_v43 = vld [vmem:[%s22527_s6 + $0x198] sm:$0xff] }
 0x640   : > { %v3280_v57 = vpop.xlane.xlu1 %3279 }
 0x641   : > { %14483 = vpow2.f32 %v3309_v20  ;;  %v3299_v51 = vsub.f32 %v17384_v40, %v3280_v57  ;;  %v4241_v20 = vld [vmem:[%s22527_s6 + $0x190] sm:$0xff]  ;;  %v4234_v57 = vld [vmem:[%s22527_s6 + $0x158] sm:$0xff] }
 0x643   : > { %v3311_v33 = vmul.f32 1.442695, %v3299_v51  ;;  %v4233_v51 = vld [vmem:[%s22527_s6 + $0x150] sm:$0xff] }
 0x644   : > { %v3283_v27 = vpop.xlane.xlu0 %3282 }
 0x645   : > { %14485 = vpow2.f32 %v3311_v33  ;;  %v3300_v22 = vsub.f32 %v17388_v7, %v3283_v27  ;;  %v4231_v7 = vld [vmem:[%s22527_s6 + $0x140] sm:$0xff]  ;;  %v4226_v33 = vld [vmem:[%s22527_s6 + $0x118] sm:$0xff]  ;;  %v4225_v27 = vld [vmem:[%s22527_s6 + $0x110] sm:$0xff] }
 0x646   : > { %v17450_v6 = vpop.eup %14479 }
 0x647   : > { %v3313_v37 = vmul.f32 1.442695, %v3300_v22  ;;  %13231 = vmatmul.mubr.msk.f32.vlgmr.msra.gmra.mxu0 %vm2525_vm13, %v17450_v6  ;;  %v4218_v22 = vld [vmem:[%s22527_s6 + $0xd8] sm:$0xff] }
 0x648   : > { %v3286_v40 = vpop.xlane.xlu1 %3285  ;;  %13233 = vmatprep.mubr.msk.f32.mxu0 %vm14967_vm6, %v23136_v28  ;;  %4296 = vmatpush1.msra.mxu0 %v4247_v59  ;;  %v4217_v59 = vld [vmem:[%s22527_s6 + $0xd0] sm:$0xff] }
 0x649   : > { %14487 = vpow2.f32 %v3313_v37  ;;  %v3301_v56 = vsub.f32 %v17399_v8, %v3286_v40  ;;  %4297 = vmatprep.subr.mxu0 %v4240_v60  ;;  %v4210_v60 = vld [vmem:[%s22527_s6 + $0x98] sm:$0xff]  ;;  %v4209_v37 = vld [vmem:[%s22527_s6 + $0x90] sm:$0xff] }
 0x64a   : > { %v17469_v17 = vpop.eup %14481  ;;  %4298 = vmatpush1.msra.mxu0 %v4239_v9  ;;  %v4202_v9 = vld [vmem:[%s22527_s6 + $0x58] sm:$0xff]  ;;  %v4201_v40 = vld [vmem:[%s22527_s6 + $0x50] sm:$0xff] }
 0x64b   : > { %v3315_v45 = vmul.f32 1.442695, %v3301_v56  ;;  %13234 = vmatmul.mubr.msk.f32.gmra.mxu0 %vm2525_vm13, %v17469_v17  ;;  %4299 = vmatprep.subr.mxu0 %v4232_v63  ;;  %v4194_v63 = vld [vmem:[%s22527_s6 + $0x18] sm:$0xff]  ;;  %v4193_v56 = vld [vmem:[%s22527_s6 + $0x10] sm:$0xff] }
 0x64c   : > { %v3289_v8 = vpop.xlane.xlu0 %3288  ;;  %13236 = vmatprep.mubr.msk.f32.mxu0 %vm14967_vm6, %v23136_v28  ;;  %4300 = vmatpush1.msra.mxu0 %v4231_v7  ;;  %v4252_v7 = vld [vmem:[%s22527_s6 + $0x1e8] sm:$0xff] }
 0x64d   : > { %14489 = vpow2.f32 %v3315_v45  ;;  %v3302_v30 = vsub.f32 %v17411_v31, %v3289_v8  ;;  %4301 = vmatprep.subr.mxu0 %v4224_v26  ;;  %v4207_v31 = vld [vmem:[%s22527_s6 + $0x80] sm:$0xff]  ;;  %v4244_v45 = vld [vmem:[%s22527_s6 + $0x1a8] sm:$0xff] }
 0x64e   : > { %v17488_v34 = vpop.eup %14483  ;;  %4302 = vmatpush1.msra.mxu0 %v4223_v36  ;;  %v4251_v26 = vld [vmem:[%s22527_s6 + $0x1e0] sm:$0xff]  ;;  %v4236_v8 = vld [vmem:[%s22527_s6 + $0x168] sm:$0xff] }
 0x64f   : > { %v3317_v58 = vmul.f32 1.442695, %v3302_v30  ;;  %13237 = vmatmul.mubr.msk.f32.gmra.mxu0 %vm2525_vm13, %v17488_v34  ;;  %4303 = vmatprep.subr.mxu0 %v4216_v44  ;;  %v4243_v36 = vld [vmem:[%s22527_s6 + $0x1a0] sm:$0xff]  ;;  %v4228_v30 = vld [vmem:[%s22527_s6 + $0x128] sm:$0xff] }
 0x650   : > { %v3292_v4 = vpop.xlane.xlu1 %3291  ;;  %13239 = vmatprep.mubr.msk.f32.mxu0 %vm14967_vm6, %v23136_v28  ;;  %4304 = vmatpush1.msra.mxu0 %v4215_v46  ;;  %v4235_v44 = vld [vmem:[%s22527_s6 + $0x160] sm:$0xff] }
 0x651   : > { %14491 = vpow2.f32 %v3317_v58  ;;  %v3303_v53 = vsub.f32 %v17423_v5, %v3292_v4  ;;  %4305 = vmatprep.subr.mxu0 %v4208_v23  ;;  %v4191_v5 = vld [vmem:[%s22527_s6] sm:$0xff]  ;;  %v4220_v23 = vld [vmem:[%s22527_s6 + $0xe8] sm:$0xff] }
 0x652   : > { %v17507_v54 = vpop.eup %14485  ;;  %4306 = vmatpush1.msra.mxu0 %v4207_v31  ;;  %v4227_v46 = vld [vmem:[%s22527_s6 + $0x120] sm:$0xff]  ;;  %v4212_v31 = vld [vmem:[%s22527_s6 + $0xa8] sm:$0xff] }
 0x653   : > { %v3319_v25 = vmul.f32 1.442695, %v3303_v53  ;;  %13240 = vmatmul.mubr.msk.f32.gmra.mxu0 %vm2525_vm13, %v17507_v54  ;;  %4307 = vmatprep.subr.mxu0 %v4200_v29  ;;  %v4219_v58 = vld [vmem:[%s22527_s6 + $0xe0] sm:$0xff]  ;;  %v4204_v29 = vld [vmem:[%s22527_s6 + $0x68] sm:$0xff] }
 0x654   : > { %v3295_v13 = vpop.xlane.xlu0 %3294  ;;  %13242 = vmatprep.mubr.msk.f32.mxu0 %vm14967_vm6, %v23136_v28  ;;  %4308 = vmatpush1.msra.mxu0 %v4199_v35  ;;  %v4211_v4 = vld [vmem:[%s22527_s6 + $0xa0] sm:$0xff]  ;;  %v4196_v35 = vld [vmem:[%s22527_s6 + $0x28] sm:$0xff] }
 0x655   : > { %14493 = vpow2.f32 %v3319_v25  ;;  %v3304_v11 = vsub.f32 %v17435_v1, %v3295_v13  ;;  %4309 = vmatprep.subr.mxu0 %v4192_v2  ;;  %v4203_v53 = vld [vmem:[%s22527_s6 + $0x60] sm:$0xff]  ;;  %v4254_v25 = vld [vmem:[%s22527_s6 + $0x1f8] sm:$0xff] }
 0x656   : > { %v17523_v12 = vpop.eup %14487  ;;  %4310 = vmatpush1.msra.mxu0 %v4191_v5  ;;  %v4195_v2 = vld [vmem:[%s22527_s6 + $0x20] sm:$0xff]  ;;  %v4253_v5 = vld [vmem:[%s22527_s6 + $0x1f0] sm:$0xff]  ;;  %v4246_v13 = vld [vmem:[%s22527_s6 + $0x1b8] sm:$0xff] }
 0x657   : > { %v3321_v16 = vmul.f32 1.442695, %v3304_v11  ;;  %13243 = vmatmul.mubr.msk.f32.gmra.mxu0 %vm2525_vm13, %v17523_v12  ;;  %4408 = vmatprep.subr.mxu0 %v4250_v24  ;;  %v4245_v24 = vld [vmem:[%s22527_s6 + $0x1b0] sm:$0xff]  ;;  %v4238_v11 = vld [vmem:[%s22527_s6 + $0x178] sm:$0xff] }
 0x658   : > { %13245 = vmatprep.mubr.msk.f32.mxu0 %vm14967_vm6, %v23136_v28 }
 0x659   : > { %14495 = vpow2.f32 %v3321_v16  ;;  %v4237_v16 = vld [vmem:[%s22527_s6 + $0x170] sm:$0xff] }
 0x65a   : > { %v17529_v39 = vpop.eup %14489 }
 0x65b   : > { %13246 = vmatmul.mubr.msk.f32.gmra.mxu0 %vm2525_vm13, %v17529_v39 }
 0x65c   : > { %13248 = vmatprep.mubr.msk.f32.mxu0 %vm14967_vm6, %v23136_v28 }
 0x65e   : > { %v17535_v1 = vpop.eup %14491 }
 0x65f   : > { %13249 = vmatmul.mubr.msk.f32.gmra.mxu0 %vm2525_vm13, %v17535_v1 }
 0x660   : > { %13251 = vmatprep.mubr.msk.f32.mxu0 %vm14967_vm6, %v23136_v28 }
 0x662   : > { %v17541_v18 = vpop.eup %14493 }
 0x663   : > { %13252 = vmatmul.mubr.msk.f32.gmra.mxu0 %vm2525_vm13, %v17541_v18 }
 0x664   : > { %13254 = vmatprep.mubr.msk.f32.mxu0 %vm14967_vm6, %v23136_v28 }
 0x666   : > { %v17547_v50 = vpop.eup %14495 }
 0x667   : > { %13255 = vmatmul.mubr.msk.f32.gmra.mxu0 %vm2525_vm13, %v17547_v50 }
 0x668   : > { %4343 = vmatprep.mubr.f32.mxu0 %v23136_v28 }
 0x66b   : > { %11545 = vmatmul.mubr.msk.f32.vlgmr.msra.gmra.mxu0 %vm2525_vm13, %v17358_v10 }
 0x66c   : > { %4349 = vmatprep.mubr.f32.mxu0 %v23136_v28  ;;  %4409 = vmatpush1.msra.mxu0 %v4249_v49  ;;  %v4230_v49 = vld [vmem:[%s22527_s6 + $0x138] sm:$0xff] }
 0x66d   : > { %4410 = vmatprep.subr.mxu0 %v4242_v43  ;;  %v4229_v43 = vld [vmem:[%s22527_s6 + $0x130] sm:$0xff] }
 0x66e   : > { %4411 = vmatpush1.msra.mxu0 %v4241_v20  ;;  %v4222_v20 = vld [vmem:[%s22527_s6 + $0xf8] sm:$0xff] }
 0x66f   : > { %11546 = vmatmul.mubr.msk.f32.gmra.mxu0 %vm2525_vm13, %v17356_v0  ;;  %4412 = vmatprep.subr.mxu0 %v4234_v57  ;;  %v4221_v57 = vld [vmem:[%s22527_s6 + $0xf0] sm:$0xff] }
 0x670   : > { %4355 = vmatprep.mubr.f32.mxu0 %v23136_v28  ;;  %4413 = vmatpush1.msra.mxu0 %v4233_v51  ;;  %v4214_v51 = vld [vmem:[%s22527_s6 + $0xb8] sm:$0xff] }
 0x671   : > { %4414 = vmatprep.subr.mxu0 %v4226_v33  ;;  %v4213_v33 = vld [vmem:[%s22527_s6 + $0xb0] sm:$0xff] }
 0x672   : > { %4415 = vmatpush1.msra.mxu0 %v4225_v27  ;;  %v4206_v27 = vld [vmem:[%s22527_s6 + $0x78] sm:$0xff] }
 0x673   : > { %11547 = vmatmul.mubr.msk.f32.gmra.mxu0 %vm2525_vm13, %v17362_v14  ;;  %4416 = vmatprep.subr.mxu0 %v4218_v22  ;;  %v4205_v22 = vld [vmem:[%s22527_s6 + $0x70] sm:$0xff] }
 0x674   : > { %4361 = vmatprep.mubr.f32.mxu0 %v23136_v28  ;;  %4417 = vmatpush1.msra.mxu0 %v4217_v59  ;;  %v4198_v59 = vld [vmem:[%s22527_s6 + $0x38] sm:$0xff] }
 0x675   : > { %4418 = vmatprep.subr.mxu0 %v4210_v60  ;;  %v4197_v60 = vld [vmem:[%s22527_s6 + $0x30] sm:$0xff] }
 0x676   : > { %4419 = vmatpush1.msra.mxu0 %v4209_v37  ;;  %v2381_v37 = vld [vmem:[%s22525_s4 + $0x2f8] sm:$0xff] }
 0x677   : > { %11548 = vmatmul.mubr.msk.f32.gmra.mxu0 %vm2525_vm13, %v17360_v41  ;;  %4420 = vmatprep.subr.mxu0 %v4202_v9 }
 0x678   : > { %4367 = vmatprep.mubr.f32.mxu0 %v23136_v28  ;;  %4421 = vmatpush1.msra.mxu0 %v4201_v40 }
 0x679   : > { %4422 = vmatprep.subr.mxu0 %v4194_v63  ;;  %13275 = vmatprep.mubr.msk.f32.mxu1 %vm2994_vm0, %v2381_v37 }
 0x67a   : > { %4423 = vmatpush1.msra.mxu0 %v4193_v56 }
 0x67b   : > { %11549 = vmatmul.mubr.msk.f32.gmra.mxu0 %vm2525_vm13, %v17366_v3  ;;  %4521 = vmatprep.subr.mxu0 %v4252_v7 }
 0x67c   : > { %4373 = vmatprep.mubr.f32.mxu0 %v23136_v28 }
 0x67f   : > { %11550 = vmatmul.mubr.msk.f32.gmra.mxu0 %vm2525_vm13, %v17364_v52 }
 0x680   : > { %4379 = vmatprep.mubr.f32.mxu0 %v23136_v28 }
 0x683   : > { %11551 = vmatmul.mubr.msk.f32.gmra.mxu0 %vm2525_vm13, %v17370_v38 }
 0x684   : > { %4385 = vmatprep.mubr.f32.mxu0 %v23136_v28 }
 0x687   : > { %11552 = vmatmul.mubr.msk.f32.gmra.mxu0 %vm2525_vm13, %v17368_v15 }
 0x688   : > { %4456 = vmatprep.mubr.f32.mxu0 %v23136_v28 }
 0x68b   : > { %11553 = vmatmul.mubr.msk.f32.vlgmr.msra.gmra.mxu0 %vm2525_vm13, %v17358_v10 }
 0x68c   : > { %4462 = vmatprep.mubr.f32.mxu0 %v23136_v28  ;;  %4522 = vmatpush1.msra.mxu0 %v4251_v26 }
 0x68d   : > { %4523 = vmatprep.subr.mxu0 %v4244_v45 }
 0x68e   : > { %4524 = vmatpush1.msra.mxu0 %v4243_v36 }
 0x68f   : > { %11554 = vmatmul.mubr.msk.f32.gmra.mxu0 %vm2525_vm13, %v17356_v0  ;;  %4525 = vmatprep.subr.mxu0 %v4236_v8 }
 0x690   : > { %4468 = vmatprep.mubr.f32.mxu0 %v23136_v28  ;;  %4526 = vmatpush1.msra.mxu0 %v4235_v44 }
 0x691   : > { %4527 = vmatprep.subr.mxu0 %v4228_v30 }
 0x692   : > { %4528 = vmatpush1.msra.mxu0 %v4227_v46 }
 0x693   : > { %11555 = vmatmul.mubr.msk.f32.gmra.mxu0 %vm2525_vm13, %v17362_v14  ;;  %4529 = vmatprep.subr.mxu0 %v4220_v23 }
 0x694   : > { %4474 = vmatprep.mubr.f32.mxu0 %v23136_v28  ;;  %4530 = vmatpush1.msra.mxu0 %v4219_v58 }
 0x695   : > { %4531 = vmatprep.subr.mxu0 %v4212_v31 }
 0x696   : > { %4532 = vmatpush1.msra.mxu0 %v4211_v4 }
 0x697   : > { %11556 = vmatmul.mubr.msk.f32.gmra.mxu0 %vm2525_vm13, %v17360_v41  ;;  %4533 = vmatprep.subr.mxu0 %v4204_v29 }
 0x698   : > { %4480 = vmatprep.mubr.f32.mxu0 %v23136_v28  ;;  %4534 = vmatpush1.msra.mxu0 %v4203_v53 }
 0x699   : > { %4535 = vmatprep.subr.mxu0 %v4196_v35 }
 0x69a   : > { %4536 = vmatpush1.msra.mxu0 %v4195_v2 }
 0x69b   : > { %11557 = vmatmul.mubr.msk.f32.gmra.mxu0 %vm2525_vm13, %v17366_v3  ;;  %4634 = vmatprep.subr.mxu0 %v4254_v25 }
 0x69c   : > { %4486 = vmatprep.mubr.f32.mxu0 %v23136_v28 }
 0x69f   : > { %11558 = vmatmul.mubr.msk.f32.gmra.mxu0 %vm2525_vm13, %v17364_v52 }
 0x6a0   : > { %4492 = vmatprep.mubr.f32.mxu0 %v23136_v28 }
 0x6a3   : > { %11559 = vmatmul.mubr.msk.f32.gmra.mxu0 %vm2525_vm13, %v17370_v38 }
 0x6a4   : > { %4498 = vmatprep.mubr.f32.mxu0 %v23136_v28 }
 0x6a7   : > { %11560 = vmatmul.mubr.msk.f32.gmra.mxu0 %vm2525_vm13, %v17368_v15 }
 0x6a8   : > { %4569 = vmatprep.mubr.f32.mxu0 %v23136_v28 }
 0x6ab   : > { %11561 = vmatmul.mubr.msk.f32.vlgmr.msra.gmra.mxu0 %vm2525_vm13, %v17358_v10 }
 0x6ac   : > { %4575 = vmatprep.mubr.f32.mxu0 %v23136_v28  ;;  %4635 = vmatpush1.msra.mxu0 %v4253_v5 }
 0x6ad   : > { %4636 = vmatprep.subr.mxu0 %v4246_v13 }
 0x6ae   : > { %4637 = vmatpush1.msra.mxu0 %v4245_v24 }
 0x6af   : > { %11562 = vmatmul.mubr.msk.f32.gmra.mxu0 %vm2525_vm13, %v17356_v0  ;;  %4638 = vmatprep.subr.mxu0 %v4238_v11 }
 0x6b0   : > { %4581 = vmatprep.mubr.f32.mxu0 %v23136_v28  ;;  %4639 = vmatpush1.msra.mxu0 %v4237_v16 }
 0x6b1   : > { %4640 = vmatprep.subr.mxu0 %v4230_v49 }
 0x6b2   : > { %4641 = vmatpush1.msra.mxu0 %v4229_v43 }
 0x6b3   : > { %11563 = vmatmul.mubr.msk.f32.gmra.mxu0 %vm2525_vm13, %v17362_v14  ;;  %4642 = vmatprep.subr.mxu0 %v4222_v20 }
 0x6b4   : > { %4587 = vmatprep.mubr.f32.mxu0 %v23136_v28  ;;  %4643 = vmatpush1.msra.mxu0 %v4221_v57 }
 0x6b5   : > { %4644 = vmatprep.subr.mxu0 %v4214_v51 }
 0x6b6   : > { %4645 = vmatpush1.msra.mxu0 %v4213_v33 }
 0x6b7   : > { %11564 = vmatmul.mubr.msk.f32.gmra.mxu0 %vm2525_vm13, %v17360_v41  ;;  %4646 = vmatprep.subr.mxu0 %v4206_v27 }
 0x6b8   : > { %4593 = vmatprep.mubr.f32.mxu0 %v23136_v28  ;;  %4647 = vmatpush1.msra.mxu0 %v4205_v22 }
 0x6b9   : > { %4648 = vmatprep.subr.mxu0 %v4198_v59 }
 0x6ba   : > { %4649 = vmatpush1.msra.mxu0 %v4197_v60 }
 0x6bb   : > { %11565 = vmatmul.mubr.msk.f32.gmra.mxu0 %vm2525_vm13, %v17366_v3  ;;  %13426 = vmatprep.subr.mxu0 %v23136_v28 }
 0x6bc   : > { %4599 = vmatprep.mubr.f32.mxu0 %v23136_v28 }
 0x6bf   : > { %11566 = vmatmul.mubr.msk.f32.gmra.mxu0 %vm2525_vm13, %v17364_v52 }
 0x6c0   : > { %4605 = vmatprep.mubr.f32.mxu0 %v23136_v28 }
 0x6c3   : > { %11567 = vmatmul.mubr.msk.f32.gmra.mxu0 %vm2525_vm13, %v17370_v38 }
 0x6c4   : > { %4611 = vmatprep.mubr.f32.mxu0 %v23136_v28 }
 0x6c7   : > { %11568 = vmatmul.mubr.msk.f32.gmra.mxu0 %vm2525_vm13, %v17368_v15 }
 0x6c8   : > { %4682 = vmatprep.mubr.f32.mxu0 %v23136_v28 }
 0x6cb   : > { %11569 = vmatmul.mubr.msk.f32.vlgmr.msra.gmra.mxu0 %vm2525_vm13, %v17358_v10 }
 0x6cc   : > { %4688 = vmatprep.mubr.f32.mxu0 %v23136_v28 }
 0x6cf   : > { %11570 = vmatmul.mubr.msk.f32.gmra.mxu0 %vm2525_vm13, %v17356_v0 }
 0x6d0   : > { %4694 = vmatprep.mubr.f32.mxu0 %v23136_v28 }
 0x6d3   : > { %11571 = vmatmul.mubr.msk.f32.gmra.mxu0 %vm2525_vm13, %v17362_v14 }
 0x6d4   : > { %4700 = vmatprep.mubr.f32.mxu0 %v23136_v28 }
 0x6d7   : > { %11572 = vmatmul.mubr.msk.f32.gmra.mxu0 %vm2525_vm13, %v17360_v41 }
 0x6d8   : > { %4706 = vmatprep.mubr.f32.mxu0 %v23136_v28 }
 0x6db   : > { %11573 = vmatmul.mubr.msk.f32.gmra.mxu0 %vm2525_vm13, %v17366_v3 }
 0x6dc   : > { %4712 = vmatprep.mubr.f32.mxu0 %v23136_v28 }
 0x6df   : > { %11574 = vmatmul.mubr.msk.f32.gmra.mxu0 %vm2525_vm13, %v17364_v52 }
 0x6e0   : > { %4718 = vmatprep.mubr.f32.mxu0 %v23136_v28 }
 0x6e3   : > { %11575 = vmatmul.mubr.msk.f32.gmra.mxu0 %vm2525_vm13, %v17370_v38 }
 0x6e4   : > { %4724 = vmatprep.mubr.f32.mxu0 %v23136_v28 }
 0x6e7   : > { %11576 = vmatmul.mubr.msk.f32.gmra.mxu0 %vm2525_vm13, %v17368_v15 }
 0x6e8   : > { %13442 = vmatprep.mubr.msk.f32.mxu0 %vm14967_vm6, %v23136_v28 }
 0x707   : > { %v3416_v0 = vpop.f32.mrf.mxu0 }
 0x708   : > { %v3417_v24 = vadd.f32 1e-20, %v3416_v0 }
 0x709   : > { %v13232_v10 = vpop.f32.mrf.mxu0 }
 0x70b   : > { %v3421_v41 = vpop.f32.mrf.mxu0 }
 0x70c   : > { %v3422_v5 = vadd.f32 1e-20, %v3421_v41 }
 0x70d   : > { %v13235_v14 = vpop.f32.mrf.mxu0 }
 0x70f   : > { %v3426_v3 = vpop.f32.mrf.mxu0 }
 0x710   : > { %v3427_v2 = vadd.f32 1e-20, %v3426_v3 }
 0x711   : > { %v13238_v9 = vpop.f32.mrf.mxu0 }
 0x713   : > { %v3431_v52 = vpop.f32.mrf.mxu0 }
 0x714   : > { %v3432_v53 = vadd.f32 1e-20, %v3431_v52 }
 0x715   : > { %v13241_v40 = vpop.f32.mrf.mxu0 }
 0x717   : > { %v3436_v63 = vpop.f32.mrf.mxu0 }
 0x718   : > { %v3437_v4 = vadd.f32 1e-20, %v3436_v63 }
 0x719   : > { %v13244_v56 = vpop.f32.mrf.mxu0 }
 0x71b   : > { %v3441_v7 = vpop.f32.mrf.mxu0 }
 0x71c   : > { %v3442_v58 = vadd.f32 1e-20, %v3441_v7  ;;  %v2385_v7 = vld [vmem:[%s22525_s4 + $0x318] sm:$0xff] }
 0x71d   : > { %v13247_v38 = vpop.f32.mrf.mxu0 }
 0x71e   : > { %v2386_v38 = vld [vmem:[%s22525_s4 + $0x320] sm:$0xff] }
 0x71f   : > { %v3446_v26 = vpop.f32.mrf.mxu0 }
 0x720   : > { %v3447_v30 = vadd.f32 1e-20, %v3446_v26  ;;  %v2387_v26 = vld [vmem:[%s22525_s4 + $0x328] sm:$0xff] }
 0x721   : > { %v13250_v45 = vpop.f32.mrf.mxu0 }
 0x722   : > { %v2388_v45 = vld [vmem:[%s22525_s4 + $0x330] sm:$0xff] }
 0x723   : > { %v3451_v36 = vpop.f32.mrf.mxu0 }
 0x724   : > { %v3452_v8 = vadd.f32 1e-20, %v3451_v36  ;;  %v2389_v36 = vld [vmem:[%s22525_s4 + $0x338] sm:$0xff] }
 0x725   : > { %v13253_v15 = vpop.f32.mrf.mxu0 }
 0x726   : > { %14497 = vrcp.f32 %v3452_v8  ;;  %v2390_v8 = vld [vmem:[%s22525_s4 + $0x340] sm:$0xff]  ;;  %v2391_v15 = vld [vmem:[%s22525_s4 + $0x348] sm:$0xff] }
 0x727   : > { %v3456_v44 = vpop.f32.mrf.mxu0 }
 0x728   : > { %v3457_v46 = vadd.f32 1e-20, %v3456_v44  ;;  %v2392_v44 = vld [vmem:[%s22525_s4 + $0x350] sm:$0xff] }
 0x729   : > { %v13256_v23 = vpop.f32.mrf.mxu0 }
 0x72a   : > { %14499 = vrcp.f32 %v3457_v46  ;;  %v2394_v46 = vld [vmem:[%s22525_s4 + $0x360] sm:$0xff]  ;;  %v2395_v23 = vld [vmem:[%s22525_s4 + $0x368] sm:$0xff] }
 0x72b   : > { %v17795_v31 = vpop.f32.mrf.mxu0  ;;  %14501 = vrcp.f32 %v3447_v30  ;;  %v2393_v30 = vld [vmem:[%s22525_s4 + $0x358] sm:$0xff] }
 0x72c   : > { %14503 = vrcp.f32 %v3442_v58  ;;  %v2396_v58 = vld [vmem:[%s22525_s4 + $0x370] sm:$0xff] }
 0x72d   : > { %v17797_v29 = vpop.f32.mrf.mxu0  ;;  %14505 = vrcp.f32 %v3437_v4  ;;  %v2398_v4 = vld [vmem:[%s22525_s4 + $0x380] sm:$0xff] }
 0x72e   : > { %14507 = vrcp.f32 %v3432_v53  ;;  %v2400_v53 = vld [vmem:[%s22525_s4 + $0x390] sm:$0xff] }
 0x72f   : > { %v17799_v35 = vpop.f32.mrf.mxu0  ;;  %14509 = vrcp.f32 %v3427_v2  ;;  %v2402_v2 = vld [vmem:[%s22525_s4 + $0x3a0] sm:$0xff] }
 0x730   : > { %14511 = vrcp.f32 %v3422_v5  ;;  %v2404_v5 = vld [vmem:[%s22525_s4 + $0x3b0] sm:$0xff] }
 0x731   : > { %v17801_v25 = vpop.f32.mrf.mxu0  ;;  %14513 = vrcp.f32 %v3417_v24  ;;  %v2406_v24 = vld [vmem:[%s22525_s4 + $0x3c0] sm:$0xff] }
 0x733   : > { %v17803_v13 = vpop.f32.mrf.mxu0  ;;  %v14498_v16 = vpop.eup %14497 }
 0x734   : > { %v3476_v33 = vmul.f32 %v14498_v16, %v17541_v18  ;;  %v2408_v16 = vld [vmem:[%s22525_s4 + $0x3d0] sm:$0xff] }
 0x735   : > { %v17805_v11 = vpop.f32.mrf.mxu0 }
 0x737   : > { %v14500_v49 = vpop.eup %14499  ;;  %v17807_v43 = vpop.f32.mrf.mxu0 }
 0x738   : > { %v3477_v20 = vmul.f32 %v14500_v49, %v17547_v50  ;;  %v14502_v57 = vpop.eup %14501  ;;  %v2409_v49 = vld [vmem:[%s22525_s4 + $0x3d8] sm:$0xff] }
 0x739   : > { %v17810_v51 = vpop.f32.mrf.mxu0  ;;  %v14504_v27 = vpop.eup %14503  ;;  %v3475_v59 = vmul.f32 %v14502_v57, %v17535_v1  ;;  %v2412_v57 = vld [vmem:[%s22525_s4 + $0x3f0] sm:$0xff] }
 0x73a   : > { %13257 = vmatprep.subr.mxu1 %v3477_v20  ;;  %v14506_v60 = vpop.eup %14505  ;;  %v3474_v0 = vmul.f32 %v14504_v27, %v17529_v39  ;;  %v2415_v27 = vld [vmem:[%s22525_s4 + $0x408] sm:$0xff] }
 0x73b   : > { %13258 = vmatpush3.msra.mxu1 %v3477_v20  ;;  %v4369_v22 = vpop.f32.mrf.mxu0  ;;  %v14508_v10 = vpop.eup %14507  ;;  %v3473_v41 = vmul.f32 %v14506_v60, %v17523_v12  ;;  %v2411_v20 = vld [vmem:[%s22525_s4 + $0x3e8] sm:$0xff]  ;;  %v2418_v60 = vld [vmem:[%s22525_s4 + $0x420] sm:$0xff] }
 0x73c   : > { %13259 = vmatprep.subr.mxu1 %v3476_v33  ;;  %v14510_v14 = vpop.eup %14509  ;;  %v3472_v3 = vmul.f32 %v14508_v10, %v17507_v54  ;;  %v2382_v54 = vld [vmem:[%s22525_s4 + $0x300] sm:$0xff]  ;;  %v2421_v10 = vld [vmem:[%s22525_s4 + $0x438] sm:$0xff] }
 0x73d   : > { %13260 = vmatpush3.msra.mxu1 %v3476_v33  ;;  %v4371_v37 = vpop.f32.mrf.mxu0  ;;  %v14512_v9 = vpop.eup %14511  ;;  %v3471_v52 = vmul.f32 %v14510_v14, %v17488_v34  ;;  %v2414_v33 = vld [vmem:[%s22525_s4 + $0x400] sm:$0xff]  ;;  %v2424_v14 = vld [vmem:[%s22525_s4 + $0x450] sm:$0xff] }
 0x73e   : > { %13261 = vmatprep.subr.mxu1 %v3475_v59  ;;  %v14514_v40 = vpop.eup %14513  ;;  %v3470_v63 = vmul.f32 %v14512_v9, %v17469_v17  ;;  %v2384_v17 = vld [vmem:[%s22525_s4 + $0x310] sm:$0xff]  ;;  %v2427_v9 = vld [vmem:[%s22525_s4 + $0x468] sm:$0xff] }
 0x73f   : > { %13262 = vmatpush3.msra.mxu1 %v3475_v59  ;;  %v4375_v50 = vpop.f32.mrf.mxu0  ;;  %v3469_v56 = vmul.f32 %v14514_v40, %v17450_v6  ;;  %v2383_v6 = vld [vmem:[%s22525_s4 + $0x308] sm:$0xff]  ;;  %v2417_v59 = vld [vmem:[%s22525_s4 + $0x418] sm:$0xff]  ;;  %v2430_v40 = vld [vmem:[%s22525_s4 + $0x480] sm:$0xff] }
 0x740   : > { %13263 = vmatprep.subr.mxu1 %v3474_v0 }
 0x741   : > { %13264 = vmatpush3.msra.mxu1 %v3474_v0  ;;  %v4377_v18 = vpop.f32.mrf.mxu0  ;;  %v2420_v0 = vld [vmem:[%s22525_s4 + $0x430] sm:$0xff] }
 0x742   : > { %13265 = vmatprep.subr.mxu1 %v3473_v41 }
 0x743   : > { %13266 = vmatpush3.msra.mxu1 %v3473_v41  ;;  %v4381_v1 = vpop.f32.mrf.mxu0  ;;  %v2423_v41 = vld [vmem:[%s22525_s4 + $0x448] sm:$0xff] }
 0x744   : > { %13267 = vmatprep.subr.mxu1 %v3472_v3 }
 0x745   : > { %13268 = vmatpush3.msra.mxu1 %v3472_v3  ;;  %v4383_v39 = vpop.f32.mrf.mxu0  ;;  %v2426_v3 = vld [vmem:[%s22525_s4 + $0x460] sm:$0xff] }
 0x746   : > { %13269 = vmatprep.subr.mxu1 %v3471_v52 }
 0x747   : > { %13270 = vmatpush3.msra.mxu1 %v3471_v52  ;;  %v4387_v12 = vpop.f32.mrf.mxu0  ;;  %v2429_v52 = vld [vmem:[%s22525_s4 + $0x478] sm:$0xff] }
 0x748   : > { %13271 = vmatprep.subr.mxu1 %v3470_v63  ;;  %13427 = vmatpush3.msra.mxu0 %v4387_v12  ;;  %v2433_v12 = vld [vmem:[%s22525_s4 + $0x498] sm:$0xff] }
 0x749   : > { %13272 = vmatpush3.msra.mxu1 %v3470_v63  ;;  %13428 = vmatprep.subr.mxu0 %v23136_v28  ;;  %v4389_v34 = vpop.f32.mrf.mxu0  ;;  %v2432_v63 = vld [vmem:[%s22525_s4 + $0x490] sm:$0xff] }
 0x74a   : > { %13273 = vmatprep.subr.mxu1 %v3469_v56  ;;  %13429 = vmatpush3.msra.mxu0 %v4381_v1  ;;  %v2428_v1 = vld [vmem:[%s22525_s4 + $0x470] sm:$0xff] }
 0x74b   : > { %13274 = vmatpush3.msra.mxu1 %v3469_v56  ;;  %13430 = vmatprep.subr.mxu0 %v23136_v28  ;;  %v2434_v56 = vld [vmem:[%s22525_s4 + $0x4a0] sm:$0xff] }
 0x74c   : > { %13276 = vmatmul.mubr.msk.f32.vlgmr.msra.gmra.mxu1 %vm2994_vm0, %v2382_v54  ;;  %13383 = vmatprep.subr.mxu1 %v23136_v28  ;;  %v2435_v54 = vld [vmem:[%s22525_s4 + $0x4a8] sm:$0xff] }
 0x74d   : > { %13431 = vmatpush3.msra.mxu0 %v4375_v50  ;;  %13384 = vmatpush3.msra.mxu1 %v4389_v34  ;;  %v2422_v50 = vld [vmem:[%s22525_s4 + $0x440] sm:$0xff]  ;;  %v18059_v34 = vpop.f32.mrf.mxu0 }
 0x74e   : > { %13432 = vmatprep.subr.mxu0 %v23136_v28  ;;  %13385 = vmatprep.subr.mxu1 %v23136_v28 }
 0x74f   : > { %13433 = vmatpush3.msra.mxu0 %v4369_v22  ;;  %13278 = vmatprep.mubr.msk.f32.mxu1 %vm2994_vm0, %v2383_v6  ;;  %v2416_v22 = vld [vmem:[%s22525_s4 + $0x410] sm:$0xff] }
 0x750   : > { %13386 = vmatpush3.msra.mxu1 %v4383_v39  ;;  %13434 = vmatprep.subr.mxu0 %v23136_v28  ;;  %v2431_v39 = vld [vmem:[%s22525_s4 + $0x488] sm:$0xff]  ;;  %v2436_v6 = vld [vmem:[%s22525_s4 + $0x4b0] sm:$0xff] }
 0x751   : > { %13279 = vmatmul.mubr.msk.f32.gmra.mxu1 %vm2994_vm0, %v2384_v17  ;;  %13387 = vmatprep.subr.mxu1 %v23136_v28  ;;  %v2437_v17 = vld [vmem:[%s22525_s4 + $0x4b8] sm:$0xff] }
 0x752   : > { %13435 = vmatpush3.msra.mxu0 %v17807_v43  ;;  %13388 = vmatpush3.msra.mxu1 %v4377_v18  ;;  %v2410_v43 = vld [vmem:[%s22525_s4 + $0x3e0] sm:$0xff]  ;;  %v2425_v18 = vld [vmem:[%s22525_s4 + $0x458] sm:$0xff] }
 0x753   : > { %13436 = vmatprep.subr.mxu0 %v23136_v28  ;;  %13389 = vmatprep.subr.mxu1 %v23136_v28 }
 0x754   : > { %13437 = vmatpush3.msra.mxu0 %v17803_v13  ;;  %13281 = vmatprep.mubr.msk.f32.mxu1 %vm2994_vm0, %v2385_v7  ;;  %v2405_v13 = vld [vmem:[%s22525_s4 + $0x3b8] sm:$0xff]  ;;  %v18069_v7 = vpop.f32.mrf.mxu0 }
 0x755   : > { %13390 = vmatpush3.msra.mxu1 %v4371_v37  ;;  %13438 = vmatprep.subr.mxu0 %v23136_v28  ;;  %v2419_v37 = vld [vmem:[%s22525_s4 + $0x428] sm:$0xff] }
 0x756   : > { %13282 = vmatmul.mubr.msk.f32.gmra.mxu1 %vm2994_vm0, %v2386_v38  ;;  %13391 = vmatprep.subr.mxu1 %v23136_v28  ;;  %v2438_v38 = vld [vmem:[%s22525_s4 + $0x4c0] sm:$0xff] }
 0x757   : > { %13439 = vmatpush3.msra.mxu0 %v17799_v35  ;;  %13392 = vmatpush3.msra.mxu1 %v17810_v51  ;;  %v2401_v35 = vld [vmem:[%s22525_s4 + $0x398] sm:$0xff] }
 0x758   : > { %13440 = vmatprep.subr.mxu0 %v23136_v28  ;;  %13393 = vmatprep.subr.mxu1 %v23136_v28  ;;  %v2413_v51 = vld [vmem:[%s22525_s4 + $0x3f8] sm:$0xff] }
 0x759   : > { %13441 = vmatpush3.msra.mxu0 %v17795_v31  ;;  %13284 = vmatprep.mubr.msk.f32.mxu1 %vm2994_vm0, %v2387_v26  ;;  %v2397_v31 = vld [vmem:[%s22525_s4 + $0x378] sm:$0xff]  ;;  %v2439_v26 = vld [vmem:[%s22525_s4 + $0x4c8] sm:$0xff] }
 0x75a   : > { %13394 = vmatpush3.msra.mxu1 %v17805_v11  ;;  %13512 = vmatprep.subr.mxu0 %v23136_v28  ;;  %v2407_v11 = vld [vmem:[%s22525_s4 + $0x3c8] sm:$0xff] }
 0x75b   : > { %13285 = vmatmul.mubr.msk.f32.gmra.mxu1 %vm2994_vm0, %v2388_v45  ;;  %13395 = vmatprep.subr.mxu1 %v23136_v28  ;;  %v18079_v45 = vpop.f32.mrf.mxu0 }
 0x75c   : > { %13396 = vmatpush3.msra.mxu1 %v17801_v25  ;;  %13287 = vmatprep.mubr.msk.f32.mxu1 %vm2994_vm0, %v2389_v36  ;;  %v2403_v25 = vld [vmem:[%s22525_s4 + $0x3a8] sm:$0xff]  ;;  %v2440_v36 = vld [vmem:[%s22525_s4 + $0x4d0] sm:$0xff] }
 0x75d   : > { %13397 = vmatprep.subr.mxu1 %v23136_v28 }
 0x75e   : > { %13398 = vmatpush3.msra.mxu1 %v17797_v29  ;;  %v2399_v29 = vld [vmem:[%s22525_s4 + $0x388] sm:$0xff] }
 0x75f   : > { %13288 = vmatmul.mubr.msk.f32.gmra.mxu1 %vm2994_vm0, %v2390_v8  ;;  %13469 = vmatprep.subr.mxu1 %v23136_v28  ;;  %v2441_v8 = vld [vmem:[%s22525_s4 + $0x4d8] sm:$0xff] }
 0x760   : > { %13290 = vmatprep.mubr.msk.f32.mxu1 %vm2994_vm0, %v2391_v15  ;;  %v18089_v15 = vpop.f32.mrf.mxu0 }
 0x763   : > { %13291 = vmatmul.mubr.msk.f32.gmra.mxu1 %vm2994_vm0, %v2392_v44  ;;  %v2442_v44 = vld [vmem:[%s22525_s4 + $0x4e0] sm:$0xff] }
 0x764   : > { %13293 = vmatprep.mubr.msk.f32.mxu1 %vm2994_vm0, %v2393_v30  ;;  %v2443_v30 = vld [vmem:[%s22525_s4 + $0x4e8] sm:$0xff] }
 0x767   : > { %13294 = vmatmul.mubr.msk.f32.gmra.mxu1 %vm2994_vm0, %v2394_v46  ;;  %v18099_v46 = vpop.f32.mrf.mxu0 }
 0x768   : > { %13296 = vmatprep.mubr.msk.f32.mxu1 %vm2994_vm0, %v2395_v23  ;;  %v2444_v23 = vld [vmem:[%s22525_s4 + $0x4f0] sm:$0xff] }
 0x76b   : > { %13297 = vmatmul.mubr.msk.f32.gmra.mxu1 %vm2994_vm0, %v2396_v58  ;;  %v2445_v58 = vld [vmem:[%s22525_s4 + $0x4f8] sm:$0xff] }
 0x76c   : > { %13299 = vmatprep.mubr.msk.f32.mxu1 %vm2994_vm0, %v2397_v31  ;;  %v18109_v31 = vpop.f32.mrf.mxu0 }
 0x76f   : > { %13300 = vmatmul.mubr.msk.f32.gmra.mxu1 %vm2994_vm0, %v2398_v4  ;;  %v2446_v4 = vld [vmem:[%s22525_s4 + $0x500] sm:$0xff] }
 0x770   : > { %13302 = vmatprep.mubr.msk.f32.mxu1 %vm2994_vm0, %v2399_v29  ;;  %v2447_v29 = vld [vmem:[%s22525_s4 + $0x508] sm:$0xff] }
 0x773   : > { %13303 = vmatmul.mubr.msk.f32.gmra.mxu1 %vm2994_vm0, %v2400_v53  ;;  %v18119_v53 = vpop.f32.mrf.mxu0 }
 0x774   : > { %13305 = vmatprep.mubr.msk.f32.mxu1 %vm2994_vm0, %v2401_v35  ;;  %v2448_v35 = vld [vmem:[%s22525_s4 + $0x510] sm:$0xff] }
 0x777   : > { %13306 = vmatmul.mubr.msk.f32.gmra.mxu1 %vm2994_vm0, %v2402_v2  ;;  %v2449_v2 = vld [vmem:[%s22525_s4 + $0x518] sm:$0xff] }
 0x778   : > { %13308 = vmatprep.mubr.msk.f32.mxu1 %vm2994_vm0, %v2403_v25  ;;  %v4478_v25 = vpop.f32.mrf.mxu0 }
 0x77b   : > { %13309 = vmatmul.mubr.msk.f32.gmra.mxu1 %vm2994_vm0, %v2404_v5  ;;  %v2450_v5 = vld [vmem:[%s22525_s4 + $0x520] sm:$0xff] }
 0x77c   : > { %13311 = vmatprep.mubr.msk.f32.mxu1 %vm2994_vm0, %v2405_v13  ;;  %v2451_v13 = vld [vmem:[%s22525_s4 + $0x528] sm:$0xff] }
 0x77f   : > { %13312 = vmatmul.mubr.msk.f32.gmra.mxu1 %vm2994_vm0, %v2406_v24  ;;  %v18137_v24 = vpop.f32.mrf.mxu0 }
 0x780   : > { %13314 = vmatprep.mubr.msk.f32.mxu1 %vm2994_vm0, %v2407_v11  ;;  %v2452_v11 = vld [vmem:[%s22525_s4 + $0x530] sm:$0xff] }
 0x783   : > { %13315 = vmatmul.mubr.msk.f32.gmra.mxu1 %vm2994_vm0, %v2408_v16  ;;  %v4484_v16 = vpop.f32.mrf.mxu0 }
 0x784   : > { %13317 = vmatprep.mubr.msk.f32.mxu1 %vm2994_vm0, %v2409_v49 }
 0x785   : > { %v18147_v49 = vpop.f32.mrf.mxu0 }
 0x787   : > { %13318 = vmatmul.mubr.msk.f32.gmra.mxu1 %vm2994_vm0, %v2410_v43  ;;  %v4490_v43 = vpop.f32.mrf.mxu0 }
 0x788   : > { %13320 = vmatprep.mubr.msk.f32.mxu1 %vm2994_vm0, %v2411_v20 }
 0x789   : > { %v18149_v20 = vpop.f32.mrf.mxu0 }
 0x78b   : > { %13321 = vmatmul.mubr.msk.f32.gmra.mxu1 %vm2994_vm0, %v2412_v57  ;;  %v4496_v57 = vpop.f32.mrf.mxu0 }
 0x78c   : > { %13323 = vmatprep.mubr.msk.f32.mxu1 %vm2994_vm0, %v2413_v51 }
 0x78d   : > { %v18151_v51 = vpop.f32.mrf.mxu0 }
 0x78f   : > { %13324 = vmatmul.mubr.msk.f32.gmra.mxu1 %vm2994_vm0, %v2414_v33  ;;  %v4502_v33 = vpop.f32.mrf.mxu0 }
 0x790   : > { %13326 = vmatprep.mubr.msk.f32.mxu1 %vm2994_vm0, %v2415_v27 }
 0x791   : > { %v18153_v27 = vpop.f32.mrf.mxu0 }
 0x793   : > { %13327 = vmatmul.mubr.msk.f32.gmra.mxu1 %vm2994_vm0, %v2416_v22  ;;  %v18155_v22 = vpop.f32.mrf.mxu0 }
 0x794   : > { %13329 = vmatprep.mubr.msk.f32.mxu1 %vm2994_vm0, %v2417_v59 }
 0x795   : > { %v18157_v59 = vpop.f32.mrf.mxu0 }
 0x797   : > { %13330 = vmatmul.mubr.msk.f32.gmra.mxu1 %vm2994_vm0, %v2418_v60  ;;  %v18159_v60 = vpop.f32.mrf.mxu0 }
 0x798   : > { %13332 = vmatprep.mubr.msk.f32.mxu1 %vm2994_vm0, %v2419_v37 }
 0x799   : > { %v18161_v37 = vpop.f32.mrf.mxu0 }
 0x79b   : > { %13333 = vmatmul.mubr.msk.f32.gmra.mxu1 %vm2994_vm0, %v2420_v0  ;;  %v18163_v0 = vpop.f32.mrf.mxu0 }
 0x79c   : > { %13335 = vmatprep.mubr.msk.f32.mxu1 %vm2994_vm0, %v2421_v10 }
 0x79f   : > { %13336 = vmatmul.mubr.msk.f32.gmra.mxu1 %vm2994_vm0, %v2422_v50  ;;  %v2453_v50 = vld [vmem:[%s22525_s4 + $0x538] sm:$0xff] }
 0x7a0   : > { %13338 = vmatprep.mubr.msk.f32.mxu1 %vm2994_vm0, %v2423_v41  ;;  %v18168_v41 = vpop.f32.mrf.mxu0 }
 0x7a3   : > { %13339 = vmatmul.mubr.msk.f32.gmra.mxu1 %vm2994_vm0, %v2424_v14 }
 0x7a4   : > { %13341 = vmatprep.mubr.msk.f32.mxu1 %vm2994_vm0, %v2425_v18 }
 0x7a7   : > { %13342 = vmatmul.mubr.msk.f32.gmra.mxu1 %vm2994_vm0, %v2426_v3  ;;  %v2454_v3 = vld [vmem:[%s22525_s4 + $0x540] sm:$0xff] }
 0x7a8   : > { %13344 = vmatprep.mubr.msk.f32.mxu1 %vm2994_vm0, %v2427_v9 }
 0x7ab   : > { %13345 = vmatmul.mubr.msk.f32.gmra.mxu1 %vm2994_vm0, %v2428_v1  ;;  %v18174_v1 = vpop.f32.mrf.mxu0 }
 0x7ac   : > { %13347 = vmatprep.mubr.msk.f32.mxu1 %vm2994_vm0, %v2429_v52 }
 0x7af   : > { %13348 = vmatmul.mubr.msk.f32.gmra.mxu1 %vm2994_vm0, %v2430_v40 }
 0x7b0   : > { %13350 = vmatprep.mubr.msk.f32.mxu1 %vm2994_vm0, %v2431_v39  ;;  %v2455_v39 = vld [vmem:[%s22525_s4 + $0x548] sm:$0xff] }
 0x7b3   : > { %13351 = vmatmul.mubr.msk.f32.gmra.mxu1 %vm2994_vm0, %v2432_v63  ;;  %v18184_v63 = vpop.f32.mrf.mxu0 }
 0x7b4   : > { %13353 = vmatprep.mubr.msk.f32.mxu1 %vm2994_vm0, %v2433_v12 }
 0x7b7   : > { %13354 = vmatmul.mubr.msk.f32.gmra.mxu1 %vm2994_vm0, %v2434_v56 }
 0x7b8   : > { %13356 = vmatprep.mubr.msk.f32.mxu1 %vm2994_vm0, %v2435_v54  ;;  %v2456_v54 = vld [vmem:[%s22525_s4 + $0x550] sm:$0xff] }
 0x7bb   : > { %13357 = vmatmul.mubr.msk.f32.gmra.mxu1 %vm2994_vm0, %v2436_v6 }
 0x7bc   : > { %13359 = vmatprep.mubr.msk.f32.mxu1 %vm2994_vm0, %v2437_v17  ;;  %v18194_v17 = vpop.f32.mrf.mxu0 }
 0x7bf   : > { %13360 = vmatmul.mubr.msk.f32.gmra.mxu1 %vm2994_vm0, %v2438_v38 }
 0x7c0   : > { %13362 = vmatprep.mubr.msk.f32.mxu1 %vm2994_vm0, %v2439_v26 }
 0x7c3   : > { %13363 = vmatmul.mubr.msk.f32.gmra.mxu1 %vm2994_vm0, %v2440_v36  ;;  %v2457_v36 = vld [vmem:[%s22525_s4 + $0x558] sm:$0xff] }
 0x7c4   : > { %13365 = vmatprep.mubr.msk.f32.mxu1 %vm2994_vm0, %v2441_v8 }
 0x7c7   : > { %13366 = vmatmul.mubr.msk.f32.gmra.mxu1 %vm2994_vm0, %v2442_v44  ;;  %v2462_v44 = vld [vmem:[%s22525_s4 + $0x580] sm:$0xff] }
 0x7c8   : > { %13368 = vmatprep.mubr.msk.f32.mxu1 %vm2994_vm0, %v2443_v30  ;;  %v18208_v30 = vpop.f32.mrf.mxu0 }
 0x7cb   : > { %13369 = vmatmul.mubr.msk.f32.gmra.mxu1 %vm2994_vm0, %v2444_v23 }
 0x7cc   : > { %13371 = vmatprep.mubr.msk.f32.mxu1 %vm2994_vm0, %v2445_v58 }
 0x7cf   : > { %13372 = vmatmul.mubr.msk.f32.gmra.mxu1 %vm2994_vm0, %v2446_v4 }
 0x7d0   : > { %13374 = vmatprep.mubr.msk.f32.mxu1 %vm2994_vm0, %v2447_v29 }
 0x7d3   : > { %13375 = vmatmul.mubr.msk.f32.gmra.mxu1 %vm2994_vm0, %v2448_v35 }
 0x7d4   : > { %13377 = vmatprep.mubr.msk.f32.mxu1 %vm2994_vm0, %v2449_v2 }
 0x7d7   : > { %13378 = vmatmul.mubr.msk.f32.gmra.mxu1 %vm2994_vm0, %v2450_v5 }
 0x7d8   : > { %13380 = vmatprep.mubr.msk.f32.mxu1 %vm2994_vm0, %v2451_v13 }
 0x7db   : > { %13381 = vmatmul.mubr.msk.f32.gmra.mxu1 %vm2994_vm0, %v2452_v11 }
 0x7dc   : > { %13399 = vmatprep.mubr.msk.f32.mxu1 %vm14967_vm6, %v23136_v28 }
 0x80c   : > { %v13277_v10 = vpop.f32.mrf.mxu1 }
 0x80d   : > { %v4120_v52 = vmul.f32 %v13277_v10, %v2454_v3 }
 0x80e   : > { %v3760_v14 = vpop.f32.mrf.mxu1 }
 0x80f   : > { %v4119_v18 = vmul.f32 %v3760_v14, %v2453_v50  ;;  %v2461_v14 = vld [vmem:[%s22525_s4 + $0x578] sm:$0xff] }
 0x811   : > { %v13280_v9 = vpop.f32.mrf.mxu1  ;;  %13443 = vmatmul.mubr.msk.f32.vlgmr.msra.gmra.mxu0 %vm2525_vm13, %v4119_v18 }
 0x812   : > { %13513 = vmatpush3.msra.mxu0 %v4502_v33  ;;  %13445 = vmatprep.mubr.msk.f32.mxu0 %vm14967_vm6, %v23136_v28  ;;  %v4122_v38 = vmul.f32 %v13280_v9, %v2456_v54  ;;  %v2466_v9 = vld [vmem:[%s22525_s4 + $0x5a0] sm:$0xff] }
 0x813   : > { %v3770_v40 = vpop.f32.mrf.mxu1  ;;  %13514 = vmatprep.subr.mxu0 %v23136_v28 }
 0x814   : > { %13515 = vmatpush3.msra.mxu0 %v4496_v57  ;;  %v4121_v56 = vmul.f32 %v3770_v40, %v2455_v39 }
 0x815   : > { %13516 = vmatprep.subr.mxu0 %v23136_v28  ;;  %13446 = vmatmul.mubr.msk.f32.gmra.mxu0 %vm2525_vm13, %v4120_v52 }
 0x816   : > { %v13283_v12 = vpop.f32.mrf.mxu1  ;;  %13517 = vmatpush3.msra.mxu0 %v4490_v43  ;;  %13448 = vmatprep.mubr.msk.f32.mxu0 %vm14967_vm6, %v23136_v28 }
 0x817   : > { %13518 = vmatprep.subr.mxu0 %v23136_v28 }
 0x818   : > { %v3780_v6 = vpop.f32.mrf.mxu1  ;;  %13519 = vmatpush3.msra.mxu0 %v4484_v16  ;;  %v2464_v16 = vld [vmem:[%s22525_s4 + $0x590] sm:$0xff] }
 0x819   : > { %13520 = vmatprep.subr.mxu0 %v23136_v28  ;;  %13449 = vmatmul.mubr.msk.f32.gmra.mxu0 %vm2525_vm13, %v4121_v56  ;;  %v4123_v23 = vmul.f32 %v3780_v6, %v2457_v36 }
 0x81a   : > { %13521 = vmatpush3.msra.mxu0 %v4478_v25  ;;  %13451 = vmatprep.mubr.msk.f32.mxu0 %vm14967_vm6, %v23136_v28  ;;  %v2459_v25 = vld [vmem:[%s22525_s4 + $0x568] sm:$0xff] }
 0x81b   : > { %v13286_v26 = vpop.f32.mrf.mxu1  ;;  %13522 = vmatprep.subr.mxu0 %v23136_v28 }
 0x81c   : > { %13523 = vmatpush3.msra.mxu0 %v18109_v31  ;;  %v2458_v31 = vld [vmem:[%s22525_s4 + $0x560] sm:$0xff] }
 0x81d   : > { %v3790_v8 = vpop.f32.mrf.mxu1  ;;  %13524 = vmatprep.subr.mxu0 %v23136_v28  ;;  %13452 = vmatmul.mubr.msk.f32.gmra.mxu0 %vm2525_vm13, %v4122_v38  ;;  %v4124_v35 = vmul.f32 %v13283_v12, %v2458_v31  ;;  %v2468_v38 = vld [vmem:[%s22525_s4 + $0x5b0] sm:$0xff] }
 0x81e   : > { %13525 = vmatpush3.msra.mxu0 %v18089_v15  ;;  %13454 = vmatprep.mubr.msk.f32.mxu0 %vm14967_vm6, %v23136_v28  ;;  %v18220_v15 = vpop.f32.mrf.mxu0  ;;  %v4125_v57 = vmul.f32 %v3790_v8, %v2459_v25  ;;  %v2480_v25 = vld [vmem:[%s22525_s4 + $0x610] sm:$0xff] }
 0x81f   : > { %v13289_v58 = vpop.f32.mrf.mxu1  ;;  %13526 = vmatprep.subr.mxu0 %v23136_v28 }
 0x820   : > { %v4128_v4 = vmul.f32 %v13289_v58, %v2462_v44  ;;  %13527 = vmatpush3.msra.mxu0 %v18069_v7  ;;  %v2463_v7 = vld [vmem:[%s22525_s4 + $0x588] sm:$0xff]  ;;  %v18237_v13 = vpop.f32.mrf.mxu0 }
 0x821   : > { %v3800_v29 = vpop.f32.mrf.mxu1  ;;  %13455 = vmatmul.mubr.msk.f32.gmra.mxu0 %vm2525_vm13, %v4123_v23  ;;  %13598 = vmatprep.subr.mxu0 %v23136_v28  ;;  %v2469_v23 = vld [vmem:[%s22525_s4 + $0x5b8] sm:$0xff] }
 0x822   : > { %13400 = vmatmul.mubr.msk.f32.vlgmr.msra.gmra.mxu1 %vm2525_vm13, %v4128_v4  ;;  %13457 = vmatprep.mubr.msk.f32.mxu0 %vm14967_vm6, %v23136_v28  ;;  %v18254_v33 = vpop.f32.mrf.mxu0 }
 0x823   : > { %13470 = vmatpush3.msra.mxu1 %v18151_v51  ;;  %v13292_v2 = vpop.f32.mrf.mxu1  ;;  %13402 = vmatprep.mubr.msk.f32.mxu1 %vm14967_vm6, %v23136_v28 }
 0x824   : > { %13471 = vmatprep.subr.mxu1 %v23136_v28  ;;  %v4130_v10 = vmul.f32 %v13292_v2, %v2464_v16  ;;  %v2471_v16 = vld [vmem:[%s22525_s4 + $0x5c8] sm:$0xff] }
 0x825   : > { %13472 = vmatpush3.msra.mxu1 %v18149_v20  ;;  %v3810_v5 = vpop.f32.mrf.mxu1  ;;  %13458 = vmatmul.mubr.msk.f32.gmra.mxu0 %vm2525_vm13, %v4124_v35  ;;  %v2460_v20 = vld [vmem:[%s22525_s4 + $0x570] sm:$0xff]  ;;  %v2470_v35 = vld [vmem:[%s22525_s4 + $0x5c0] sm:$0xff] }
 0x826   : > { %v4129_v11 = vmul.f32 %v3810_v5, %v2463_v7  ;;  %13473 = vmatprep.subr.mxu1 %v23136_v28  ;;  %13460 = vmatprep.mubr.msk.f32.mxu0 %vm14967_vm6, %v23136_v28 }
 0x827   : > { %13474 = vmatpush3.msra.mxu1 %v18147_v49  ;;  %v13295_v43 = vpop.f32.mrf.mxu1  ;;  %v2465_v49 = vld [vmem:[%s22525_s4 + $0x598] sm:$0xff] }
 0x828   : > { %13475 = vmatprep.subr.mxu1 %v23136_v28  ;;  %13403 = vmatmul.mubr.msk.f32.gmra.mxu1 %vm2525_vm13, %v4129_v11  ;;  %v4132_v12 = vmul.f32 %v13295_v43, %v2466_v9 }
 0x829   : > { %13476 = vmatpush3.msra.mxu1 %v18137_v24  ;;  %v3820_v51 = vpop.f32.mrf.mxu1  ;;  %13405 = vmatprep.mubr.msk.f32.mxu1 %vm14967_vm6, %v23136_v28  ;;  %v4126_v24 = vmul.f32 %v13286_v26, %v2460_v20 }
 0x82a   : > { %13477 = vmatprep.subr.mxu1 %v23136_v28  ;;  %13461 = vmatmul.mubr.msk.f32.gmra.mxu0 %vm2525_vm13, %v4125_v57  ;;  %v4131_v3 = vmul.f32 %v3820_v51, %v2465_v49 }
 0x82b   : > { %13478 = vmatpush3.msra.mxu1 %v18119_v53  ;;  %v13298_v50 = vpop.f32.mrf.mxu1  ;;  %13463 = vmatprep.mubr.msk.f32.mxu0 %vm14967_vm6, %v23136_v28  ;;  %v18272_v53 = vpop.f32.mrf.mxu0 }
 0x82c   : > { %13479 = vmatprep.subr.mxu1 %v23136_v28  ;;  %13406 = vmatmul.mubr.msk.f32.gmra.mxu1 %vm2525_vm13, %v4130_v10  ;;  %v4134_v44 = vmul.f32 %v13298_v50, %v2468_v38  ;;  %v2481_v50 = vld [vmem:[%s22525_s4 + $0x618] sm:$0xff] }
 0x82d   : > { %13480 = vmatpush3.msra.mxu1 %v18099_v46  ;;  %v3830_v18 = vpop.f32.mrf.mxu1  ;;  %13408 = vmatprep.mubr.msk.f32.mxu1 %vm14967_vm6, %v23136_v28  ;;  %v4127_v46 = vmul.f32 %v3800_v29, %v2461_v14  ;;  %v4615_v39 = vpop.f32.mrf.mxu0 }
 0x82e   : > { %13481 = vmatprep.subr.mxu1 %v23136_v28  ;;  %13464 = vmatmul.mubr.msk.f32.gmra.mxu0 %vm2525_vm13, %v4126_v24  ;;  %v2472_v24 = vld [vmem:[%s22525_s4 + $0x5d0] sm:$0xff] }
 0x82f   : > { %13482 = vmatpush3.msra.mxu1 %v18079_v45  ;;  %v13301_v52 = vpop.f32.mrf.mxu1  ;;  %13466 = vmatprep.mubr.msk.f32.mxu0 %vm14967_vm6, %v23136_v28  ;;  %v2467_v45 = vld [vmem:[%s22525_s4 + $0x5a8] sm:$0xff]  ;;  %v18297_v54 = vpop.f32.mrf.mxu0 }
 0x830   : > { %13483 = vmatprep.subr.mxu1 %v23136_v28  ;;  %13409 = vmatmul.mubr.msk.f32.gmra.mxu1 %vm2525_vm13, %v4131_v3  ;;  %v4133_v6 = vmul.f32 %v3830_v18, %v2467_v45  ;;  %v4136_v11 = vmul.f32 %v13301_v52, %v2470_v35  ;;  %v2477_v35 = vld [vmem:[%s22525_s4 + $0x5f8] sm:$0xff] }
 0x831   : > { %13484 = vmatpush3.msra.mxu1 %v18059_v34  ;;  %v3840_v40 = vpop.f32.mrf.mxu1  ;;  %13411 = vmatprep.mubr.msk.f32.mxu1 %vm14967_vm6, %v23136_v28  ;;  %v18307_v8 = vpop.f32.mrf.mxu0 }
 0x832   : > { %13467 = vmatmul.mubr.msk.f32.gmra.mxu0 %vm2525_vm13, %v4127_v46  ;;  %13555 = vmatprep.subr.mxu1 %v23136_v28  ;;  %v4135_v29 = vmul.f32 %v3840_v40, %v2469_v23  ;;  %v2473_v46 = vld [vmem:[%s22525_s4 + $0x5d8] sm:$0xff] }
 0x833   : > { %v13304_v56 = vpop.f32.mrf.mxu1  ;;  %13528 = vmatprep.mubr.msk.f32.mxu0 %vm14967_vm6, %v23136_v28  ;;  %v18319_v4 = vpop.f32.mrf.mxu0 }
 0x834   : > { %13412 = vmatmul.mubr.msk.f32.gmra.mxu1 %vm2525_vm13, %v4132_v12  ;;  %v4138_v9 = vmul.f32 %v13304_v56, %v2472_v24 }
 0x835   : > { %v3850_v34 = vpop.f32.mrf.mxu1  ;;  %13414 = vmatprep.mubr.msk.f32.mxu1 %vm14967_vm6, %v23136_v28  ;;  %v18334_v5 = vpop.f32.mrf.mxu0 }
 0x836   : > { %v4137_v10 = vmul.f32 %v3850_v34, %v2471_v16 }
 0x837   : > { %v18302_v26 = vpop.f32.mrf.mxu1  ;;  %v18344_v51 = vpop.f32.mrf.mxu0 }
 0x838   : > { %13415 = vmatmul.mubr.msk.f32.gmra.mxu1 %vm2525_vm13, %v4133_v6 }
 0x839   : > { %v3860_v36 = vpop.f32.mrf.mxu1  ;;  %13417 = vmatprep.mubr.msk.f32.mxu1 %vm14967_vm6, %v23136_v28  ;;  %v18359_v18 = vpop.f32.mrf.mxu0 }
 0x83a   : > { %v4139_v40 = vmul.f32 %v3860_v36, %v2473_v46 }
 0x83b   : > { %v18312_v58 = vpop.f32.mrf.mxu1 }
 0x83c   : > { %13418 = vmatmul.mubr.msk.f32.gmra.mxu1 %vm2525_vm13, %v4134_v44  ;;  %v2476_v44 = vld [vmem:[%s22525_s4 + $0x5f0] sm:$0xff] }
 0x83d   : > { %v18315_v31 = vpop.f32.mrf.mxu1  ;;  %13420 = vmatprep.mubr.msk.f32.mxu1 %vm14967_vm6, %v23136_v28 }
 0x83f   : > { %v18324_v2 = vpop.f32.mrf.mxu1 }
 0x840   : > { %13421 = vmatmul.mubr.msk.f32.gmra.mxu1 %vm2525_vm13, %v4135_v29 }
 0x841   : > { %v18327_v7 = vpop.f32.mrf.mxu1  ;;  %13423 = vmatprep.mubr.msk.f32.mxu1 %vm14967_vm6, %v23136_v28 }
 0x843   : > { %v13316_v43 = vpop.f32.mrf.mxu1 }
 0x844   : > { %v4146_v57 = vmul.f32 %v13316_v43, %v2480_v25  ;;  %13424 = vmatmul.mubr.msk.f32.gmra.mxu1 %vm2525_vm13, %v4136_v11  ;;  %v2486_v11 = vld [vmem:[%s22525_s4 + $0x640] sm:$0xff]  ;;  %v4143_v43 = vmul.f32 %v18327_v7, %v2477_v35 }
 0x845   : > { %v18340_v20 = vpop.f32.mrf.mxu1  ;;  %13485 = vmatprep.mubr.msk.f32.mxu1 %vm14967_vm6, %v23136_v28 }
 0x846   : > { %13529 = vmatmul.mubr.msk.f32.vlgmr.msra.gmra.mxu0 %vm2525_vm13, %v4146_v57 }
 0x847   : > { %13599 = vmatpush3.msra.mxu0 %v4615_v39  ;;  %v13319_v49 = vpop.f32.mrf.mxu1  ;;  %13531 = vmatprep.mubr.msk.f32.mxu0 %vm14967_vm6, %v23136_v28 }
 0x848   : > { %13600 = vmatprep.subr.mxu0 %v23136_v28  ;;  %13486 = vmatmul.mubr.msk.f32.vlgmr.msra.gmra.mxu1 %vm2525_vm13, %v4137_v10  ;;  %v2478_v10 = vld [vmem:[%s22525_s4 + $0x600] sm:$0xff] }
 0x849   : > { %13556 = vmatpush3.msra.mxu1 %v18272_v53  ;;  %13601 = vmatpush3.msra.mxu0 %v18254_v33  ;;  %v3900_v14 = vpop.f32.mrf.mxu1  ;;  %v18370_v53 = vpop.f32.mrf.mxu0 }
 0x84a   : > { %v4147_v3 = vmul.f32 %v3900_v14, %v2481_v50  ;;  %13557 = vmatprep.subr.mxu1 %v23136_v28  ;;  %13602 = vmatprep.subr.mxu0 %v23136_v28  ;;  %v2487_v50 = vld [vmem:[%s22525_s4 + $0x648] sm:$0xff]  ;;  %v4144_v14 = vmul.f32 %v18324_v2, %v2478_v10 }
 0x84b   : > { %13558 = vmatpush3.msra.mxu1 %v18237_v13  ;;  %13603 = vmatpush3.msra.mxu0 %v18220_v15  ;;  %v13322_v52 = vpop.f32.mrf.mxu1  ;;  %v2482_v15 = vld [vmem:[%s22525_s4 + $0x620] sm:$0xff]  ;;  %v18389_v39 = vpop.f32.mrf.mxu0 }
 0x84c   : > { %13488 = vmatprep.mubr.msk.f32.mxu1 %vm14967_vm6, %v23136_v28  ;;  %13559 = vmatprep.subr.mxu1 %v23136_v28  ;;  %v4148_v12 = vmul.f32 %v13319_v49, %v2482_v15 }
 0x84d   : > { %13604 = vmatprep.subr.mxu0 %v23136_v28  ;;  %13489 = vmatmul.mubr.msk.f32.gmra.mxu1 %vm2525_vm13, %v4138_v9  ;;  %v3910_v33 = vpop.f32.mrf.mxu1  ;;  %v18408_v56 = vpop.f32.mrf.mxu0  ;;  %v2479_v9 = vld [vmem:[%s22525_s4 + $0x608] sm:$0xff] }
 0x84e   : > { %13532 = vmatmul.mubr.msk.f32.gmra.mxu0 %vm2525_vm13, %v4147_v3  ;;  %13560 = vmatpush3.msra.mxu1 %v18208_v30  ;;  %v4145_v2 = vmul.f32 %v18340_v20, %v2479_v9 }
 0x84f   : > { %13605 = vmatpush3.msra.mxu0 %v18194_v17  ;;  %13561 = vmatprep.subr.mxu1 %v23136_v28  ;;  %v18382_v13 = vpop.f32.mrf.mxu1  ;;  %v2483_v17 = vld [vmem:[%s22525_s4 + $0x628] sm:$0xff]  ;;  %v18431_v38 = vpop.f32.mrf.mxu0 }
 0x850   : > { %13606 = vmatprep.subr.mxu0 %v23136_v28  ;;  %13562 = vmatpush3.msra.mxu1 %v18184_v63  ;;  %v4149_v6 = vmul.f32 %v3910_v33, %v2483_v17  ;;  %v4152_v49 = vmul.f32 %v18382_v13, %v2486_v11  ;;  %v2488_v33 = vld [vmem:[%s22525_s4 + $0x650] sm:$0xff]  ;;  %v2498_v13 = vld [vmem:[%s22525_s4 + $0x6a0] sm:$0xff] }
 0x851   : > { %13607 = vmatpush3.msra.mxu0 %v18174_v1  ;;  %13491 = vmatprep.mubr.msk.f32.mxu1 %vm14967_vm6, %v23136_v28  ;;  %v3920_v30 = vpop.f32.mrf.mxu1  ;;  %v2474_v1 = vld [vmem:[%s22525_s4 + $0x5e0] sm:$0xff] }
 0x852   : > { %13534 = vmatprep.mubr.msk.f32.mxu0 %vm14967_vm6, %v23136_v28  ;;  %13563 = vmatprep.subr.mxu1 %v23136_v28  ;;  %v4140_v34 = vmul.f32 %v18302_v26, %v2474_v1 }
 0x853   : > { %13608 = vmatprep.subr.mxu0 %v23136_v28  ;;  %13492 = vmatmul.mubr.msk.f32.gmra.mxu1 %vm2525_vm13, %v4139_v40  ;;  %v18396_v63 = vpop.f32.mrf.mxu1 }
 0x854   : > { %13535 = vmatmul.mubr.msk.f32.gmra.mxu0 %vm2525_vm13, %v4148_v12  ;;  %13564 = vmatpush3.msra.mxu1 %v18168_v41  ;;  %v2489_v12 = vld [vmem:[%s22525_s4 + $0x658] sm:$0xff] }
 0x855   : > { %13609 = vmatpush3.msra.mxu0 %v18163_v0  ;;  %13565 = vmatprep.subr.mxu1 %v23136_v28  ;;  %v3930_v45 = vpop.f32.mrf.mxu1  ;;  %v2475_v0 = vld [vmem:[%s22525_s4 + $0x5e8] sm:$0xff] }
 0x856   : > { %13610 = vmatprep.subr.mxu0 %v23136_v28  ;;  %13566 = vmatpush3.msra.mxu1 %v18161_v37  ;;  %v2484_v37 = vld [vmem:[%s22525_s4 + $0x630] sm:$0xff]  ;;  %v4141_v26 = vmul.f32 %v18315_v31, %v2475_v0  ;;  %v18454_v31 = vpop.f32.mrf.mxu0 }
 0x857   : > { %13611 = vmatpush3.msra.mxu0 %v18159_v60  ;;  %13494 = vmatprep.mubr.msk.f32.mxu1 %vm14967_vm6, %v23136_v28  ;;  %v18416_v41 = vpop.f32.mrf.mxu1  ;;  %v4150_v23 = vmul.f32 %v13322_v52, %v2484_v37  ;;  %v4153_v52 = vmul.f32 %v3930_v45, %v2487_v50  ;;  %v2490_v37 = vld [vmem:[%s22525_s4 + $0x660] sm:$0xff] }
 0x858   : > { %13537 = vmatprep.mubr.msk.f32.mxu0 %vm14967_vm6, %v23136_v28  ;;  %13567 = vmatprep.subr.mxu1 %v23136_v28  ;;  %v18475_v16 = vpop.f32.mrf.mxu0  ;;  %v2494_v50 = vld [vmem:[%s22525_s4 + $0x680] sm:$0xff] }
 0x859   : > { %13612 = vmatprep.subr.mxu0 %v23136_v28  ;;  %13495 = vmatmul.mubr.msk.f32.gmra.mxu1 %vm2525_vm13, %v4140_v34  ;;  %v18429_v60 = vpop.f32.mrf.mxu1  ;;  %v2499_v34 = vld [vmem:[%s22525_s4 + $0x6a8] sm:$0xff] }
 0x85a   : > { %13538 = vmatmul.mubr.msk.f32.gmra.mxu0 %vm2525_vm13, %v4149_v6  ;;  %13568 = vmatpush3.msra.mxu1 %v18157_v59  ;;  %v2485_v59 = vld [vmem:[%s22525_s4 + $0x638] sm:$0xff]  ;;  %v4720_v7 = vpop.f32.mrf.mxu0  ;;  %v4155_v20 = vmul.f32 %v18429_v60, %v2489_v12  ;;  %v2516_v12 = vld [vmem:[%s22525_s4 + $0x730] sm:$0xff] }
 0x85b   : > { %13613 = vmatpush3.msra.mxu0 %v18155_v22  ;;  %13569 = vmatprep.subr.mxu1 %v23136_v28  ;;  %v18438_v36 = vpop.f32.mrf.mxu1  ;;  %v4151_v25 = vmul.f32 %v3920_v30, %v2485_v59  ;;  %v4154_v30 = vmul.f32 %v18396_v63, %v2488_v33 }
 0x85c   : > { %13570 = vmatpush3.msra.mxu1 %v18153_v27  ;;  %13497 = vmatprep.mubr.msk.f32.mxu1 %vm14967_vm6, %v23136_v28  ;;  %v4142_v27 = vmul.f32 %v18312_v58, %v2476_v44  ;;  %v4722_v15 = vpop.f32.mrf.mxu0  ;;  %v4156_v44 = vmul.f32 %v18416_v41, %v2490_v37  ;;  %v2491_v41 = vld [vmem:[%s22525_s4 + $0x668] sm:$0xff] }
 0x85d   : > { %13540 = vmatprep.mubr.msk.f32.mxu0 %vm14967_vm6, %v23136_v28  ;;  %13498 = vmatmul.mubr.msk.f32.gmra.mxu1 %vm2525_vm13, %v4141_v26  ;;  %v18452_v22 = vpop.f32.mrf.mxu1 }
 0x85e   : > { %13541 = vmatmul.mubr.msk.f32.gmra.mxu0 %vm2525_vm13, %v4150_v23  ;;  %13500 = vmatprep.mubr.msk.f32.mxu1 %vm14967_vm6, %v23136_v28  ;;  %v4726_v17 = vpop.f32.mrf.mxu0 }
 0x85f   : > { %13543 = vmatprep.mubr.msk.f32.mxu0 %vm14967_vm6, %v23136_v28  ;;  %v18462_v29 = vpop.f32.mrf.mxu1  ;;  %13641 = vmatprep.subr.mxu1 %v23136_v28 }
 0x860   : > { %13684 = vmatprep.subr.mxu0 %v23136_v28  ;;  %v4728_v6 = vpop.f32.mrf.mxu0 }
 0x861   : > { %13501 = vmatmul.mubr.msk.f32.gmra.mxu1 %vm2525_vm13, %v4142_v27  ;;  %v18473_v58 = vpop.f32.mrf.mxu1  ;;  %v2500_v27 = vld [vmem:[%s22525_s4 + $0x6b0] sm:$0xff] }
 0x862   : > { %13544 = vmatmul.mubr.msk.f32.gmra.mxu0 %vm2525_vm13, %v4151_v25  ;;  %13503 = vmatprep.mubr.msk.f32.mxu1 %vm14967_vm6, %v23136_v28  ;;  %v4157_v25 = vmul.f32 %v18452_v22, %v2491_v41  ;;  %v2501_v22 = vld [vmem:[%s22525_s4 + $0x6b8] sm:$0xff] }
 0x863   : > { %13546 = vmatprep.mubr.msk.f32.mxu0 %vm14967_vm6, %v23136_v28  ;;  %v18483_v57 = vpop.f32.mrf.mxu1 }
 0x865   : > { %13504 = vmatmul.mubr.msk.f32.gmra.mxu1 %vm2525_vm13, %v4143_v43  ;;  %v18493_v24 = vpop.f32.mrf.mxu1 }
 0x866   : > { %13547 = vmatmul.mubr.msk.f32.gmra.mxu0 %vm2525_vm13, %v4152_v49  ;;  %13506 = vmatprep.mubr.msk.f32.mxu1 %vm14967_vm6, %v23136_v28 }
 0x867   : > { %13549 = vmatprep.mubr.msk.f32.mxu0 %vm14967_vm6, %v23136_v28  ;;  %v13343_v3 = vpop.f32.mrf.mxu1 }
 0x868   : > { %v4164_v45 = vmul.f32 %v13343_v3, %v2498_v13  ;;  %v2504_v3 = vld [vmem:[%s22525_s4 + $0x6d0] sm:$0xff]  ;;  %v2497_v13 = vld [vmem:[%s22525_s4 + $0x698] sm:$0xff] }
 0x869   : > { %13507 = vmatmul.mubr.msk.f32.gmra.mxu1 %vm2525_vm13, %v4144_v14  ;;  %v18508_v46 = vpop.f32.mrf.mxu1 }
 0x86a   : > { %13550 = vmatmul.mubr.msk.f32.gmra.mxu0 %vm2525_vm13, %v4153_v52  ;;  %13509 = vmatprep.mubr.msk.f32.mxu1 %vm14967_vm6, %v23136_v28  ;;  %v2496_v52 = vld [vmem:[%s22525_s4 + $0x690] sm:$0xff] }
 0x86b   : > { %13552 = vmatprep.mubr.msk.f32.mxu0 %vm14967_vm6, %v23136_v28  ;;  %v13346_v40 = vpop.f32.mrf.mxu1 }
 0x86c   : > { %v4166_v11 = vmul.f32 %v13346_v40, %v2500_v27  ;;  %v2510_v27 = vld [vmem:[%s22525_s4 + $0x700] sm:$0xff] }
 0x86d   : > { %13510 = vmatmul.mubr.msk.f32.gmra.mxu1 %vm2525_vm13, %v4145_v2  ;;  %v3990_v1 = vpop.f32.mrf.mxu1 }
 0x86e   : > { %13553 = vmatmul.mubr.msk.f32.gmra.mxu0 %vm2525_vm13, %v4154_v30  ;;  %13571 = vmatprep.mubr.msk.f32.mxu1 %vm14967_vm6, %v23136_v28  ;;  %v4165_v26 = vmul.f32 %v3990_v1, %v2499_v34  ;;  %v2506_v30 = vld [vmem:[%s22525_s4 + $0x6e0] sm:$0xff] }
 0x86f   : > { %13614 = vmatprep.mubr.msk.f32.mxu0 %vm14967_vm6, %v23136_v28  ;;  %v18530_v63 = vpop.f32.mrf.mxu1 }
 0x871   : > { %13572 = vmatmul.mubr.msk.f32.vlgmr.msra.gmra.mxu1 %vm2525_vm13, %v4155_v20  ;;  %v4000_v0 = vpop.f32.mrf.mxu1 }
 0x872   : > { %13615 = vmatmul.mubr.msk.f32.vlgmr.msra.gmra.mxu0 %vm2525_vm13, %v4164_v45  ;;  %13642 = vmatpush3.msra.mxu1 %v4726_v17  ;;  %v4167_v10 = vmul.f32 %v4000_v0, %v2501_v22  ;;  %v2507_v45 = vld [vmem:[%s22525_s4 + $0x6e8] sm:$0xff]  ;;  %v2508_v0 = vld [vmem:[%s22525_s4 + $0x6f0] sm:$0xff] }
 0x873   : > { %13685 = vmatpush3.msra.mxu0 %v4728_v6  ;;  %13643 = vmatprep.subr.mxu1 %v23136_v28  ;;  %v18541_v60 = vpop.f32.mrf.mxu1 }
 0x874   : > { %13686 = vmatprep.subr.mxu0 %v23136_v28  ;;  %13644 = vmatpush3.msra.mxu1 %v4720_v7  ;;  %v4170_v33 = vmul.f32 %v18541_v60, %v2504_v3  ;;  %v2515_v3 = vld [vmem:[%s22525_s4 + $0x728] sm:$0xff] }
 0x875   : > { %13687 = vmatpush3.msra.mxu0 %v4722_v15  ;;  %13574 = vmatprep.mubr.msk.f32.mxu1 %vm14967_vm6, %v23136_v28  ;;  %v18547_v23 = vpop.f32.mrf.mxu1  ;;  %v2505_v15 = vld [vmem:[%s22525_s4 + $0x6d8] sm:$0xff] }
 0x876   : > { %13617 = vmatprep.mubr.msk.f32.mxu0 %vm14967_vm6, %v23136_v28  ;;  %13645 = vmatprep.subr.mxu1 %v23136_v28 }
 0x877   : > { %13688 = vmatprep.subr.mxu0 %v23136_v28  ;;  %13575 = vmatmul.mubr.msk.f32.gmra.mxu1 %vm2525_vm13, %v4156_v44  ;;  %v18554_v59 = vpop.f32.mrf.mxu1  ;;  %v2518_v44 = vld [vmem:[%s22525_s4 + $0x740] sm:$0xff] }
 0x878   : > { %13618 = vmatmul.mubr.msk.f32.gmra.mxu0 %vm2525_vm13, %v4165_v26  ;;  %13646 = vmatpush3.msra.mxu1 %v18454_v31  ;;  %v4172_v17 = vmul.f32 %v18554_v59, %v2506_v30  ;;  %v2509_v26 = vld [vmem:[%s22525_s4 + $0x6f8] sm:$0xff]  ;;  %v2519_v59 = vld [vmem:[%s22525_s4 + $0x748] sm:$0xff] }
 0x879   : > { %13689 = vmatpush3.msra.mxu0 %v18475_v16  ;;  %13647 = vmatprep.subr.mxu1 %v23136_v28  ;;  %v18566_v35 = vpop.f32.mrf.mxu1 }
 0x87a   : > { %13690 = vmatprep.subr.mxu0 %v23136_v28  ;;  %13648 = vmatpush3.msra.mxu1 %v18408_v56  ;;  %v4171_v40 = vmul.f32 %v18566_v35, %v2505_v15 }
 0x87b   : > { %13691 = vmatpush3.msra.mxu0 %v18431_v38  ;;  %13577 = vmatprep.mubr.msk.f32.mxu1 %vm14967_vm6, %v23136_v28  ;;  %v18574_v31 = vpop.f32.mrf.mxu1  ;;  %v2492_v38 = vld [vmem:[%s22525_s4 + $0x670] sm:$0xff] }
 0x87c   : > { %13620 = vmatprep.mubr.msk.f32.mxu0 %vm14967_vm6, %v23136_v28  ;;  %13649 = vmatprep.subr.mxu1 %v23136_v28  ;;  %v4158_v43 = vmul.f32 %v18438_v36, %v2492_v38  ;;  %v4174_v37 = vmul.f32 %v18574_v31, %v2508_v0  ;;  %v2520_v38 = vld [vmem:[%s22525_s4 + $0x750] sm:$0xff] }
 0x87d   : > { %13692 = vmatprep.subr.mxu0 %v23136_v28  ;;  %13578 = vmatmul.mubr.msk.f32.gmra.mxu1 %vm2525_vm13, %v4157_v25  ;;  %v18581_v56 = vpop.f32.mrf.mxu1 }
 0x87e   : > { %13621 = vmatmul.mubr.msk.f32.gmra.mxu0 %vm2525_vm13, %v4166_v11  ;;  %13650 = vmatpush3.msra.mxu1 %v18370_v53 }
 0x87f   : > { %13693 = vmatpush3.msra.mxu0 %v18389_v39  ;;  %13651 = vmatprep.subr.mxu1 %v23136_v28  ;;  %v18593_v16 = vpop.f32.mrf.mxu1  ;;  %v2493_v39 = vld [vmem:[%s22525_s4 + $0x678] sm:$0xff] }
 0x880   : > { %13694 = vmatprep.subr.mxu0 %v23136_v28  ;;  %13652 = vmatpush3.msra.mxu1 %v18344_v51  ;;  %v4159_v49 = vmul.f32 %v18473_v58, %v2493_v39  ;;  %v2495_v58 = vld [vmem:[%s22525_s4 + $0x688] sm:$0xff]  ;;  %v4176_v31 = vmul.f32 %v18593_v16, %v2510_v27  ;;  %v2521_v16 = vld [vmem:[%s22525_s4 + $0x758] sm:$0xff] }
 0x881   : > { %13695 = vmatpush3.msra.mxu0 %v18359_v18  ;;  %13580 = vmatprep.mubr.msk.f32.mxu1 %vm14967_vm6, %v23136_v28  ;;  %v18601_v53 = vpop.f32.mrf.mxu1  ;;  %v2502_v18 = vld [vmem:[%s22525_s4 + $0x6c0] sm:$0xff] }
 0x882   : > { %13623 = vmatprep.mubr.msk.f32.mxu0 %vm14967_vm6, %v23136_v28  ;;  %13653 = vmatprep.subr.mxu1 %v23136_v28  ;;  %v4168_v7 = vmul.f32 %v18530_v63, %v2502_v18  ;;  %v2517_v63 = vld [vmem:[%s22525_s4 + $0x738] sm:$0xff] }
 0x883   : > { %13696 = vmatprep.subr.mxu0 %v23136_v28  ;;  %13581 = vmatmul.mubr.msk.f32.gmra.mxu1 %vm2525_vm13, %v4158_v43  ;;  %v18611_v51 = vpop.f32.mrf.mxu1 }
 0x884   : > { %13624 = vmatmul.mubr.msk.f32.gmra.mxu0 %vm2525_vm13, %v4167_v10  ;;  %13654 = vmatpush3.msra.mxu1 %v18319_v4 }
 0x885   : > { %13697 = vmatpush3.msra.mxu0 %v18334_v5  ;;  %13655 = vmatprep.subr.mxu1 %v23136_v28  ;;  %v18620_v36 = vpop.f32.mrf.mxu1  ;;  %v2503_v5 = vld [vmem:[%s22525_s4 + $0x6c8] sm:$0xff] }
 0x886   : > { %13698 = vmatprep.subr.mxu0 %v23136_v28  ;;  %13656 = vmatpush3.msra.mxu1 %v18297_v54  ;;  %v4160_v54 = vmul.f32 %v18462_v29, %v2494_v50  ;;  %v4169_v14 = vmul.f32 %v18547_v23, %v2503_v5  ;;  %v4161_v29 = vmul.f32 %v18493_v24, %v2495_v58  ;;  %v2522_v50 = vld [vmem:[%s22525_s4 + $0x760] sm:$0xff] }
 0x887   : > { %13699 = vmatpush3.msra.mxu0 %v18307_v8  ;;  %13583 = vmatprep.mubr.msk.f32.mxu1 %vm14967_vm6, %v23136_v28  ;;  %v18632_v4 = vpop.f32.mrf.mxu1  ;;  %v4162_v24 = vmul.f32 %v18483_v57, %v2496_v52  ;;  %v4163_v57 = vmul.f32 %v18508_v46, %v2497_v13  ;;  %v4173_v46 = vmul.f32 %v18581_v56, %v2507_v45  ;;  %v2511_v56 = vld [vmem:[%s22525_s4 + $0x708] sm:$0xff] }
 0x888   : > { %13626 = vmatprep.mubr.msk.f32.mxu0 %vm14967_vm6, %v23136_v28  ;;  %13584 = vmatmul.mubr.msk.f32.gmra.mxu1 %vm2525_vm13, %v4159_v49  ;;  %v4175_v23 = vmul.f32 %v18601_v53, %v2509_v26  ;;  %v4177_v22 = vmul.f32 %v18620_v36, %v2511_v56  ;;  %v2512_v53 = vld [vmem:[%s22525_s4 + $0x710] sm:$0xff]  ;;  %v2513_v49 = vld [vmem:[%s22525_s4 + $0x718] sm:$0xff] }
 0x889   : > { %13627 = vmatmul.mubr.msk.f32.gmra.mxu0 %vm2525_vm13, %v4168_v7  ;;  %13586 = vmatprep.mubr.msk.f32.mxu1 %vm14967_vm6, %v23136_v28  ;;  %v18646_v8 = vpop.f32.mrf.mxu1  ;;  %v4178_v18 = vmul.f32 %v18611_v51, %v2512_v53  ;;  %v2523_v7 = vld [vmem:[%s22525_s4 + $0x768] sm:$0xff] }
 0x88a   : > { %13629 = vmatprep.mubr.msk.f32.mxu0 %vm14967_vm6, %v23136_v28  ;;  %v4179_v51 = vmul.f32 %v18646_v8, %v2513_v49 }
 0x88b   : > { %v13370_v9 = vpop.f32.mrf.mxu1 }
 0x88c   : > { %13587 = vmatmul.mubr.msk.f32.gmra.mxu1 %vm2525_vm13, %v4160_v54  ;;  %v4182_v20 = vmul.f32 %v13370_v9, %v2516_v12  ;;  %v2514_v54 = vld [vmem:[%s22525_s4 + $0x720] sm:$0xff] }
 0x88d   : > { %13630 = vmatmul.mubr.msk.f32.gmra.mxu0 %vm2525_vm13, %v4169_v14  ;;  %13589 = vmatprep.mubr.msk.f32.mxu1 %vm14967_vm6, %v23136_v28  ;;  %v18676_v2 = vpop.f32.mrf.mxu1  ;;  %v4180_v8 = vmul.f32 %v18632_v4, %v2514_v54 }
 0x88e   : > { %13632 = vmatprep.mubr.msk.f32.mxu0 %vm14967_vm6, %v23136_v28  ;;  %v4181_v4 = vmul.f32 %v18676_v2, %v2515_v3 }
 0x88f   : > { %v13373_v1 = vpop.f32.mrf.mxu1 }
 0x890   : > { %13590 = vmatmul.mubr.msk.f32.gmra.mxu1 %vm2525_vm13, %v4161_v29  ;;  %v4184_v35 = vmul.f32 %v13373_v1, %v2518_v44  ;;  %v2524_v29 = vld [vmem:[%s22525_s4 + $0x770] sm:$0xff] }
 0x891   : > { %13633 = vmatmul.mubr.msk.f32.gmra.mxu0 %vm2525_vm13, %v4170_v33  ;;  %13592 = vmatprep.mubr.msk.f32.mxu1 %vm14967_vm6, %v23136_v28  ;;  %v4080_v34 = vpop.f32.mrf.mxu1 }
 0x892   : > { %13635 = vmatprep.mubr.msk.f32.mxu0 %vm14967_vm6, %v23136_v28  ;;  %v4183_v6 = vmul.f32 %v4080_v34, %v2517_v63 }
 0x893   : > { %v13376_v60 = vpop.f32.mrf.mxu1 }
 0x894   : > { %13593 = vmatmul.mubr.msk.f32.gmra.mxu1 %vm2525_vm13, %v4162_v24  ;;  %v4186_v10 = vmul.f32 %v13376_v60, %v2520_v38 }
 0x895   : > { %13636 = vmatmul.mubr.msk.f32.gmra.mxu0 %vm2525_vm13, %v4171_v40  ;;  %13595 = vmatprep.mubr.msk.f32.mxu1 %vm14967_vm6, %v23136_v28  ;;  %v4090_v41 = vpop.f32.mrf.mxu1 }
 0x896   : > { %13638 = vmatprep.mubr.msk.f32.mxu0 %vm14967_vm6, %v23136_v28  ;;  %v4185_v25 = vmul.f32 %v4090_v41, %v2519_v59 }
 0x897   : > { %v13379_v11 = vpop.f32.mrf.mxu1 }
 0x898   : > { %13596 = vmatmul.mubr.msk.f32.gmra.mxu1 %vm2525_vm13, %v4163_v57  ;;  %v4188_v58 = vmul.f32 %v13379_v11, %v2522_v50 }
 0x899   : > { %13639 = vmatmul.mubr.msk.f32.gmra.mxu0 %vm2525_vm13, %v4172_v17  ;;  %13657 = vmatprep.mubr.msk.f32.mxu1 %vm14967_vm6, %v23136_v28  ;;  %v4100_v43 = vpop.f32.mrf.mxu1 }
 0x89a   : > { %13700 = vmatprep.mubr.msk.f32.mxu0 %vm14967_vm6, %v23136_v28  ;;  %v4187_v39 = vmul.f32 %v4100_v43, %v2521_v16 }
 0x89b   : > { %v13382_v36 = vpop.f32.mrf.mxu1 }
 0x89c   : > { %13658 = vmatmul.mubr.msk.f32.vlgmr.msra.gmra.mxu1 %vm2525_vm13, %v4173_v46  ;;  %v4190_v9 = vmul.f32 %v13382_v36, %v2524_v29 }
 0x89d   : > { %13701 = vmatmul.mubr.msk.f32.vlgmr.msra.gmra.mxu0 %vm2525_vm13, %v4182_v20  ;;  %13660 = vmatprep.mubr.msk.f32.mxu1 %vm14967_vm6, %v23136_v28  ;;  %v4110_v5 = vpop.f32.mrf.mxu1 }
 0x89e   : > { %13703 = vmatprep.mubr.msk.f32.mxu0 %vm14967_vm6, %v23136_v28  ;;  %v4189_v14 = vmul.f32 %v4110_v5, %v2523_v7 }
 0x8a0   : > { %13661 = vmatmul.mubr.msk.f32.gmra.mxu1 %vm2525_vm13, %v4174_v37 }
 0x8a1   : > { %13704 = vmatmul.mubr.msk.f32.gmra.mxu0 %vm2525_vm13, %v4183_v6  ;;  %13663 = vmatprep.mubr.msk.f32.mxu1 %vm14967_vm6, %v23136_v28 }
 0x8a2   : > { %13706 = vmatprep.mubr.msk.f32.mxu0 %vm14967_vm6, %v23136_v28 }
 0x8a4   : > { %13664 = vmatmul.mubr.msk.f32.gmra.mxu1 %vm2525_vm13, %v4175_v23 }
 0x8a5   : > { %13707 = vmatmul.mubr.msk.f32.gmra.mxu0 %vm2525_vm13, %v4184_v35  ;;  %13666 = vmatprep.mubr.msk.f32.mxu1 %vm14967_vm6, %v23136_v28 }
 0x8a6   : > { %13709 = vmatprep.mubr.msk.f32.mxu0 %vm14967_vm6, %v23136_v28 }
 0x8a8   : > { %13667 = vmatmul.mubr.msk.f32.gmra.mxu1 %vm2525_vm13, %v4176_v31 }
 0x8a9   : > { %13710 = vmatmul.mubr.msk.f32.gmra.mxu0 %vm2525_vm13, %v4185_v25  ;;  %13669 = vmatprep.mubr.msk.f32.mxu1 %vm14967_vm6, %v23136_v28 }
 0x8aa   : > { %13712 = vmatprep.mubr.msk.f32.mxu0 %vm14967_vm6, %v23136_v28 }
 0x8ac   : > { %13670 = vmatmul.mubr.msk.f32.gmra.mxu1 %vm2525_vm13, %v4177_v22 }
 0x8ad   : > { %13713 = vmatmul.mubr.msk.f32.gmra.mxu0 %vm2525_vm13, %v4186_v10  ;;  %13672 = vmatprep.mubr.msk.f32.mxu1 %vm14967_vm6, %v23136_v28 }
 0x8ae   : > { %13715 = vmatprep.mubr.msk.f32.mxu0 %vm14967_vm6, %v23136_v28 }
 0x8b0   : > { %13673 = vmatmul.mubr.msk.f32.gmra.mxu1 %vm2525_vm13, %v4178_v18 }
 0x8b1   : > { %13716 = vmatmul.mubr.msk.f32.gmra.mxu0 %vm2525_vm13, %v4187_v39  ;;  %13675 = vmatprep.mubr.msk.f32.mxu1 %vm14967_vm6, %v23136_v28 }
 0x8b2   : > { %13718 = vmatprep.mubr.msk.f32.mxu0 %vm14967_vm6, %v23136_v28 }
 0x8b4   : > { %13676 = vmatmul.mubr.msk.f32.gmra.mxu1 %vm2525_vm13, %v4179_v51 }
 0x8b5   : > { %13719 = vmatmul.mubr.msk.f32.gmra.mxu0 %vm2525_vm13, %v4188_v58  ;;  %13678 = vmatprep.mubr.msk.f32.mxu1 %vm14967_vm6, %v23136_v28 }
 0x8b6   : > { %13721 = vmatprep.mubr.msk.f32.mxu0 %vm14967_vm6, %v23136_v28 }
 0x8b8   : > { %13679 = vmatmul.mubr.msk.f32.gmra.mxu1 %vm2525_vm13, %v4180_v8 }
 0x8b9   : > { %13722 = vmatmul.mubr.msk.f32.gmra.mxu0 %vm2525_vm13, %v4189_v14  ;;  %13681 = vmatprep.mubr.msk.f32.mxu1 %vm14967_vm6, %v23136_v28 }
 0x8ba   : > { %13724 = vmatprep.mubr.msk.f32.mxu0 %vm14967_vm6, %v23136_v28 }
 0x8bc   : > { %13682 = vmatmul.mubr.msk.f32.gmra.mxu1 %vm2525_vm13, %v4181_v4 }
 0x8bd   : > { %13725 = vmatmul.mubr.msk.f32.gmra.mxu0 %vm2525_vm13, %v4190_v9  ;;  %6184 = vmatprep.mubr.f32.mxu1 %v23136_v28 }
 0x8be   : > { %6303 = vmatprep.mubr.f32.mxu0 %v23136_v28 }
 0x8d1   : > { %v4961_v52 = vpop.f32.mrf.mxu0 }
 0x8d3   : > { %v13444_v33 = vpop.f32.mrf.mxu0 }
 0x8d5   : > { %v4966_v15 = vpop.f32.mrf.mxu0 }
 0x8d7   : > { %v13447_v24 = vpop.f32.mrf.mxu0 }
 0x8d9   : > { %v4971_v13 = vpop.f32.mrf.mxu0 }
 0x8db   : > { %v13450_v40 = vpop.f32.mrf.mxu0 }
 0x8dd   : > { %v4976_v30 = vpop.f32.mrf.mxu0 }
 0x8df   : > { %v13453_v2 = vpop.f32.mrf.mxu0 }
 0x8e1   : > { %v4981_v57 = vpop.f32.mrf.mxu0 }
 0x8e2   : > { %v4824_v12 = vpop.f32.mrf.mxu1 }
 0x8e3   : > { %v4962_v1 = vadd.f32 %v4961_v52, %v4824_v12  ;;  %v13456_v17 = vpop.f32.mrf.mxu0 }
 0x8e4   : > { %v13401_v45 = vpop.f32.mrf.mxu1 }
 0x8e5   : > { %v4986_v20 = vpop.f32.mrf.mxu0 }
 0x8e7   : > { %v13459_v46 = vpop.f32.mrf.mxu0 }
 0x8e8   : > { %v4829_v63 = vpop.f32.mrf.mxu1 }
 0x8e9   : > { %v4967_v34 = vadd.f32 %v4966_v15, %v4829_v63 }
 0x8ea   : > { %v13404_v0 = vpop.f32.mrf.mxu1  ;;  %v4991_v6 = vpop.f32.mrf.mxu0 }
 0x8ec   : > { %v4834_v37 = vpop.f32.mrf.mxu1  ;;  %v13462_v60 = vpop.f32.mrf.mxu0 }
 0x8ed   : > { %v4972_v26 = vadd.f32 %v4971_v13, %v4834_v37 }
 0x8ee   : > { %v13407_v44 = vpop.f32.mrf.mxu1  ;;  %v4996_v23 = vpop.f32.mrf.mxu0 }
 0x8f0   : > { %v4839_v59 = vpop.f32.mrf.mxu1  ;;  %v13465_v41 = vpop.f32.mrf.mxu0 }
 0x8f1   : > { %v4977_v27 = vadd.f32 %v4976_v30, %v4839_v59 }
 0x8f2   : > { %v13410_v35 = vpop.f32.mrf.mxu1  ;;  %v5001_v25 = vpop.f32.mrf.mxu0 }
 0x8f4   : > { %v4844_v31 = vpop.f32.mrf.mxu1  ;;  %v13468_v11 = vpop.f32.mrf.mxu0 }
 0x8f5   : > { %v4982_v56 = vadd.f32 %v4981_v57, %v4844_v31 }
 0x8f6   : > { %v13413_v38 = vpop.f32.mrf.mxu1 }
 0x8f8   : > { %v4849_v22 = vpop.f32.mrf.mxu1 }
 0x8f9   : > { %v4987_v16 = vadd.f32 %v4986_v20, %v4849_v22 }
 0x8fa   : > { %v13416_v43 = vpop.f32.mrf.mxu1 }
 0x8fc   : > { %v4854_v53 = vpop.f32.mrf.mxu1 }
 0x8fd   : > { %v4992_v10 = vadd.f32 %v4991_v6, %v4854_v53 }
 0x8fe   : > { %v13419_v39 = vpop.f32.mrf.mxu1 }
 0x900   : > { %v4859_v18 = vpop.f32.mrf.mxu1 }
 0x901   : > { %v4997_v36 = vadd.f32 %v4996_v23, %v4859_v18 }
 0x902   : > { %v13422_v49 = vpop.f32.mrf.mxu1 }
 0x904   : > { %v4864_v50 = vpop.f32.mrf.mxu1 }
 0x905   : > { %v5002_v51 = vadd.f32 %v5001_v25, %v4864_v50 }
 0x906   : > { %v13425_v7 = vpop.f32.mrf.mxu1  ;;  %v5244_v5 = vpop.f32.mrf.mxu0 }
 0x908   : > { %v5098_v54 = vpop.f32.mrf.mxu1  ;;  %v13530_v58 = vpop.f32.mrf.mxu0 }
 0x909   : > { %v5142_v14 = vadd.f32 %v5098_v54, %v4962_v1 }
 0x90a   : > { %v13487_v8 = vpop.f32.mrf.mxu1 }
 0x90b   : > { %v18814_v3 = vadd.f32 %v5244_v5, %v5142_v14 }
 0x90d   : > { %v5103_v29 = vpop.f32.mrf.mxu1 }
 0x90e   : > { %v5143_v4 = vadd.f32 %v5103_v29, %v4967_v34  ;;  %v5249_v9 = vpop.f32.mrf.mxu0 }
 0x90f   : > { %v13490_v52 = vpop.f32.mrf.mxu1 }
 0x910   : > { %v18816_v33 = vadd.f32 %v5249_v9, %v5143_v4  ;;  %v13533_v15 = vpop.f32.mrf.mxu0 }
 0x913   : > { %v5108_v24 = vpop.f32.mrf.mxu1 }
 0x914   : > { %v5144_v13 = vadd.f32 %v5108_v24, %v4972_v26  ;;  %v5254_v40 = vpop.f32.mrf.mxu0 }
 0x915   : > { %v13493_v30 = vpop.f32.mrf.mxu1 }
 0x916   : > { %v18818_v2 = vadd.f32 %v5254_v40, %v5144_v13  ;;  %v13536_v57 = vpop.f32.mrf.mxu0 }
 0x919   : > { %v5113_v12 = vpop.f32.mrf.mxu1 }
 0x91a   : > { %v5145_v17 = vadd.f32 %v5113_v12, %v4977_v27  ;;  %v5259_v1 = vpop.f32.mrf.mxu0 }
 0x91b   : > { %v13496_v45 = vpop.f32.mrf.mxu1 }
 0x91c   : > { %v18820_v20 = vadd.f32 %v5259_v1, %v5145_v17  ;;  %v13539_v46 = vpop.f32.mrf.mxu0 }
 0x91d   : > { %v5118_v63 = vpop.f32.mrf.mxu1 }
 0x91e   : > { %v5146_v34 = vadd.f32 %v5118_v63, %v4982_v56  ;;  %v5264_v0 = vpop.f32.mrf.mxu0 }
 0x91f   : > { %v13499_v6 = vpop.f32.mrf.mxu1 }
 0x920   : > { %v18822_v37 = vadd.f32 %v5264_v0, %v5146_v34  ;;  %v13542_v60 = vpop.f32.mrf.mxu0 }
 0x921   : > { %v5123_v26 = vpop.f32.mrf.mxu1 }
 0x922   : > { %v5147_v44 = vadd.f32 %v5123_v26, %v4987_v16  ;;  %v5269_v23 = vpop.f32.mrf.mxu0 }
 0x923   : > { %v13502_v59 = vpop.f32.mrf.mxu1 }
 0x924   : > { %v18824_v41 = vadd.f32 %v5269_v23, %v5147_v44  ;;  %v13545_v35 = vpop.f32.mrf.mxu0 }
 0x925   : > { %v5128_v27 = vpop.f32.mrf.mxu1 }
 0x926   : > { %v5148_v25 = vadd.f32 %v5128_v27, %v4992_v10  ;;  %v5274_v31 = vpop.f32.mrf.mxu0 }
 0x927   : > { %v13505_v11 = vpop.f32.mrf.mxu1 }
 0x928   : > { %v18826_v38 = vadd.f32 %v5274_v31, %v5148_v25  ;;  %v13548_v22 = vpop.f32.mrf.mxu0 }
 0x929   : > { %v5133_v56 = vpop.f32.mrf.mxu1 }
 0x92a   : > { %v5149_v43 = vadd.f32 %v5133_v56, %v4997_v36  ;;  %v5279_v53 = vpop.f32.mrf.mxu0 }
 0x92b   : > { %v13508_v39 = vpop.f32.mrf.mxu1 }
 0x92c   : > { %v18828_v18 = vadd.f32 %v5279_v53, %v5149_v43  ;;  %v13551_v49 = vpop.f32.mrf.mxu0 }
 0x92d   : > { %v5138_v16 = vpop.f32.mrf.mxu1 }
 0x92e   : > { %v5150_v50 = vadd.f32 %v5138_v16, %v5002_v51  ;;  %v5284_v7 = vpop.f32.mrf.mxu0 }
 0x92f   : > { %v13511_v5 = vpop.f32.mrf.mxu1 }
 0x930   : > { %v5296_v54 = vadd.f32 %v5284_v7, %v5150_v50  ;;  %v13554_v58 = vpop.f32.mrf.mxu0 }
 0x931   : > { %v5390_v14 = vpop.f32.mrf.mxu1  ;;  %v18847_v58 = vld [vmem:[%s22526_s5 + $0x2] ss:$0 sm:$0xff] }
 0x932   : > { %v5536_v10 = vpop.f32.mrf.mxu0  ;;  %v5434_v25 = vadd.f32 %v5390_v14, %v18814_v3 }
 0x933   : > { %v13573_v8 = vpop.f32.mrf.mxu1 }
 0x934   : > { %v13616_v29 = vpop.f32.mrf.mxu0  ;;  %v5580_v53 = vadd.f32 %v5536_v10, %v5434_v25 }
 0x937   : > { %v5395_v4 = vpop.f32.mrf.mxu1 }
 0x938   : > { %v5541_v9 = vpop.f32.mrf.mxu0  ;;  %v5435_v39 = vadd.f32 %v5395_v4, %v18816_v33 }
 0x939   : > { %v13576_v52 = vpop.f32.mrf.mxu1 }
 0x93a   : > { %v13619_v15 = vpop.f32.mrf.mxu0  ;;  %v5581_v14 = vadd.f32 %v5541_v9, %v5435_v39 }
 0x93d   : > { %v5400_v36 = vpop.f32.mrf.mxu1 }
 0x93e   : > { %v5546_v24 = vpop.f32.mrf.mxu0 }
 0x93f   : > { %v13579_v13 = vpop.f32.mrf.mxu1 }
 0x940   : > { %v13622_v40 = vpop.f32.mrf.mxu0 }
 0x943   : > { %v5405_v30 = vpop.f32.mrf.mxu1 }
 0x944   : > { %v5551_v57 = vpop.f32.mrf.mxu0  ;;  %v5437_v40 = vadd.f32 %v5405_v30, %v18820_v20 }
 0x945   : > { %v13582_v12 = vpop.f32.mrf.mxu1 }
 0x946   : > { %v13625_v51 = vpop.f32.mrf.mxu0 }
 0x948   : > { %v5410_v17 = vpop.f32.mrf.mxu1 }
 0x949   : > { %v5556_v1 = vpop.f32.mrf.mxu0 }
 0x94a   : > { %v13585_v45 = vpop.f32.mrf.mxu1 }
 0x94b   : > { %v13628_v46 = vpop.f32.mrf.mxu0 }
 0x94c   : > { %v5415_v63 = vpop.f32.mrf.mxu1 }
 0x94d   : > { %v18830_v34 = vpop.f32.mrf.mxu0 }
 0x94e   : > { %v13588_v0 = vpop.f32.mrf.mxu1 }
 0x94f   : > { %v13631_v6 = vpop.f32.mrf.mxu0 }
 0x950   : > { %v18832_v60 = vpop.f32.mrf.mxu1 }
 0x951   : > { %v18834_v26 = vpop.f32.mrf.mxu0 }
 0x952   : > { %v13591_v44 = vpop.f32.mrf.mxu1 }
 0x953   : > { %v13634_v23 = vpop.f32.mrf.mxu0  ;;  %v5583_v44 = vadd.f32 %v5551_v57, %v5437_v40  ;;  %v5439_v57 = vadd.f32 %v5415_v63, %v18824_v41  ;;  %v5440_v41 = vadd.f32 %v18832_v60, %v18826_v38 }
 0x954   : > { %v18836_v59 = vpop.f32.mrf.mxu1 }
 0x955   : > { %v18838_v35 = vpop.f32.mrf.mxu0  ;;  %v5441_v38 = vadd.f32 %v18836_v59, %v18828_v18 }
 0x956   : > { %v13594_v27 = vpop.f32.mrf.mxu1 }
 0x957   : > { %v13637_v31 = vpop.f32.mrf.mxu0 }
 0x958   : > { %v5430_v11 = vpop.f32.mrf.mxu1 }
 0x959   : > { %v5442_v22 = vadd.f32 %v5430_v11, %v5296_v54  ;;  %v5576_v56 = vpop.f32.mrf.mxu0  ;;  %v5436_v54 = vadd.f32 %v5400_v36, %v18818_v2 }
 0x95a   : > { %v13597_v43 = vpop.f32.mrf.mxu1 }
 0x95b   : > { %v18842_v49 = vadd.f32 %v5576_v56, %v5442_v22  ;;  %v13640_v16 = vpop.f32.mrf.mxu0  ;;  %v5582_v13 = vadd.f32 %v5546_v24, %v5436_v54  ;;  %v5438_v24 = vadd.f32 %v5410_v17, %v18822_v37 }
 0x95c   : > { %v5682_v50 = vpop.f32.mrf.mxu1 }
 0x95d   : > { %v5726_v7 = vadd.f32 %v5682_v50, %v5580_v53  ;;  %v5828_v5 = vpop.f32.mrf.mxu0  ;;  %v5584_v56 = vadd.f32 %v5556_v1, %v5438_v24 }
 0x95e   : > { %v13659_v3 = vpop.f32.mrf.mxu1 }
 0x95f   : > { %v5872_v8 = vadd.f32 %v5828_v5, %v5726_v7  ;;  %v13702_v29 = vpop.f32.mrf.mxu0  ;;  %v5585_v5 = vadd.f32 %v18830_v34, %v5439_v57  ;;  %v5586_v34 = vadd.f32 %v18834_v26, %v5440_v41  ;;  %v5587_v26 = vadd.f32 %v18838_v35, %v5441_v38 }
 0x960   : > { %v5687_v10 = vpop.f32.mrf.mxu1 }
 0x961   : > { %v5882_v33 = vadd.f32 %v18847_v58, %v5872_v8  ;;  %v5727_v4 = vadd.f32 %v5687_v10, %v5581_v14  ;;  %v5833_v52 = vpop.f32.mrf.mxu0 }
 0x962   : > { %v13662_v15 = vpop.f32.mrf.mxu1 }
 0x963   : > { %v18853_v12 = vadd.f32 %v5882_v33, %v17102_v55  ;;  %v5873_v51 = vadd.f32 %v5833_v52, %v5727_v4  ;;  %v13705_v45 = vpop.f32.mrf.mxu0 }
 0x964   : > { %v5692_v46 = vpop.f32.mrf.mxu1 }
 0x965   : > { %23137 = vst [vmem:[#allocation47_spill] sm:$0xff] %v18853_v12  ;;  %v5883_v9 = vadd.f32 %v18847_v58, %v5873_v51  ;;  %v5728_v2 = vadd.f32 %v5692_v46, %v5582_v13  ;;  %v5838_v36 = vpop.f32.mrf.mxu0  ;;  %v5900_v0 = vsel %vm2525_vm13, %v18853_v12, 0.0 }
 0x966   : > { %5901 = vadd.xlane.f32.xlu1 %v5900_v0  ;;  %v13665_v6 = vpop.f32.mrf.mxu1 }
 0x967   : > { %v18860_v20 = vadd.f32 %v5883_v9, %v17098_v48  ;;  %v5874_v55 = vadd.f32 %v5838_v36, %v5728_v2  ;;  %v13708_v30 = vpop.f32.mrf.mxu0 }
 0x968   : > { %v5697_v23 = vpop.f32.mrf.mxu1 }
 0x969   : > { %23138 = vst [vmem:[#allocation46_spill] sm:$0xff] %v18860_v20  ;;  %v5884_v27 = vadd.f32 %v18847_v58, %v5874_v55  ;;  %v5729_v25 = vadd.f32 %v5697_v23, %v5583_v44  ;;  %v5843_v31 = vpop.f32.mrf.mxu0  ;;  %v5903_v11 = vsel %vm2525_vm13, %v18860_v20, 0.0 }
 0x96a   : > { %5904 = vadd.xlane.f32.xlu0 %v5903_v11  ;;  %v13668_v22 = vpop.f32.mrf.mxu1 }
 0x96b   : > { %v18867_v37 = vadd.f32 %v5884_v27, %v17091_v42  ;;  %v5875_v48 = vadd.f32 %v5843_v31, %v5729_v25  ;;  %v13711_v17 = vpop.f32.mrf.mxu0 }
 0x96c   : > { %v5702_v43 = vpop.f32.mrf.mxu1 }
 0x96d   : > { %23139 = vst [vmem:[#allocation48_spill] sm:$0xff] %v18867_v37  ;;  %v5885_v53 = vadd.f32 %v18847_v58, %v5875_v48  ;;  %v5730_v39 = vadd.f32 %v5702_v43, %v5584_v56  ;;  %v5848_v16 = vpop.f32.mrf.mxu0  ;;  %v5906_v50 = vsel %vm2525_vm13, %v18867_v37, 0.0 }
 0x96e   : > { %5907 = vadd.xlane.f32.xlu1 %v5906_v50  ;;  %v13671_v7 = vpop.f32.mrf.mxu1 }
 0x96f   : > { %v18876_v42 = vadd.f32 %v5885_v53, %v17084_v32  ;;  %v5876_v1 = vadd.f32 %v5848_v16, %v5730_v39  ;;  %v13714_v63 = vpop.f32.mrf.mxu0 }
 0x970   : > { %v5707_v3 = vpop.f32.mrf.mxu1 }
 0x971   : > { %23140 = vst [vmem:[#allocation32_spill] sm:$0xff] %v18876_v42  ;;  %v5886_v14 = vadd.f32 %v18847_v58, %v5876_v1  ;;  %v5731_v54 = vadd.f32 %v5707_v3, %v5585_v5  ;;  %v5853_v8 = vpop.f32.mrf.mxu0  ;;  %v5909_v29 = vsel %vm2525_vm13, %v18876_v42, 0.0 }
 0x972   : > { %5910 = vadd.xlane.f32.xlu0 %v5909_v29  ;;  %v13674_v10 = vpop.f32.mrf.mxu1 }
 0x973   : > { %v18885_v32 = vadd.f32 %v5886_v14, %v17076_v61  ;;  %v5877_v60 = vadd.f32 %v5853_v8, %v5731_v54  ;;  %v13717_v33 = vpop.f32.mrf.mxu0 }
 0x974   : > { %v5712_v4 = vpop.f32.mrf.mxu1 }
 0x975   : > { %23141 = vst [vmem:[#allocation53_spill] sm:$0xff] %v18885_v32  ;;  %v5887_v52 = vadd.f32 %v18847_v58, %v5877_v60  ;;  %v5732_v15 = vadd.f32 %v5712_v4, %v5586_v34  ;;  %v5858_v13 = vpop.f32.mrf.mxu0  ;;  %v5912_v40 = vsel %vm2525_vm13, %v18885_v32, 0.0 }
 0x976   : > { %5913 = vadd.xlane.f32.xlu1 %v5912_v40  ;;  %v13677_v51 = vpop.f32.mrf.mxu1  ;;  %v6067_v40 = vld [vmem:[%s22528_s7 + $0xe8] sm:$0xff] }
 0x977   : > { %v18892_v45 = vadd.f32 %v5887_v52, %v17068_v19  ;;  %v5878_v18 = vadd.f32 %v5858_v13, %v5732_v15  ;;  %v13720_v61 = vpop.f32.mrf.mxu0  ;;  %v6069_v51 = vld [vmem:[%s22528_s7 + $0xf8] sm:$0xff]  ;;  %6136 = vmatprep.subr.mxu1 %v6067_v40 }
 0x978   : > { %v5717_v59 = vpop.f32.mrf.mxu1  ;;  %6255 = vmatprep.subr.mxu0 %v6069_v51  ;;  %v6066_v61 = vld [vmem:[%s22528_s7 + $0xe0] sm:$0xff] }
 0x979   : > { %23142 = vst [vmem:[#allocation56_spill] sm:$0xff] %v18892_v45  ;;  %v5888_v46 = vadd.f32 %v18847_v58, %v5878_v18  ;;  %v5733_v9 = vadd.f32 %v5717_v59, %v5587_v26  ;;  %v5863_v2 = vpop.f32.mrf.mxu0  ;;  %v5915_v36 = vsel %vm2525_vm13, %v18892_v45, 0.0  ;;  %v6068_v59 = vld [vmem:[%s22528_s7 + $0xf0] sm:$0xff]  ;;  %6137 = vmatpush1.msra.mxu1 %v6066_v61 }
 0x97a   : > { %5916 = vadd.xlane.f32.xlu0 %v5915_v36  ;;  %v13680_v0 = vpop.f32.mrf.mxu1  ;;  %6256 = vmatpush1.msra.mxu0 %v6068_v59 }
 0x97b   : > { %v18898_v6 = vadd.f32 %v5888_v46, %v17061_v21  ;;  %v5879_v44 = vadd.f32 %v5863_v2, %v5733_v9  ;;  %v13723_v35 = vpop.f32.mrf.mxu0  ;;  %v6063_v9 = vld [vmem:[%s22528_s7 + $0xc8] sm:$0xff]  ;;  %v6065_v2 = vld [vmem:[%s22528_s7 + $0xd8] sm:$0xff] }
 0x97c   : > { %v5722_v24 = vpop.f32.mrf.mxu1  ;;  %6138 = vmatprep.subr.mxu1 %v6063_v9  ;;  %v6064_v35 = vld [vmem:[%s22528_s7 + $0xd0] sm:$0xff]  ;;  %6257 = vmatprep.subr.mxu0 %v6065_v2 }
 0x97d   : > { %23143 = vst [vmem:[#allocation37_spill] sm:$0xff] %v18898_v6  ;;  %v5889_v19 = vadd.f32 %v18847_v58, %v5879_v44  ;;  %v5734_v55 = vadd.f32 %v5722_v24, %v18842_v49  ;;  %v5868_v30 = vpop.f32.mrf.mxu0  ;;  %v5918_v23 = vsel %vm2525_vm13, %v18898_v6, 0.0  ;;  %v6062_v44 = vld [vmem:[%s22528_s7 + $0xc0] sm:$0xff]  ;;  %v6059_v24 = vld [vmem:[%s22528_s7 + $0xa8] sm:$0xff]  ;;  %6258 = vmatpush1.msra.mxu0 %v6064_v35 }
 0x97e   : > { %5919 = vadd.xlane.f32.xlu1 %v5918_v23  ;;  %v13683_v27 = vpop.f32.mrf.mxu1  ;;  %6139 = vmatpush1.msra.mxu1 %v6062_v44  ;;  %v19067_v35 = vld [vmem:[%s22526_s5 + $0x4] ss:$0 sm:$0xff] }
 0x97f   : > { %v18905_v25 = vadd.f32 %v5889_v19, %v17040_v47  ;;  %v5880_v31 = vadd.f32 %v5868_v30, %v5734_v55  ;;  %v13726_v11 = vpop.f32.mrf.mxu0  ;;  %v6061_v19 = vld [vmem:[%s22528_s7 + $0xb8] sm:$0xff]  ;;  %v14733_v55 = vld [vmem:[%s22525_s4 + $0x40] sm:$0xff]  ;;  %6140 = vmatprep.subr.mxu1 %v6059_v24 }
 0x980   : > { %v6060_v11 = vld [vmem:[%s22528_s7 + $0xb0] sm:$0xff]  ;;  %6259 = vmatprep.subr.mxu0 %v6061_v19 }
 0x981   : > { %23144 = vst [vmem:[#allocation35_spill] sm:$0xff] %v18905_v25  ;;  %v18908_v21 = vadd.f32 %v18847_v58, %v5880_v31  ;;  %v5921_v22 = vsel %vm2525_vm13, %v18905_v25, 0.0  ;;  %v6058_v31 = vld [vmem:[%s22528_s7 + $0xa0] sm:$0xff]  ;;  %6260 = vmatpush1.msra.mxu0 %v6060_v11 }
 0x982   : > { %5922 = vadd.xlane.f32.xlu0 %v5921_v22  ;;  %v6057_v22 = vld [vmem:[%s22528_s7 + $0x98] sm:$0xff]  ;;  %6141 = vmatpush1.msra.mxu1 %v6058_v31 }
 0x983   : > { %v18987_v30 = vadd.f32 %v14733_v55, %v18908_v21  ;;  %v6055_v21 = vld [vmem:[%s22528_s7 + $0x88] sm:$0xff]  ;;  %6261 = vmatprep.subr.mxu0 %v6057_v22  ;;  %v19073_v55 = vld [vmem:[%s22526_s5 + $0x6] ss:$0 sm:$0xff] }
 0x984   : > { %6142 = vmatprep.subr.mxu1 %v6055_v21 }
 0x985   : > { %23145 = vst [vmem:[#allocation63_spill] sm:$0xff] %v18987_v30 }
 0x9ef   : > { %v5902_v56 = vpop.xlane.xlu1 %5901 }
 0x9f0   : > { %v5928_v49 = vmul.f32 0.015625, %v5902_v56 }
 0x9f2   : > { %v18913_v57 = vsub.f32 %v18853_v12, %v5928_v49  ;;  %v6054_v49 = vld [vmem:[%s22528_s7 + $0x80] sm:$0xff] }
 0x9f3   : > { %v5905_v48 = vpop.xlane.xlu0 %5904  ;;  %6143 = vmatpush1.msra.mxu1 %v6054_v49 }
 0x9f4   : > { %v5929_v17 = vmul.f32 0.015625, %v5905_v48  ;;  %v5946_v47 = vmul.f32 %v18913_v57, %v18913_v57  ;;  %v6056_v48 = vld [vmem:[%s22528_s7 + $0x90] sm:$0xff] }
 0x9f5   : > { %6262 = vmatpush1.msra.mxu0 %v6056_v48 }
 0x9f6   : > { %v18918_v43 = vsub.f32 %v18860_v20, %v5929_v17  ;;  %v5955_v58 = vsel %vm2525_vm13, %v5946_v47, 0.0  ;;  %v6051_v17 = vld [vmem:[%s22528_s7 + $0x68] sm:$0xff]  ;;  %v6053_v47 = vld [vmem:[%s22528_s7 + $0x78] sm:$0xff] }
 0x9f7   : > { %v5908_v53 = vpop.xlane.xlu1 %5907  ;;  %5956 = vadd.xlane.f32.xlu1 %v5955_v58  ;;  %6144 = vmatprep.subr.mxu1 %v6051_v17 }
 0x9f8   : > { %v5930_v39 = vmul.f32 0.015625, %v5908_v53  ;;  %v5947_v16 = vmul.f32 %v18918_v43, %v18918_v43  ;;  %v5924_v53 = vsel %vm2525_vm13, %v18987_v30, 0.0  ;;  %6263 = vmatprep.subr.mxu0 %v6053_v47 }
 0x9fa   : > { %v18924_v50 = vsub.f32 %v18867_v37, %v5930_v39  ;;  %v5958_v7 = vsel %vm2525_vm13, %v5947_v16, 0.0  ;;  %v6050_v39 = vld [vmem:[%s22528_s7 + $0x60] sm:$0xff]  ;;  %v6052_v16 = vld [vmem:[%s22528_s7 + $0x70] sm:$0xff] }
 0x9fb   : > { %v5911_v5 = vpop.xlane.xlu0 %5910  ;;  %5959 = vadd.xlane.f32.xlu0 %v5958_v7  ;;  %v6047_v7 = vld [vmem:[%s22528_s7 + $0x48] sm:$0xff]  ;;  %6145 = vmatpush1.msra.mxu1 %v6050_v39 }
 0x9fc   : > { %v5931_v41 = vmul.f32 0.015625, %v5911_v5  ;;  %v5948_v1 = vmul.f32 %v18924_v50, %v18924_v50  ;;  %v6049_v5 = vld [vmem:[%s22528_s7 + $0x58] sm:$0xff]  ;;  %6264 = vmatpush1.msra.mxu0 %v6052_v16  ;;  %6146 = vmatprep.subr.mxu1 %v6047_v7 }
 0x9fd   : > { %6265 = vmatprep.subr.mxu0 %v6049_v5 }
 0x9fe   : > { %v18930_v63 = vsub.f32 %v18876_v42, %v5931_v41  ;;  %v5961_v3 = vsel %vm2525_vm13, %v5948_v1, 0.0  ;;  %v6046_v41 = vld [vmem:[%s22528_s7 + $0x40] sm:$0xff]  ;;  %v6048_v1 = vld [vmem:[%s22528_s7 + $0x50] sm:$0xff] }
 0x9ff   : > { %v5914_v14 = vpop.xlane.xlu1 %5913  ;;  %5962 = vadd.xlane.f32.xlu1 %v5961_v3  ;;  %v6043_v3 = vld [vmem:[%s22528_s7 + $0x28] sm:$0xff]  ;;  %6147 = vmatpush1.msra.mxu1 %v6046_v41 }
 0xa00   : > { %v5932_v54 = vmul.f32 0.015625, %v5914_v14  ;;  %v5949_v8 = vmul.f32 %v18930_v63, %v18930_v63  ;;  %v6045_v14 = vld [vmem:[%s22528_s7 + $0x38] sm:$0xff]  ;;  %6266 = vmatpush1.msra.mxu0 %v6048_v1  ;;  %6148 = vmatprep.subr.mxu1 %v6043_v3 }
 0xa01   : > { %6267 = vmatprep.subr.mxu0 %v6045_v14 }
 0xa02   : > { %v18936_v29 = vsub.f32 %v18885_v32, %v5932_v54  ;;  %v5964_v10 = vsel %vm2525_vm13, %v5949_v8, 0.0  ;;  %v6042_v54 = vld [vmem:[%s22528_s7 + $0x20] sm:$0xff]  ;;  %v6044_v8 = vld [vmem:[%s22528_s7 + $0x30] sm:$0xff] }
 0xa03   : > { %v5917_v34 = vpop.xlane.xlu0 %5916  ;;  %5965 = vadd.xlane.f32.xlu0 %v5964_v10  ;;  %v6039_v10 = vld [vmem:[%s22528_s7 + $0x8] sm:$0xff]  ;;  %6149 = vmatpush1.msra.mxu1 %v6042_v54 }
 0xa04   : > { %v5933_v38 = vmul.f32 0.015625, %v5917_v34  ;;  %v5950_v60 = vmul.f32 %v18936_v29, %v18936_v29  ;;  %v6041_v34 = vld [vmem:[%s22528_s7 + $0x18] sm:$0xff]  ;;  %6268 = vmatpush1.msra.mxu0 %v6044_v8  ;;  %6150 = vmatprep.subr.mxu1 %v6039_v10 }
 0xa05   : > { %6269 = vmatprep.subr.mxu0 %v6041_v34 }
 0xa06   : > { %v18942_v33 = vsub.f32 %v18892_v45, %v5933_v38  ;;  %v5967_v4 = vsel %vm2525_vm13, %v5950_v60, 0.0  ;;  %v6038_v38 = vld [vmem:[%s22528_s7] sm:$0xff]  ;;  %v6040_v60 = vld [vmem:[%s22528_s7 + $0x10] sm:$0xff] }
 0xa07   : > { %5968 = vadd.xlane.f32.xlu1 %v5967_v4  ;;  %v5920_v52 = vpop.xlane.xlu1 %5919  ;;  %6151 = vmatpush1.msra.mxu1 %v6038_v38 }
 0xa08   : > { %v5934_v15 = vmul.f32 0.015625, %v5920_v52  ;;  %v5951_v13 = vmul.f32 %v18942_v33, %v18942_v33  ;;  %6270 = vmatpush1.msra.mxu0 %v6040_v60 }
 0xa0a   : > { %v18954_v26 = vsub.f32 %v18898_v6, %v5934_v15  ;;  %v5970_v18 = vsel %vm2525_vm13, %v5951_v13, 0.0 }
 0xa0b   : > { %5971 = vadd.xlane.f32.xlu0 %v5970_v18  ;;  %v5923_v46 = vpop.xlane.xlu0 %5922 }
 0xa0c   : > { %v5935_v36 = vmul.f32 0.015625, %v5923_v46  ;;  %v5952_v0 = vmul.f32 %v18954_v26, %v18954_v26 }
 0xa0e   : > { %v18990_v23 = vsub.f32 %v18905_v25, %v5935_v36  ;;  %v5973_v27 = vsel %vm2525_vm13, %v5952_v0, 0.0 }
 0xa0f   : > { %5974 = vadd.xlane.f32.xlu1 %v5973_v27 }
 0xa10   : > { %v5953_v56 = vmul.f32 %v18990_v23, %v18990_v23 }
 0xa12   : > { %v5976_v58 = vsel %vm2525_vm13, %v5953_v56, 0.0 }
 0xa13   : > { %5977 = vadd.xlane.f32.xlu0 %v5976_v58  ;;  %5925 = vadd.xlane.f32.xlu1 %v5924_v53 }
 0xa80   : > { %v5957_v4 = vpop.xlane.xlu1 %5956 }
 0xa81   : > { %v5982_v52 = vmul.f32 0.015625, %v5957_v4 }
 0xa83   : > { %v5991_v15 = vadd.f32 1e-06, %v5982_v52 }
 0xa84   : > { %v5960_v13 = vpop.xlane.xlu0 %5959 }
 0xa85   : > { %14515 = vrsqrt.f32 %v5991_v15  ;;  %v5983_v40 = vmul.f32 0.015625, %v5960_v13 }
 0xa87   : > { %v5992_v51 = vadd.f32 1e-06, %v5983_v40 }
 0xa88   : > { %v5963_v18 = vpop.xlane.xlu1 %5962 }
 0xa89   : > { %14517 = vrsqrt.f32 %v5992_v51  ;;  %v5984_v61 = vmul.f32 0.015625, %v5963_v18 }
 0xa8b   : > { %v5993_v59 = vadd.f32 1e-06, %v5984_v61 }
 0xa8c   : > { %v5966_v46 = vpop.xlane.xlu0 %5965 }
 0xa8d   : > { %14519 = vrsqrt.f32 %v5993_v59  ;;  %v5985_v9 = vmul.f32 0.015625, %v5966_v46 }
 0xa8f   : > { %v5994_v2 = vadd.f32 1e-06, %v5985_v9 }
 0xa90   : > { %v5969_v36 = vpop.xlane.xlu1 %5968 }
 0xa91   : > { %14521 = vrsqrt.f32 %v5994_v2  ;;  %v5986_v0 = vmul.f32 0.015625, %v5969_v36  ;;  %v6745_v2 = vld [vmem:[%s22529_s8 + $0x1f8] sm:$0xff] }
 0xa92   : > { %v14516_v44 = vpop.eup %14515  ;;  %12492 = vmatprep.subr.mxu0 %v6745_v2  ;;  %v6697_v36 = vld [vmem:[%s22529_s8 + $0x78] sm:$0xff] }
 0xa93   : > { %v6009_v24 = vmul.f32 %v14516_v44, %v18913_v57  ;;  %v5995_v19 = vadd.f32 1e-06, %v5986_v0  ;;  %v6729_v0 = vld [vmem:[%s22529_s8 + $0x178] sm:$0xff]  ;;  %v6712_v44 = vld [vmem:[%s22529_s8 + $0xf0] sm:$0xff] }
 0xa94   : > { %v5972_v27 = vpop.xlane.xlu0 %5971  ;;  %v6717_v2 = vld [vmem:[%s22529_s8 + $0x118] sm:$0xff] }
 0xa95   : > { %v6019_v31 = vmul.f32 %v19067_v35, %v6009_v24  ;;  %14523 = vrsqrt.f32 %v5995_v19  ;;  %v5987_v11 = vmul.f32 0.015625, %v5972_v27  ;;  %v6744_v24 = vld [vmem:[%s22529_s8 + $0x1f0] sm:$0xff] }
 0xa96   : > { %v14518_v21 = vpop.eup %14517  ;;  %v6696_v19 = vld [vmem:[%s22529_s8 + $0x70] sm:$0xff] }
 0xa97   : > { %v6029_v22 = vadd.f32 %v19073_v55, %v6019_v31  ;;  %v6010_v56 = vmul.f32 %v14518_v21, %v18918_v43  ;;  %v5996_v49 = vadd.f32 1e-06, %v5987_v11  ;;  %v6728_v27 = vld [vmem:[%s22529_s8 + $0x170] sm:$0xff]  ;;  %v6711_v31 = vld [vmem:[%s22529_s8 + $0xe8] sm:$0xff] }
 0xa98   : > { %v5975_v48 = vpop.xlane.xlu1 %5974  ;;  %v6743_v11 = vld [vmem:[%s22529_s8 + $0x1e8] sm:$0xff] }
 0xa99   : > { %14525 = vrsqrt.f32 %v5996_v49  ;;  %v5988_v57 = vmul.f32 0.015625, %v5975_v48  ;;  %11650 = vmatmul.mubr.msk.f32.vlgmr.msra.gmra.mxu1 %vm2525_vm13, %v6029_v22  ;;  %11659 = vmatmul.mubr.msk.f32.vlgmr.msra.gmra.mxu0 %vm2525_vm13, %v6029_v22  ;;  %v6020_v17 = vmul.f32 %v19067_v35, %v6010_v56  ;;  %v6695_v21 = vld [vmem:[%s22529_s8 + $0x68] sm:$0xff]  ;;  %v6710_v56 = vld [vmem:[%s22529_s8 + $0xe0] sm:$0xff] }
 0xa9a   : > { %v14520_v47 = vpop.eup %14519  ;;  %6190 = vmatprep.mubr.f32.mxu1 %v23136_v28  ;;  %6309 = vmatprep.mubr.f32.mxu0 %v23136_v28  ;;  %v6727_v22 = vld [vmem:[%s22529_s8 + $0x168] sm:$0xff]  ;;  %v6742_v49 = vld [vmem:[%s22529_s8 + $0x1e0] sm:$0xff] }
 0xa9b   : > { %v6011_v58 = vmul.f32 %v14520_v47, %v18924_v50  ;;  %v5997_v53 = vadd.f32 1e-06, %v5988_v57  ;;  %v6030_v43 = vadd.f32 %v19073_v55, %v6020_v17  ;;  %12493 = vmatpush3.msra.mxu0 %v6729_v0  ;;  %v6694_v48 = vld [vmem:[%s22529_s8 + $0x60] sm:$0xff]  ;;  %v6709_v17 = vld [vmem:[%s22529_s8 + $0xd8] sm:$0xff]  ;;  %v6732_v0 = vld [vmem:[%s22529_s8 + $0x190] sm:$0xff] }
 0xa9c   : > { %v5978_v39 = vpop.xlane.xlu0 %5977  ;;  %v5926_v16 = vpop.xlane.xlu1 %5925  ;;  %12494 = vmatprep.subr.mxu0 %v6744_v24  ;;  %v6726_v57 = vld [vmem:[%s22529_s8 + $0x160] sm:$0xff]  ;;  %v6741_v47 = vld [vmem:[%s22529_s8 + $0x1d8] sm:$0xff]  ;;  %v6716_v24 = vld [vmem:[%s22529_s8 + $0x110] sm:$0xff] }
 0xa9d   : > { %14527 = vrsqrt.f32 %v5997_v53  ;;  %v5989_v7 = vmul.f32 0.015625, %v5978_v39  ;;  %v5936_v5 = vmul.f32 0.015625, %v5926_v16  ;;  %11651 = vmatmul.mubr.msk.f32.gmra.mxu1 %vm2525_vm13, %v6030_v43  ;;  %11660 = vmatmul.mubr.msk.f32.gmra.mxu0 %vm2525_vm13, %v6030_v43  ;;  %v6021_v41 = vmul.f32 %v19067_v35, %v6011_v58  ;;  %v6693_v58 = vld [vmem:[%s22529_s8 + $0x58] sm:$0xff]  ;;  %v6708_v43 = vld [vmem:[%s22529_s8 + $0xd0] sm:$0xff] }
 0xa9e   : > { %v14522_v1 = vpop.eup %14521  ;;  %6196 = vmatprep.mubr.f32.mxu1 %v23136_v28  ;;  %6315 = vmatprep.mubr.f32.mxu0 %v23136_v28  ;;  %v6725_v53 = vld [vmem:[%s22529_s8 + $0x158] sm:$0xff]  ;;  %v6740_v39 = vld [vmem:[%s22529_s8 + $0x1d0] sm:$0xff] }
 0xa9f   : > { %v6012_v50 = vmul.f32 %v14522_v1, %v18930_v63  ;;  %v5998_v3 = vadd.f32 1e-06, %v5989_v7  ;;  %v19092_v14 = vsub.f32 %v18987_v30, %v5936_v5  ;;  %v6031_v54 = vadd.f32 %v19073_v55, %v6021_v41  ;;  %12495 = vmatpush3.msra.mxu0 %v6728_v27  ;;  %v6692_v16 = vld [vmem:[%s22529_s8 + $0x50] sm:$0xff]  ;;  %v6707_v5 = vld [vmem:[%s22529_s8 + $0xc8] sm:$0xff] }
 0xaa0   : > { %12496 = vmatprep.subr.mxu0 %v6743_v11  ;;  %v6724_v7 = vld [vmem:[%s22529_s8 + $0x150] sm:$0xff]  ;;  %v6739_v41 = vld [vmem:[%s22529_s8 + $0x1c8] sm:$0xff] }
 0xaa1   : > { %14529 = vrsqrt.f32 %v5998_v3  ;;  %11652 = vmatmul.mubr.msk.f32.gmra.mxu1 %vm2525_vm13, %v6031_v54  ;;  %11661 = vmatmul.mubr.msk.f32.gmra.mxu0 %vm2525_vm13, %v6031_v54  ;;  %v5954_v8 = vmul.f32 %v19092_v14, %v19092_v14  ;;  %v6022_v10 = vmul.f32 %v19067_v35, %v6012_v50  ;;  %v6691_v1 = vld [vmem:[%s22529_s8 + $0x48] sm:$0xff]  ;;  %v6706_v3 = vld [vmem:[%s22529_s8 + $0xc0] sm:$0xff] }
 0xaa2   : > { %v14524_v34 = vpop.eup %14523  ;;  %6202 = vmatprep.mubr.f32.mxu1 %v23136_v28  ;;  %6321 = vmatprep.mubr.f32.mxu0 %v23136_v28  ;;  %v6723_v50 = vld [vmem:[%s22529_s8 + $0x148] sm:$0xff]  ;;  %v6738_v54 = vld [vmem:[%s22529_s8 + $0x1c0] sm:$0xff] }
 0xaa3   : > { %v6013_v63 = vmul.f32 %v14524_v34, %v18936_v29  ;;  %v5979_v38 = vsel %vm2525_vm13, %v5954_v8, 0.0  ;;  %v6032_v60 = vadd.f32 %v19073_v55, %v6022_v10  ;;  %12497 = vmatpush3.msra.mxu0 %v6727_v22  ;;  %v6690_v8 = vld [vmem:[%s22529_s8 + $0x40] sm:$0xff]  ;;  %v6705_v34 = vld [vmem:[%s22529_s8 + $0xb8] sm:$0xff]  ;;  %v6731_v27 = vld [vmem:[%s22529_s8 + $0x188] sm:$0xff] }
 0xaa4   : > { %5980 = vadd.xlane.f32.xlu0 %v5979_v38  ;;  %12498 = vmatprep.subr.mxu0 %v6742_v49  ;;  %v6722_v10 = vld [vmem:[%s22529_s8 + $0x140] sm:$0xff]  ;;  %v6689_v38 = vld [vmem:[%s22529_s8 + $0x38] sm:$0xff]  ;;  %v6715_v11 = vld [vmem:[%s22529_s8 + $0x108] sm:$0xff] }
 0xaa5   : > { %11653 = vmatmul.mubr.msk.f32.gmra.mxu1 %vm2525_vm13, %v6032_v60  ;;  %11662 = vmatmul.mubr.msk.f32.gmra.mxu0 %vm2525_vm13, %v6032_v60  ;;  %v6023_v4 = vmul.f32 %v19067_v35, %v6013_v63  ;;  %v6737_v63 = vld [vmem:[%s22529_s8 + $0x1b8] sm:$0xff]  ;;  %v6730_v22 = vld [vmem:[%s22529_s8 + $0x180] sm:$0xff] }
 0xaa6   : > { %v14526_v52 = vpop.eup %14525  ;;  %6208 = vmatprep.mubr.f32.mxu1 %v23136_v28  ;;  %6327 = vmatprep.mubr.f32.mxu0 %v23136_v28  ;;  %v6721_v60 = vld [vmem:[%s22529_s8 + $0x138] sm:$0xff]  ;;  %v6714_v49 = vld [vmem:[%s22529_s8 + $0x100] sm:$0xff] }
 0xaa7   : > { %v6014_v15 = vmul.f32 %v14526_v52, %v18942_v33  ;;  %v6033_v29 = vadd.f32 %v19073_v55, %v6023_v4  ;;  %12499 = vmatpush3.msra.mxu0 %v6726_v57  ;;  %v6704_v4 = vld [vmem:[%s22529_s8 + $0xb0] sm:$0xff] }
 0xaa8   : > { %12500 = vmatprep.subr.mxu0 %v6741_v47  ;;  %v6736_v52 = vld [vmem:[%s22529_s8 + $0x1b0] sm:$0xff] }
 0xaa9   : > { %11654 = vmatmul.mubr.msk.f32.gmra.mxu1 %vm2525_vm13, %v6033_v29  ;;  %11663 = vmatmul.mubr.msk.f32.gmra.mxu0 %vm2525_vm13, %v6033_v29  ;;  %v6024_v13 = vmul.f32 %v19067_v35, %v6014_v15  ;;  %v6688_v15 = vld [vmem:[%s22529_s8 + $0x30] sm:$0xff] }
 0xaaa   : > { %v14528_v40 = vpop.eup %14527  ;;  %6214 = vmatprep.mubr.f32.mxu1 %v23136_v28  ;;  %6333 = vmatprep.mubr.f32.mxu0 %v23136_v28  ;;  %v6720_v29 = vld [vmem:[%s22529_s8 + $0x130] sm:$0xff] }
 0xaab   : > { %v6015_v51 = vmul.f32 %v14528_v40, %v18954_v26  ;;  %v6034_v18 = vadd.f32 %v19073_v55, %v6024_v13  ;;  %12501 = vmatpush3.msra.mxu0 %v6725_v53  ;;  %v6703_v13 = vld [vmem:[%s22529_s8 + $0xa8] sm:$0xff] }
 0xaac   : > { %12502 = vmatprep.subr.mxu0 %v6740_v39  ;;  %v6735_v40 = vld [vmem:[%s22529_s8 + $0x1a8] sm:$0xff]  ;;  %v22664_v39 = vsub.s32 0, %v15329_v62 }
 0xaad   : > { %11655 = vmatmul.mubr.msk.f32.gmra.mxu1 %vm2525_vm13, %v6034_v18  ;;  %11664 = vmatmul.mubr.msk.f32.gmra.mxu0 %vm2525_vm13, %v6034_v18  ;;  %v6025_v33 = vmul.f32 %v19067_v35, %v6015_v51  ;;  %v6687_v51 = vld [vmem:[%s22529_s8 + $0x28] sm:$0xff] }
 0xaae   : > { %v14530_v61 = vpop.eup %14529  ;;  %6220 = vmatprep.mubr.f32.mxu1 %v23136_v28  ;;  %6339 = vmatprep.mubr.f32.mxu0 %v23136_v28  ;;  %v6719_v18 = vld [vmem:[%s22529_s8 + $0x128] sm:$0xff] }
 0xaaf   : > { %v6016_v59 = vmul.f32 %v14530_v61, %v18990_v23  ;;  %v6035_v46 = vadd.f32 %v19073_v55, %v6025_v33  ;;  %v6713_v23 = vld [vmem:[%s22529_s8 + $0xf8] sm:$0xff]  ;;  %12503 = vmatpush3.msra.mxu0 %v6724_v7  ;;  %v6702_v33 = vld [vmem:[%s22529_s8 + $0xa0] sm:$0xff] }
 0xab0   : > { %12433 = vmatprep.subr.mxu1 %v6713_v23  ;;  %12504 = vmatprep.subr.mxu0 %v6739_v41  ;;  %v6734_v61 = vld [vmem:[%s22529_s8 + $0x1a0] sm:$0xff]  ;;  %v6685_v23 = vld [vmem:[%s22529_s8 + $0x18] sm:$0xff] }
 0xab1   : > { %11656 = vmatmul.mubr.msk.f32.gmra.mxu1 %vm2525_vm13, %v6035_v46  ;;  %11665 = vmatmul.mubr.msk.f32.gmra.mxu0 %vm2525_vm13, %v6035_v46  ;;  %v6026_v26 = vmul.f32 %v19067_v35, %v6016_v59  ;;  %v6686_v59 = vld [vmem:[%s22529_s8 + $0x20] sm:$0xff] }
 0xab2   : > { %6226 = vmatprep.mubr.f32.mxu1 %v23136_v28  ;;  %6345 = vmatprep.mubr.f32.mxu0 %v23136_v28  ;;  %v6718_v46 = vld [vmem:[%s22529_s8 + $0x120] sm:$0xff] }
 0xab3   : > { %v6036_v9 = vadd.f32 %v19073_v55, %v6026_v26  ;;  %12434 = vmatpush3.msra.mxu1 %v6697_v36  ;;  %12505 = vmatpush3.msra.mxu0 %v6723_v50  ;;  %v6701_v26 = vld [vmem:[%s22529_s8 + $0x98] sm:$0xff]  ;;  %v6700_v36 = vld [vmem:[%s22529_s8 + $0x90] sm:$0xff] }
 0xab4   : > { %12435 = vmatprep.subr.mxu1 %v6712_v44  ;;  %12506 = vmatprep.subr.mxu0 %v6738_v54  ;;  %v6684_v44 = vld [vmem:[%s22529_s8 + $0x10] sm:$0xff] }
 0xab5   : > { %11657 = vmatmul.mubr.msk.f32.gmra.mxu1 %vm2525_vm13, %v6036_v9  ;;  %11666 = vmatmul.mubr.msk.f32.gmra.mxu0 %vm2525_vm13, %v6036_v9  ;;  %v6733_v9 = vld [vmem:[%s22529_s8 + $0x198] sm:$0xff] }
 0xab6   : > { %6232 = vmatprep.mubr.f32.mxu1 %v23136_v28  ;;  %6351 = vmatprep.mubr.f32.mxu0 %v23136_v28  ;;  %v11649_v7 = vld [vmem:[%s22526_s5 + $0x20] ss:$8 sm:$0xf] }
 0xab7   : > { %12436 = vmatpush3.msra.mxu1 %v6696_v19  ;;  %12507 = vmatpush3.msra.mxu0 %v6722_v10  ;;  %v6699_v19 = vld [vmem:[%s22529_s8 + $0x88] sm:$0xff] }
 0xab8   : > { %12437 = vmatprep.subr.mxu1 %v6711_v31  ;;  %12508 = vmatprep.subr.mxu0 %v6737_v63  ;;  %v6683_v31 = vld [vmem:[%s22529_s8 + $0x8] sm:$0xff] }
 0xab9   : > { %12438 = vmatpush3.msra.mxu1 %v6695_v21  ;;  %12509 = vmatpush3.msra.mxu0 %v6721_v60  ;;  %v6698_v21 = vld [vmem:[%s22529_s8 + $0x80] sm:$0xff] }
 0xaba   : > { %12439 = vmatprep.subr.mxu1 %v6710_v56  ;;  %12510 = vmatprep.subr.mxu0 %v6736_v52  ;;  %v6682_v56 = vld [vmem:[%s22529_s8] sm:$0xff] }
 0xabb   : > { %12440 = vmatpush3.msra.mxu1 %v6694_v48  ;;  %12511 = vmatpush3.msra.mxu0 %v6720_v29 }
 0xabc   : > { %12441 = vmatprep.subr.mxu1 %v6709_v17  ;;  %12512 = vmatprep.subr.mxu0 %v6735_v40 }
 0xabd   : > { %12442 = vmatpush3.msra.mxu1 %v6693_v58  ;;  %12513 = vmatpush3.msra.mxu0 %v6719_v18 }
 0xabe   : > { %12443 = vmatprep.subr.mxu1 %v6708_v43  ;;  %12514 = vmatprep.subr.mxu0 %v6734_v61 }
 0xabf   : > { %12444 = vmatpush3.msra.mxu1 %v6692_v16  ;;  %12515 = vmatpush3.msra.mxu0 %v6718_v46  ;;  %v22663_v16 = vsub.s32 2, %v15329_v62 }
 0xac0   : > { %12445 = vmatprep.subr.mxu1 %v6707_v5  ;;  %12516 = vmatprep.subr.mxu0 %v6733_v9  ;;  %v22662_v5 = vsub.s32 1, %v15329_v62 }
 0xac1   : > { %12446 = vmatpush3.msra.mxu1 %v6691_v1  ;;  %12517 = vmatpush3.msra.mxu0 %v6717_v2 }
 0xac2   : > { %12447 = vmatprep.subr.mxu1 %v6706_v3  ;;  %12518 = vmatprep.subr.mxu0 %v6732_v0  ;;  %v19350_v50 = vrot.slane %v11649_v7, %v22662_v5 }
 0xac3   : > { %12448 = vmatpush3.msra.mxu1 %v6690_v8  ;;  %12519 = vmatpush3.msra.mxu0 %v6716_v24 }
 0xac4   : > { %12449 = vmatprep.subr.mxu1 %v6705_v34  ;;  %12520 = vmatprep.subr.mxu0 %v6731_v27  ;;  %23148 = vst [vmem:[#allocation74_spill] sm:$0xff] %v19350_v50 }
 0xac5   : > { %12450 = vmatpush3.msra.mxu1 %v6689_v38  ;;  %12521 = vmatpush3.msra.mxu0 %v6715_v11 }
 0xac6   : > { %12451 = vmatprep.subr.mxu1 %v6704_v4  ;;  %12522 = vmatprep.subr.mxu0 %v6730_v22 }
 0xac7   : > { %12452 = vmatpush3.msra.mxu1 %v6688_v15  ;;  %12523 = vmatpush3.msra.mxu0 %v6714_v49 }
 0xac8   : > { %12453 = vmatprep.subr.mxu1 %v6703_v13 }
 0xac9   : > { %12454 = vmatpush3.msra.mxu1 %v6687_v51 }
 0xaca   : > { %12455 = vmatprep.subr.mxu1 %v6702_v33 }
 0xacb   : > { %12456 = vmatpush3.msra.mxu1 %v6686_v59 }
 0xacc   : > { %12457 = vmatprep.subr.mxu1 %v6701_v26 }
 0xacd   : > { %12458 = vmatpush3.msra.mxu1 %v6685_v23 }
 0xace   : > { %12459 = vmatprep.subr.mxu1 %v6700_v36 }
 0xacf   : > { %12460 = vmatpush3.msra.mxu1 %v6684_v44 }
 0xad0   : > { %12461 = vmatprep.subr.mxu1 %v6699_v19 }
 0xad1   : > { %12462 = vmatpush3.msra.mxu1 %v6683_v31 }
 0xad2   : > { %12463 = vmatprep.subr.mxu1 %v6698_v21 }
 0xad3   : > { %12464 = vmatpush3.msra.mxu1 %v6682_v56 }
 0xb2d   : > { %v5981_v48 = vpop.xlane.xlu0 %5980 }
 0xb2e   : > { %v5990_v57 = vmul.f32 0.015625, %v5981_v48 }
 0xb30   : > { %v5999_v17 = vadd.f32 1e-06, %v5990_v57 }
 0xb32   : > { %14531 = vrsqrt.f32 %v5999_v17 }
 0xb3f   : > { %v14532_v47 = vpop.eup %14531 }
 0xb40   : > { %v6017_v58 = vmul.f32 %v14532_v47, %v19092_v14  ;;  %v19341_v14 = vrot.slane %v11649_v7, %v22664_v39 }
 0xb42   : > { %v6027_v53 = vmul.f32 %v19067_v35, %v6017_v58  ;;  %23146 = vst [vmem:[#allocation7_spill] sm:$0xff] %v19341_v14  ;;  %v19345_v35 = vrot.slane %v11649_v7, %v22663_v16 }
 0xb44   : > { %v6037_v43 = vadd.f32 %v19073_v55, %v6027_v53  ;;  %23147 = vst [vmem:[#allocation25_spill] sm:$0xff] %v19345_v35  ;;  %v22661_v55 = vsub.s32 3, %v15329_v62 }
 0xb46   : > { %11658 = vmatmul.mubr.msk.f32.gmra.mxu1 %vm2525_vm13, %v6037_v43  ;;  %11667 = vmatmul.mubr.msk.f32.gmra.mxu0 %vm2525_vm13, %v6037_v43  ;;  %v19356_v10 = vrot.slane %v11649_v7, %v22661_v55 }
 0xb48   : > { %23149 = vst [vmem:[#allocation8_spill] sm:$0xff] %v19356_v10 }
 0xb59   : > { %v6186_v41 = vpop.f32.mrf.mxu1  ;;  %v6305_v1 = vpop.f32.mrf.mxu0 }
 0xb5a   : > { %v6187_v3 = vadd.f32 %v6186_v41, %v19341_v14  ;;  %v6306_v54 = vadd.f32 %v6305_v1, %v19345_v35 }
 0xb5b   : > { %v6188_v8 = vpop.f32.mrf.mxu1  ;;  %v6307_v34 = vpop.f32.mrf.mxu0 }
 0xb5c   : > { %v6394_v63 = vmul.f32 0.044715, %v6187_v3  ;;  %v6396_v38 = vmul.f32 0.044715, %v6306_v54  ;;  %v19359_v60 = vadd.f32 %v6188_v8, %v19350_v50  ;;  %v19368_v51 = vadd.f32 %v6307_v34, %v19356_v10 }
 0xb5d   : > { %v6192_v4 = vpop.f32.mrf.mxu1  ;;  %v6311_v52 = vpop.f32.mrf.mxu0  ;;  %v19378_v0 = vmul.f32 0.5, %v6187_v3  ;;  %v19393_v7 = vmul.f32 0.5, %v6306_v54 }
 0xb5e   : > { %v6430_v15 = vmul.f32 %v6394_v63, %v6187_v3  ;;  %v6432_v29 = vmul.f32 %v6396_v38, %v6306_v54  ;;  %v19362_v13 = vadd.f32 %v6192_v4, %v19341_v14  ;;  %v19365_v40 = vadd.f32 %v6311_v52, %v19345_v35 }
 0xb5f   : > { %v6194_v18 = vpop.f32.mrf.mxu1  ;;  %v6313_v33 = vpop.f32.mrf.mxu0  ;;  %v6395_v19 = vmul.f32 0.044715, %v19359_v60  ;;  %v6397_v57 = vmul.f32 0.044715, %v19368_v51  ;;  %v19397_v1 = vmul.f32 0.5, %v19359_v60 }
 0xb60   : > { %v6466_v61 = vmul.f32 %v6430_v15, %v6187_v3  ;;  %v6468_v59 = vmul.f32 %v6432_v29, %v6306_v54  ;;  %v6398_v46 = vmul.f32 0.044715, %v19362_v13  ;;  %v6400_v26 = vmul.f32 0.044715, %v19365_v40 }
 0xb61   : > { %v19373_v9 = vadd.f32 %v6194_v18, %v19350_v50  ;;  %v19376_v23 = vadd.f32 %v6313_v33, %v19356_v10  ;;  %v6198_v2 = vpop.f32.mrf.mxu1  ;;  %v6317_v36 = vpop.f32.mrf.mxu0  ;;  %23152 = vst [vmem:[#allocation69_spill] sm:$0xff] %v19397_v1  ;;  %v19405_v4 = vmul.f32 %v6395_v19, %v19359_v60  ;;  %v19414_v15 = vmul.f32 0.5, %v19368_v51 }
 0xb62   : > { %v6502_v44 = vadd.f32 %v6466_v61, %v6187_v3  ;;  %v6504_v24 = vadd.f32 %v6468_v59, %v6306_v54  ;;  %v6434_v27 = vmul.f32 %v6398_v46, %v19362_v13  ;;  %v6436_v31 = vmul.f32 %v6400_v26, %v19365_v40 }
 0xb63   : > { %v19384_v11 = vadd.f32 %v6198_v2, %v19341_v14  ;;  %v19387_v21 = vadd.f32 %v6317_v36, %v19345_v35  ;;  %v6200_v22 = vpop.f32.mrf.mxu1  ;;  %v6319_v56 = vpop.f32.mrf.mxu0  ;;  %v6399_v17 = vmul.f32 0.044715, %v19373_v9  ;;  %v6401_v47 = vmul.f32 0.044715, %v19376_v23  ;;  %23155 = vst [vmem:[#allocation11_spill] sm:$0xff] %v19414_v15 }
 0xb64   : > { %v6538_v49 = vmul.f32 0.7978846, %v6502_v44  ;;  %v6540_v48 = vmul.f32 0.7978846, %v6504_v24  ;;  %v6470_v3 = vmul.f32 %v6434_v27, %v19362_v13  ;;  %v6472_v8 = vmul.f32 %v6436_v31, %v19365_v40 }
 0xb65   : > { %23150 = vst [vmem:[#allocation51_spill] sm:$0xff] %v19384_v11  ;;  %23151 = vst [vmem:[#allocation10_spill] sm:$0xff] %v19387_v21  ;;  %v6402_v58 = vmul.f32 0.044715, %v19384_v11  ;;  %v6204_v53 = vpop.f32.mrf.mxu1  ;;  %v6323_v43 = vpop.f32.mrf.mxu0  ;;  %v6404_v41 = vmul.f32 0.044715, %v19387_v21  ;;  %v19402_v34 = vadd.f32 %v6200_v22, %v19350_v50  ;;  %v19417_v29 = vmul.f32 %v6397_v57, %v19368_v51 }
 0xb66   : > { %14533 = vtanh.f32 %v6538_v49  ;;  %v19408_v54 = vadd.f32 %v6204_v53, %v19341_v14  ;;  %v19411_v52 = vadd.f32 %v6323_v43, %v19345_v35  ;;  %v19420_v18 = vmul.f32 %v6399_v17, %v19373_v9 }
 0xb67   : > { %14535 = vtanh.f32 %v6540_v48  ;;  %v6206_v63 = vpop.f32.mrf.mxu1  ;;  %v6325_v38 = vpop.f32.mrf.mxu0  ;;  %v19423_v33 = vmul.f32 %v6401_v47, %v19376_v23  ;;  %v6438_v61 = vmul.f32 %v6402_v58, %v19384_v11  ;;  %v6440_v26 = vmul.f32 %v6404_v41, %v19387_v21 }
 0xb68   : > { %23153 = vst [vmem:[#allocation9_spill] sm:$0xff] %v19408_v54  ;;  %23154 = vst [vmem:[#allocation59_spill] sm:$0xff] %v19411_v52  ;;  %v19428_v2 = vadd.f32 %v6319_v56, %v19356_v10  ;;  %v6406_v36 = vmul.f32 0.044715, %v19408_v54  ;;  %v6408_v44 = vmul.f32 0.044715, %v19411_v52  ;;  %v19433_v24 = vadd.f32 %v6470_v3, %v19362_v13 }
 0xb69   : > { %v6210_v59 = vpop.f32.mrf.mxu1  ;;  %v6329_v46 = vpop.f32.mrf.mxu0  ;;  %v19436_v19 = vadd.f32 %v6472_v8, %v19365_v40  ;;  %v6403_v27 = vmul.f32 0.044715, %v19402_v34  ;;  %v19440_v31 = vadd.f32 %v6206_v63, %v19350_v50  ;;  %v19445_v57 = vadd.f32 %v6325_v38, %v19356_v10 }
 0xb6a   : > { %v6442_v56 = vmul.f32 %v6406_v36, %v19408_v54  ;;  %v6444_v48 = vmul.f32 %v6408_v44, %v19411_v52  ;;  %v19448_v17 = vadd.f32 %v6210_v59, %v19341_v14  ;;  %v6474_v47 = vmul.f32 %v6438_v61, %v19384_v11 }
 0xb6b   : > { %v6212_v22 = vpop.f32.mrf.mxu1  ;;  %v6331_v49 = vpop.f32.mrf.mxu0  ;;  %v19452_v58 = vadd.f32 %v6329_v46, %v19345_v35  ;;  %v6476_v8 = vmul.f32 %v6440_v26, %v19387_v21  ;;  %v6405_v63 = vmul.f32 0.044715, %v19428_v2  ;;  %v19467_v61 = vmul.f32 %v6403_v27, %v19402_v34 }
 0xb6c   : > { %v19455_v53 = vadd.f32 %v6212_v22, %v19350_v50  ;;  %v19458_v43 = vadd.f32 %v6331_v49, %v19356_v10  ;;  %v6410_v38 = vmul.f32 0.044715, %v19448_v17  ;;  %v6407_v46 = vmul.f32 0.044715, %v19440_v31 }
 0xb6d   : > { %v6216_v41 = vpop.f32.mrf.mxu1  ;;  %v6335_v3 = vpop.f32.mrf.mxu0  ;;  %v6412_v36 = vmul.f32 0.044715, %v19452_v58  ;;  %v6478_v26 = vmul.f32 %v6442_v56, %v19408_v54  ;;  %v6480_v55 = vmul.f32 %v6444_v48, %v19411_v52  ;;  %v6409_v5 = vmul.f32 0.044715, %v19445_v57 }
 0xb6e   : > { %v19464_v59 = vadd.f32 %v6216_v41, %v19341_v14  ;;  %v19472_v44 = vadd.f32 %v6335_v3, %v19345_v35  ;;  %v19479_v27 = vadd.f32 %v6474_v47, %v19384_v11  ;;  %v6411_v16 = vmul.f32 0.044715, %v19455_v53 }
 0xb6f   : > { %v6218_v22 = vpop.f32.mrf.mxu1  ;;  %v6337_v49 = vpop.f32.mrf.mxu0  ;;  %v6413_v39 = vmul.f32 0.044715, %v19458_v43  ;;  %v19485_v30 = vadd.f32 %v6476_v8, %v19387_v21  ;;  %v19488_v56 = vmul.f32 %v6405_v63, %v19428_v2  ;;  %v6446_v48 = vmul.f32 %v6410_v38, %v19448_v17 }
 0xb70   : > { %23156 = vst [vmem:[#allocation75_spill] sm:$0xff] %v19464_v59  ;;  %23157 = vst [vmem:[#allocation12_spill] sm:$0xff] %v19472_v44  ;;  %v6414_v41 = vmul.f32 0.044715, %v19464_v59  ;;  %v6416_v3 = vmul.f32 0.044715, %v19472_v44  ;;  %v6448_v12 = vmul.f32 %v6412_v36, %v19452_v58  ;;  %v19494_v37 = vadd.f32 %v6218_v22, %v19350_v50 }
 0xb71   : > { %v6222_v62 = vpop.f32.mrf.mxu1  ;;  %v6341_v28 = vpop.f32.mrf.mxu0  ;;  %v19503_v6 = vadd.f32 %v6478_v26, %v19408_v54  ;;  %v19506_v38 = vadd.f32 %v6480_v55, %v19411_v52  ;;  %v19509_v36 = vmul.f32 %v6407_v46, %v19440_v31  ;;  %v19512_v22 = vmul.f32 %v6409_v5, %v19445_v57 }
 0xb72   : > { %v6450_v20 = vmul.f32 %v6414_v41, %v19464_v59  ;;  %v19497_v42 = vadd.f32 %v6222_v62, %v19341_v14  ;;  %v19500_v32 = vadd.f32 %v6341_v28, %v19345_v35  ;;  %v19515_v62 = vmul.f32 %v6411_v16, %v19455_v53 }
 0xb73   : > { %v14534_v47 = vpop.eup %14533  ;;  %v6224_v8 = vpop.f32.mrf.mxu1  ;;  %v19518_v28 = vmul.f32 %v6413_v39, %v19458_v43  ;;  %v6452_v41 = vmul.f32 %v6416_v3, %v19472_v44  ;;  %v19522_v26 = vadd.f32 %v6337_v49, %v19356_v10  ;;  %v6482_v46 = vmul.f32 %v6446_v48, %v19448_v17 }
 0xb74   : > { %23158 = vst [vmem:[#allocation14_spill] sm:$0xff] %v19497_v42  ;;  %v6343_v45 = vpop.f32.mrf.mxu0  ;;  %v14536_v63 = vpop.eup %14535  ;;  %v6610_v52 = vadd.f32 1.0, %v14534_v47  ;;  %v6484_v15 = vmul.f32 %v6448_v12, %v19452_v58  ;;  %v6418_v5 = vmul.f32 0.044715, %v19497_v42  ;;  %v6486_v16 = vmul.f32 %v6450_v20, %v19464_v59 }
 0xb75   : > { %23159 = vst [vmem:[#allocation13_spill] sm:$0xff] %v19518_v28  ;;  %v6228_v25 = vpop.f32.mrf.mxu1  ;;  %v6612_v1 = vadd.f32 1.0, %v14536_v63  ;;  %v6415_v39 = vmul.f32 0.044715, %v19494_v37  ;;  %v6420_v54 = vmul.f32 0.044715, %v19500_v32  ;;  %v19532_v11 = vadd.f32 %v6224_v8, %v19350_v50 }
 0xb76   : > { %v6347_v55 = vpop.f32.mrf.mxu0  ;;  %v6454_v49 = vmul.f32 %v6418_v5, %v19497_v42  ;;  %v19535_v48 = vadd.f32 %v6343_v45, %v19356_v10  ;;  %v19538_v12 = vadd.f32 %v6228_v25, %v19341_v14  ;;  %v6488_v47 = vmul.f32 %v6452_v41, %v19472_v44 }
 0xb77   : > { %v6230_v3 = vpop.f32.mrf.mxu1  ;;  %v6417_v20 = vmul.f32 0.044715, %v19522_v26  ;;  %v6456_v63 = vmul.f32 %v6420_v54, %v19500_v32  ;;  %v19544_v28 = vadd.f32 %v6347_v55, %v19345_v35  ;;  %v19547_v5 = vadd.f32 %v6482_v46, %v19448_v17 }
 0xb78   : > { %v6349_v21 = vpop.f32.mrf.mxu0  ;;  %v19550_v8 = vadd.f32 %v6484_v15, %v19452_v58  ;;  %v19553_v45 = vadd.f32 %v6230_v3, %v19350_v50  ;;  %v19559_v41 = vmul.f32 %v6610_v52, %v19378_v0  ;;  %v19562_v54 = vadd.f32 %v6486_v16, %v19464_v59 }
 0xb79   : > { %v19556_v25 = vadd.f32 %v6349_v21, %v19356_v10  ;;  %v6490_v55 = vmul.f32 %v6454_v49, %v19497_v42  ;;  %v6419_v46 = vmul.f32 0.044715, %v19532_v11  ;;  %v19567_v35 = vmul.f32 %v6612_v1, %v19393_v7 }
 0xb7a   : > { %v19570_v15 = vmul.f32 %v6415_v39, %v19494_v37  ;;  %v6421_v3 = vmul.f32 0.044715, %v19535_v48  ;;  %v6422_v21 = vmul.f32 0.044715, %v19538_v12  ;;  %v19575_v0 = vadd.f32 %v6488_v47, %v19472_v44 }
 0xb7b   : > { %v19578_v52 = vmul.f32 %v6417_v20, %v19522_v26  ;;  %v6492_v16 = vmul.f32 %v6456_v63, %v19500_v32  ;;  %v6424_v49 = vmul.f32 0.044715, %v19544_v28  ;;  %v6423_v7 = vmul.f32 0.044715, %v19553_v45 }
 0xb7c   : > { %v6425_v1 = vmul.f32 0.044715, %v19556_v25  ;;  %v6467_v39 = vmul.f32 %v19405_v4, %v19359_v60  ;;  %v6469_v10 = vmul.f32 %v19417_v29, %v19368_v51  ;;  %v19589_v47 = vadd.f32 %v6490_v55, %v19497_v42 }
 0xb7d   : > { %v19592_v20 = vmul.f32 %v6419_v46, %v19532_v11  ;;  %v6471_v63 = vmul.f32 %v19420_v18, %v19373_v9  ;;  %v6473_v50 = vmul.f32 %v19423_v33, %v19376_v23  ;;  %v19599_v14 = vmul.f32 %v6421_v3, %v19535_v48 }
 0xb7e   : > { %v6458_v4 = vmul.f32 %v6422_v21, %v19538_v12  ;;  %v6503_v44 = vadd.f32 %v6467_v39, %v19359_v60  ;;  %v6505_v29 = vadd.f32 %v6469_v10, %v19368_v51  ;;  %v19605_v55 = vadd.f32 %v6492_v16, %v19500_v32 }
 0xb7f   : > { %v6507_v46 = vadd.f32 %v6471_v63, %v19373_v9  ;;  %v6509_v42 = vadd.f32 %v6473_v50, %v19376_v23  ;;  %v6542_v18 = vmul.f32 0.7978846, %v19433_v24  ;;  %v6460_v33 = vmul.f32 %v6424_v49, %v19544_v28 }
 0xb80   : > { %v19612_v3 = vmul.f32 %v6423_v7, %v19553_v45  ;;  %v6539_v59 = vmul.f32 0.7978846, %v6503_v44  ;;  %v6541_v21 = vmul.f32 0.7978846, %v6505_v29  ;;  %v19615_v60 = vmul.f32 %v6425_v1, %v19556_v25 }
 0xb81   : > { %v6543_v10 = vmul.f32 0.7978846, %v6507_v46  ;;  %v6545_v51 = vmul.f32 0.7978846, %v6509_v42  ;;  %14537 = vtanh.f32 %v6542_v18  ;;  %v6544_v16 = vmul.f32 0.7978846, %v19436_v19 }
 0xb82   : > { %14539 = vtanh.f32 %v6539_v59  ;;  %v6475_v50 = vmul.f32 %v19467_v61, %v19402_v34  ;;  %v6477_v24 = vmul.f32 %v19488_v56, %v19428_v2  ;;  %v6494_v49 = vmul.f32 %v6458_v4, %v19538_v12 }
 0xb83   : > { %14541 = vtanh.f32 %v6541_v21  ;;  %v19624_v44 = vmul.f32 0.5, %v19373_v9  ;;  %v6546_v7 = vmul.f32 0.7978846, %v19479_v27  ;;  %v6496_v42 = vmul.f32 %v6460_v33, %v19544_v28  ;;  %v23160_v21 = vld [vmem:[#allocation13_spill] sm:$0xff] }
 0xb84   : > { %14543 = vtanh.f32 %v6543_v10  ;;  %v6511_v59 = vadd.f32 %v6475_v50, %v19402_v34  ;;  %v6513_v19 = vadd.f32 %v6477_v24, %v19428_v2  ;;  %v19631_v61 = vmul.f32 0.5, %v19376_v23 }
 0xb85   : > { %14545 = vtanh.f32 %v6545_v51  ;;  %v6548_v56 = vmul.f32 0.7978846, %v19485_v30  ;;  %v6479_v1 = vmul.f32 %v19509_v36, %v19440_v31  ;;  %v6481_v27 = vmul.f32 %v19512_v22, %v19445_v57 }
 0xb86   : > { %14547 = vtanh.f32 %v6544_v16  ;;  %v6547_v9 = vmul.f32 0.7978846, %v6511_v59  ;;  %v6549_v39 = vmul.f32 0.7978846, %v6513_v19  ;;  %v19639_v63 = vadd.f32 %v6494_v49, %v19538_v12 }
 0xb87   : > { %v19642_v4 = vmul.f32 0.5, %v19362_v13  ;;  %14549 = vtanh.f32 %v6546_v7  ;;  %v6515_v23 = vadd.f32 %v6479_v1, %v19440_v31  ;;  %v19646_v30 = vadd.f32 %v6496_v42, %v19544_v28 }
 0xb88   : > { %v19649_v36 = vmul.f32 0.5, %v19365_v40  ;;  %14551 = vtanh.f32 %v6547_v9  ;;  %v6517_v29 = vadd.f32 %v6481_v27, %v19445_v57  ;;  %v6550_v46 = vmul.f32 0.7978846, %v19503_v6  ;;  %v23161_v6 = vld [vmem:[#allocation51_spill] sm:$0xff]  ;;  %v23163_v27 = vld [vmem:[#allocation9_spill] sm:$0xff] }
 0xb89   : > { %14553 = vtanh.f32 %v6549_v39  ;;  %v6551_v22 = vmul.f32 0.7978846, %v6515_v23  ;;  %v6483_v13 = vmul.f32 %v19515_v62, %v19455_v53  ;;  %v6552_v33 = vmul.f32 0.7978846, %v19506_v38  ;;  %v23162_v62 = vld [vmem:[#allocation10_spill] sm:$0xff] }
 0xb8a   : > { %14555 = vtanh.f32 %v6548_v56  ;;  %v6553_v18 = vmul.f32 0.7978846, %v6517_v29  ;;  %v6485_v10 = vmul.f32 %v23160_v21, %v19458_v43  ;;  %v19659_v40 = vmul.f32 0.5, %v19402_v34 }
 0xb8b   : > { %v19662_v51 = vmul.f32 0.5, %v19428_v2  ;;  %14557 = vtanh.f32 %v6551_v22  ;;  %v6519_v16 = vadd.f32 %v6483_v13, %v19455_v53  ;;  %v19666_v50 = vmul.f32 0.5, %v23161_v6 }
 0xb8c   : > { %v19669_v24 = vmul.f32 0.5, %v23162_v62  ;;  %14559 = vtanh.f32 %v6553_v18  ;;  %v6521_v38 = vadd.f32 %v6485_v10, %v19458_v43  ;;  %v6554_v34 = vmul.f32 0.7978846, %v19547_v5  ;;  %v23165_v10 = vld [vmem:[#allocation11_spill] sm:$0xff] }
 0xb8d   : > { %14561 = vtanh.f32 %v6550_v46  ;;  %v6555_v49 = vmul.f32 0.7978846, %v6519_v16  ;;  %v6487_v2 = vmul.f32 %v19570_v15, %v19494_v37  ;;  %v6556_v59 = vmul.f32 0.7978846, %v19550_v8 }
 0xb8e   : > { %v14538_v7 = vpop.eup %14537  ;;  %14563 = vtanh.f32 %v6552_v33  ;;  %v6557_v42 = vmul.f32 0.7978846, %v6521_v38  ;;  %v6489_v19 = vmul.f32 %v19578_v52, %v19522_v26  ;;  %v19679_v1 = vmul.f32 0.5, %v19440_v31 }
 0xb8f   : > { %v14540_v56 = vpop.eup %14539  ;;  %v19682_v9 = vmul.f32 0.5, %v19445_v57  ;;  %14565 = vtanh.f32 %v6555_v49  ;;  %v6523_v5 = vadd.f32 %v6487_v2, %v19494_v37  ;;  %v19686_v23 = vmul.f32 0.5, %v23163_v27  ;;  %v23164_v57 = vld [vmem:[#allocation69_spill] sm:$0xff] }
 0xb90   : > { %v14542_v39 = vpop.eup %14541  ;;  %v6611_v15 = vadd.f32 1.0, %v14540_v56  ;;  %14567 = vtanh.f32 %v6557_v42  ;;  %v6525_v8 = vadd.f32 %v6489_v19, %v19522_v26  ;;  %v6558_v31 = vmul.f32 0.7978846, %v19562_v54 }
 0xb91   : > { %v14544_v29 = vpop.eup %14543  ;;  %v6613_v52 = vadd.f32 1.0, %v14542_v39  ;;  %14569 = vtanh.f32 %v6554_v34  ;;  %v6559_v22 = vmul.f32 0.7978846, %v6523_v5  ;;  %v6614_v62 = vadd.f32 1.0, %v14538_v7 }
 0xb92   : > { %v14546_v46 = vpop.eup %14545  ;;  %v6647_v13 = vmul.f32 %v6611_v15, %v23164_v57  ;;  %v6615_v18 = vadd.f32 1.0, %v14544_v29  ;;  %14571 = vtanh.f32 %v6556_v59  ;;  %v6561_v33 = vmul.f32 0.7978846, %v6525_v8  ;;  %v23166_v59 = vld [vmem:[#allocation59_spill] sm:$0xff] }
 0xb93   : > { %v14548_v21 = vpop.eup %14547  ;;  %v6649_v16 = vmul.f32 %v6613_v52, %v23165_v10  ;;  %v6617_v6 = vadd.f32 1.0, %v14546_v46  ;;  %14573 = vtanh.f32 %v6559_v22  ;;  %v6560_v54 = vmul.f32 0.7978846, %v19575_v0 }
 0xb94   : > { %v14550_v38 = vpop.eup %14549  ;;  %6811 = vmatprep.mubr.f32.mxu1 %v6647_v13  ;;  %v6651_v49 = vmul.f32 %v6615_v18, %v19624_v44  ;;  %v6616_v34 = vadd.f32 1.0, %v14548_v21  ;;  %14575 = vtanh.f32 %v6561_v33  ;;  %v19697_v19 = vmul.f32 0.5, %v23166_v59 }
 0xb95   : > { %v14552_v2 = vpop.eup %14551  ;;  %6921 = vmatprep.mubr.f32.mxu0 %v6649_v16  ;;  %6812 = vmatmul.mubr.f32.vlgmr.msra.gmra.mxu1 %v19559_v41  ;;  %v6653_v42 = vmul.f32 %v6617_v6, %v19631_v61  ;;  %v6375_v7 = vmul.f32 0.5, %v19455_v53  ;;  %14577 = vtanh.f32 %v6558_v31  ;;  %v6618_v5 = vadd.f32 1.0, %v14550_v38 }
 0xb96   : > { %v14554_v56 = vpop.eup %14553  ;;  %6922 = vmatmul.mubr.f32.vlgmr.msra.gmra.mxu0 %v19567_v35  ;;  %6816 = vmatprep.mubr.f32.mxu1 %v6651_v49  ;;  %v6619_v44 = vadd.f32 1.0, %v14552_v2  ;;  %14579 = vtanh.f32 %v6560_v54  ;;  %v6491_v0 = vmul.f32 %v19592_v20, %v19532_v11  ;;  %v6650_v41 = vmul.f32 %v6614_v62, %v19642_v4 }
 0xb97   : > { %v14556_v39 = vpop.eup %14555  ;;  %6926 = vmatprep.mubr.f32.mxu0 %v6653_v42  ;;  %v6621_v61 = vadd.f32 1.0, %v14554_v56  ;;  %v6377_v15 = vmul.f32 0.5, %v19458_v43  ;;  %v6493_v53 = vmul.f32 %v19599_v14, %v19535_v48  ;;  %v6652_v35 = vmul.f32 %v6616_v34, %v19649_v36 }
 0xb98   : > { %v14558_v27 = vpop.eup %14557  ;;  %v6655_v8 = vmul.f32 %v6619_v44, %v19659_v40  ;;  %v6620_v29 = vadd.f32 1.0, %v14556_v39  ;;  %v6527_v52 = vadd.f32 %v6491_v0, %v19532_v11  ;;  %v6562_v43 = vmul.f32 0.7978846, %v19589_v47 }
 0xb99   : > { %v14560_v22 = vpop.eup %14559  ;;  %6817 = vmatmul.mubr.f32.gmra.mxu1 %v6650_v41  ;;  %v6657_v20 = vmul.f32 %v6621_v61, %v19662_v51  ;;  %v6623_v31 = vadd.f32 1.0, %v14558_v27  ;;  %v6529_v4 = vadd.f32 %v6493_v53, %v19535_v48  ;;  %v6654_v14 = vmul.f32 %v6618_v5, %v19666_v50 }
 0xb9a   : > { %v14562_v46 = vpop.eup %14561  ;;  %6927 = vmatmul.mubr.f32.gmra.mxu0 %v6652_v35  ;;  %6821 = vmatprep.mubr.f32.mxu1 %v6655_v8  ;;  %v6656_v36 = vmul.f32 %v6620_v29, %v19669_v24  ;;  %v6625_v40 = vadd.f32 1.0, %v14560_v22  ;;  %v6563_v57 = vmul.f32 0.7978846, %v6527_v52  ;;  %14581 = vtanh.f32 %v6562_v43  ;;  %v23168_v52 = vld [vmem:[#allocation12_spill] sm:$0xff] }
 0xb9b   : > { %v14564_v13 = vpop.eup %14563  ;;  %6931 = vmatprep.mubr.f32.mxu0 %v6657_v20  ;;  %v6659_v18 = vmul.f32 %v6623_v31, %v19679_v1  ;;  %v6622_v33 = vadd.f32 1.0, %v14562_v46  ;;  %v6565_v51 = vmul.f32 0.7978846, %v6529_v4  ;;  %v6564_v16 = vmul.f32 0.7978846, %v19605_v55 }
 0xb9c   : > { %v14566_v21 = vpop.eup %14565  ;;  %v6661_v10 = vmul.f32 %v6625_v40, %v19682_v9  ;;  %v6624_v47 = vadd.f32 1.0, %v14564_v13  ;;  %14583 = vtanh.f32 %v6563_v57  ;;  %v6374_v24 = vmul.f32 0.5, %v19448_v17 }
 0xb9d   : > { %v14568_v6 = vpop.eup %14567  ;;  %6822 = vmatmul.mubr.f32.gmra.mxu1 %v6654_v14  ;;  %v6627_v50 = vadd.f32 1.0, %v14566_v21  ;;  %v6376_v62 = vmul.f32 0.5, %v19452_v58  ;;  %14585 = vtanh.f32 %v6565_v51  ;;  %v6379_v49 = vmul.f32 0.5, %v19494_v37 }
 0xb9e   : > { %v14570_v38 = vpop.eup %14569  ;;  %6932 = vmatmul.mubr.f32.gmra.mxu0 %v6656_v36  ;;  %6826 = vmatprep.mubr.f32.mxu1 %v6659_v18  ;;  %v6629_v1 = vadd.f32 1.0, %v14568_v6  ;;  %14587 = vtanh.f32 %v6564_v16  ;;  %v6495_v9 = vmul.f32 %v19612_v3, %v19553_v45  ;;  %v6658_v55 = vmul.f32 %v6622_v33, %v19686_v23  ;;  %v23169_v18 = vld [vmem:[#allocation14_spill] sm:$0xff] }
 0xb9f   : > { %v14572_v34 = vpop.eup %14571  ;;  %6936 = vmatprep.mubr.f32.mxu0 %v6661_v10  ;;  %v6663_v54 = vmul.f32 %v6627_v50, %v6375_v7  ;;  %v6626_v2 = vadd.f32 1.0, %v14570_v38  ;;  %v6497_v17 = vmul.f32 %v19615_v60, %v19556_v25  ;;  %v6660_v42 = vmul.f32 %v6624_v47, %v19697_v19 }
 0xba0   : > { %v14574_v58 = vpop.eup %14573  ;;  %v6665_v59 = vmul.f32 %v6629_v1, %v6377_v15  ;;  %v6628_v56 = vadd.f32 1.0, %v14572_v34  ;;  %v6531_v37 = vadd.f32 %v6495_v9, %v19553_v45  ;;  %v6381_v3 = vmul.f32 0.5, %v19522_v26 }
 0xba1   : > { %v14576_v44 = vpop.eup %14575  ;;  %6827 = vmatmul.mubr.f32.gmra.mxu1 %v6658_v55  ;;  %v6631_v5 = vadd.f32 1.0, %v14574_v58  ;;  %v6533_v0 = vadd.f32 %v6497_v17, %v19556_v25  ;;  %v6566_v23 = vmul.f32 0.7978846, %v19639_v63  ;;  %v6662_v60 = vmul.f32 %v6626_v2, %v6374_v24  ;;  %v23167_v63 = vld [vmem:[#allocation75_spill] sm:$0xff] }
 0xba2   : > { %v14578_v7 = vpop.eup %14577  ;;  %6937 = vmatmul.mubr.f32.gmra.mxu0 %v6660_v42  ;;  %6831 = vmatprep.mubr.f32.mxu1 %v6663_v54  ;;  %v6664_v39 = vmul.f32 %v6628_v56, %v6376_v62  ;;  %v6633_v41 = vadd.f32 1.0, %v14576_v44  ;;  %v6567_v19 = vmul.f32 0.7978846, %v6531_v37  ;;  %v6568_v26 = vmul.f32 0.7978846, %v19646_v30  ;;  %v23171_v37 = vld [vmem:[#allocation25_spill] sm:$0xff] }
 0xba3   : > { %v14580_v61 = vpop.eup %14579  ;;  %6941 = vmatprep.mubr.f32.mxu0 %v6665_v59  ;;  %v6667_v15 = vmul.f32 %v6631_v5, %v6379_v49  ;;  %v6630_v53 = vadd.f32 1.0, %v14578_v7  ;;  %v6569_v27 = vmul.f32 0.7978846, %v6533_v0  ;;  %14589 = vtanh.f32 %v6566_v23  ;;  %v23170_v59 = vld [vmem:[#allocation7_spill] sm:$0xff]  ;;  %v23172_v0 = vld [vmem:[#allocation74_spill] sm:$0xff]  ;;  %v23173_v23 = vld [vmem:[#allocation8_spill] sm:$0xff] }
 0xba4   : > { %v6669_v35 = vmul.f32 %v6633_v41, %v6381_v3  ;;  %v6632_v8 = vadd.f32 1.0, %v14580_v61  ;;  %14591 = vtanh.f32 %v6567_v19  ;;  %v6378_v29 = vmul.f32 0.5, %v23167_v63 }
 0xba5   : > { %6832 = vmatmul.mubr.f32.gmra.mxu1 %v6662_v60  ;;  %14593 = vtanh.f32 %v6569_v27  ;;  %v6380_v22 = vmul.f32 0.5, %v23168_v52  ;;  %v6383_v30 = vmul.f32 0.5, %v19532_v11  ;;  %v6385_v57 = vmul.f32 0.5, %v19535_v48 }
 0xba6   : > { %6942 = vmatmul.mubr.f32.gmra.mxu0 %v6664_v39  ;;  %6836 = vmatprep.mubr.f32.mxu1 %v6667_v15  ;;  %14595 = vtanh.f32 %v6568_v26  ;;  %v6666_v20 = vmul.f32 %v6630_v53, %v6378_v29  ;;  %v6382_v33 = vmul.f32 0.5, %v23169_v18  ;;  %v6384_v21 = vmul.f32 0.5, %v19500_v32 }
 0xba7   : > { %6946 = vmatprep.mubr.f32.mxu0 %v6669_v35  ;;  %v14582_v31 = vpop.eup %14581  ;;  %v6668_v4 = vmul.f32 %v6632_v8, %v6380_v22  ;;  %v6387_v48 = vmul.f32 0.5, %v19553_v45  ;;  %v6389_v49 = vmul.f32 0.5, %v19556_v25  ;;  %v6386_v32 = vmul.f32 0.5, %v19538_v12 }
 0xba8   : > { %v6634_v46 = vadd.f32 1.0, %v14582_v31  ;;  %v6388_v55 = vmul.f32 0.5, %v19544_v28 }
 0xba9   : > { %v14584_v43 = vpop.eup %14583  ;;  %6837 = vmatmul.mubr.f32.gmra.mxu1 %v6666_v20 }
 0xbaa   : > { %v14586_v14 = vpop.eup %14585  ;;  %6947 = vmatmul.mubr.f32.gmra.mxu0 %v6668_v4  ;;  %v6635_v36 = vadd.f32 1.0, %v14584_v43  ;;  %v6670_v16 = vmul.f32 %v6634_v46, %v6382_v33 }
 0xbab   : > { %v14588_v40 = vpop.eup %14587  ;;  %v6637_v13 = vadd.f32 1.0, %v14586_v14 }
 0xbac   : > { %v6671_v51 = vmul.f32 %v6635_v36, %v6383_v30  ;;  %v6636_v10 = vadd.f32 1.0, %v14588_v40 }
 0xbad   : > { %v6673_v47 = vmul.f32 %v6637_v13, %v6385_v57 }
 0xbae   : > { %6841 = vmatprep.mubr.f32.mxu1 %v6671_v51  ;;  %v6672_v6 = vmul.f32 %v6636_v10, %v6384_v21 }
 0xbaf   : > { %6951 = vmatprep.mubr.f32.mxu0 %v6673_v47  ;;  %6842 = vmatmul.mubr.f32.gmra.mxu1 %v6670_v16 }
 0xbb0   : > { %v14590_v50 = vpop.eup %14589  ;;  %6952 = vmatmul.mubr.f32.gmra.mxu0 %v6672_v6 }
 0xbb1   : > { %v14592_v11 = vpop.eup %14591  ;;  %v6638_v24 = vadd.f32 1.0, %v14590_v50  ;;  %v14734_v50 = vld [vmem:[%s22525_s4 + $0x88] sm:$0xff] }
 0xbb2   : > { %v14594_v62 = vpop.eup %14593  ;;  %v6639_v38 = vadd.f32 1.0, %v14592_v11  ;;  %v14735_v11 = vld [vmem:[%s22525_s4 + $0xd8] sm:$0xff] }
 0xbb3   : > { %v14596_v1 = vpop.eup %14595  ;;  %v6641_v9 = vadd.f32 1.0, %v14594_v62  ;;  %v6674_v17 = vmul.f32 %v6638_v24, %v6386_v32 }
 0xbb4   : > { %v6675_v34 = vmul.f32 %v6639_v38, %v6387_v48  ;;  %v6640_v54 = vadd.f32 1.0, %v14596_v1 }
 0xbb5   : > { %v6677_v2 = vmul.f32 %v6641_v9, %v6389_v49 }
 0xbb6   : > { %6846 = vmatprep.mubr.f32.mxu1 %v6675_v34  ;;  %v6676_v58 = vmul.f32 %v6640_v54, %v6388_v55 }
 0xbb7   : > { %6956 = vmatprep.mubr.f32.mxu0 %v6677_v2  ;;  %6847 = vmatmul.mubr.f32.gmra.mxu1 %v6674_v17 }
 0xbb8   : > { %6957 = vmatmul.mubr.f32.gmra.mxu0 %v6676_v58 }
 0xc06   : > { %v6234_v42 = vpop.f32.mrf.mxu1  ;;  %v6353_v45 = vpop.f32.mrf.mxu0 }
 0xc07   : > { %v6235_v56 = vadd.f32 %v6234_v42, %v23170_v59  ;;  %v6354_v25 = vadd.f32 %v6353_v45, %v23171_v37 }
 0xc08   : > { %v6236_v44 = vpop.f32.mrf.mxu1  ;;  %v6355_v5 = vpop.f32.mrf.mxu0 }
 0xc09   : > { %v6426_v12 = vmul.f32 0.044715, %v6235_v56  ;;  %v6428_v3 = vmul.f32 0.044715, %v6354_v25  ;;  %v6237_v28 = vadd.f32 %v6236_v44, %v23172_v0  ;;  %v6356_v7 = vadd.f32 %v6355_v5, %v23173_v23 }
 0xc0a   : > { %v6390_v51 = vmul.f32 0.5, %v6235_v56  ;;  %v6392_v10 = vmul.f32 0.5, %v6354_v25 }
 0xc0b   : > { %v6462_v60 = vmul.f32 %v6426_v12, %v6235_v56  ;;  %v6464_v39 = vmul.f32 %v6428_v3, %v6354_v25  ;;  %v6427_v41 = vmul.f32 0.044715, %v6237_v28  ;;  %v6429_v19 = vmul.f32 0.044715, %v6356_v7 }
 0xc0c   : > { %v6391_v40 = vmul.f32 0.5, %v6237_v28  ;;  %v6393_v18 = vmul.f32 0.5, %v6356_v7 }
 0xc0d   : > { %v6498_v61 = vmul.f32 %v6462_v60, %v6235_v56  ;;  %v6500_v15 = vmul.f32 %v6464_v39, %v6354_v25  ;;  %v6463_v53 = vmul.f32 %v6427_v41, %v6237_v28  ;;  %v6465_v27 = vmul.f32 %v6429_v19, %v6356_v7 }
 0xc0f   : > { %v6534_v35 = vadd.f32 %v6498_v61, %v6235_v56  ;;  %v6536_v8 = vadd.f32 %v6500_v15, %v6354_v25  ;;  %v6499_v26 = vmul.f32 %v6463_v53, %v6237_v28  ;;  %v6501_v63 = vmul.f32 %v6465_v27, %v6356_v7  ;;  %v19761_v61 = vld [vmem:[%s22526_s5 + $0x22] ss:$0 sm:$0xff] }
 0xc11   : > { %v6535_v29 = vadd.f32 %v6499_v26, %v6237_v28  ;;  %v6537_v52 = vadd.f32 %v6501_v63, %v6356_v7  ;;  %v6570_v22 = vmul.f32 0.7978846, %v6534_v35  ;;  %v6572_v20 = vmul.f32 0.7978846, %v6536_v8 }
 0xc13   : > { %v6571_v31 = vmul.f32 0.7978846, %v6535_v29  ;;  %v6573_v4 = vmul.f32 0.7978846, %v6537_v52  ;;  %14597 = vtanh.f32 %v6570_v22 }
 0xc14   : > { %14599 = vtanh.f32 %v6572_v20 }
 0xc15   : > { %14601 = vtanh.f32 %v6571_v31 }
 0xc16   : > { %14603 = vtanh.f32 %v6573_v4 }
 0xc20   : > { %v14598_v43 = vpop.eup %14597 }
 0xc21   : > { %v14600_v46 = vpop.eup %14599  ;;  %v6642_v30 = vadd.f32 1.0, %v14598_v43 }
 0xc22   : > { %v14602_v14 = vpop.eup %14601  ;;  %v6644_v13 = vadd.f32 1.0, %v14600_v46 }
 0xc23   : > { %v14604_v36 = vpop.eup %14603  ;;  %v6643_v57 = vadd.f32 1.0, %v14602_v14  ;;  %v6678_v16 = vmul.f32 %v6642_v30, %v6390_v51 }
 0xc24   : > { %v6645_v33 = vadd.f32 1.0, %v14604_v36  ;;  %v6680_v6 = vmul.f32 %v6644_v13, %v6392_v10  ;;  %v23175_v10 = vld [vmem:[#allocation37_spill] sm:$0xff] }
 0xc25   : > { %v6679_v21 = vmul.f32 %v6643_v57, %v6391_v40  ;;  %v23174_v57 = vld [vmem:[#allocation35_spill] sm:$0xff] }
 0xc26   : > { %v6681_v47 = vmul.f32 %v6645_v33, %v6393_v18 }
 0xc27   : > { %6851 = vmatprep.mubr.f32.mxu1 %v6679_v21 }
 0xc28   : > { %6961 = vmatprep.mubr.f32.mxu0 %v6681_v47  ;;  %6852 = vmatmul.mubr.f32.gmra.mxu1 %v6678_v16 }
 0xc29   : > { %6962 = vmatmul.mubr.f32.gmra.mxu0 %v6680_v6  ;;  %13743 = vmatprep.mubr.msk.f32.mxu1 %vm2525_vm13, %v14734_v50 }
 0xc2a   : > { %13778 = vmatprep.mubr.msk.f32.mxu0 %vm2711_vm8, %v14735_v11  ;;  %v23176_v11 = vld [vmem:[#allocation56_spill] sm:$0xff] }
 0xc55   : > { %v12465_v24 = vpop.f32.mrf.mxu1 }
 0xc56   : > { %v19754_v62 = vpop.f32.mrf.mxu0 }
 0xc57   : > { %v12466_v48 = vpop.f32.mrf.mxu1 }
 0xc58   : > { %v19756_v38 = vpop.f32.mrf.mxu0  ;;  %v12467_v18 = vadd.f32 %v12466_v48, %v12465_v24 }
 0xc59   : > { %v12468_v1 = vpop.f32.mrf.mxu1 }
 0xc5a   : > { %v12527_v49 = vpop.f32.mrf.mxu0  ;;  %v6814_v24 = vadd.f32 %v12467_v18, %v19761_v61 }
 0xc5b   : > { %v12469_v9 = vpop.f32.mrf.mxu1 }
 0xc5c   : > { %v12528_v32 = vpop.f32.mrf.mxu0  ;;  %v12470_v14 = vadd.f32 %v12469_v9, %v12468_v1 }
 0xc5d   : > { %v12471_v34 = vpop.f32.mrf.mxu1  ;;  %v12529_v48 = vadd.f32 %v12528_v32, %v12527_v49  ;;  %v23179_v32 = vld [vmem:[#allocation48_spill] sm:$0xff] }
 0xc5e   : > { %v12530_v55 = vpop.f32.mrf.mxu0  ;;  %v6819_v16 = vadd.f32 %v12470_v14, %v19761_v61 }
 0xc5f   : > { %v12472_v54 = vpop.f32.mrf.mxu1 }
 0xc60   : > { %v12531_v2 = vpop.f32.mrf.mxu0  ;;  %v12473_v20 = vadd.f32 %v12472_v54, %v12471_v34  ;;  %v23177_v34 = vld [vmem:[#allocation53_spill] sm:$0xff] }
 0xc61   : > { %v12474_v17 = vpop.f32.mrf.mxu1  ;;  %v12532_v6 = vadd.f32 %v12531_v2, %v12530_v55  ;;  %v12526_v55 = vadd.f32 %v19756_v38, %v19754_v62  ;;  %v6929_v2 = vadd.f32 %v12529_v48, %v6819_v16  ;;  %v23181_v38 = vld [vmem:[#allocation47_spill] sm:$0xff] }
 0xc62   : > { %v12533_v58 = vpop.f32.mrf.mxu0  ;;  %v6824_v33 = vadd.f32 %v12473_v20, %v19761_v61  ;;  %v7092_v16 = vld [vmem:[%s22525_s4 + $0x2b0] sm:$0xff]  ;;  %v7091_v48 = vld [vmem:[%s22525_s4 + $0x2a8] sm:$0xff] }
 0xc63   : > { %v12475_v42 = vpop.f32.mrf.mxu1  ;;  %v6924_v49 = vadd.f32 %v12526_v55, %v6814_v24 }
 0xc64   : > { %v12534_v45 = vpop.f32.mrf.mxu0  ;;  %v12476_v26 = vadd.f32 %v12475_v42, %v12474_v17  ;;  %v6934_v9 = vadd.f32 %v12532_v6, %v6824_v33  ;;  %v23178_v17 = vld [vmem:[#allocation32_spill] sm:$0xff] }
 0xc65   : > { %v12477_v59 = vpop.f32.mrf.mxu1  ;;  %v12535_v51 = vadd.f32 %v12534_v45, %v12533_v58  ;;  %v23180_v45 = vld [vmem:[#allocation46_spill] sm:$0xff]  ;;  %v7097_v6 = vld [vmem:[%s22525_s4 + $0x2d8] sm:$0xff] }
 0xc66   : > { %v12536_v56 = vpop.f32.mrf.mxu0  ;;  %v6829_v30 = vadd.f32 %v12476_v26, %v19761_v61  ;;  %v19798_v42 = vadd.f32 %v6934_v9, %v23179_v32  ;;  %v19803_v62 = vadd.f32 %v6929_v2, %v23180_v45  ;;  %v7096_v9 = vld [vmem:[%s22525_s4 + $0x2d0] sm:$0xff] }
 0xc67   : > { %v12478_v37 = vpop.f32.mrf.mxu1 }
 0xc68   : > { %v12537_v25 = vpop.f32.mrf.mxu0  ;;  %v12479_v53 = vadd.f32 %v12478_v37, %v12477_v59  ;;  %v6939_v50 = vadd.f32 %v12535_v51, %v6829_v30  ;;  %v19808_v59 = vadd.f32 %v6924_v49, %v23181_v38  ;;  %v14737_v37 = vld [vmem:[%s22525_s4 + $0x98] sm:$0xff] }
 0xc69   : > { %v12480_v44 = vpop.f32.mrf.mxu1  ;;  %v12538_v36 = vadd.f32 %v12537_v25, %v12536_v56  ;;  %v14736_v56 = vld [vmem:[%s22525_s4 + $0x90] sm:$0xff]  ;;  %v14738_v25 = vld [vmem:[%s22525_s4 + $0xa0] sm:$0xff] }
 0xc6a   : > { %v12539_v5 = vpop.f32.mrf.mxu0  ;;  %v6834_v31 = vadd.f32 %v12479_v53, %v19761_v61  ;;  %v19793_v58 = vadd.f32 %v6939_v50, %v23178_v17 }
 0xc6b   : > { %v12481_v12 = vpop.f32.mrf.mxu1 }
 0xc6c   : > { %v12540_v3 = vpop.f32.mrf.mxu0  ;;  %v12482_v41 = vadd.f32 %v12481_v12, %v12480_v44  ;;  %v6944_v21 = vadd.f32 %v12538_v36, %v6834_v31  ;;  %v14739_v44 = vld [vmem:[%s22525_s4 + $0xa8] sm:$0xff]  ;;  %v14741_v12 = vld [vmem:[%s22525_s4 + $0xb8] sm:$0xff]  ;;  %v7094_v36 = vld [vmem:[%s22525_s4 + $0x2c0] sm:$0xff] }
 0xc6d   : > { %v12541_v4 = vadd.f32 %v12540_v3, %v12539_v5  ;;  %v14740_v5 = vld [vmem:[%s22525_s4 + $0xb0] sm:$0xff]  ;;  %v14742_v3 = vld [vmem:[%s22525_s4 + $0xc0] sm:$0xff] }
 0xc6e   : > { %v6839_v63 = vadd.f32 %v12482_v41, %v19761_v61  ;;  %v19786_v54 = vadd.f32 %v6944_v21, %v23177_v34 }
 0xc6f   : > { %v12483_v0 = vpop.f32.mrf.mxu1 }
 0xc70   : > { %v12542_v28 = vpop.f32.mrf.mxu0  ;;  %v6949_v40 = vadd.f32 %v12541_v4, %v6839_v63  ;;  %v7099_v4 = vld [vmem:[%s22525_s4 + $0x2e8] sm:$0xff] }
 0xc71   : > { %v12484_v23 = vpop.f32.mrf.mxu1 }
 0xc72   : > { %v12543_v7 = vpop.f32.mrf.mxu0  ;;  %v12485_v60 = vadd.f32 %v12484_v23, %v12483_v0  ;;  %v19780_v1 = vadd.f32 %v6949_v40, %v23176_v11  ;;  %v14743_v0 = vld [vmem:[%s22525_s4 + $0xc8] sm:$0xff]  ;;  %v7093_v40 = vld [vmem:[%s22525_s4 + $0x2b8] sm:$0xff] }
 0xc73   : > { %v12544_v29 = vadd.f32 %v12543_v7, %v12542_v28  ;;  %v14744_v28 = vld [vmem:[%s22525_s4 + $0xd0] sm:$0xff] }
 0xc74   : > { %v6844_v27 = vadd.f32 %v12485_v60, %v19761_v61 }
 0xc76   : > { %v6954_v43 = vadd.f32 %v12544_v29, %v6844_v27  ;;  %v23182_v27 = vld [vmem:[#allocation63_spill] sm:$0xff] }
 0xc77   : > { %v12486_v39 = vpop.f32.mrf.mxu1 }
 0xc78   : > { %v12545_v19 = vpop.f32.mrf.mxu0  ;;  %v19774_v47 = vadd.f32 %v6954_v43, %v23175_v10 }
 0xc79   : > { %v12487_v15 = vpop.f32.mrf.mxu1 }
 0xc7a   : > { %v12488_v35 = vadd.f32 %v12487_v15, %v12486_v39  ;;  %v12546_v8 = vpop.f32.mrf.mxu0 }
 0xc7b   : > { %v12547_v22 = vadd.f32 %v12546_v8, %v12545_v19 }
 0xc7c   : > { %v6849_v52 = vadd.f32 %v12488_v35, %v19761_v61 }
 0xc7e   : > { %v6959_v46 = vadd.f32 %v12547_v22, %v6849_v52 }
 0xc80   : > { %v19769_v13 = vadd.f32 %v6959_v46, %v23174_v57  ;;  %v7095_v46 = vld [vmem:[%s22525_s4 + $0x2c8] sm:$0xff]  ;;  %v7098_v57 = vld [vmem:[%s22525_s4 + $0x2e0] sm:$0xff] }
 0xc82   : > { %13727 = vmatprep.subr.mxu1 %v19769_v13 }
 0xc83   : > { %13728 = vmatpush3.msra.mxu1 %v19769_v13 }
 0xc84   : > { %13729 = vmatprep.subr.mxu1 %v19774_v47 }
 0xc85   : > { %13730 = vmatpush3.msra.mxu1 %v19774_v47 }
 0xc86   : > { %13731 = vmatprep.subr.mxu1 %v19780_v1 }
 0xc87   : > { %13732 = vmatpush3.msra.mxu1 %v19780_v1 }
 0xc88   : > { %13733 = vmatprep.subr.mxu1 %v19786_v54 }
 0xc89   : > { %13734 = vmatpush3.msra.mxu1 %v19786_v54 }
 0xc8a   : > { %13735 = vmatprep.subr.mxu1 %v19793_v58 }
 0xc8b   : > { %13736 = vmatpush3.msra.mxu1 %v19793_v58 }
 0xc8c   : > { %13737 = vmatprep.subr.mxu1 %v19798_v42 }
 0xc8d   : > { %13738 = vmatpush3.msra.mxu1 %v19798_v42 }
 0xc8e   : > { %13739 = vmatprep.subr.mxu1 %v19803_v62 }
 0xc8f   : > { %13740 = vmatpush3.msra.mxu1 %v19803_v62 }
 0xc90   : > { %13741 = vmatprep.subr.mxu1 %v19808_v59 }
 0xc91   : > { %13742 = vmatpush3.msra.mxu1 %v19808_v59 }
 0xc92   : > { %13744 = vmatmul.mubr.msk.f32.vlgmr.msra.gmra.mxu1 %vm2525_vm13, %v14736_v56 }
 0xc93   : > { %13746 = vmatprep.mubr.msk.f32.mxu1 %vm2525_vm13, %v14737_v37 }
 0xc96   : > { %13747 = vmatmul.mubr.msk.f32.gmra.mxu1 %vm2525_vm13, %v14738_v25 }
 0xc97   : > { %13749 = vmatprep.mubr.msk.f32.mxu1 %vm2525_vm13, %v14739_v44 }
 0xc9a   : > { %13750 = vmatmul.mubr.msk.f32.gmra.mxu1 %vm2525_vm13, %v14740_v5 }
 0xc9b   : > { %13752 = vmatprep.mubr.msk.f32.mxu1 %vm2525_vm13, %v14741_v12 }
 0xc9e   : > { %13753 = vmatmul.mubr.msk.f32.gmra.mxu1 %vm2525_vm13, %v14742_v3 }
 0xc9f   : > { %13755 = vmatprep.mubr.msk.f32.mxu1 %vm2525_vm13, %v14743_v0 }
 0xca2   : > { %13756 = vmatmul.mubr.msk.f32.gmra.mxu1 %vm2525_vm13, %v14744_v28 }
 0xce8   : > { %v12489_v23 = vpop.f32.mrf.mxu1 }
 0xce9   : > { %v12548_v7 = vpop.f32.mrf.mxu0 }
 0xcea   : > { %v12490_v60 = vpop.f32.mrf.mxu1 }
 0xceb   : > { %v12491_v39 = vadd.f32 %v12490_v60, %v12489_v23  ;;  %v12549_v41 = vpop.f32.mrf.mxu0 }
 0xcec   : > { %v12550_v15 = vadd.f32 %v12549_v41, %v12548_v7  ;;  %v7243_v41 = vld [vmem:[%s22525_s4 + $0x1d0] sm:$0xff] }
 0xced   : > { %v6854_v19 = vadd.f32 %v12491_v39, %v19761_v61  ;;  %v7100_v61 = vld [vmem:[%s22525_s4 + $0x2f0] sm:$0xff] }
 0xcef   : > { %v6964_v53 = vadd.f32 %v12550_v15, %v6854_v19  ;;  %v14745_v19 = vld [vmem:[%s22525_s4 + $0xe0] sm:$0xff]  ;;  %v23183_v15 = vmov 0.0  }
 0xcf1   : > { %v19851_v35 = vadd.f32 %v6964_v53, %v23182_v27  ;;  %v7242_v53 = vld [vmem:[%s22525_s4 + $0x1c8] sm:$0xff] }
 0xcf2   : > { %v14746_v27 = vld [vmem:[%s22525_s4 + $0xe8] sm:$0xff] }
 0xcf3   : > { %13833 = vmatprep.subr.mxu1 %v19851_v35 }
 0xcf4   : > { %13834 = vmatpush3.msra.mxu1 %v19851_v35 }
 0xd52   : > { %v13745_v8 = vpop.f32.mrf.mxu1 }
 0xd53   : > { %v7122_v34 = vmul.f32 %v13745_v8, %v7097_v6  ;;  %v7102_v0 = vmul.f32 %v13745_v8, %v7092_v16  ;;  %v7241_v8 = vld [vmem:[%s22525_s4 + $0x1c0] sm:$0xff] }
 0xd54   : > { %v7042_v26 = vpop.f32.mrf.mxu1 }
 0xd55   : > { %v7121_v17 = vmul.f32 %v7096_v9, %v7042_v26  ;;  %v7101_v7 = vmul.f32 %v7091_v48, %v7042_v26  ;;  %v14747_v26 = vld [vmem:[%s22525_s4 + $0xf0] sm:$0xff] }
 0xd56   : > { %v13748_v63 = vpop.f32.mrf.mxu1 }
 0xd57   : > { %v7124_v33 = vmul.f32 %v13748_v63, %v7099_v4  ;;  %v7104_v37 = vmul.f32 %v13748_v63, %v7094_v36  ;;  %v7240_v63 = vld [vmem:[%s22525_s4 + $0x1b8] sm:$0xff] }
 0xd58   : > { %v7052_v29 = vpop.f32.mrf.mxu1 }
 0xd59   : > { %v7123_v50 = vmul.f32 %v7098_v57, %v7052_v29  ;;  %v7103_v5 = vmul.f32 %v7093_v40, %v7052_v29  ;;  %v14748_v29 = vld [vmem:[%s22525_s4 + $0xf8] sm:$0xff] }
 0xd5a   : > { %v13751_v52 = vpop.f32.mrf.mxu1 }
 0xd5b   : > { %v7116_v55 = vmul.f32 %v13751_v52, %v7091_v48  ;;  %v7106_v28 = vmul.f32 %v13751_v52, %v7096_v9  ;;  %v7239_v52 = vld [vmem:[%s22525_s4 + $0x1b0] sm:$0xff]  ;;  %v14759_v48 = vld [vmem:[%s22525_s4 + $0x48] sm:$0xff]  ;;  %v7245_v9 = vld [vmem:[%s22525_s4 + $0x220] sm:$0xff] }
 0xd5c   : > { %v7062_v22 = vpop.f32.mrf.mxu1 }
 0xd5d   : > { %v7125_v30 = vmul.f32 %v7100_v61, %v7062_v22  ;;  %v7126_v45 = vadd.f32 %v7121_v17, %v7116_v55  ;;  %v7105_v38 = vmul.f32 %v7095_v46, %v7062_v22  ;;  %v7111_v39 = vsub.f32 %v7101_v7, %v7106_v28  ;;  %v14749_v22 = vld [vmem:[%s22525_s4 + $0x100] sm:$0xff]  ;;  %v7246_v55 = vld [vmem:[%s22525_s4 + $0x228] sm:$0xff]  ;;  %v7247_v17 = vld [vmem:[%s22525_s4 + $0x230] sm:$0xff] }
 0xd5e   : > { %v13754_v20 = vpop.f32.mrf.mxu1 }
 0xd5f   : > { %v7118_v51 = vmul.f32 %v13754_v20, %v7093_v40  ;;  %v7108_v25 = vmul.f32 %v13754_v20, %v7098_v57  ;;  %v7238_v20 = vld [vmem:[%s22525_s4 + $0x1a8] sm:$0xff]  ;;  %v14752_v40 = vld [vmem:[%s22525_s4 + $0x80] sm:$0xff] }
 0xd60   : > { %v7072_v31 = vpop.f32.mrf.mxu1 }
 0xd61   : > { %v7117_v11 = vmul.f32 %v7092_v16, %v7072_v31  ;;  %v7128_v2 = vadd.f32 %v7123_v50, %v7118_v51  ;;  %v7107_v12 = vmul.f32 %v7097_v6, %v7072_v31  ;;  %v7113_v23 = vsub.f32 %v7103_v5, %v7108_v25  ;;  %v14750_v31 = vld [vmem:[%s22525_s4 + $0x108] sm:$0xff]  ;;  %v14754_v51 = vld [vmem:[%s22525_s4 + $0x70] sm:$0xff]  ;;  %v14756_v6 = vld [vmem:[%s22525_s4 + $0x60] sm:$0xff] }
 0xd62   : > { %v13757_v43 = vpop.f32.mrf.mxu1  ;;  %v11705_v25 = vld [vmem:[%s17280_s27 + $0x50] sm:$0xff]  ;;  %v11704_v5 = vld [vmem:[%s17280_s27 + $0x48] sm:$0xff] }
 0xd63   : > { %v7120_v14 = vmul.f32 %v13757_v43, %v7095_v46  ;;  %v7110_v49 = vmul.f32 %v13757_v43, %v7100_v61  ;;  %v7127_v32 = vadd.f32 %v7122_v34, %v7117_v11  ;;  %v7112_v60 = vsub.f32 %v7102_v0, %v7107_v12  ;;  %v14751_v61 = vld [vmem:[%s22525_s4 + $0x110] sm:$0xff]  ;;  %v7236_v43 = vld [vmem:[%s22525_s4 + $0x198] sm:$0xff]  ;;  %v11703_v12 = vld [vmem:[%s17280_s27 + $0x40] sm:$0xff] }
 0xd64   : > { %v7082_v18 = vpop.f32.mrf.mxu1  ;;  %v7244_v46 = vld [vmem:[%s22525_s4 + $0x218] sm:$0xff] }
 0xd65   : > { %v7130_v21 = vadd.f32 %v7125_v30, %v7120_v14  ;;  %v7119_v10 = vmul.f32 %v7094_v36, %v7082_v18  ;;  %v7109_v56 = vmul.f32 %v7099_v4, %v7082_v18  ;;  %v7115_v44 = vsub.f32 %v7105_v38, %v7110_v49  ;;  %v7237_v4 = vld [vmem:[%s22525_s4 + $0x1a0] sm:$0xff]  ;;  %13851 = vmatprep.mubr.msk.f32.mxu1 %vm2994_vm0, %v7244_v46  ;;  %v14753_v18 = vld [vmem:[%s22525_s4 + $0x78] sm:$0xff]  ;;  %v11708_v49 = vld [vmem:[%s17280_s27 + $0x68] sm:$0xff] }
 0xd66   : > { %v14757_v11 = vld [vmem:[%s22525_s4 + $0x58] sm:$0xff]  ;;  %v7249_v38 = vld [vmem:[%s22525_s4 + $0x240] sm:$0xff] }
 0xd67   : > { %13758 = vmatprep.subr.mxu0 %v7130_v21  ;;  %v7129_v24 = vadd.f32 %v7124_v33, %v7119_v10  ;;  %v7114_v3 = vsub.f32 %v7104_v37, %v7109_v56  ;;  %v14755_v10 = vld [vmem:[%s22525_s4 + $0x68] sm:$0xff]  ;;  %v11710_v34 = vld [vmem:[%s17280_s27 + $0x78] sm:$0xff] }
 0xd68   : > { %13759 = vmatpush3.msra.mxu0 %v7130_v21  ;;  %v11706_v56 = vld [vmem:[%s17280_s27 + $0x58] sm:$0xff]  ;;  %v7250_v37 = vld [vmem:[%s22525_s4 + $0x248] sm:$0xff] }
 0xd69   : > { %13760 = vmatprep.subr.mxu0 %v7129_v24 }
 0xd6a   : > { %13761 = vmatpush3.msra.mxu0 %v7129_v24  ;;  %v14758_v24 = vld [vmem:[%s22525_s4 + $0x50] sm:$0xff] }
 0xd6b   : > { %13762 = vmatprep.subr.mxu0 %v7128_v2 }
 0xd6c   : > { %13763 = vmatpush3.msra.mxu0 %v7128_v2  ;;  %v11709_v2 = vld [vmem:[%s17280_s27 + $0x70] sm:$0xff] }
 0xd6d   : > { %13764 = vmatprep.subr.mxu0 %v7127_v32 }
 0xd6e   : > { %13765 = vmatpush3.msra.mxu0 %v7127_v32  ;;  %v7248_v32 = vld [vmem:[%s22525_s4 + $0x238] sm:$0xff] }
 0xd6f   : > { %13766 = vmatprep.subr.mxu0 %v7126_v45 }
 0xd70   : > { %13767 = vmatpush3.msra.mxu0 %v7126_v45  ;;  %v11707_v45 = vld [vmem:[%s17280_s27 + $0x60] sm:$0xff]  ;;  %s14910_s27 = scalar_lea.vmem %s14909_s26, 32 }
 0xd71   : > { %13768 = vmatprep.subr.mxu0 %v7115_v44  ;;  %p14912_p4 = scmp.lt.s32.totalorder %s14910_s27, %s14904_s25 }
 0xd72   : > { %13769 = vmatpush3.msra.mxu0 %v7115_v44  ;;  %v7251_v44 = vld [vmem:[%s22525_s4 + $0x250] sm:$0xff] }
 0xd73   : > { %13770 = vmatprep.subr.mxu0 %v7114_v3  ;;  %p14913_p5 = por %p14912_p4, %p14911_p3 }
 0xd74   : > { %13771 = vmatpush3.msra.mxu0 %v7114_v3 }
 0xd75   : > { %13772 = vmatprep.subr.mxu0 %v7113_v23  ;;  %p14914_p7 = pnand %p14913_p5, %p14907_p2 }
 0xd76   : > { %13773 = vmatpush3.msra.mxu0 %v7113_v23 }
 0xd77   : > { %13774 = vmatprep.subr.mxu0 %v7112_v60 }
 0xd78   : > { %13775 = vmatpush3.msra.mxu0 %v7112_v60 }
 0xd79   : > { %13776 = vmatprep.subr.mxu0 %v7111_v39 }
 0xd7a   : > { %13777 = vmatpush3.msra.mxu0 %v7111_v39 }
 0xd7b   : > { %13779 = vmatmul.mubr.msk.f32.vlgmr.msra.gmra.mxu0 %vm2711_vm8, %v14745_v19  ;;  %13790 = vmatprep.subr.mxu0 %v23183_v15 }
 0xd7c   : > { %13781 = vmatprep.mubr.msk.f32.mxu0 %vm2711_vm8, %v14746_v27  ;;  %13791 = vmatpush3.msra.mxu0 %v7243_v41 }
 0xd7d   : > { %13792 = vmatprep.subr.mxu0 %v23183_v15 }
 0xd7e   : > { %13793 = vmatpush3.msra.mxu0 %v7242_v53 }
 0xd7f   : > { %13782 = vmatmul.mubr.msk.f32.gmra.mxu0 %vm2711_vm8, %v14747_v26  ;;  %13794 = vmatprep.subr.mxu0 %v23183_v15 }
 0xd80   : > { %13784 = vmatprep.mubr.msk.f32.mxu0 %vm2711_vm8, %v14748_v29  ;;  %13795 = vmatpush3.msra.mxu0 %v7241_v8 }
 0xd81   : > { %13796 = vmatprep.subr.mxu0 %v23183_v15 }
 0xd82   : > { %13797 = vmatpush3.msra.mxu0 %v7240_v63 }
 0xd83   : > { %13785 = vmatmul.mubr.msk.f32.gmra.mxu0 %vm2711_vm8, %v14749_v22  ;;  %13798 = vmatprep.subr.mxu0 %v23183_v15 }
 0xd84   : > { %13787 = vmatprep.mubr.msk.f32.mxu0 %vm2711_vm8, %v14750_v31  ;;  %13799 = vmatpush3.msra.mxu0 %v7239_v52  ;;  %v14760_v31 = vld [vmem:[%s22525_s4 + $0x2f8] sm:$0xff] }
 0xd85   : > { %13800 = vmatprep.subr.mxu0 %v23183_v15 }
 0xd86   : > { %13801 = vmatpush3.msra.mxu0 %v7238_v20 }
 0xd87   : > { %13788 = vmatmul.mubr.msk.f32.gmra.mxu0 %vm2711_vm8, %v14751_v61  ;;  %13802 = vmatprep.subr.mxu0 %v23183_v15 }
 0xd88   : > { %13806 = vmatprep.mubr.msk.f32.mxu0 %vm14967_vm6, %v23183_v15  ;;  %13803 = vmatpush3.msra.mxu0 %v7237_v4 }
 0xd89   : > { %13804 = vmatprep.subr.mxu0 %v23183_v15 }
 0xd8a   : > { %13805 = vmatpush3.msra.mxu0 %v7236_v43 }
 0xd8b   : > { %13906 = vmatprep.subr.mxu0 %v23183_v15 }
 0xe3b   : > { %v13780_v14 = vpop.f32.mrf.mxu0 }
 0xe3d   : > { %v7197_v30 = vpop.f32.mrf.mxu0 }
 0xe3e   : > { %13807 = vmatmul.mubr.msk.f32.vlgmr.msra.gmra.mxu0 %vm2525_vm13, %v7197_v30 }
 0xe3f   : > { %v13783_v36 = vpop.f32.mrf.mxu0  ;;  %13809 = vmatprep.mubr.msk.f32.mxu0 %vm14967_vm6, %v23183_v15  ;;  %13907 = vmatpush3.msra.mxu0 %v14752_v40 }
 0xe40   : > { %13908 = vmatprep.subr.mxu0 %v23183_v15 }
 0xe41   : > { %v7207_v57 = vpop.f32.mrf.mxu0  ;;  %13909 = vmatpush3.msra.mxu0 %v14753_v18 }
 0xe42   : > { %13810 = vmatmul.mubr.msk.f32.gmra.mxu0 %vm2525_vm13, %v13780_v14  ;;  %13910 = vmatprep.subr.mxu0 %v23183_v15 }
 0xe43   : > { %v13786_v33 = vpop.f32.mrf.mxu0  ;;  %13812 = vmatprep.mubr.msk.f32.mxu0 %vm14967_vm6, %v23183_v15  ;;  %13911 = vmatpush3.msra.mxu0 %v14754_v51 }
 0xe44   : > { %13912 = vmatprep.subr.mxu0 %v23183_v15 }
 0xe45   : > { %v7217_v21 = vpop.f32.mrf.mxu0  ;;  %13913 = vmatpush3.msra.mxu0 %v14755_v10 }
 0xe46   : > { %13813 = vmatmul.mubr.msk.f32.gmra.mxu0 %vm2525_vm13, %v7207_v57  ;;  %13914 = vmatprep.subr.mxu0 %v23183_v15 }
 0xe47   : > { %v13789_v16 = vpop.f32.mrf.mxu0  ;;  %13815 = vmatprep.mubr.msk.f32.mxu0 %vm14967_vm6, %v23183_v15  ;;  %13915 = vmatpush3.msra.mxu0 %v14756_v6 }
 0xe48   : > { %13835 = vmatprep.subr.mxu1 %v13789_v16  ;;  %13916 = vmatprep.subr.mxu0 %v23183_v15 }
 0xe49   : > { %v7227_v50 = vpop.f32.mrf.mxu0  ;;  %13836 = vmatpush3.msra.mxu1 %v13789_v16  ;;  %13917 = vmatpush3.msra.mxu0 %v14757_v11 }
 0xe4a   : > { %13816 = vmatmul.mubr.msk.f32.gmra.mxu0 %vm2525_vm13, %v13783_v36  ;;  %13837 = vmatprep.subr.mxu1 %v7227_v50 }
 0xe4b   : > { %13838 = vmatpush3.msra.mxu1 %v7227_v50  ;;  %13818 = vmatprep.mubr.msk.f32.mxu0 %vm14967_vm6, %v23183_v15 }
 0xe4c   : > { %13839 = vmatprep.subr.mxu1 %v13786_v33  ;;  %13918 = vmatprep.subr.mxu0 %v23183_v15 }
 0xe4d   : > { %13840 = vmatpush3.msra.mxu1 %v13786_v33  ;;  %13919 = vmatpush3.msra.mxu0 %v14758_v24 }
 0xe4e   : > { %13819 = vmatmul.mubr.msk.f32.gmra.mxu0 %vm2525_vm13, %v7217_v21  ;;  %13841 = vmatprep.subr.mxu1 %v7217_v21 }
 0xe4f   : > { %13842 = vmatpush3.msra.mxu1 %v7217_v21  ;;  %13821 = vmatprep.mubr.msk.f32.mxu0 %vm14967_vm6, %v23183_v15 }
 0xe50   : > { %13843 = vmatprep.subr.mxu1 %v13783_v36  ;;  %13920 = vmatprep.subr.mxu0 %v23183_v15 }
 0xe51   : > { %13844 = vmatpush3.msra.mxu1 %v13783_v36  ;;  %13921 = vmatpush3.msra.mxu0 %v14759_v48 }
 0xe52   : > { %13822 = vmatmul.mubr.msk.f32.gmra.mxu0 %vm2525_vm13, %v13786_v33  ;;  %13845 = vmatprep.subr.mxu1 %v7207_v57 }
 0xe53   : > { %13846 = vmatpush3.msra.mxu1 %v7207_v57  ;;  %13824 = vmatprep.mubr.msk.f32.mxu0 %vm14967_vm6, %v23183_v15 }
 0xe54   : > { %13847 = vmatprep.subr.mxu1 %v13780_v14 }
 0xe55   : > { %13848 = vmatpush3.msra.mxu1 %v13780_v14 }
 0xe56   : > { %13825 = vmatmul.mubr.msk.f32.gmra.mxu0 %vm2525_vm13, %v7227_v50  ;;  %13849 = vmatprep.subr.mxu1 %v7197_v30 }
 0xe57   : > { %13850 = vmatpush3.msra.mxu1 %v7197_v30  ;;  %13827 = vmatprep.mubr.msk.f32.mxu0 %vm14967_vm6, %v23183_v15 }
 0xe58   : > { %13852 = vmatmul.mubr.msk.f32.vlgmr.msra.gmra.mxu1 %vm2994_vm0, %v7245_v9  ;;  %13863 = vmatprep.subr.mxu1 %v23183_v15 }
 0xe59   : > { %13864 = vmatpush3.msra.mxu1 %v11710_v34  ;;  %13854 = vmatprep.mubr.msk.f32.mxu1 %vm2994_vm0, %v7246_v55 }
 0xe5a   : > { %13828 = vmatmul.mubr.msk.f32.gmra.mxu0 %vm2525_vm13, %v13789_v16  ;;  %13865 = vmatprep.subr.mxu1 %v23183_v15 }
 0xe5b   : > { %13830 = vmatprep.mubr.msk.f32.mxu0 %vm14967_vm6, %v23183_v15  ;;  %13866 = vmatpush3.msra.mxu1 %v11709_v2 }
 0xe5c   : > { %13855 = vmatmul.mubr.msk.f32.gmra.mxu1 %vm2994_vm0, %v7247_v17  ;;  %13867 = vmatprep.subr.mxu1 %v23183_v15 }
 0xe5d   : > { %13868 = vmatpush3.msra.mxu1 %v11708_v49  ;;  %13857 = vmatprep.mubr.msk.f32.mxu1 %vm2994_vm0, %v7248_v32 }
 0xe5e   : > { %13831 = vmatmul.mubr.msk.f32.gmra.mxu0 %vm2525_vm13, %v19851_v35  ;;  %13869 = vmatprep.subr.mxu1 %v23183_v15 }
 0xe5f   : > { %13870 = vmatpush3.msra.mxu1 %v11707_v45  ;;  %13922 = vmatprep.mubr.msk.f32.mxu0 %vm14967_vm6, %v23183_v15 }
 0xe60   : > { %13858 = vmatmul.mubr.msk.f32.gmra.mxu1 %vm2994_vm0, %v7249_v38  ;;  %13871 = vmatprep.subr.mxu1 %v23183_v15 }
 0xe61   : > { %13872 = vmatpush3.msra.mxu1 %v11706_v56  ;;  %13860 = vmatprep.mubr.msk.f32.mxu1 %vm2994_vm0, %v7250_v37 }
 0xe62   : > { %13873 = vmatprep.subr.mxu1 %v23183_v15 }
 0xe63   : > { %13874 = vmatpush3.msra.mxu1 %v11705_v25 }
 0xe64   : > { %13861 = vmatmul.mubr.msk.f32.gmra.mxu1 %vm2994_vm0, %v7251_v44  ;;  %13875 = vmatprep.subr.mxu1 %v23183_v15 }
 0xe65   : > { %13876 = vmatpush3.msra.mxu1 %v11704_v5  ;;  %13879 = vmatprep.mubr.msk.f32.mxu1 %vm14967_vm6, %v23183_v15 }
 0xe66   : > { %13877 = vmatprep.subr.mxu1 %v23183_v15 }
 0xe67   : > { %13878 = vmatpush3.msra.mxu1 %v11703_v12 }
 0xefe   : > { %v7345_v3 = vpop.f32.mrf.mxu0 }
 0xeff   : > { %13880 = vmatmul.mubr.msk.f32.vlgmr.msra.gmra.mxu1 %vm2525_vm13, %v7345_v3  ;;  %v11858_v3 = vld [vmem:[%s22527_s6 + $0x3c8] sm:$0xff] }
 0xf00   : > { %v13808_v0 = vpop.f32.mrf.mxu0  ;;  %13882 = vmatprep.mubr.msk.f32.mxu1 %vm14967_vm6, %v23183_v15  ;;  %8475 = vmatprep.subr.mxu0 %v11858_v3  ;;  %v11860_v3 = vld [vmem:[%s22527_s6 + $0x3d8] sm:$0xff] }
 0xf02   : > { %v7350_v28 = vpop.f32.mrf.mxu0 }
 0xf03   : > { %13883 = vmatmul.mubr.msk.f32.gmra.mxu1 %vm2525_vm13, %v7350_v28 }
 0xf04   : > { %v13811_v23 = vpop.f32.mrf.mxu0  ;;  %13885 = vmatprep.mubr.msk.f32.mxu1 %vm14967_vm6, %v23183_v15 }
 0xf06   : > { %v7355_v7 = vpop.f32.mrf.mxu0 }
 0xf07   : > { %13886 = vmatmul.mubr.msk.f32.gmra.mxu1 %vm2525_vm13, %v7355_v7 }
 0xf08   : > { %v13814_v60 = vpop.f32.mrf.mxu0  ;;  %13888 = vmatprep.mubr.msk.f32.mxu1 %vm14967_vm6, %v23183_v15 }
 0xf0a   : > { %v7360_v39 = vpop.f32.mrf.mxu0 }
 0xf0b   : > { %13889 = vmatmul.mubr.msk.f32.gmra.mxu1 %vm2525_vm13, %v7360_v39 }
 0xf0c   : > { %v13817_v41 = vpop.f32.mrf.mxu0  ;;  %13891 = vmatprep.mubr.msk.f32.mxu1 %vm14967_vm6, %v23183_v15 }
 0xf0e   : > { %v7365_v19 = vpop.f32.mrf.mxu0 }
 0xf0f   : > { %13892 = vmatmul.mubr.msk.f32.gmra.mxu1 %vm2525_vm13, %v7365_v19 }
 0xf10   : > { %v13820_v53 = vpop.f32.mrf.mxu0  ;;  %13894 = vmatprep.mubr.msk.f32.mxu1 %vm14967_vm6, %v23183_v15 }
 0xf12   : > { %v7370_v27 = vpop.f32.mrf.mxu0 }
 0xf13   : > { %13895 = vmatmul.mubr.msk.f32.gmra.mxu1 %vm2525_vm13, %v7370_v27 }
 0xf14   : > { %v13823_v8 = vpop.f32.mrf.mxu0  ;;  %13897 = vmatprep.mubr.msk.f32.mxu1 %vm14967_vm6, %v23183_v15 }
 0xf16   : > { %v7375_v26 = vpop.f32.mrf.mxu0 }
 0xf17   : > { %13898 = vmatmul.mubr.msk.f32.gmra.mxu1 %vm2525_vm13, %v7375_v26 }
 0xf18   : > { %v13826_v63 = vpop.f32.mrf.mxu0  ;;  %13900 = vmatprep.mubr.msk.f32.mxu1 %vm14967_vm6, %v23183_v15  ;;  %v20086_v61 = vpop.f32.mrf.mxu1 }
 0xf1a   : > { %v7380_v29 = vpop.f32.mrf.mxu0  ;;  %v20088_v4 = vpop.f32.mrf.mxu1 }
 0xf1b   : > { %13901 = vmatmul.mubr.msk.f32.gmra.mxu1 %vm2525_vm13, %v7380_v29 }
 0xf1c   : > { %v13829_v52 = vpop.f32.mrf.mxu0  ;;  %13903 = vmatprep.mubr.msk.f32.mxu1 %vm14967_vm6, %v23183_v15  ;;  %v20090_v43 = vpop.f32.mrf.mxu1 }
 0xf1d   : > { %v11857_v52 = vld [vmem:[%s22527_s6 + $0x3c0] sm:$0xff] }
 0xf1e   : > { %v7385_v22 = vpop.f32.mrf.mxu0  ;;  %v20092_v46 = vpop.f32.mrf.mxu1 }
 0xf1f   : > { %13904 = vmatmul.mubr.msk.f32.gmra.mxu1 %vm2525_vm13, %v7385_v22 }
 0xf20   : > { %v13832_v20 = vpop.f32.mrf.mxu0  ;;  %13967 = vmatprep.mubr.msk.f32.mxu1 %vm2994_vm0, %v14760_v31  ;;  %v20094_v14 = vpop.f32.mrf.mxu1 }
 0xf21   : > { %v11850_v20 = vld [vmem:[%s22527_s6 + $0x388] sm:$0xff] }
 0xf22   : > { %v20096_v30 = vpop.f32.mrf.mxu1 }
 0xf24   : > { %v20098_v36 = vpop.f32.mrf.mxu1 }
 0xf26   : > { %v20100_v40 = vpop.f32.mrf.mxu1 }
 0xfbf   : > { %v7620_v57 = vpop.f32.mrf.mxu1 }
 0xfc0   : > { %v7664_v18 = vsel %vm2525_vm13, %v7620_v57, -inf }
 0xfc1   : > { %7665 = vmax.xlane.f32.xlu1 %v7664_v18  ;;  %v13881_v33 = vpop.f32.mrf.mxu1 }
 0xfc2   : > { %v11842_v33 = vld [vmem:[%s22527_s6 + $0x348] sm:$0xff] }
 0xfc3   : > { %v7625_v51 = vpop.f32.mrf.mxu1 }
 0xfc4   : > { %v7667_v21 = vsel %vm2525_vm13, %v7625_v51, -inf }
 0xfc5   : > { %7668 = vmax.xlane.f32.xlu0 %v7667_v21  ;;  %v13884_v10 = vpop.f32.mrf.mxu1  ;;  %v11841_v21 = vld [vmem:[%s22527_s6 + $0x340] sm:$0xff] }
 0xfc7   : > { %v7630_v16 = vpop.f32.mrf.mxu1 }
 0xfc8   : > { %v7670_v6 = vsel %vm2525_vm13, %v7630_v16, -inf }
 0xfc9   : > { %7671 = vmax.xlane.f32.xlu1 %v7670_v6  ;;  %v13887_v50 = vpop.f32.mrf.mxu1 }
 0xfca   : > { %v11833_v50 = vld [vmem:[%s22527_s6 + $0x300] sm:$0xff] }
 0xfcb   : > { %v7635_v11 = vpop.f32.mrf.mxu1 }
 0xfcc   : > { %v7673_v24 = vsel %vm2525_vm13, %v7635_v11, -inf }
 0xfcd   : > { %7674 = vmax.xlane.f32.xlu0 %v7673_v24  ;;  %v13890_v48 = vpop.f32.mrf.mxu1  ;;  %v11826_v24 = vld [vmem:[%s22527_s6 + $0x2c8] sm:$0xff] }
 0xfcf   : > { %v7640_v9 = vpop.f32.mrf.mxu1 }
 0xfd0   : > { %v7676_v34 = vsel %vm2525_vm13, %v7640_v9, -inf }
 0xfd1   : > { %7677 = vmax.xlane.f32.xlu1 %v7676_v34  ;;  %v13893_v55 = vpop.f32.mrf.mxu1 }
 0xfd2   : > { %v11818_v55 = vld [vmem:[%s22527_s6 + $0x288] sm:$0xff] }
 0xfd3   : > { %v7645_v2 = vpop.f32.mrf.mxu1 }
 0xfd4   : > { %v7679_v17 = vsel %vm2525_vm13, %v7645_v2, -inf }
 0xfd5   : > { %7680 = vmax.xlane.f32.xlu0 %v7679_v17  ;;  %v13896_v49 = vpop.f32.mrf.mxu1  ;;  %v11817_v17 = vld [vmem:[%s22527_s6 + $0x280] sm:$0xff] }
 0xfd7   : > { %v20108_v32 = vpop.f32.mrf.mxu1 }
 0xfd8   : > { %v7682_v45 = vsel %vm2525_vm13, %v20108_v32, -inf }
 0xfd9   : > { %7683 = vmax.xlane.f32.xlu1 %v7682_v45  ;;  %v13899_v38 = vpop.f32.mrf.mxu1 }
 0xfda   : > { %v11809_v38 = vld [vmem:[%s22527_s6 + $0x240] sm:$0xff] }
 0xfdb   : > { %v20112_v56 = vpop.f32.mrf.mxu1 }
 0xfdc   : > { %v7685_v37 = vsel %vm2525_vm13, %v20112_v56, -inf }
 0xfdd   : > { %7686 = vmax.xlane.f32.xlu0 %v7685_v37  ;;  %v13902_v25 = vpop.f32.mrf.mxu1 }
 0xfde   : > { %v11802_v25 = vld [vmem:[%s22527_s6 + $0x208] sm:$0xff] }
 0xfdf   : > { %v20116_v44 = vpop.f32.mrf.mxu1 }
 0xfe0   : > { %v7688_v5 = vsel %vm2525_vm13, %v20116_v44, -inf }
 0xfe1   : > { %7689 = vmax.xlane.f32.xlu1 %v7688_v5  ;;  %v13905_v12 = vpop.f32.mrf.mxu1 }
0x104a   : > { %v7666_v0 = vpop.xlane.xlu1 %7665 }
0x104b   : > { %v7691_v28 = vsub.f32 %v7620_v57, %v7666_v0  ;;  %v11849_v57 = vld [vmem:[%s22527_s6 + $0x380] sm:$0xff] }
0x104d   : > { %v7700_v23 = vmul.f32 1.442695, %v7691_v28 }
0x104e   : > { %v7669_v7 = vpop.xlane.xlu0 %7668 }
0x104f   : > { %14605 = vpow2.f32 %v7700_v23  ;;  %v7692_v60 = vsub.f32 %v7625_v51, %v7669_v7 }
0x1051   : > { %v7702_v39 = vmul.f32 1.442695, %v7692_v60 }
0x1052   : > { %v7672_v41 = vpop.xlane.xlu1 %7671 }
0x1053   : > { %14607 = vpow2.f32 %v7702_v39  ;;  %v7693_v19 = vsub.f32 %v7630_v16, %v7672_v41  ;;  %v11834_v16 = vld [vmem:[%s22527_s6 + $0x308] sm:$0xff]  ;;  %v11859_v41 = vld [vmem:[%s22527_s6 + $0x3d0] sm:$0xff] }
0x1055   : > { %v7704_v53 = vmul.f32 1.442695, %v7693_v19  ;;  %v11852_v19 = vld [vmem:[%s22527_s6 + $0x398] sm:$0xff] }
0x1056   : > { %v7675_v27 = vpop.xlane.xlu0 %7674 }
0x1057   : > { %14609 = vpow2.f32 %v7704_v53  ;;  %v7694_v8 = vsub.f32 %v7635_v11, %v7675_v27  ;;  %v11851_v53 = vld [vmem:[%s22527_s6 + $0x390] sm:$0xff]  ;;  %v11844_v27 = vld [vmem:[%s22527_s6 + $0x358] sm:$0xff] }
0x1059   : > { %v7706_v26 = vmul.f32 1.442695, %v7694_v8  ;;  %v11843_v8 = vld [vmem:[%s22527_s6 + $0x350] sm:$0xff] }
0x105a   : > { %v7678_v63 = vpop.xlane.xlu1 %7677 }
0x105b   : > { %14611 = vpow2.f32 %v7706_v26  ;;  %v7695_v29 = vsub.f32 %v7640_v9, %v7678_v63  ;;  %v11825_v9 = vld [vmem:[%s22527_s6 + $0x2c0] sm:$0xff]  ;;  %v11836_v26 = vld [vmem:[%s22527_s6 + $0x318] sm:$0xff]  ;;  %v11835_v63 = vld [vmem:[%s22527_s6 + $0x310] sm:$0xff] }
0x105c   : > { %v20126_v22 = vpop.eup %14605 }
0x105d   : > { %v7708_v31 = vmul.f32 1.442695, %v7695_v29  ;;  %13923 = vmatmul.mubr.msk.f32.vlgmr.msra.gmra.mxu0 %vm2525_vm13, %v20126_v22  ;;  %v11828_v29 = vld [vmem:[%s22527_s6 + $0x2d8] sm:$0xff] }
0x105e   : > { %v7681_v18 = vpop.xlane.xlu0 %7680  ;;  %13925 = vmatprep.mubr.msk.f32.mxu0 %vm14967_vm6, %v23183_v15  ;;  %8476 = vmatpush1.msra.mxu0 %v11857_v52  ;;  %v11827_v52 = vld [vmem:[%s22527_s6 + $0x2d0] sm:$0xff] }
0x105f   : > { %14613 = vpow2.f32 %v7708_v31  ;;  %v7696_v51 = vsub.f32 %v7645_v2, %v7681_v18  ;;  %8477 = vmatprep.subr.mxu0 %v11850_v20  ;;  %v11820_v20 = vld [vmem:[%s22527_s6 + $0x298] sm:$0xff]  ;;  %v11819_v31 = vld [vmem:[%s22527_s6 + $0x290] sm:$0xff] }
0x1060   : > { %v20144_v10 = vpop.eup %14607  ;;  %8478 = vmatpush1.msra.mxu0 %v11849_v57  ;;  %v11812_v57 = vld [vmem:[%s22527_s6 + $0x258] sm:$0xff]  ;;  %v11811_v18 = vld [vmem:[%s22527_s6 + $0x250] sm:$0xff] }
0x1061   : > { %v7710_v6 = vmul.f32 1.442695, %v7696_v51  ;;  %13926 = vmatmul.mubr.msk.f32.gmra.mxu0 %vm2525_vm13, %v20144_v10  ;;  %8479 = vmatprep.subr.mxu0 %v11842_v33  ;;  %v11804_v33 = vld [vmem:[%s22527_s6 + $0x218] sm:$0xff]  ;;  %v11803_v51 = vld [vmem:[%s22527_s6 + $0x210] sm:$0xff] }
0x1062   : > { %v7684_v11 = vpop.xlane.xlu1 %7683  ;;  %13928 = vmatprep.mubr.msk.f32.mxu0 %vm14967_vm6, %v23183_v15  ;;  %8480 = vmatpush1.msra.mxu0 %v11841_v21  ;;  %v11862_v21 = vld [vmem:[%s22527_s6 + $0x3e8] sm:$0xff] }
0x1063   : > { %14615 = vpow2.f32 %v7710_v6  ;;  %v7697_v48 = vsub.f32 %v20108_v32, %v7684_v11  ;;  %8481 = vmatprep.subr.mxu0 %v11834_v16  ;;  %v11810_v32 = vld [vmem:[%s22527_s6 + $0x248] sm:$0xff]  ;;  %v11861_v16 = vld [vmem:[%s22527_s6 + $0x3e0] sm:$0xff] }
0x1064   : > { %v20163_v34 = vpop.eup %14609  ;;  %8482 = vmatpush1.msra.mxu0 %v11833_v50  ;;  %v11854_v6 = vld [vmem:[%s22527_s6 + $0x3a8] sm:$0xff]  ;;  %v11853_v50 = vld [vmem:[%s22527_s6 + $0x3a0] sm:$0xff] }
0x1065   : > { %v7712_v2 = vmul.f32 1.442695, %v7697_v48  ;;  %13929 = vmatmul.mubr.msk.f32.gmra.mxu0 %vm2525_vm13, %v20163_v34  ;;  %8483 = vmatprep.subr.mxu0 %v11826_v24  ;;  %v11846_v11 = vld [vmem:[%s22527_s6 + $0x368] sm:$0xff]  ;;  %v11845_v24 = vld [vmem:[%s22527_s6 + $0x360] sm:$0xff] }
0x1066   : > { %v7687_v49 = vpop.xlane.xlu0 %7686  ;;  %13931 = vmatprep.mubr.msk.f32.mxu0 %vm14967_vm6, %v23183_v15  ;;  %8484 = vmatpush1.msra.mxu0 %v11825_v9  ;;  %v11838_v48 = vld [vmem:[%s22527_s6 + $0x328] sm:$0xff]  ;;  %v11837_v9 = vld [vmem:[%s22527_s6 + $0x320] sm:$0xff] }
0x1067   : > { %14617 = vpow2.f32 %v7712_v2  ;;  %v7698_v45 = vsub.f32 %v20112_v56, %v7687_v49  ;;  %8485 = vmatprep.subr.mxu0 %v11818_v55  ;;  %v11801_v56 = vld [vmem:[%s22527_s6 + $0x200] sm:$0xff]  ;;  %v11830_v55 = vld [vmem:[%s22527_s6 + $0x2e8] sm:$0xff] }
0x1068   : > { %v20182_v37 = vpop.eup %14611  ;;  %8486 = vmatpush1.msra.mxu0 %v11817_v17  ;;  %v11829_v2 = vld [vmem:[%s22527_s6 + $0x2e0] sm:$0xff]  ;;  %v11822_v17 = vld [vmem:[%s22527_s6 + $0x2a8] sm:$0xff] }
0x1069   : > { %v7714_v5 = vmul.f32 1.442695, %v7698_v45  ;;  %13932 = vmatmul.mubr.msk.f32.gmra.mxu0 %vm2525_vm13, %v20182_v37  ;;  %8487 = vmatprep.subr.mxu0 %v11810_v32  ;;  %v11821_v49 = vld [vmem:[%s22527_s6 + $0x2a0] sm:$0xff]  ;;  %v11814_v32 = vld [vmem:[%s22527_s6 + $0x268] sm:$0xff] }
0x106a   : > { %v7690_v12 = vpop.xlane.xlu1 %7689  ;;  %13934 = vmatprep.mubr.msk.f32.mxu0 %vm14967_vm6, %v23183_v15  ;;  %8488 = vmatpush1.msra.mxu0 %v11809_v38  ;;  %v11813_v45 = vld [vmem:[%s22527_s6 + $0x260] sm:$0xff]  ;;  %v11806_v38 = vld [vmem:[%s22527_s6 + $0x228] sm:$0xff] }
0x106b   : > { %14619 = vpow2.f32 %v7714_v5  ;;  %v7699_v0 = vsub.f32 %v20116_v44, %v7690_v12  ;;  %8489 = vmatprep.subr.mxu0 %v11802_v25  ;;  %v11805_v25 = vld [vmem:[%s22527_s6 + $0x220] sm:$0xff]  ;;  %v11864_v5 = vld [vmem:[%s22527_s6 + $0x3f8] sm:$0xff] }
0x106c   : > { %v20198_v28 = vpop.eup %14613  ;;  %8490 = vmatpush1.msra.mxu0 %v11801_v56  ;;  %v11863_v56 = vld [vmem:[%s22527_s6 + $0x3f0] sm:$0xff]  ;;  %v11856_v12 = vld [vmem:[%s22527_s6 + $0x3b8] sm:$0xff] }
0x106d   : > { %v7716_v23 = vmul.f32 1.442695, %v7699_v0  ;;  %13935 = vmatmul.mubr.msk.f32.gmra.mxu0 %vm2525_vm13, %v20198_v28  ;;  %8588 = vmatprep.subr.mxu0 %v11860_v3  ;;  %v11855_v3 = vld [vmem:[%s22527_s6 + $0x3b0] sm:$0xff]  ;;  %v11848_v0 = vld [vmem:[%s22527_s6 + $0x378] sm:$0xff] }
0x106e   : > { %13937 = vmatprep.mubr.msk.f32.mxu0 %vm14967_vm6, %v23183_v15 }
0x106f   : > { %14621 = vpow2.f32 %v7716_v23  ;;  %v11847_v23 = vld [vmem:[%s22527_s6 + $0x370] sm:$0xff] }
0x1070   : > { %v20204_v7 = vpop.eup %14615 }
0x1071   : > { %13938 = vmatmul.mubr.msk.f32.gmra.mxu0 %vm2525_vm13, %v20204_v7 }
0x1072   : > { %13940 = vmatprep.mubr.msk.f32.mxu0 %vm14967_vm6, %v23183_v15 }
0x1074   : > { %v20210_v44 = vpop.eup %14617 }
0x1075   : > { %13941 = vmatmul.mubr.msk.f32.gmra.mxu0 %vm2525_vm13, %v20210_v44 }
0x1076   : > { %13943 = vmatprep.mubr.msk.f32.mxu0 %vm14967_vm6, %v23183_v15 }
0x1078   : > { %v20216_v60 = vpop.eup %14619 }
0x1079   : > { %13944 = vmatmul.mubr.msk.f32.gmra.mxu0 %vm2525_vm13, %v20216_v60 }
0x107a   : > { %13946 = vmatprep.mubr.msk.f32.mxu0 %vm14967_vm6, %v23183_v15 }
0x107c   : > { %v20222_v39 = vpop.eup %14621 }
0x107d   : > { %13947 = vmatmul.mubr.msk.f32.gmra.mxu0 %vm2525_vm13, %v20222_v39 }
0x107e   : > { %8523 = vmatprep.mubr.f32.mxu0 %v23183_v15 }
0x1081   : > { %11865 = vmatmul.mubr.msk.f32.vlgmr.msra.gmra.mxu0 %vm2525_vm13, %v20088_v4 }
0x1082   : > { %8529 = vmatprep.mubr.f32.mxu0 %v23183_v15  ;;  %8589 = vmatpush1.msra.mxu0 %v11859_v41  ;;  %v11840_v41 = vld [vmem:[%s22527_s6 + $0x338] sm:$0xff] }
0x1083   : > { %8590 = vmatprep.subr.mxu0 %v11852_v19  ;;  %v11839_v19 = vld [vmem:[%s22527_s6 + $0x330] sm:$0xff] }
0x1084   : > { %8591 = vmatpush1.msra.mxu0 %v11851_v53  ;;  %v11832_v53 = vld [vmem:[%s22527_s6 + $0x2f8] sm:$0xff] }
0x1085   : > { %11866 = vmatmul.mubr.msk.f32.gmra.mxu0 %vm2525_vm13, %v20086_v61  ;;  %8592 = vmatprep.subr.mxu0 %v11844_v27  ;;  %v11831_v27 = vld [vmem:[%s22527_s6 + $0x2f0] sm:$0xff] }
0x1086   : > { %8535 = vmatprep.mubr.f32.mxu0 %v23183_v15  ;;  %8593 = vmatpush1.msra.mxu0 %v11843_v8  ;;  %v11824_v8 = vld [vmem:[%s22527_s6 + $0x2b8] sm:$0xff] }
0x1087   : > { %8594 = vmatprep.subr.mxu0 %v11836_v26  ;;  %v11823_v26 = vld [vmem:[%s22527_s6 + $0x2b0] sm:$0xff] }
0x1088   : > { %8595 = vmatpush1.msra.mxu0 %v11835_v63  ;;  %v11816_v63 = vld [vmem:[%s22527_s6 + $0x278] sm:$0xff] }
0x1089   : > { %11867 = vmatmul.mubr.msk.f32.gmra.mxu0 %vm2525_vm13, %v20092_v46  ;;  %8596 = vmatprep.subr.mxu0 %v11828_v29  ;;  %v11815_v29 = vld [vmem:[%s22527_s6 + $0x270] sm:$0xff] }
0x108a   : > { %8541 = vmatprep.mubr.f32.mxu0 %v23183_v15  ;;  %8597 = vmatpush1.msra.mxu0 %v11827_v52  ;;  %v11808_v52 = vld [vmem:[%s22527_s6 + $0x238] sm:$0xff] }
0x108b   : > { %8598 = vmatprep.subr.mxu0 %v11820_v20  ;;  %v11807_v20 = vld [vmem:[%s22527_s6 + $0x230] sm:$0xff] }
0x108c   : > { %8599 = vmatpush1.msra.mxu0 %v11819_v31 }
0x108d   : > { %11868 = vmatmul.mubr.msk.f32.gmra.mxu0 %vm2525_vm13, %v20090_v43  ;;  %8600 = vmatprep.subr.mxu0 %v11812_v57 }
0x108e   : > { %8547 = vmatprep.mubr.f32.mxu0 %v23183_v15  ;;  %8601 = vmatpush1.msra.mxu0 %v11811_v18 }
0x108f   : > { %8602 = vmatprep.subr.mxu0 %v11804_v33 }
0x1090   : > { %8603 = vmatpush1.msra.mxu0 %v11803_v51 }
0x1091   : > { %11869 = vmatmul.mubr.msk.f32.gmra.mxu0 %vm2525_vm13, %v20096_v30  ;;  %8701 = vmatprep.subr.mxu0 %v11862_v21 }
0x1092   : > { %8553 = vmatprep.mubr.f32.mxu0 %v23183_v15 }
0x1095   : > { %11870 = vmatmul.mubr.msk.f32.gmra.mxu0 %vm2525_vm13, %v20094_v14 }
0x1096   : > { %8559 = vmatprep.mubr.f32.mxu0 %v23183_v15 }
0x1099   : > { %11871 = vmatmul.mubr.msk.f32.gmra.mxu0 %vm2525_vm13, %v20100_v40 }
0x109a   : > { %8565 = vmatprep.mubr.f32.mxu0 %v23183_v15 }
0x109d   : > { %11872 = vmatmul.mubr.msk.f32.gmra.mxu0 %vm2525_vm13, %v20098_v36 }
0x109e   : > { %8636 = vmatprep.mubr.f32.mxu0 %v23183_v15 }
0x10a1   : > { %11873 = vmatmul.mubr.msk.f32.vlgmr.msra.gmra.mxu0 %vm2525_vm13, %v20088_v4 }
0x10a2   : > { %8642 = vmatprep.mubr.f32.mxu0 %v23183_v15  ;;  %8702 = vmatpush1.msra.mxu0 %v11861_v16 }
0x10a3   : > { %8703 = vmatprep.subr.mxu0 %v11854_v6 }
0x10a4   : > { %8704 = vmatpush1.msra.mxu0 %v11853_v50 }
0x10a5   : > { %11874 = vmatmul.mubr.msk.f32.gmra.mxu0 %vm2525_vm13, %v20086_v61  ;;  %8705 = vmatprep.subr.mxu0 %v11846_v11 }
0x10a6   : > { %8648 = vmatprep.mubr.f32.mxu0 %v23183_v15  ;;  %8706 = vmatpush1.msra.mxu0 %v11845_v24 }
0x10a7   : > { %8707 = vmatprep.subr.mxu0 %v11838_v48 }
0x10a8   : > { %8708 = vmatpush1.msra.mxu0 %v11837_v9 }
0x10a9   : > { %11875 = vmatmul.mubr.msk.f32.gmra.mxu0 %vm2525_vm13, %v20092_v46  ;;  %8709 = vmatprep.subr.mxu0 %v11830_v55 }
0x10aa   : > { %8654 = vmatprep.mubr.f32.mxu0 %v23183_v15  ;;  %8710 = vmatpush1.msra.mxu0 %v11829_v2 }
0x10ab   : > { %8711 = vmatprep.subr.mxu0 %v11822_v17 }
0x10ac   : > { %8712 = vmatpush1.msra.mxu0 %v11821_v49 }
0x10ad   : > { %11876 = vmatmul.mubr.msk.f32.gmra.mxu0 %vm2525_vm13, %v20090_v43  ;;  %8713 = vmatprep.subr.mxu0 %v11814_v32 }
0x10ae   : > { %8660 = vmatprep.mubr.f32.mxu0 %v23183_v15  ;;  %8714 = vmatpush1.msra.mxu0 %v11813_v45 }
0x10af   : > { %8715 = vmatprep.subr.mxu0 %v11806_v38 }
0x10b0   : > { %8716 = vmatpush1.msra.mxu0 %v11805_v25 }
0x10b1   : > { %11877 = vmatmul.mubr.msk.f32.gmra.mxu0 %vm2525_vm13, %v20096_v30  ;;  %8814 = vmatprep.subr.mxu0 %v11864_v5 }
0x10b2   : > { %8666 = vmatprep.mubr.f32.mxu0 %v23183_v15 }
0x10b5   : > { %11878 = vmatmul.mubr.msk.f32.gmra.mxu0 %vm2525_vm13, %v20094_v14 }
0x10b6   : > { %8672 = vmatprep.mubr.f32.mxu0 %v23183_v15 }
0x10b9   : > { %11879 = vmatmul.mubr.msk.f32.gmra.mxu0 %vm2525_vm13, %v20100_v40 }
0x10ba   : > { %8678 = vmatprep.mubr.f32.mxu0 %v23183_v15 }
0x10bd   : > { %11880 = vmatmul.mubr.msk.f32.gmra.mxu0 %vm2525_vm13, %v20098_v36 }
0x10be   : > { %8749 = vmatprep.mubr.f32.mxu0 %v23183_v15 }
0x10c1   : > { %11881 = vmatmul.mubr.msk.f32.vlgmr.msra.gmra.mxu0 %vm2525_vm13, %v20088_v4 }
0x10c2   : > { %8755 = vmatprep.mubr.f32.mxu0 %v23183_v15  ;;  %8815 = vmatpush1.msra.mxu0 %v11863_v56 }
0x10c3   : > { %8816 = vmatprep.subr.mxu0 %v11856_v12 }
0x10c4   : > { %8817 = vmatpush1.msra.mxu0 %v11855_v3 }
0x10c5   : > { %11882 = vmatmul.mubr.msk.f32.gmra.mxu0 %vm2525_vm13, %v20086_v61  ;;  %8818 = vmatprep.subr.mxu0 %v11848_v0 }
0x10c6   : > { %8761 = vmatprep.mubr.f32.mxu0 %v23183_v15  ;;  %8819 = vmatpush1.msra.mxu0 %v11847_v23 }
0x10c7   : > { %8820 = vmatprep.subr.mxu0 %v11840_v41 }
0x10c8   : > { %8821 = vmatpush1.msra.mxu0 %v11839_v19 }
0x10c9   : > { %11883 = vmatmul.mubr.msk.f32.gmra.mxu0 %vm2525_vm13, %v20092_v46  ;;  %8822 = vmatprep.subr.mxu0 %v11832_v53 }
0x10ca   : > { %8767 = vmatprep.mubr.f32.mxu0 %v23183_v15  ;;  %8823 = vmatpush1.msra.mxu0 %v11831_v27 }
0x10cb   : > { %8824 = vmatprep.subr.mxu0 %v11824_v8 }
0x10cc   : > { %8825 = vmatpush1.msra.mxu0 %v11823_v26 }
0x10cd   : > { %11884 = vmatmul.mubr.msk.f32.gmra.mxu0 %vm2525_vm13, %v20090_v43  ;;  %8826 = vmatprep.subr.mxu0 %v11816_v63 }
0x10ce   : > { %8773 = vmatprep.mubr.f32.mxu0 %v23183_v15  ;;  %8827 = vmatpush1.msra.mxu0 %v11815_v29 }
0x10cf   : > { %8828 = vmatprep.subr.mxu0 %v11808_v52 }
0x10d0   : > { %8829 = vmatpush1.msra.mxu0 %v11807_v20 }
0x10d1   : > { %11885 = vmatmul.mubr.msk.f32.gmra.mxu0 %vm2525_vm13, %v20096_v30  ;;  %14118 = vmatprep.subr.mxu0 %v23183_v15 }
0x10d2   : > { %8779 = vmatprep.mubr.f32.mxu0 %v23183_v15 }
0x10d5   : > { %11886 = vmatmul.mubr.msk.f32.gmra.mxu0 %vm2525_vm13, %v20094_v14 }
0x10d6   : > { %8785 = vmatprep.mubr.f32.mxu0 %v23183_v15 }
0x10d9   : > { %11887 = vmatmul.mubr.msk.f32.gmra.mxu0 %vm2525_vm13, %v20100_v40 }
0x10da   : > { %8791 = vmatprep.mubr.f32.mxu0 %v23183_v15 }
0x10dd   : > { %11888 = vmatmul.mubr.msk.f32.gmra.mxu0 %vm2525_vm13, %v20098_v36 }
0x10de   : > { %8862 = vmatprep.mubr.f32.mxu0 %v23183_v15 }
0x10e1   : > { %11889 = vmatmul.mubr.msk.f32.vlgmr.msra.gmra.mxu0 %vm2525_vm13, %v20088_v4 }
0x10e2   : > { %8868 = vmatprep.mubr.f32.mxu0 %v23183_v15 }
0x10e5   : > { %11890 = vmatmul.mubr.msk.f32.gmra.mxu0 %vm2525_vm13, %v20086_v61 }
0x10e6   : > { %8874 = vmatprep.mubr.f32.mxu0 %v23183_v15 }
0x10e9   : > { %11891 = vmatmul.mubr.msk.f32.gmra.mxu0 %vm2525_vm13, %v20092_v46 }
0x10ea   : > { %8880 = vmatprep.mubr.f32.mxu0 %v23183_v15 }
0x10ed   : > { %11892 = vmatmul.mubr.msk.f32.gmra.mxu0 %vm2525_vm13, %v20090_v43 }
0x10ee   : > { %8886 = vmatprep.mubr.f32.mxu0 %v23183_v15 }
0x10f1   : > { %11893 = vmatmul.mubr.msk.f32.gmra.mxu0 %vm2525_vm13, %v20096_v30 }
0x10f2   : > { %8892 = vmatprep.mubr.f32.mxu0 %v23183_v15 }
0x10f5   : > { %11894 = vmatmul.mubr.msk.f32.gmra.mxu0 %vm2525_vm13, %v20094_v14 }
0x10f6   : > { %8898 = vmatprep.mubr.f32.mxu0 %v23183_v15 }
0x10f9   : > { %11895 = vmatmul.mubr.msk.f32.gmra.mxu0 %vm2525_vm13, %v20100_v40 }
0x10fa   : > { %8904 = vmatprep.mubr.f32.mxu0 %v23183_v15 }
0x10fd   : > { %11896 = vmatmul.mubr.msk.f32.gmra.mxu0 %vm2525_vm13, %v20098_v36 }
0x10fe   : > { %14134 = vmatprep.mubr.msk.f32.mxu0 %vm14967_vm6, %v23183_v15 }
0x111d   : > { %v7811_v61 = vpop.f32.mrf.mxu0 }
0x111e   : > { %v7812_v12 = vadd.f32 1e-20, %v7811_v61 }
0x111f   : > { %v13924_v4 = vpop.f32.mrf.mxu0 }
0x1121   : > { %v7816_v43 = vpop.f32.mrf.mxu0 }
0x1122   : > { %v7817_v5 = vadd.f32 1e-20, %v7816_v43 }
0x1123   : > { %v13927_v46 = vpop.f32.mrf.mxu0 }
0x1125   : > { %v7821_v30 = vpop.f32.mrf.mxu0 }
0x1126   : > { %v7822_v38 = vadd.f32 1e-20, %v7821_v30 }
0x1127   : > { %v13930_v31 = vpop.f32.mrf.mxu0 }
0x1129   : > { %v7826_v14 = vpop.f32.mrf.mxu0 }
0x112a   : > { %v7827_v32 = vadd.f32 1e-20, %v7826_v14 }
0x112b   : > { %v13933_v57 = vpop.f32.mrf.mxu0 }
0x112d   : > { %v7831_v18 = vpop.f32.mrf.mxu0 }
0x112e   : > { %v7832_v17 = vadd.f32 1e-20, %v7831_v18 }
0x112f   : > { %v13936_v33 = vpop.f32.mrf.mxu0 }
0x1131   : > { %v7836_v51 = vpop.f32.mrf.mxu0 }
0x1132   : > { %v7837_v55 = vadd.f32 1e-20, %v7836_v51  ;;  %v14764_v51 = vld [vmem:[%s22525_s4 + $0x318] sm:$0xff] }
0x1133   : > { %v13939_v40 = vpop.f32.mrf.mxu0 }
0x1134   : > { %v14765_v40 = vld [vmem:[%s22525_s4 + $0x320] sm:$0xff] }
0x1135   : > { %v7841_v21 = vpop.f32.mrf.mxu0 }
0x1136   : > { %v7842_v24 = vadd.f32 1e-20, %v7841_v21  ;;  %v14766_v21 = vld [vmem:[%s22525_s4 + $0x328] sm:$0xff] }
0x1137   : > { %v13942_v16 = vpop.f32.mrf.mxu0 }
0x1138   : > { %v14767_v16 = vld [vmem:[%s22525_s4 + $0x330] sm:$0xff] }
0x1139   : > { %v7846_v6 = vpop.f32.mrf.mxu0 }
0x113a   : > { %v7847_v50 = vadd.f32 1e-20, %v7846_v6  ;;  %v14768_v6 = vld [vmem:[%s22525_s4 + $0x338] sm:$0xff] }
0x113b   : > { %v13945_v36 = vpop.f32.mrf.mxu0 }
0x113c   : > { %14623 = vrcp.f32 %v7847_v50  ;;  %v14769_v50 = vld [vmem:[%s22525_s4 + $0x340] sm:$0xff]  ;;  %v14770_v36 = vld [vmem:[%s22525_s4 + $0x348] sm:$0xff] }
0x113d   : > { %v7851_v11 = vpop.f32.mrf.mxu0 }
0x113e   : > { %v7852_v48 = vadd.f32 1e-20, %v7851_v11  ;;  %v14771_v11 = vld [vmem:[%s22525_s4 + $0x350] sm:$0xff] }
0x113f   : > { %v13948_v9 = vpop.f32.mrf.mxu0 }
0x1140   : > { %14625 = vrcp.f32 %v7852_v48  ;;  %v14773_v48 = vld [vmem:[%s22525_s4 + $0x360] sm:$0xff]  ;;  %v14774_v9 = vld [vmem:[%s22525_s4 + $0x368] sm:$0xff] }
0x1141   : > { %v20466_v2 = vpop.f32.mrf.mxu0  ;;  %14627 = vrcp.f32 %v7842_v24  ;;  %v14772_v24 = vld [vmem:[%s22525_s4 + $0x358] sm:$0xff] }
0x1142   : > { %14629 = vrcp.f32 %v7837_v55  ;;  %v14775_v55 = vld [vmem:[%s22525_s4 + $0x370] sm:$0xff] }
0x1143   : > { %v20468_v49 = vpop.f32.mrf.mxu0  ;;  %14631 = vrcp.f32 %v7832_v17  ;;  %v14777_v17 = vld [vmem:[%s22525_s4 + $0x380] sm:$0xff] }
0x1144   : > { %14633 = vrcp.f32 %v7827_v32  ;;  %v14779_v32 = vld [vmem:[%s22525_s4 + $0x390] sm:$0xff] }
0x1145   : > { %v20470_v45 = vpop.f32.mrf.mxu0  ;;  %14635 = vrcp.f32 %v7822_v38  ;;  %v14781_v38 = vld [vmem:[%s22525_s4 + $0x3a0] sm:$0xff] }
0x1146   : > { %14637 = vrcp.f32 %v7817_v5  ;;  %v14783_v5 = vld [vmem:[%s22525_s4 + $0x3b0] sm:$0xff] }
0x1147   : > { %v20472_v25 = vpop.f32.mrf.mxu0  ;;  %14639 = vrcp.f32 %v7812_v12  ;;  %v14785_v12 = vld [vmem:[%s22525_s4 + $0x3c0] sm:$0xff] }
0x1149   : > { %v20474_v56 = vpop.f32.mrf.mxu0  ;;  %v14624_v0 = vpop.eup %14623 }
0x114a   : > { %v7871_v8 = vmul.f32 %v14624_v0, %v20216_v60  ;;  %v14787_v0 = vld [vmem:[%s22525_s4 + $0x3d0] sm:$0xff] }
0x114b   : > { %v20476_v3 = vpop.f32.mrf.mxu0 }
0x114d   : > { %v14626_v23 = vpop.eup %14625  ;;  %v20478_v41 = vpop.f32.mrf.mxu0 }
0x114e   : > { %v7872_v19 = vmul.f32 %v14626_v23, %v20222_v39  ;;  %v14628_v53 = vpop.eup %14627  ;;  %v14788_v23 = vld [vmem:[%s22525_s4 + $0x3d8] sm:$0xff] }
0x114f   : > { %v20481_v27 = vpop.f32.mrf.mxu0  ;;  %v14630_v26 = vpop.eup %14629  ;;  %v7870_v29 = vmul.f32 %v14628_v53, %v20210_v44  ;;  %v14791_v53 = vld [vmem:[%s22525_s4 + $0x3f0] sm:$0xff] }
0x1150   : > { %13949 = vmatprep.subr.mxu1 %v7872_v19  ;;  %v14632_v52 = vpop.eup %14631  ;;  %v7869_v61 = vmul.f32 %v14630_v26, %v20204_v7  ;;  %v14794_v26 = vld [vmem:[%s22525_s4 + $0x408] sm:$0xff] }
0x1151   : > { %13950 = vmatpush3.msra.mxu1 %v7872_v19  ;;  %v8549_v63 = vpop.f32.mrf.mxu0  ;;  %v14634_v4 = vpop.eup %14633  ;;  %v7868_v43 = vmul.f32 %v14632_v52, %v20198_v28  ;;  %v14790_v19 = vld [vmem:[%s22525_s4 + $0x3e8] sm:$0xff]  ;;  %v14797_v52 = vld [vmem:[%s22525_s4 + $0x420] sm:$0xff] }
0x1152   : > { %13951 = vmatprep.subr.mxu1 %v7871_v8  ;;  %v14636_v46 = vpop.eup %14635  ;;  %v7867_v30 = vmul.f32 %v14634_v4, %v20182_v37  ;;  %v14761_v37 = vld [vmem:[%s22525_s4 + $0x300] sm:$0xff]  ;;  %v14800_v4 = vld [vmem:[%s22525_s4 + $0x438] sm:$0xff] }
0x1153   : > { %13952 = vmatpush3.msra.mxu1 %v7871_v8  ;;  %v8551_v20 = vpop.f32.mrf.mxu0  ;;  %v14638_v31 = vpop.eup %14637  ;;  %v7866_v14 = vmul.f32 %v14636_v46, %v20163_v34  ;;  %v14793_v8 = vld [vmem:[%s22525_s4 + $0x400] sm:$0xff]  ;;  %v14803_v46 = vld [vmem:[%s22525_s4 + $0x450] sm:$0xff] }
0x1154   : > { %13953 = vmatprep.subr.mxu1 %v7870_v29  ;;  %v14640_v57 = vpop.eup %14639  ;;  %v7865_v18 = vmul.f32 %v14638_v31, %v20144_v10  ;;  %v14763_v10 = vld [vmem:[%s22525_s4 + $0x310] sm:$0xff]  ;;  %v14806_v31 = vld [vmem:[%s22525_s4 + $0x468] sm:$0xff] }
0x1155   : > { %13954 = vmatpush3.msra.mxu1 %v7870_v29  ;;  %v8555_v39 = vpop.f32.mrf.mxu0  ;;  %v7864_v33 = vmul.f32 %v14640_v57, %v20126_v22  ;;  %v14762_v22 = vld [vmem:[%s22525_s4 + $0x308] sm:$0xff]  ;;  %v14796_v29 = vld [vmem:[%s22525_s4 + $0x418] sm:$0xff]  ;;  %v14809_v57 = vld [vmem:[%s22525_s4 + $0x480] sm:$0xff] }
0x1156   : > { %13955 = vmatprep.subr.mxu1 %v7869_v61 }
0x1157   : > { %13956 = vmatpush3.msra.mxu1 %v7869_v61  ;;  %v8557_v60 = vpop.f32.mrf.mxu0  ;;  %v14799_v61 = vld [vmem:[%s22525_s4 + $0x430] sm:$0xff] }
0x1158   : > { %13957 = vmatprep.subr.mxu1 %v7868_v43 }
0x1159   : > { %13958 = vmatpush3.msra.mxu1 %v7868_v43  ;;  %v8561_v44 = vpop.f32.mrf.mxu0  ;;  %v14802_v43 = vld [vmem:[%s22525_s4 + $0x448] sm:$0xff] }
0x115a   : > { %13959 = vmatprep.subr.mxu1 %v7867_v30 }
0x115b   : > { %13960 = vmatpush3.msra.mxu1 %v7867_v30  ;;  %v8563_v7 = vpop.f32.mrf.mxu0  ;;  %v14805_v30 = vld [vmem:[%s22525_s4 + $0x460] sm:$0xff] }
0x115c   : > { %13961 = vmatprep.subr.mxu1 %v7866_v14 }
0x115d   : > { %13962 = vmatpush3.msra.mxu1 %v7866_v14  ;;  %v8567_v28 = vpop.f32.mrf.mxu0  ;;  %v14808_v14 = vld [vmem:[%s22525_s4 + $0x478] sm:$0xff] }
0x115e   : > { %13963 = vmatprep.subr.mxu1 %v7865_v18  ;;  %14119 = vmatpush3.msra.mxu0 %v8567_v28  ;;  %v14812_v28 = vld [vmem:[%s22525_s4 + $0x498] sm:$0xff] }
0x115f   : > { %13964 = vmatpush3.msra.mxu1 %v7865_v18  ;;  %14120 = vmatprep.subr.mxu0 %v23183_v15  ;;  %v8569_v34 = vpop.f32.mrf.mxu0  ;;  %v14811_v18 = vld [vmem:[%s22525_s4 + $0x490] sm:$0xff] }
0x1160   : > { %13965 = vmatprep.subr.mxu1 %v7864_v33  ;;  %14121 = vmatpush3.msra.mxu0 %v8561_v44  ;;  %v14807_v44 = vld [vmem:[%s22525_s4 + $0x470] sm:$0xff] }
0x1161   : > { %13966 = vmatpush3.msra.mxu1 %v7864_v33  ;;  %14122 = vmatprep.subr.mxu0 %v23183_v15  ;;  %v20724_v33 = vpop.f32.mrf.mxu0 }
0x1162   : > { %13968 = vmatmul.mubr.msk.f32.vlgmr.msra.gmra.mxu1 %vm2994_vm0, %v14761_v37  ;;  %14075 = vmatprep.subr.mxu1 %v23183_v15  ;;  %v14814_v37 = vld [vmem:[%s22525_s4 + $0x4a8] sm:$0xff] }
0x1163   : > { %14123 = vmatpush3.msra.mxu0 %v8555_v39  ;;  %14076 = vmatpush3.msra.mxu1 %v8569_v34  ;;  %v14801_v39 = vld [vmem:[%s22525_s4 + $0x440] sm:$0xff] }
0x1164   : > { %14124 = vmatprep.subr.mxu0 %v23183_v15  ;;  %14077 = vmatprep.subr.mxu1 %v23183_v15  ;;  %v14813_v34 = vld [vmem:[%s22525_s4 + $0x4a0] sm:$0xff] }
0x1165   : > { %14125 = vmatpush3.msra.mxu0 %v8549_v63  ;;  %13970 = vmatprep.mubr.msk.f32.mxu1 %vm2994_vm0, %v14762_v22  ;;  %v14795_v63 = vld [vmem:[%s22525_s4 + $0x410] sm:$0xff]  ;;  %v20734_v22 = vpop.f32.mrf.mxu0 }
0x1166   : > { %14078 = vmatpush3.msra.mxu1 %v8563_v7  ;;  %14126 = vmatprep.subr.mxu0 %v23183_v15  ;;  %v14810_v7 = vld [vmem:[%s22525_s4 + $0x488] sm:$0xff] }
0x1167   : > { %13971 = vmatmul.mubr.msk.f32.gmra.mxu1 %vm2994_vm0, %v14763_v10  ;;  %14079 = vmatprep.subr.mxu1 %v23183_v15  ;;  %v14815_v10 = vld [vmem:[%s22525_s4 + $0x4b0] sm:$0xff] }
0x1168   : > { %14127 = vmatpush3.msra.mxu0 %v20478_v41  ;;  %14080 = vmatpush3.msra.mxu1 %v8557_v60  ;;  %v14789_v41 = vld [vmem:[%s22525_s4 + $0x3e0] sm:$0xff]  ;;  %v14804_v60 = vld [vmem:[%s22525_s4 + $0x458] sm:$0xff] }
0x1169   : > { %14128 = vmatprep.subr.mxu0 %v23183_v15  ;;  %14081 = vmatprep.subr.mxu1 %v23183_v15 }
0x116a   : > { %14129 = vmatpush3.msra.mxu0 %v20474_v56  ;;  %13973 = vmatprep.mubr.msk.f32.mxu1 %vm2994_vm0, %v14764_v51  ;;  %v14784_v56 = vld [vmem:[%s22525_s4 + $0x3b8] sm:$0xff] }
0x116b   : > { %14082 = vmatpush3.msra.mxu1 %v8551_v20  ;;  %14130 = vmatprep.subr.mxu0 %v23183_v15  ;;  %v14798_v20 = vld [vmem:[%s22525_s4 + $0x428] sm:$0xff]  ;;  %v14816_v51 = vld [vmem:[%s22525_s4 + $0x4b8] sm:$0xff] }
0x116c   : > { %13974 = vmatmul.mubr.msk.f32.gmra.mxu1 %vm2994_vm0, %v14765_v40  ;;  %14083 = vmatprep.subr.mxu1 %v23183_v15  ;;  %v20744_v40 = vpop.f32.mrf.mxu0 }
0x116d   : > { %14131 = vmatpush3.msra.mxu0 %v20470_v45  ;;  %14084 = vmatpush3.msra.mxu1 %v20481_v27  ;;  %v14780_v45 = vld [vmem:[%s22525_s4 + $0x398] sm:$0xff] }
0x116e   : > { %14132 = vmatprep.subr.mxu0 %v23183_v15  ;;  %14085 = vmatprep.subr.mxu1 %v23183_v15  ;;  %v14792_v27 = vld [vmem:[%s22525_s4 + $0x3f8] sm:$0xff] }
0x116f   : > { %14133 = vmatpush3.msra.mxu0 %v20466_v2  ;;  %13976 = vmatprep.mubr.msk.f32.mxu1 %vm2994_vm0, %v14766_v21  ;;  %v14776_v2 = vld [vmem:[%s22525_s4 + $0x378] sm:$0xff]  ;;  %v14817_v21 = vld [vmem:[%s22525_s4 + $0x4c0] sm:$0xff] }
0x1170   : > { %14086 = vmatpush3.msra.mxu1 %v20476_v3  ;;  %14204 = vmatprep.subr.mxu0 %v23183_v15  ;;  %v14786_v3 = vld [vmem:[%s22525_s4 + $0x3c8] sm:$0xff] }
0x1171   : > { %13977 = vmatmul.mubr.msk.f32.gmra.mxu1 %vm2994_vm0, %v14767_v16  ;;  %14087 = vmatprep.subr.mxu1 %v23183_v15  ;;  %v14818_v16 = vld [vmem:[%s22525_s4 + $0x4c8] sm:$0xff] }
0x1172   : > { %14088 = vmatpush3.msra.mxu1 %v20472_v25  ;;  %13979 = vmatprep.mubr.msk.f32.mxu1 %vm2994_vm0, %v14768_v6  ;;  %v14782_v25 = vld [vmem:[%s22525_s4 + $0x3a8] sm:$0xff]  ;;  %v20754_v6 = vpop.f32.mrf.mxu0 }
0x1173   : > { %14089 = vmatprep.subr.mxu1 %v23183_v15 }
0x1174   : > { %14090 = vmatpush3.msra.mxu1 %v20468_v49  ;;  %v14778_v49 = vld [vmem:[%s22525_s4 + $0x388] sm:$0xff] }
0x1175   : > { %13980 = vmatmul.mubr.msk.f32.gmra.mxu1 %vm2994_vm0, %v14769_v50  ;;  %14161 = vmatprep.subr.mxu1 %v23183_v15  ;;  %v14819_v50 = vld [vmem:[%s22525_s4 + $0x4d0] sm:$0xff] }
0x1176   : > { %13982 = vmatprep.mubr.msk.f32.mxu1 %vm2994_vm0, %v14770_v36  ;;  %v14820_v36 = vld [vmem:[%s22525_s4 + $0x4d8] sm:$0xff] }
0x1179   : > { %13983 = vmatmul.mubr.msk.f32.gmra.mxu1 %vm2994_vm0, %v14771_v11  ;;  %v20764_v11 = vpop.f32.mrf.mxu0 }
0x117a   : > { %13985 = vmatprep.mubr.msk.f32.mxu1 %vm2994_vm0, %v14772_v24  ;;  %v14821_v24 = vld [vmem:[%s22525_s4 + $0x4e0] sm:$0xff] }
0x117d   : > { %13986 = vmatmul.mubr.msk.f32.gmra.mxu1 %vm2994_vm0, %v14773_v48  ;;  %v14822_v48 = vld [vmem:[%s22525_s4 + $0x4e8] sm:$0xff] }
0x117e   : > { %13988 = vmatprep.mubr.msk.f32.mxu1 %vm2994_vm0, %v14774_v9  ;;  %v20774_v9 = vpop.f32.mrf.mxu0 }
0x1181   : > { %13989 = vmatmul.mubr.msk.f32.gmra.mxu1 %vm2994_vm0, %v14775_v55  ;;  %v14823_v55 = vld [vmem:[%s22525_s4 + $0x4f0] sm:$0xff] }
0x1182   : > { %13991 = vmatprep.mubr.msk.f32.mxu1 %vm2994_vm0, %v14776_v2  ;;  %v14824_v2 = vld [vmem:[%s22525_s4 + $0x4f8] sm:$0xff] }
0x1185   : > { %13992 = vmatmul.mubr.msk.f32.gmra.mxu1 %vm2994_vm0, %v14777_v17  ;;  %v20784_v17 = vpop.f32.mrf.mxu0 }
0x1186   : > { %13994 = vmatprep.mubr.msk.f32.mxu1 %vm2994_vm0, %v14778_v49  ;;  %v14825_v49 = vld [vmem:[%s22525_s4 + $0x500] sm:$0xff] }
0x1189   : > { %13995 = vmatmul.mubr.msk.f32.gmra.mxu1 %vm2994_vm0, %v14779_v32  ;;  %v14826_v32 = vld [vmem:[%s22525_s4 + $0x508] sm:$0xff] }
0x118a   : > { %13997 = vmatprep.mubr.msk.f32.mxu1 %vm2994_vm0, %v14780_v45  ;;  %v8658_v45 = vpop.f32.mrf.mxu0 }
0x118d   : > { %13998 = vmatmul.mubr.msk.f32.gmra.mxu1 %vm2994_vm0, %v14781_v38  ;;  %v14827_v38 = vld [vmem:[%s22525_s4 + $0x510] sm:$0xff] }
0x118e   : > { %14000 = vmatprep.mubr.msk.f32.mxu1 %vm2994_vm0, %v14782_v25  ;;  %v14828_v25 = vld [vmem:[%s22525_s4 + $0x518] sm:$0xff] }
0x1191   : > { %14001 = vmatmul.mubr.msk.f32.gmra.mxu1 %vm2994_vm0, %v14783_v5  ;;  %v20802_v5 = vpop.f32.mrf.mxu0 }
0x1192   : > { %14003 = vmatprep.mubr.msk.f32.mxu1 %vm2994_vm0, %v14784_v56  ;;  %v14829_v56 = vld [vmem:[%s22525_s4 + $0x520] sm:$0xff] }
0x1195   : > { %14004 = vmatmul.mubr.msk.f32.gmra.mxu1 %vm2994_vm0, %v14785_v12  ;;  %v14830_v12 = vld [vmem:[%s22525_s4 + $0x528] sm:$0xff] }
0x1196   : > { %14006 = vmatprep.mubr.msk.f32.mxu1 %vm2994_vm0, %v14786_v3  ;;  %v8664_v3 = vpop.f32.mrf.mxu0 }
0x1199   : > { %14007 = vmatmul.mubr.msk.f32.gmra.mxu1 %vm2994_vm0, %v14787_v0  ;;  %v14831_v0 = vld [vmem:[%s22525_s4 + $0x530] sm:$0xff] }
0x119a   : > { %14009 = vmatprep.mubr.msk.f32.mxu1 %vm2994_vm0, %v14788_v23  ;;  %v20818_v23 = vpop.f32.mrf.mxu0 }
0x119d   : > { %14010 = vmatmul.mubr.msk.f32.gmra.mxu1 %vm2994_vm0, %v14789_v41  ;;  %v8670_v41 = vpop.f32.mrf.mxu0 }
0x119e   : > { %14012 = vmatprep.mubr.msk.f32.mxu1 %vm2994_vm0, %v14790_v19 }
0x119f   : > { %v20820_v19 = vpop.f32.mrf.mxu0 }
0x11a1   : > { %14013 = vmatmul.mubr.msk.f32.gmra.mxu1 %vm2994_vm0, %v14791_v53  ;;  %v8676_v53 = vpop.f32.mrf.mxu0 }
0x11a2   : > { %14015 = vmatprep.mubr.msk.f32.mxu1 %vm2994_vm0, %v14792_v27 }
0x11a3   : > { %v20822_v27 = vpop.f32.mrf.mxu0 }
0x11a5   : > { %14016 = vmatmul.mubr.msk.f32.gmra.mxu1 %vm2994_vm0, %v14793_v8  ;;  %v8682_v8 = vpop.f32.mrf.mxu0 }
0x11a6   : > { %14018 = vmatprep.mubr.msk.f32.mxu1 %vm2994_vm0, %v14794_v26 }
0x11a7   : > { %v20824_v26 = vpop.f32.mrf.mxu0 }
0x11a9   : > { %14019 = vmatmul.mubr.msk.f32.gmra.mxu1 %vm2994_vm0, %v14795_v63  ;;  %v20826_v63 = vpop.f32.mrf.mxu0 }
0x11aa   : > { %14021 = vmatprep.mubr.msk.f32.mxu1 %vm2994_vm0, %v14796_v29 }
0x11ab   : > { %v20828_v29 = vpop.f32.mrf.mxu0 }
0x11ad   : > { %14022 = vmatmul.mubr.msk.f32.gmra.mxu1 %vm2994_vm0, %v14797_v52  ;;  %v20830_v52 = vpop.f32.mrf.mxu0 }
0x11ae   : > { %14024 = vmatprep.mubr.msk.f32.mxu1 %vm2994_vm0, %v14798_v20 }
0x11af   : > { %v20832_v20 = vpop.f32.mrf.mxu0 }
0x11b1   : > { %14025 = vmatmul.mubr.msk.f32.gmra.mxu1 %vm2994_vm0, %v14799_v61  ;;  %v20834_v61 = vpop.f32.mrf.mxu0 }
0x11b2   : > { %14027 = vmatprep.mubr.msk.f32.mxu1 %vm2994_vm0, %v14800_v4 }
0x11b5   : > { %14028 = vmatmul.mubr.msk.f32.gmra.mxu1 %vm2994_vm0, %v14801_v39  ;;  %v20836_v39 = vpop.f32.mrf.mxu0 }
0x11b6   : > { %14030 = vmatprep.mubr.msk.f32.mxu1 %vm2994_vm0, %v14802_v43 }
0x11b9   : > { %14031 = vmatmul.mubr.msk.f32.gmra.mxu1 %vm2994_vm0, %v14803_v46  ;;  %v14832_v46 = vld [vmem:[%s22525_s4 + $0x538] sm:$0xff] }
0x11ba   : > { %14033 = vmatprep.mubr.msk.f32.mxu1 %vm2994_vm0, %v14804_v60 }
0x11bd   : > { %14034 = vmatmul.mubr.msk.f32.gmra.mxu1 %vm2994_vm0, %v14805_v30 }
0x11be   : > { %14036 = vmatprep.mubr.msk.f32.mxu1 %vm2994_vm0, %v14806_v31  ;;  %v20842_v31 = vpop.f32.mrf.mxu0 }
0x11c1   : > { %14037 = vmatmul.mubr.msk.f32.gmra.mxu1 %vm2994_vm0, %v14807_v44  ;;  %v14833_v44 = vld [vmem:[%s22525_s4 + $0x540] sm:$0xff] }
0x11c2   : > { %14039 = vmatprep.mubr.msk.f32.mxu1 %vm2994_vm0, %v14808_v14 }
0x11c5   : > { %14040 = vmatmul.mubr.msk.f32.gmra.mxu1 %vm2994_vm0, %v14809_v57 }
0x11c6   : > { %14042 = vmatprep.mubr.msk.f32.mxu1 %vm2994_vm0, %v14810_v7  ;;  %v20852_v7 = vpop.f32.mrf.mxu0 }
0x11c9   : > { %14043 = vmatmul.mubr.msk.f32.gmra.mxu1 %vm2994_vm0, %v14811_v18 }
0x11ca   : > { %14045 = vmatprep.mubr.msk.f32.mxu1 %vm2994_vm0, %v14812_v28  ;;  %v14834_v28 = vld [vmem:[%s22525_s4 + $0x548] sm:$0xff] }
0x11cd   : > { %14046 = vmatmul.mubr.msk.f32.gmra.mxu1 %vm2994_vm0, %v14813_v34 }
0x11ce   : > { %14048 = vmatprep.mubr.msk.f32.mxu1 %vm2994_vm0, %v14814_v37 }
0x11d1   : > { %14049 = vmatmul.mubr.msk.f32.gmra.mxu1 %vm2994_vm0, %v14815_v10  ;;  %v20862_v10 = vpop.f32.mrf.mxu0 }
0x11d2   : > { %14051 = vmatprep.mubr.msk.f32.mxu1 %vm2994_vm0, %v14816_v51  ;;  %v14835_v51 = vld [vmem:[%s22525_s4 + $0x550] sm:$0xff] }
0x11d5   : > { %14052 = vmatmul.mubr.msk.f32.gmra.mxu1 %vm2994_vm0, %v14817_v21 }
0x11d6   : > { %14054 = vmatprep.mubr.msk.f32.mxu1 %vm2994_vm0, %v14818_v16 }
0x11d9   : > { %14055 = vmatmul.mubr.msk.f32.gmra.mxu1 %vm2994_vm0, %v14819_v50 }
0x11da   : > { %14057 = vmatprep.mubr.msk.f32.mxu1 %vm2994_vm0, %v14820_v36  ;;  %v20873_v36 = vpop.f32.mrf.mxu0 }
0x11dd   : > { %14058 = vmatmul.mubr.msk.f32.gmra.mxu1 %vm2994_vm0, %v14821_v24  ;;  %v14836_v24 = vld [vmem:[%s22525_s4 + $0x558] sm:$0xff] }
0x11de   : > { %14060 = vmatprep.mubr.msk.f32.mxu1 %vm2994_vm0, %v14822_v48 }
0x11e1   : > { %14061 = vmatmul.mubr.msk.f32.gmra.mxu1 %vm2994_vm0, %v14823_v55 }
0x11e2   : > { %14063 = vmatprep.mubr.msk.f32.mxu1 %vm2994_vm0, %v14824_v2 }
0x11e5   : > { %14064 = vmatmul.mubr.msk.f32.gmra.mxu1 %vm2994_vm0, %v14825_v49 }
0x11e6   : > { %14066 = vmatprep.mubr.msk.f32.mxu1 %vm2994_vm0, %v14826_v32  ;;  %v14838_v32 = vld [vmem:[%s22525_s4 + $0x560] sm:$0xff] }
0x11e9   : > { %14067 = vmatmul.mubr.msk.f32.gmra.mxu1 %vm2994_vm0, %v14827_v38 }
0x11ea   : > { %14069 = vmatprep.mubr.msk.f32.mxu1 %vm2994_vm0, %v14828_v25 }
0x11ed   : > { %14070 = vmatmul.mubr.msk.f32.gmra.mxu1 %vm2994_vm0, %v14829_v56  ;;  %v14839_v56 = vld [vmem:[%s22525_s4 + $0x588] sm:$0xff] }
0x11ee   : > { %14072 = vmatprep.mubr.msk.f32.mxu1 %vm2994_vm0, %v14830_v12 }
0x11f1   : > { %14073 = vmatmul.mubr.msk.f32.gmra.mxu1 %vm2994_vm0, %v14831_v0  ;;  %v14840_v0 = vld [vmem:[%s22525_s4 + $0x568] sm:$0xff] }
0x11f2   : > { %14091 = vmatprep.mubr.msk.f32.mxu1 %vm14967_vm6, %v23183_v15 }
0x1222   : > { %v13969_v4 = vpop.f32.mrf.mxu1 }
0x1223   : > { %v8299_v14 = vmul.f32 %v14833_v44, %v13969_v4 }
0x1224   : > { %v7939_v43 = vpop.f32.mrf.mxu1 }
0x1225   : > { %v8298_v60 = vmul.f32 %v14832_v46, %v7939_v43  ;;  %v14843_v46 = vld [vmem:[%s22525_s4 + $0x598] sm:$0xff] }
0x1227   : > { %v13972_v30 = vpop.f32.mrf.mxu1  ;;  %14135 = vmatmul.mubr.msk.f32.vlgmr.msra.gmra.mxu0 %vm2525_vm13, %v8298_v60 }
0x1228   : > { %14205 = vmatpush3.msra.mxu0 %v8682_v8  ;;  %14137 = vmatprep.mubr.msk.f32.mxu0 %vm14967_vm6, %v23183_v15  ;;  %v8301_v21 = vmul.f32 %v14835_v51, %v13972_v30 }
0x1229   : > { %v7949_v57 = vpop.f32.mrf.mxu1  ;;  %14206 = vmatprep.subr.mxu0 %v23183_v15 }
0x122a   : > { %14207 = vmatpush3.msra.mxu0 %v8676_v53  ;;  %v8300_v34 = vmul.f32 %v14834_v28, %v7949_v57  ;;  %v14845_v57 = vld [vmem:[%s22525_s4 + $0x5a0] sm:$0xff] }
0x122b   : > { %14208 = vmatprep.subr.mxu0 %v23183_v15  ;;  %14138 = vmatmul.mubr.msk.f32.gmra.mxu0 %vm2525_vm13, %v8299_v14 }
0x122c   : > { %v13975_v18 = vpop.f32.mrf.mxu1  ;;  %14209 = vmatpush3.msra.mxu0 %v8670_v41  ;;  %14140 = vmatprep.mubr.msk.f32.mxu0 %vm14967_vm6, %v23183_v15 }
0x122d   : > { %14210 = vmatprep.subr.mxu0 %v23183_v15 }
0x122e   : > { %v7959_v37 = vpop.f32.mrf.mxu1  ;;  %14211 = vmatpush3.msra.mxu0 %v8664_v3 }
0x122f   : > { %14212 = vmatprep.subr.mxu0 %v23183_v15  ;;  %14141 = vmatmul.mubr.msk.f32.gmra.mxu0 %vm2525_vm13, %v8300_v34  ;;  %v8302_v48 = vmul.f32 %v14836_v24, %v7959_v37  ;;  %v14846_v37 = vld [vmem:[%s22525_s4 + $0x5a8] sm:$0xff]  ;;  %v14847_v24 = vld [vmem:[%s22525_s4 + $0x5b0] sm:$0xff] }
0x1230   : > { %14213 = vmatpush3.msra.mxu0 %v8658_v45  ;;  %14143 = vmatprep.mubr.msk.f32.mxu0 %vm14967_vm6, %v23183_v15  ;;  %v8303_v45 = vmul.f32 %v14838_v32, %v13975_v18 }
0x1231   : > { %v13978_v16 = vpop.f32.mrf.mxu1  ;;  %14214 = vmatprep.subr.mxu0 %v23183_v15 }
0x1232   : > { %14215 = vmatpush3.msra.mxu0 %v20774_v9  ;;  %v14837_v9 = vld [vmem:[%s22525_s4 + $0x580] sm:$0xff] }
0x1233   : > { %v7969_v50 = vpop.f32.mrf.mxu1  ;;  %14216 = vmatprep.subr.mxu0 %v23183_v15  ;;  %14144 = vmatmul.mubr.msk.f32.gmra.mxu0 %vm2525_vm13, %v8301_v21 }
0x1234   : > { %14217 = vmatpush3.msra.mxu0 %v20754_v6  ;;  %14146 = vmatprep.mubr.msk.f32.mxu0 %vm14967_vm6, %v23183_v15  ;;  %v20888_v6 = vpop.f32.mrf.mxu0  ;;  %v8304_v41 = vmul.f32 %v14840_v0, %v7969_v50  ;;  %v14850_v0 = vld [vmem:[%s22525_s4 + $0x610] sm:$0xff] }
0x1235   : > { %v13981_v55 = vpop.f32.mrf.mxu1  ;;  %14218 = vmatprep.subr.mxu0 %v23183_v15 }
0x1236   : > { %v8307_v2 = vmul.f32 %v14837_v9, %v13981_v55  ;;  %14219 = vmatpush3.msra.mxu0 %v20734_v22  ;;  %v20902_v25 = vpop.f32.mrf.mxu0 }
0x1237   : > { %v7979_v49 = vpop.f32.mrf.mxu1  ;;  %14147 = vmatmul.mubr.msk.f32.gmra.mxu0 %vm2525_vm13, %v8302_v48  ;;  %14290 = vmatprep.subr.mxu0 %v23183_v15 }
0x1238   : > { %14092 = vmatmul.mubr.msk.f32.vlgmr.msra.gmra.mxu1 %vm2525_vm13, %v8307_v2  ;;  %14149 = vmatprep.mubr.msk.f32.mxu0 %vm14967_vm6, %v23183_v15  ;;  %v20919_v53 = vpop.f32.mrf.mxu0 }
0x1239   : > { %14162 = vmatpush3.msra.mxu1 %v20822_v27  ;;  %v13984_v22 = vpop.f32.mrf.mxu1  ;;  %14094 = vmatprep.mubr.msk.f32.mxu1 %vm14967_vm6, %v23183_v15 }
0x123a   : > { %14163 = vmatprep.subr.mxu1 %v23183_v15 }
0x123b   : > { %14164 = vmatpush3.msra.mxu1 %v20820_v19  ;;  %v7989_v38 = vpop.f32.mrf.mxu1  ;;  %14150 = vmatmul.mubr.msk.f32.gmra.mxu0 %vm2525_vm13, %v8303_v45 }
0x123c   : > { %v8308_v12 = vmul.f32 %v14839_v56, %v7989_v38  ;;  %14165 = vmatprep.subr.mxu1 %v23183_v15  ;;  %14152 = vmatprep.mubr.msk.f32.mxu0 %vm14967_vm6, %v23183_v15  ;;  %v14849_v56 = vld [vmem:[%s22525_s4 + $0x5c0] sm:$0xff] }
0x123d   : > { %14166 = vmatpush3.msra.mxu1 %v20818_v23  ;;  %v13987_v3 = vpop.f32.mrf.mxu1  ;;  %v14841_v23 = vld [vmem:[%s22525_s4 + $0x590] sm:$0xff] }
0x123e   : > { %14167 = vmatprep.subr.mxu1 %v23183_v15  ;;  %14095 = vmatmul.mubr.msk.f32.gmra.mxu1 %vm2525_vm13, %v8308_v12  ;;  %v8309_v27 = vmul.f32 %v14841_v23, %v13984_v22  ;;  %v8311_v18 = vmul.f32 %v14845_v57, %v13987_v3 }
0x123f   : > { %14168 = vmatpush3.msra.mxu1 %v20802_v5  ;;  %v7999_v19 = vpop.f32.mrf.mxu1  ;;  %14097 = vmatprep.mubr.msk.f32.mxu1 %vm14967_vm6, %v23183_v15  ;;  %v14842_v5 = vld [vmem:[%s22525_s4 + $0x570] sm:$0xff] }
0x1240   : > { %14169 = vmatprep.subr.mxu1 %v23183_v15  ;;  %14153 = vmatmul.mubr.msk.f32.gmra.mxu0 %vm2525_vm13, %v8304_v41  ;;  %v8305_v4 = vmul.f32 %v14842_v5, %v13978_v16  ;;  %v8310_v60 = vmul.f32 %v14843_v46, %v7999_v19  ;;  %v14852_v46 = vld [vmem:[%s22525_s4 + $0x618] sm:$0xff] }
0x1241   : > { %14170 = vmatpush3.msra.mxu1 %v20784_v17  ;;  %v13990_v8 = vpop.f32.mrf.mxu1  ;;  %14155 = vmatprep.mubr.msk.f32.mxu0 %vm14967_vm6, %v23183_v15  ;;  %v20937_v17 = vpop.f32.mrf.mxu0 }
0x1242   : > { %14171 = vmatprep.subr.mxu1 %v23183_v15  ;;  %14098 = vmatmul.mubr.msk.f32.gmra.mxu1 %vm2525_vm13, %v8309_v27  ;;  %v8313_v48 = vmul.f32 %v14847_v24, %v13990_v8  ;;  %v14851_v27 = vld [vmem:[%s22525_s4 + $0x5c8] sm:$0xff]  ;;  %v14859_v24 = vld [vmem:[%s22525_s4 + $0x630] sm:$0xff] }
0x1243   : > { %14172 = vmatpush3.msra.mxu1 %v20764_v11  ;;  %v8009_v43 = vpop.f32.mrf.mxu1  ;;  %14100 = vmatprep.mubr.msk.f32.mxu1 %vm14967_vm6, %v23183_v15  ;;  %v14844_v11 = vld [vmem:[%s22525_s4 + $0x578] sm:$0xff] }
0x1244   : > { %14173 = vmatprep.subr.mxu1 %v23183_v15  ;;  %14156 = vmatmul.mubr.msk.f32.gmra.mxu0 %vm2525_vm13, %v8305_v4  ;;  %v8306_v44 = vmul.f32 %v14844_v11, %v7979_v49  ;;  %v8312_v51 = vmul.f32 %v14846_v37, %v8009_v43  ;;  %v14848_v49 = vld [vmem:[%s22525_s4 + $0x5b8] sm:$0xff] }
0x1245   : > { %14174 = vmatpush3.msra.mxu1 %v20744_v40  ;;  %v13993_v30 = vpop.f32.mrf.mxu1  ;;  %14158 = vmatprep.mubr.msk.f32.mxu0 %vm14967_vm6, %v23183_v15  ;;  %v8795_v40 = vpop.f32.mrf.mxu0 }
0x1246   : > { %14175 = vmatprep.subr.mxu1 %v23183_v15  ;;  %14101 = vmatmul.mubr.msk.f32.gmra.mxu1 %vm2525_vm13, %v8310_v60  ;;  %v8315_v12 = vmul.f32 %v14849_v56, %v13993_v30  ;;  %v14853_v30 = vld [vmem:[%s22525_s4 + $0x5d0] sm:$0xff] }
0x1247   : > { %14176 = vmatpush3.msra.mxu1 %v20724_v33  ;;  %v8019_v14 = vpop.f32.mrf.mxu1  ;;  %14103 = vmatprep.mubr.msk.f32.mxu1 %vm14967_vm6, %v23183_v15  ;;  %v20965_v34 = vpop.f32.mrf.mxu0 }
0x1248   : > { %14159 = vmatmul.mubr.msk.f32.gmra.mxu0 %vm2525_vm13, %v8306_v44  ;;  %14247 = vmatprep.subr.mxu1 %v23183_v15  ;;  %v8314_v32 = vmul.f32 %v14848_v49, %v8019_v14 }
0x1249   : > { %v13996_v28 = vpop.f32.mrf.mxu1  ;;  %14220 = vmatprep.mubr.msk.f32.mxu0 %vm14967_vm6, %v23183_v15  ;;  %v20975_v50 = vpop.f32.mrf.mxu0 }
0x124a   : > { %14104 = vmatmul.mubr.msk.f32.gmra.mxu1 %vm2525_vm13, %v8311_v18  ;;  %v8317_v11 = vmul.f32 %v14853_v30, %v13996_v28  ;;  %v14856_v28 = vld [vmem:[%s22525_s4 + $0x5e0] sm:$0xff]  ;;  %v14865_v30 = vld [vmem:[%s22525_s4 + $0x648] sm:$0xff] }
0x124b   : > { %v8029_v33 = vpop.f32.mrf.mxu1  ;;  %14106 = vmatprep.mubr.msk.f32.mxu1 %vm14967_vm6, %v23183_v15  ;;  %v20987_v2 = vpop.f32.mrf.mxu0 }
0x124c   : > { %v8316_v8 = vmul.f32 %v14851_v27, %v8029_v33  ;;  %v14863_v27 = vld [vmem:[%s22525_s4 + $0x640] sm:$0xff] }
0x124d   : > { %v20970_v21 = vpop.f32.mrf.mxu1  ;;  %v20999_v38 = vpop.f32.mrf.mxu0 }
0x124e   : > { %14107 = vmatmul.mubr.msk.f32.gmra.mxu1 %vm2525_vm13, %v8312_v51  ;;  %v8319_v33 = vmul.f32 %v14856_v28, %v20970_v21  ;;  %v14858_v51 = vld [vmem:[%s22525_s4 + $0x5e8] sm:$0xff]  ;;  %v14869_v28 = vld [vmem:[%s22525_s4 + $0x658] sm:$0xff] }
0x124f   : > { %v8039_v16 = vpop.f32.mrf.mxu1  ;;  %14109 = vmatprep.mubr.msk.f32.mxu1 %vm14967_vm6, %v23183_v15  ;;  %v21012_v23 = vpop.f32.mrf.mxu0 }
0x1251   : > { %v20980_v55 = vpop.f32.mrf.mxu1  ;;  %v21024_v43 = vpop.f32.mrf.mxu0 }
0x1252   : > { %14110 = vmatmul.mubr.msk.f32.gmra.mxu1 %vm2525_vm13, %v8313_v48 }
0x1253   : > { %v20983_v9 = vpop.f32.mrf.mxu1  ;;  %14112 = vmatprep.mubr.msk.f32.mxu1 %vm14967_vm6, %v23183_v15  ;;  %v21041_v44 = vpop.f32.mrf.mxu0 }
0x1254   : > { %v8320_v21 = vmul.f32 %v14858_v51, %v20983_v9 }
0x1255   : > { %v20992_v45 = vpop.f32.mrf.mxu1 }
0x1256   : > { %14113 = vmatmul.mubr.msk.f32.gmra.mxu1 %vm2525_vm13, %v8314_v32  ;;  %v14861_v32 = vld [vmem:[%s22525_s4 + $0x638] sm:$0xff] }
0x1257   : > { %v20995_v22 = vpop.f32.mrf.mxu1  ;;  %14115 = vmatprep.mubr.msk.f32.mxu1 %vm14967_vm6, %v23183_v15 }
0x1259   : > { %v14008_v3 = vpop.f32.mrf.mxu1 }
0x125a   : > { %v8325_v41 = vmul.f32 %v14850_v0, %v14008_v3  ;;  %14116 = vmatmul.mubr.msk.f32.gmra.mxu1 %vm2525_vm13, %v8315_v12 }
0x125b   : > { %v21008_v19 = vpop.f32.mrf.mxu1  ;;  %14177 = vmatprep.mubr.msk.f32.mxu1 %vm14967_vm6, %v23183_v15 }
0x125c   : > { %14221 = vmatmul.mubr.msk.f32.vlgmr.msra.gmra.mxu0 %vm2525_vm13, %v8325_v41 }
0x125d   : > { %14291 = vmatpush3.msra.mxu0 %v8795_v40  ;;  %v14011_v5 = vpop.f32.mrf.mxu1  ;;  %14223 = vmatprep.mubr.msk.f32.mxu0 %vm14967_vm6, %v23183_v15  ;;  %v14855_v40 = vld [vmem:[%s22525_s4 + $0x620] sm:$0xff] }
0x125e   : > { %14292 = vmatprep.subr.mxu0 %v23183_v15  ;;  %14178 = vmatmul.mubr.msk.f32.vlgmr.msra.gmra.mxu1 %vm2525_vm13, %v8316_v8  ;;  %v8327_v57 = vmul.f32 %v14855_v40, %v14011_v5 }
0x125f   : > { %14248 = vmatpush3.msra.mxu1 %v20937_v17  ;;  %14293 = vmatpush3.msra.mxu0 %v20919_v53  ;;  %v8079_v4 = vpop.f32.mrf.mxu1 }
0x1260   : > { %v8326_v60 = vmul.f32 %v14852_v46, %v8079_v4  ;;  %14249 = vmatprep.subr.mxu1 %v23183_v15  ;;  %14294 = vmatprep.subr.mxu0 %v23183_v15 }
0x1261   : > { %14250 = vmatpush3.msra.mxu1 %v20902_v25  ;;  %14295 = vmatpush3.msra.mxu0 %v20888_v6  ;;  %v14014_v53 = vpop.f32.mrf.mxu1  ;;  %v14854_v25 = vld [vmem:[%s22525_s4 + $0x5d8] sm:$0xff] }
0x1262   : > { %14180 = vmatprep.mubr.msk.f32.mxu1 %vm14967_vm6, %v23183_v15  ;;  %14251 = vmatprep.subr.mxu1 %v23183_v15  ;;  %v8318_v14 = vmul.f32 %v14854_v25, %v8039_v16  ;;  %v8329_v48 = vmul.f32 %v14859_v24, %v14014_v53 }
0x1263   : > { %14296 = vmatprep.subr.mxu0 %v23183_v15  ;;  %14181 = vmatmul.mubr.msk.f32.gmra.mxu1 %vm2525_vm13, %v8317_v11  ;;  %v8089_v17 = vpop.f32.mrf.mxu1 }
0x1264   : > { %14224 = vmatmul.mubr.msk.f32.gmra.mxu0 %vm2525_vm13, %v8326_v60  ;;  %14252 = vmatpush3.msra.mxu1 %v20873_v36 }
0x1265   : > { %14297 = vmatpush3.msra.mxu0 %v20862_v10  ;;  %14253 = vmatprep.subr.mxu1 %v23183_v15  ;;  %v21047_v6 = vpop.f32.mrf.mxu1  ;;  %v21057_v10 = vpop.f32.mrf.mxu0 }
0x1266   : > { %14298 = vmatprep.subr.mxu0 %v23183_v15  ;;  %14254 = vmatpush3.msra.mxu1 %v20852_v7  ;;  %v8331_v8 = vmul.f32 %v14863_v27, %v21047_v6 }
0x1267   : > { %14299 = vmatpush3.msra.mxu0 %v20842_v31  ;;  %14183 = vmatprep.mubr.msk.f32.mxu1 %vm14967_vm6, %v23183_v15  ;;  %v8099_v36 = vpop.f32.mrf.mxu1  ;;  %v21075_v18 = vpop.f32.mrf.mxu0 }
0x1268   : > { %14226 = vmatprep.mubr.msk.f32.mxu0 %vm14967_vm6, %v23183_v15  ;;  %14255 = vmatprep.subr.mxu1 %v23183_v15  ;;  %v8330_v56 = vmul.f32 %v14861_v32, %v8099_v36  ;;  %v14872_v32 = vld [vmem:[%s22525_s4 + $0x668] sm:$0xff] }
0x1269   : > { %14300 = vmatprep.subr.mxu0 %v23183_v15  ;;  %14184 = vmatmul.mubr.msk.f32.gmra.mxu1 %vm2525_vm13, %v8318_v14  ;;  %v21067_v31 = vpop.f32.mrf.mxu1  ;;  %v14867_v14 = vld [vmem:[%s22525_s4 + $0x650] sm:$0xff] }
0x126a   : > { %14227 = vmatmul.mubr.msk.f32.gmra.mxu0 %vm2525_vm13, %v8327_v57  ;;  %14256 = vmatpush3.msra.mxu1 %v20836_v39  ;;  %v14857_v39 = vld [vmem:[%s22525_s4 + $0x628] sm:$0xff]  ;;  %v8333_v36 = vmul.f32 %v14867_v14, %v21067_v31 }
0x126b   : > { %14301 = vmatpush3.msra.mxu0 %v20834_v61  ;;  %14257 = vmatprep.subr.mxu1 %v23183_v15  ;;  %v21073_v7 = vpop.f32.mrf.mxu1  ;;  %v8328_v37 = vmul.f32 %v14857_v39, %v8089_v17 }
0x126c   : > { %14302 = vmatprep.subr.mxu0 %v23183_v15  ;;  %14258 = vmatpush3.msra.mxu1 %v20832_v20  ;;  %v21098_v20 = vpop.f32.mrf.mxu0  ;;  %v8332_v11 = vmul.f32 %v14865_v30, %v21073_v7 }
0x126d   : > { %14303 = vmatpush3.msra.mxu0 %v20830_v52  ;;  %14186 = vmatprep.mubr.msk.f32.mxu1 %vm14967_vm6, %v23183_v15  ;;  %v21086_v61 = vpop.f32.mrf.mxu1 }
0x126e   : > { %14229 = vmatprep.mubr.msk.f32.mxu0 %vm14967_vm6, %v23183_v15  ;;  %14259 = vmatprep.subr.mxu1 %v23183_v15 }
0x126f   : > { %14304 = vmatprep.subr.mxu0 %v23183_v15  ;;  %14187 = vmatmul.mubr.msk.f32.gmra.mxu1 %vm2525_vm13, %v8319_v33  ;;  %v21096_v52 = vpop.f32.mrf.mxu1 }
0x1270   : > { %14230 = vmatmul.mubr.msk.f32.gmra.mxu0 %vm2525_vm13, %v8328_v37  ;;  %14260 = vmatpush3.msra.mxu1 %v20828_v29  ;;  %v21121_v29 = vpop.f32.mrf.mxu0  ;;  %v8334_v31 = vmul.f32 %v14869_v28, %v21096_v52  ;;  %v14870_v52 = vld [vmem:[%s22525_s4 + $0x660] sm:$0xff]  ;;  %v14887_v28 = vld [vmem:[%s22525_s4 + $0x730] sm:$0xff] }
0x1271   : > { %14305 = vmatpush3.msra.mxu0 %v20826_v63  ;;  %14261 = vmatprep.subr.mxu1 %v23183_v15  ;;  %v21108_v16 = vpop.f32.mrf.mxu1 }
0x1272   : > { %14262 = vmatpush3.msra.mxu1 %v20824_v26  ;;  %14189 = vmatprep.mubr.msk.f32.mxu1 %vm14967_vm6, %v23183_v15  ;;  %v14860_v26 = vld [vmem:[%s22525_s4 + $0x5f0] sm:$0xff]  ;;  %v8896_v3 = vpop.f32.mrf.mxu0 }
0x1273   : > { %14232 = vmatprep.mubr.msk.f32.mxu0 %vm14967_vm6, %v23183_v15  ;;  %14190 = vmatmul.mubr.msk.f32.gmra.mxu1 %vm2525_vm13, %v8320_v21  ;;  %v21119_v63 = vpop.f32.mrf.mxu1  ;;  %v8321_v9 = vmul.f32 %v14860_v26, %v20980_v55  ;;  %v14862_v55 = vld [vmem:[%s22525_s4 + $0x5f8] sm:$0xff]  ;;  %v8335_v21 = vmul.f32 %v14870_v52, %v21086_v61 }
0x1274   : > { %14233 = vmatmul.mubr.msk.f32.gmra.mxu0 %vm2525_vm13, %v8329_v48  ;;  %14192 = vmatprep.mubr.msk.f32.mxu1 %vm14967_vm6, %v23183_v15  ;;  %v8322_v0 = vmul.f32 %v14862_v55, %v20995_v22  ;;  %v8900_v4 = vpop.f32.mrf.mxu0  ;;  %v14864_v22 = vld [vmem:[%s22525_s4 + $0x600] sm:$0xff]  ;;  %v14871_v48 = vld [vmem:[%s22525_s4 + $0x6a8] sm:$0xff] }
0x1275   : > { %14235 = vmatprep.mubr.msk.f32.mxu0 %vm14967_vm6, %v23183_v15  ;;  %v21132_v49 = vpop.f32.mrf.mxu1  ;;  %14333 = vmatprep.subr.mxu1 %v23183_v15  ;;  %v8323_v46 = vmul.f32 %v14864_v22, %v20992_v45  ;;  %v14866_v45 = vld [vmem:[%s22525_s4 + $0x608] sm:$0xff] }
0x1276   : > { %14376 = vmatprep.subr.mxu0 %v23183_v15  ;;  %v8902_v17 = vpop.f32.mrf.mxu0  ;;  %v8324_v6 = vmul.f32 %v14866_v45, %v21008_v19  ;;  %v14868_v19 = vld [vmem:[%s22525_s4 + $0x6a0] sm:$0xff]  ;;  %v14879_v22 = vld [vmem:[%s22525_s4 + $0x6c8] sm:$0xff] }
0x1277   : > { %14193 = vmatmul.mubr.msk.f32.gmra.mxu1 %vm2525_vm13, %v8321_v9  ;;  %v21140_v12 = vpop.f32.mrf.mxu1 }
0x1278   : > { %14236 = vmatmul.mubr.msk.f32.gmra.mxu0 %vm2525_vm13, %v8330_v56  ;;  %14195 = vmatprep.mubr.msk.f32.mxu1 %vm14967_vm6, %v23183_v15  ;;  %v8906_v57 = vpop.f32.mrf.mxu0  ;;  %v8336_v56 = vmul.f32 %v14872_v32, %v21119_v63  ;;  %v14873_v63 = vld [vmem:[%s22525_s4 + $0x6b0] sm:$0xff]  ;;  %v14892_v32 = vld [vmem:[%s22525_s4 + $0x700] sm:$0xff] }
0x1279   : > { %14238 = vmatprep.mubr.msk.f32.mxu0 %vm14967_vm6, %v23183_v15  ;;  %v21151_v41 = vpop.f32.mrf.mxu1 }
0x127a   : > { %v8908_v37 = vpop.f32.mrf.mxu0 }
0x127b   : > { %14196 = vmatmul.mubr.msk.f32.gmra.mxu1 %vm2525_vm13, %v8322_v0  ;;  %v21158_v5 = vpop.f32.mrf.mxu1 }
0x127c   : > { %14239 = vmatmul.mubr.msk.f32.gmra.mxu0 %vm2525_vm13, %v8331_v8  ;;  %14198 = vmatprep.mubr.msk.f32.mxu1 %vm14967_vm6, %v23183_v15  ;;  %v14877_v8 = vld [vmem:[%s22525_s4 + $0x6c0] sm:$0xff] }
0x127d   : > { %14241 = vmatprep.mubr.msk.f32.mxu0 %vm14967_vm6, %v23183_v15  ;;  %v14035_v60 = vpop.f32.mrf.mxu1 }
0x127e   : > { %v8343_v7 = vmul.f32 %v14868_v19, %v14035_v60 }
0x127f   : > { %14199 = vmatmul.mubr.msk.f32.gmra.mxu1 %vm2525_vm13, %v8323_v46  ;;  %v21174_v53 = vpop.f32.mrf.mxu1 }
0x1280   : > { %14242 = vmatmul.mubr.msk.f32.gmra.mxu0 %vm2525_vm13, %v8332_v11  ;;  %14201 = vmatprep.mubr.msk.f32.mxu1 %vm14967_vm6, %v23183_v15  ;;  %v14881_v11 = vld [vmem:[%s22525_s4 + $0x6d0] sm:$0xff] }
0x1281   : > { %14244 = vmatprep.mubr.msk.f32.mxu0 %vm14967_vm6, %v23183_v15  ;;  %v14038_v25 = vpop.f32.mrf.mxu1 }
0x1283   : > { %14202 = vmatmul.mubr.msk.f32.gmra.mxu1 %vm2525_vm13, %v8324_v6  ;;  %v8169_v40 = vpop.f32.mrf.mxu1 }
0x1284   : > { %14245 = vmatmul.mubr.msk.f32.gmra.mxu0 %vm2525_vm13, %v8333_v36  ;;  %14263 = vmatprep.mubr.msk.f32.mxu1 %vm14967_vm6, %v23183_v15  ;;  %v8344_v26 = vmul.f32 %v14871_v48, %v8169_v40 }
0x1285   : > { %14306 = vmatprep.mubr.msk.f32.mxu0 %vm14967_vm6, %v23183_v15  ;;  %v21202_v33 = vpop.f32.mrf.mxu1 }
0x1287   : > { %14264 = vmatmul.mubr.msk.f32.vlgmr.msra.gmra.mxu1 %vm2525_vm13, %v8334_v31  ;;  %v8179_v39 = vpop.f32.mrf.mxu1 }
0x1288   : > { %14307 = vmatmul.mubr.msk.f32.vlgmr.msra.gmra.mxu0 %vm2525_vm13, %v8343_v7  ;;  %14334 = vmatpush3.msra.mxu1 %v8906_v57  ;;  %v14885_v57 = vld [vmem:[%s22525_s4 + $0x6e0] sm:$0xff] }
0x1289   : > { %14377 = vmatpush3.msra.mxu0 %v8908_v37  ;;  %14335 = vmatprep.subr.mxu1 %v23183_v15  ;;  %v21207_v51 = vpop.f32.mrf.mxu1 }
0x128a   : > { %14378 = vmatprep.subr.mxu0 %v23183_v15  ;;  %14336 = vmatpush3.msra.mxu1 %v8900_v4  ;;  %v8347_v4 = vmul.f32 %v14877_v8, %v21202_v33 }
0x128b   : > { %14379 = vmatpush3.msra.mxu0 %v8902_v17  ;;  %14266 = vmatprep.mubr.msk.f32.mxu1 %vm14967_vm6, %v23183_v15  ;;  %v21216_v24 = vpop.f32.mrf.mxu1  ;;  %v8349_v17 = vmul.f32 %v14881_v11, %v21207_v51  ;;  %v14889_v51 = vld [vmem:[%s22525_s4 + $0x738] sm:$0xff] }
0x128c   : > { %14337 = vmatprep.subr.mxu1 %v23183_v15  ;;  %14380 = vmatprep.subr.mxu0 %v23183_v15  ;;  %v8348_v46 = vmul.f32 %v14879_v22, %v21216_v24  ;;  %v14890_v24 = vld [vmem:[%s22525_s4 + $0x6f8] sm:$0xff] }
0x128d   : > { %14267 = vmatmul.mubr.msk.f32.gmra.mxu1 %vm2525_vm13, %v8335_v21  ;;  %14381 = vmatpush3.msra.mxu0 %v8896_v3  ;;  %v21224_v9 = vpop.f32.mrf.mxu1 }
0x128e   : > { %14338 = vmatpush3.msra.mxu1 %v21121_v29  ;;  %14309 = vmatprep.mubr.msk.f32.mxu0 %vm14967_vm6, %v23183_v15  ;;  %v8351_v19 = vmul.f32 %v14885_v57, %v21224_v9  ;;  %v14891_v9 = vld [vmem:[%s22525_s4 + $0x740] sm:$0xff] }
0x128f   : > { %14339 = vmatprep.subr.mxu1 %v23183_v15  ;;  %14382 = vmatprep.subr.mxu0 %v23183_v15  ;;  %v21231_v61 = vpop.f32.mrf.mxu1 }
0x1290   : > { %14310 = vmatmul.mubr.msk.f32.gmra.mxu0 %vm2525_vm13, %v8344_v26  ;;  %14340 = vmatpush3.msra.mxu1 %v21075_v18 }
0x1291   : > { %14383 = vmatpush3.msra.mxu0 %v21098_v20  ;;  %14269 = vmatprep.mubr.msk.f32.mxu1 %vm14967_vm6, %v23183_v15  ;;  %v21242_v29 = vpop.f32.mrf.mxu1  ;;  %v8345_v20 = vmul.f32 %v14873_v63, %v14038_v25  ;;  %v14883_v25 = vld [vmem:[%s22525_s4 + $0x6d8] sm:$0xff] }
0x1292   : > { %14341 = vmatprep.subr.mxu1 %v23183_v15  ;;  %14384 = vmatprep.subr.mxu0 %v23183_v15  ;;  %v8350_v14 = vmul.f32 %v14883_v25, %v21231_v61 }
0x1293   : > { %14270 = vmatmul.mubr.msk.f32.gmra.mxu1 %vm2525_vm13, %v8336_v56  ;;  %14385 = vmatpush3.msra.mxu0 %v21057_v10  ;;  %v21248_v18 = vpop.f32.mrf.mxu1  ;;  %v14874_v10 = vld [vmem:[%s22525_s4 + $0x670] sm:$0xff] }
0x1294   : > { %14342 = vmatpush3.msra.mxu1 %v21041_v44  ;;  %14312 = vmatprep.mubr.msk.f32.mxu0 %vm14967_vm6, %v23183_v15  ;;  %v8337_v55 = vmul.f32 %v14874_v10, %v21108_v16  ;;  %v14875_v16 = vld [vmem:[%s22525_s4 + $0x6b8] sm:$0xff] }
0x1295   : > { %14343 = vmatprep.subr.mxu1 %v23183_v15  ;;  %14386 = vmatprep.subr.mxu0 %v23183_v15  ;;  %v21258_v3 = vpop.f32.mrf.mxu1 }
0x1296   : > { %14313 = vmatmul.mubr.msk.f32.gmra.mxu0 %vm2525_vm13, %v8345_v20  ;;  %14344 = vmatpush3.msra.mxu1 %v21012_v23  ;;  %v8355_v56 = vmul.f32 %v14892_v32, %v21258_v3  ;;  %v14894_v20 = vld [vmem:[%s22525_s4 + $0x708] sm:$0xff] }
0x1297   : > { %14387 = vmatpush3.msra.mxu0 %v21024_v43  ;;  %14272 = vmatprep.mubr.msk.f32.mxu1 %vm14967_vm6, %v23183_v15  ;;  %v21269_v44 = vpop.f32.mrf.mxu1  ;;  %v8346_v43 = vmul.f32 %v14875_v16, %v8179_v39  ;;  %v14888_v39 = vld [vmem:[%s22525_s4 + $0x6f0] sm:$0xff] }
0x1298   : > { %14345 = vmatprep.subr.mxu1 %v23183_v15  ;;  %14388 = vmatprep.subr.mxu0 %v23183_v15  ;;  %v8353_v37 = vmul.f32 %v14888_v39, %v21242_v29  ;;  %v8354_v48 = vmul.f32 %v14890_v24, %v21269_v44  ;;  %v14893_v29 = vld [vmem:[%s22525_s4 + $0x748] sm:$0xff]  ;;  %v14896_v16 = vld [vmem:[%s22525_s4 + $0x710] sm:$0xff] }
0x1299   : > { %14273 = vmatmul.mubr.msk.f32.gmra.mxu1 %vm2525_vm13, %v8337_v55  ;;  %14389 = vmatpush3.msra.mxu0 %v20999_v38  ;;  %v21275_v23 = vpop.f32.mrf.mxu1  ;;  %v14876_v38 = vld [vmem:[%s22525_s4 + $0x678] sm:$0xff]  ;;  %v14895_v55 = vld [vmem:[%s22525_s4 + $0x750] sm:$0xff] }
0x129a   : > { %14346 = vmatpush3.msra.mxu1 %v20987_v2  ;;  %14315 = vmatprep.mubr.msk.f32.mxu0 %vm14967_vm6, %v23183_v15  ;;  %v8338_v27 = vmul.f32 %v14876_v38, %v21140_v12 }
0x129b   : > { %14347 = vmatprep.subr.mxu1 %v23183_v15  ;;  %14390 = vmatprep.subr.mxu0 %v23183_v15  ;;  %v21285_v0 = vpop.f32.mrf.mxu1 }
0x129c   : > { %14316 = vmatmul.mubr.msk.f32.gmra.mxu0 %vm2525_vm13, %v8346_v43  ;;  %14348 = vmatpush3.msra.mxu1 %v20965_v34  ;;  %v14878_v34 = vld [vmem:[%s22525_s4 + $0x680] sm:$0xff]  ;;  %v8356_v3 = vmul.f32 %v14894_v20, %v21285_v0  ;;  %v8357_v43 = vmul.f32 %v14896_v16, %v21275_v23  ;;  %v14897_v0 = vld [vmem:[%s22525_s4 + $0x758] sm:$0xff] }
0x129d   : > { %14391 = vmatpush3.msra.mxu0 %v20975_v50  ;;  %14275 = vmatprep.mubr.msk.f32.mxu1 %vm14967_vm6, %v23183_v15  ;;  %v21296_v2 = vpop.f32.mrf.mxu1  ;;  %v8339_v50 = vmul.f32 %v14878_v34, %v21132_v49  ;;  %v14880_v49 = vld [vmem:[%s22525_s4 + $0x688] sm:$0xff]  ;;  %v14898_v23 = vld [vmem:[%s22525_s4 + $0x718] sm:$0xff]  ;;  %v14899_v34 = vld [vmem:[%s22525_s4 + $0x760] sm:$0xff] }
0x129e   : > { %14276 = vmatmul.mubr.msk.f32.gmra.mxu1 %vm2525_vm13, %v8338_v27  ;;  %14318 = vmatprep.mubr.msk.f32.mxu0 %vm14967_vm6, %v23183_v15  ;;  %v8340_v60 = vmul.f32 %v14880_v49, %v21158_v5  ;;  %v14882_v5 = vld [vmem:[%s22525_s4 + $0x690] sm:$0xff] }
0x129f   : > { %14278 = vmatprep.mubr.msk.f32.mxu1 %vm14967_vm6, %v23183_v15  ;;  %v21314_v12 = vpop.f32.mrf.mxu1  ;;  %v8341_v45 = vmul.f32 %v14882_v5, %v21151_v41  ;;  %v14884_v41 = vld [vmem:[%s22525_s4 + $0x698] sm:$0xff] }
0x12a0   : > { %14319 = vmatmul.mubr.msk.f32.gmra.mxu0 %vm2525_vm13, %v8347_v4  ;;  %v8342_v36 = vmul.f32 %v14884_v41, %v21174_v53  ;;  %v14886_v53 = vld [vmem:[%s22525_s4 + $0x6e8] sm:$0xff]  ;;  %v8358_v8 = vmul.f32 %v14898_v23, %v21314_v12  ;;  %v14900_v12 = vld [vmem:[%s22525_s4 + $0x720] sm:$0xff] }
0x12a1   : > { %14321 = vmatprep.mubr.msk.f32.mxu0 %vm14967_vm6, %v23183_v15  ;;  %v14062_v30 = vpop.f32.mrf.mxu1  ;;  %v8352_v7 = vmul.f32 %v14886_v53, %v21248_v18  ;;  %v8359_v22 = vmul.f32 %v14900_v12, %v21296_v2 }
0x12a2   : > { %14279 = vmatmul.mubr.msk.f32.gmra.mxu1 %vm2525_vm13, %v8339_v50  ;;  %v8361_v31 = vmul.f32 %v14887_v28, %v14062_v30  ;;  %v14903_v30 = vld [vmem:[%s22525_s4 + $0x770] sm:$0xff] }
0x12a3   : > { %14281 = vmatprep.mubr.msk.f32.mxu1 %vm14967_vm6, %v23183_v15  ;;  %v21344_v6 = vpop.f32.mrf.mxu1 }
0x12a4   : > { %14322 = vmatmul.mubr.msk.f32.gmra.mxu0 %vm2525_vm13, %v8348_v46  ;;  %v14901_v46 = vld [vmem:[%s22525_s4 + $0x768] sm:$0xff] }
0x12a5   : > { %14324 = vmatprep.mubr.msk.f32.mxu0 %vm14967_vm6, %v23183_v15  ;;  %v14065_v40 = vpop.f32.mrf.mxu1 }
0x12a6   : > { %14282 = vmatmul.mubr.msk.f32.gmra.mxu1 %vm2525_vm13, %v8340_v60  ;;  %v8363_v61 = vmul.f32 %v14891_v9, %v14065_v40  ;;  %v14902_v60 = vld [vmem:[%s22525_s4 + $0x728] sm:$0xff] }
0x12a7   : > { %14284 = vmatprep.mubr.msk.f32.mxu1 %vm14967_vm6, %v23183_v15  ;;  %v8259_v33 = vpop.f32.mrf.mxu1  ;;  %v8360_v2 = vmul.f32 %v14902_v60, %v21344_v6 }
0x12a8   : > { %14325 = vmatmul.mubr.msk.f32.gmra.mxu0 %vm2525_vm13, %v8349_v17  ;;  %v8362_v52 = vmul.f32 %v14889_v51, %v8259_v33 }
0x12a9   : > { %14327 = vmatprep.mubr.msk.f32.mxu0 %vm14967_vm6, %v23183_v15  ;;  %v14068_v21 = vpop.f32.mrf.mxu1 }
0x12aa   : > { %14285 = vmatmul.mubr.msk.f32.gmra.mxu1 %vm2525_vm13, %v8341_v45  ;;  %v8365_v44 = vmul.f32 %v14895_v55, %v14068_v21 }
0x12ab   : > { %14287 = vmatprep.mubr.msk.f32.mxu1 %vm14967_vm6, %v23183_v15  ;;  %v8269_v26 = vpop.f32.mrf.mxu1 }
0x12ac   : > { %14328 = vmatmul.mubr.msk.f32.gmra.mxu0 %vm2525_vm13, %v8350_v14  ;;  %v8364_v18 = vmul.f32 %v14893_v29, %v8269_v26 }
0x12ad   : > { %14330 = vmatprep.mubr.msk.f32.mxu0 %vm14967_vm6, %v23183_v15  ;;  %v14071_v63 = vpop.f32.mrf.mxu1 }
0x12ae   : > { %14288 = vmatmul.mubr.msk.f32.gmra.mxu1 %vm2525_vm13, %v8342_v36  ;;  %v8367_v50 = vmul.f32 %v14899_v34, %v14071_v63 }
0x12af   : > { %14349 = vmatprep.mubr.msk.f32.mxu1 %vm14967_vm6, %v23183_v15  ;;  %v8279_v10 = vpop.f32.mrf.mxu1 }
0x12b0   : > { %14331 = vmatmul.mubr.msk.f32.gmra.mxu0 %vm2525_vm13, %v8351_v19  ;;  %v8366_v38 = vmul.f32 %v14897_v0, %v8279_v10 }
0x12b1   : > { %14392 = vmatprep.mubr.msk.f32.mxu0 %vm14967_vm6, %v23183_v15  ;;  %v14074_v27 = vpop.f32.mrf.mxu1 }
0x12b2   : > { %14350 = vmatmul.mubr.msk.f32.vlgmr.msra.gmra.mxu1 %vm2525_vm13, %v8352_v7  ;;  %v8369_v11 = vmul.f32 %v14903_v30, %v14074_v27 }
0x12b3   : > { %14352 = vmatprep.mubr.msk.f32.mxu1 %vm14967_vm6, %v23183_v15  ;;  %v8289_v4 = vpop.f32.mrf.mxu1 }
0x12b4   : > { %14393 = vmatmul.mubr.msk.f32.vlgmr.msra.gmra.mxu0 %vm2525_vm13, %v8361_v31  ;;  %v8368_v49 = vmul.f32 %v14901_v46, %v8289_v4 }
0x12b5   : > { %14395 = vmatprep.mubr.msk.f32.mxu0 %vm14967_vm6, %v23183_v15 }
0x12b6   : > { %14353 = vmatmul.mubr.msk.f32.gmra.mxu1 %vm2525_vm13, %v8353_v37 }
0x12b7   : > { %14355 = vmatprep.mubr.msk.f32.mxu1 %vm14967_vm6, %v23183_v15 }
0x12b8   : > { %14396 = vmatmul.mubr.msk.f32.gmra.mxu0 %vm2525_vm13, %v8362_v52 }
0x12b9   : > { %14398 = vmatprep.mubr.msk.f32.mxu0 %vm14967_vm6, %v23183_v15 }
0x12ba   : > { %14356 = vmatmul.mubr.msk.f32.gmra.mxu1 %vm2525_vm13, %v8354_v48 }
0x12bb   : > { %14358 = vmatprep.mubr.msk.f32.mxu1 %vm14967_vm6, %v23183_v15 }
0x12bc   : > { %14399 = vmatmul.mubr.msk.f32.gmra.mxu0 %vm2525_vm13, %v8363_v61 }
0x12bd   : > { %14401 = vmatprep.mubr.msk.f32.mxu0 %vm14967_vm6, %v23183_v15 }
0x12be   : > { %14359 = vmatmul.mubr.msk.f32.gmra.mxu1 %vm2525_vm13, %v8355_v56 }
0x12bf   : > { %14361 = vmatprep.mubr.msk.f32.mxu1 %vm14967_vm6, %v23183_v15 }
0x12c0   : > { %14402 = vmatmul.mubr.msk.f32.gmra.mxu0 %vm2525_vm13, %v8364_v18 }
0x12c1   : > { %14404 = vmatprep.mubr.msk.f32.mxu0 %vm14967_vm6, %v23183_v15 }
0x12c2   : > { %14362 = vmatmul.mubr.msk.f32.gmra.mxu1 %vm2525_vm13, %v8356_v3 }
0x12c3   : > { %14364 = vmatprep.mubr.msk.f32.mxu1 %vm14967_vm6, %v23183_v15 }
0x12c4   : > { %14405 = vmatmul.mubr.msk.f32.gmra.mxu0 %vm2525_vm13, %v8365_v44 }
0x12c5   : > { %14407 = vmatprep.mubr.msk.f32.mxu0 %vm14967_vm6, %v23183_v15 }
0x12c6   : > { %14365 = vmatmul.mubr.msk.f32.gmra.mxu1 %vm2525_vm13, %v8357_v43 }
0x12c7   : > { %14367 = vmatprep.mubr.msk.f32.mxu1 %vm14967_vm6, %v23183_v15 }
0x12c8   : > { %14408 = vmatmul.mubr.msk.f32.gmra.mxu0 %vm2525_vm13, %v8366_v38 }
0x12c9   : > { %14410 = vmatprep.mubr.msk.f32.mxu0 %vm14967_vm6, %v23183_v15 }
0x12ca   : > { %14368 = vmatmul.mubr.msk.f32.gmra.mxu1 %vm2525_vm13, %v8358_v8 }
0x12cb   : > { %14370 = vmatprep.mubr.msk.f32.mxu1 %vm14967_vm6, %v23183_v15 }
0x12cc   : > { %14411 = vmatmul.mubr.msk.f32.gmra.mxu0 %vm2525_vm13, %v8367_v50 }
0x12cd   : > { %14413 = vmatprep.mubr.msk.f32.mxu0 %vm14967_vm6, %v23183_v15 }
0x12ce   : > { %14371 = vmatmul.mubr.msk.f32.gmra.mxu1 %vm2525_vm13, %v8359_v22 }
0x12cf   : > { %14373 = vmatprep.mubr.msk.f32.mxu1 %vm14967_vm6, %v23183_v15 }
0x12d0   : > { %14414 = vmatmul.mubr.msk.f32.gmra.mxu0 %vm2525_vm13, %v8368_v49 }
0x12d1   : > { %14416 = vmatprep.mubr.msk.f32.mxu0 %vm14967_vm6, %v23183_v15 }
0x12d2   : > { %14374 = vmatmul.mubr.msk.f32.gmra.mxu1 %vm2525_vm13, %v8360_v2 }
0x12d3   : > { %10364 = vmatprep.mubr.f32.mxu1 %v23183_v15 }
0x12d4   : > { %14417 = vmatmul.mubr.msk.f32.gmra.mxu0 %vm2525_vm13, %v8369_v11 }
0x12d5   : > { %10483 = vmatprep.mubr.f32.mxu0 %v23183_v15 }
0x12e7   : > { %v9141_v17 = vpop.f32.mrf.mxu0 }
0x12e9   : > { %v14136_v5 = vpop.f32.mrf.mxu0 }
0x12eb   : > { %v9146_v45 = vpop.f32.mrf.mxu0 }
0x12ed   : > { %v14139_v6 = vpop.f32.mrf.mxu0 }
0x12ef   : > { %v9151_v25 = vpop.f32.mrf.mxu0 }
0x12f1   : > { %v14142_v14 = vpop.f32.mrf.mxu0 }
0x12f3   : > { %v9156_v41 = vpop.f32.mrf.mxu0 }
0x12f5   : > { %v14145_v36 = vpop.f32.mrf.mxu0 }
0x12f7   : > { %v9161_v40 = vpop.f32.mrf.mxu0 }
0x12f8   : > { %v9004_v57 = vpop.f32.mrf.mxu1 }
0x12f9   : > { %v9142_v19 = vadd.f32 %v9141_v17, %v9004_v57  ;;  %v14148_v53 = vpop.f32.mrf.mxu0 }
0x12fa   : > { %v14093_v7 = vpop.f32.mrf.mxu1 }
0x12fb   : > { %v9166_v28 = vpop.f32.mrf.mxu0 }
0x12fd   : > { %v14151_v31 = vpop.f32.mrf.mxu0 }
0x12fe   : > { %v9009_v33 = vpop.f32.mrf.mxu1 }
0x12ff   : > { %v9147_v39 = vadd.f32 %v9146_v45, %v9009_v33 }
0x1300   : > { %v14096_v37 = vpop.f32.mrf.mxu1  ;;  %v9171_v51 = vpop.f32.mrf.mxu0 }
0x1302   : > { %v9014_v52 = vpop.f32.mrf.mxu1  ;;  %v14154_v21 = vpop.f32.mrf.mxu0 }
0x1303   : > { %v9152_v24 = vadd.f32 %v9151_v25, %v9014_v52 }
0x1304   : > { %v14099_v48 = vpop.f32.mrf.mxu1  ;;  %v9176_v26 = vpop.f32.mrf.mxu0 }
0x1306   : > { %v9019_v9 = vpop.f32.mrf.mxu1  ;;  %v14157_v61 = vpop.f32.mrf.mxu0 }
0x1307   : > { %v9157_v32 = vadd.f32 %v9156_v41, %v9019_v9 }
0x1308   : > { %v14102_v56 = vpop.f32.mrf.mxu1  ;;  %v9181_v29 = vpop.f32.mrf.mxu0 }
0x130a   : > { %v9024_v18 = vpop.f32.mrf.mxu1  ;;  %v14160_v63 = vpop.f32.mrf.mxu0 }
0x130b   : > { %v9162_v20 = vadd.f32 %v9161_v40, %v9024_v18 }
0x130c   : > { %v14105_v3 = vpop.f32.mrf.mxu1 }
0x130e   : > { %v9029_v10 = vpop.f32.mrf.mxu1 }
0x130f   : > { %v9167_v55 = vadd.f32 %v9166_v28, %v9029_v10 }
0x1310   : > { %v14108_v44 = vpop.f32.mrf.mxu1 }
0x1312   : > { %v9034_v16 = vpop.f32.mrf.mxu1 }
0x1313   : > { %v9172_v43 = vadd.f32 %v9171_v51, %v9034_v16 }
0x1314   : > { %v14111_v0 = vpop.f32.mrf.mxu1 }
0x1316   : > { %v9039_v38 = vpop.f32.mrf.mxu1 }
0x1317   : > { %v9177_v27 = vadd.f32 %v9176_v26, %v9039_v38 }
0x1318   : > { %v14114_v23 = vpop.f32.mrf.mxu1 }
0x131a   : > { %v9044_v8 = vpop.f32.mrf.mxu1 }
0x131b   : > { %v9182_v4 = vadd.f32 %v9181_v29, %v9044_v8 }
0x131c   : > { %v14117_v34 = vpop.f32.mrf.mxu1  ;;  %v9424_v50 = vpop.f32.mrf.mxu0 }
0x131e   : > { %v9278_v12 = vpop.f32.mrf.mxu1  ;;  %v14222_v22 = vpop.f32.mrf.mxu0 }
0x131f   : > { %v9322_v46 = vadd.f32 %v9278_v12, %v9142_v19 }
0x1320   : > { %v14179_v49 = vpop.f32.mrf.mxu1 }
0x1321   : > { %v21485_v60 = vadd.f32 %v9424_v50, %v9322_v46 }
0x1323   : > { %v9283_v2 = vpop.f32.mrf.mxu1 }
0x1324   : > { %v9323_v30 = vadd.f32 %v9283_v2, %v9147_v39  ;;  %v9429_v11 = vpop.f32.mrf.mxu0 }
0x1325   : > { %v14182_v17 = vpop.f32.mrf.mxu1 }
0x1326   : > { %v21487_v5 = vadd.f32 %v9429_v11, %v9323_v30  ;;  %v14225_v45 = vpop.f32.mrf.mxu0 }
0x1329   : > { %v9288_v6 = vpop.f32.mrf.mxu1 }
0x132a   : > { %v9324_v25 = vadd.f32 %v9288_v6, %v9152_v24  ;;  %v9434_v14 = vpop.f32.mrf.mxu0 }
0x132b   : > { %v14185_v41 = vpop.f32.mrf.mxu1 }
0x132c   : > { %v21489_v36 = vadd.f32 %v9434_v14, %v9324_v25  ;;  %v14228_v40 = vpop.f32.mrf.mxu0 }
0x132f   : > { %v9293_v57 = vpop.f32.mrf.mxu1 }
0x1330   : > { %v9325_v53 = vadd.f32 %v9293_v57, %v9157_v32  ;;  %v9439_v19 = vpop.f32.mrf.mxu0 }
0x1331   : > { %v14188_v7 = vpop.f32.mrf.mxu1 }
0x1332   : > { %v21491_v28 = vadd.f32 %v9439_v19, %v9325_v53  ;;  %v14231_v31 = vpop.f32.mrf.mxu0 }
0x1333   : > { %v9298_v33 = vpop.f32.mrf.mxu1 }
0x1334   : > { %v9326_v39 = vadd.f32 %v9298_v33, %v9162_v20  ;;  %v9444_v37 = vpop.f32.mrf.mxu0 }
0x1335   : > { %v14191_v51 = vpop.f32.mrf.mxu1 }
0x1336   : > { %v21493_v52 = vadd.f32 %v9444_v37, %v9326_v39  ;;  %v14234_v21 = vpop.f32.mrf.mxu0 }
0x1337   : > { %v9303_v24 = vpop.f32.mrf.mxu1 }
0x1338   : > { %v9327_v48 = vadd.f32 %v9303_v24, %v9167_v55  ;;  %v9449_v26 = vpop.f32.mrf.mxu0 }
0x1339   : > { %v14194_v9 = vpop.f32.mrf.mxu1 }
0x133a   : > { %v21495_v61 = vadd.f32 %v9449_v26, %v9327_v48  ;;  %v14237_v56 = vpop.f32.mrf.mxu0 }
0x133b   : > { %v9308_v32 = vpop.f32.mrf.mxu1 }
0x133c   : > { %v9328_v29 = vadd.f32 %v9308_v32, %v9172_v43  ;;  %v9454_v18 = vpop.f32.mrf.mxu0 }
0x133d   : > { %v14197_v63 = vpop.f32.mrf.mxu1 }
0x133e   : > { %v21497_v3 = vadd.f32 %v9454_v18, %v9328_v29  ;;  %v14240_v10 = vpop.f32.mrf.mxu0 }
0x133f   : > { %v9313_v20 = vpop.f32.mrf.mxu1 }
0x1340   : > { %v9329_v44 = vadd.f32 %v9313_v20, %v9177_v27  ;;  %v9459_v16 = vpop.f32.mrf.mxu0 }
0x1341   : > { %v14200_v0 = vpop.f32.mrf.mxu1 }
0x1342   : > { %v21499_v38 = vadd.f32 %v9459_v16, %v9329_v44  ;;  %v14243_v23 = vpop.f32.mrf.mxu0 }
0x1343   : > { %v9318_v55 = vpop.f32.mrf.mxu1 }
0x1344   : > { %v9330_v8 = vadd.f32 %v9318_v55, %v9182_v4  ;;  %v9464_v34 = vpop.f32.mrf.mxu0 }
0x1345   : > { %v14203_v50 = vpop.f32.mrf.mxu1 }
0x1346   : > { %v21501_v12 = vadd.f32 %v9464_v34, %v9330_v8  ;;  %v14246_v22 = vpop.f32.mrf.mxu0  ;;  %v21522_v50 = vld [vmem:[%s22526_s5 + $0x3] ss:$0 sm:$0xff] }
0x1347   : > { %v9570_v43 = vpop.f32.mrf.mxu1 }
0x1348   : > { %v9716_v46 = vpop.f32.mrf.mxu0  ;;  %v9614_v29 = vadd.f32 %v9570_v43, %v21485_v60 }
0x1349   : > { %v14265_v49 = vpop.f32.mrf.mxu1 }
0x134a   : > { %v14308_v2 = vpop.f32.mrf.mxu0  ;;  %v9760_v44 = vadd.f32 %v9716_v46, %v9614_v29 }
0x134d   : > { %v9575_v30 = vpop.f32.mrf.mxu1 }
0x134e   : > { %v9615_v16 = vadd.f32 %v9575_v30, %v21487_v5 }
0x134f   : > { %v14268_v11 = vpop.f32.mrf.mxu1 }
0x1350   : > { %v9721_v17 = vpop.f32.mrf.mxu0 }
0x1351   : > { %v9761_v60 = vadd.f32 %v9721_v17, %v9615_v16 }
0x1352   : > { %v14311_v27 = vpop.f32.mrf.mxu0 }
0x1353   : > { %v9580_v45 = vpop.f32.mrf.mxu1 }
0x1354   : > { %v9616_v22 = vadd.f32 %v9580_v45, %v21489_v36 }
0x1355   : > { %v14271_v6 = vpop.f32.mrf.mxu1 }
0x1356   : > { %v9726_v25 = vpop.f32.mrf.mxu0 }
0x1357   : > { %v9762_v27 = vadd.f32 %v9726_v25, %v9616_v22 }
0x1358   : > { %v14314_v14 = vpop.f32.mrf.mxu0 }
0x1359   : > { %v9585_v41 = vpop.f32.mrf.mxu1 }
0x135a   : > { %v9617_v6 = vadd.f32 %v9585_v41, %v21491_v28 }
0x135b   : > { %v14274_v40 = vpop.f32.mrf.mxu1 }
0x135c   : > { %v9731_v4 = vpop.f32.mrf.mxu0 }
0x135e   : > { %v9590_v57 = vpop.f32.mrf.mxu1  ;;  %v14317_v53 = vpop.f32.mrf.mxu0 }
0x135f   : > { %v9618_v25 = vadd.f32 %v9590_v57, %v21493_v52 }
0x1360   : > { %v14277_v19 = vpop.f32.mrf.mxu1  ;;  %v9736_v7 = vpop.f32.mrf.mxu0 }
0x1362   : > { %v9595_v31 = vpop.f32.mrf.mxu1  ;;  %v14320_v33 = vpop.f32.mrf.mxu0 }
0x1364   : > { %v14280_v39 = vpop.f32.mrf.mxu1  ;;  %v21503_v37 = vpop.f32.mrf.mxu0 }
0x1366   : > { %v21505_v51 = vpop.f32.mrf.mxu1  ;;  %v14323_v21 = vpop.f32.mrf.mxu0 }
0x1367   : > { %v9763_v21 = vadd.f32 %v9731_v4, %v9617_v6  ;;  %v9619_v4 = vadd.f32 %v9595_v31, %v21495_v61  ;;  %v9620_v61 = vadd.f32 %v21505_v51, %v21497_v3 }
0x1368   : > { %v14283_v24 = vpop.f32.mrf.mxu1  ;;  %v21507_v48 = vpop.f32.mrf.mxu0 }
0x136a   : > { %v21509_v26 = vpop.f32.mrf.mxu1  ;;  %v14326_v9 = vpop.f32.mrf.mxu0 }
0x136b   : > { %v9621_v3 = vadd.f32 %v21509_v26, %v21499_v38 }
0x136c   : > { %v14286_v56 = vpop.f32.mrf.mxu1  ;;  %v21511_v32 = vpop.f32.mrf.mxu0 }
0x136e   : > { %v21514_v18 = vpop.f32.mrf.mxu1  ;;  %v14329_v63 = vpop.f32.mrf.mxu0 }
0x136f   : > { %v9622_v38 = vadd.f32 %v21514_v18, %v21501_v12 }
0x1370   : > { %v14289_v10 = vpop.f32.mrf.mxu1  ;;  %v21516_v20 = vpop.f32.mrf.mxu0 }
0x1372   : > { %v14332_v0 = vpop.f32.mrf.mxu0  ;;  %v9862_v23 = vpop.f32.mrf.mxu1 }
0x1373   : > { %v9906_v55 = vadd.f32 %v9862_v23, %v9760_v44  ;;  %v9764_v44 = vadd.f32 %v9736_v7, %v9618_v25 }
0x1374   : > { %v14351_v8 = vpop.f32.mrf.mxu1  ;;  %v10008_v34 = vpop.f32.mrf.mxu0 }
0x1375   : > { %v10052_v43 = vadd.f32 %v10008_v34, %v9906_v55 }
0x1376   : > { %v9867_v49 = vpop.f32.mrf.mxu1  ;;  %v14394_v2 = vpop.f32.mrf.mxu0 }
0x1377   : > { %v10062_v46 = vadd.f32 %v21522_v50, %v10052_v43  ;;  %v9907_v11 = vadd.f32 %v9867_v49, %v9761_v60  ;;  %v9765_v60 = vadd.f32 %v21503_v37, %v9619_v4  ;;  %v9766_v37 = vadd.f32 %v21507_v48, %v9620_v61 }
0x1378   : > { %v14354_v5 = vpop.f32.mrf.mxu1  ;;  %v10013_v30 = vpop.f32.mrf.mxu0  ;;  %v9767_v48 = vadd.f32 %v21511_v32, %v9621_v3 }
0x1379   : > { %v10053_v14 = vadd.f32 %v10013_v30, %v9907_v11  ;;  %v21528_v40 = vadd.f32 %v10062_v46, %v19808_v59 }
0x137a   : > { %v9872_v53 = vpop.f32.mrf.mxu1  ;;  %v14397_v19 = vpop.f32.mrf.mxu0 }
0x137b   : > { %v10063_v17 = vadd.f32 %v21522_v50, %v10053_v14  ;;  %v9908_v36 = vadd.f32 %v9872_v53, %v9762_v27  ;;  %v10080_v45 = vsel %vm2525_vm13, %v21528_v40, 0.0 }
0x137c   : > { %v14357_v33 = vpop.f32.mrf.mxu1  ;;  %10081 = vadd.xlane.f32.xlu0 %v10080_v45  ;;  %v10018_v39 = vpop.f32.mrf.mxu0 }
0x137d   : > { %v10054_v24 = vadd.f32 %v10018_v39, %v9908_v36  ;;  %v21535_v28 = vadd.f32 %v10063_v17, %v19803_v62 }
0x137e   : > { %v9877_v59 = vpop.f32.mrf.mxu1  ;;  %v14400_v41 = vpop.f32.mrf.mxu0 }
0x137f   : > { %v10064_v9 = vadd.f32 %v21522_v50, %v10054_v24  ;;  %v9909_v56 = vadd.f32 %v9877_v59, %v9763_v21  ;;  %v10083_v29 = vsel %vm2525_vm13, %v21535_v28, 0.0  ;;  %v9768_v24 = vadd.f32 %v21516_v20, %v9622_v38  ;;  %v11997_v38 = vld [vmem:[%s22528_s7 + $0x1e0] sm:$0xff] }
0x1380   : > { %v14360_v63 = vpop.f32.mrf.mxu1  ;;  %10084 = vadd.xlane.f32.xlu1 %v10083_v29  ;;  %v10023_v10 = vpop.f32.mrf.mxu0 }
0x1381   : > { %v10055_v16 = vadd.f32 %v10023_v10, %v9909_v56  ;;  %v21542_v52 = vadd.f32 %v10064_v9, %v19798_v42 }
0x1382   : > { %v9882_v62 = vpop.f32.mrf.mxu1  ;;  %v14403_v57 = vpop.f32.mrf.mxu0 }
0x1383   : > { %v10065_v0 = vadd.f32 %v21522_v50, %v10055_v16  ;;  %v9910_v23 = vadd.f32 %v9882_v62, %v9764_v44  ;;  %v10086_v55 = vsel %vm2525_vm13, %v21542_v52, 0.0 }
0x1384   : > { %v14363_v8 = vpop.f32.mrf.mxu1  ;;  %10087 = vadd.xlane.f32.xlu0 %v10086_v55  ;;  %v10028_v34 = vpop.f32.mrf.mxu0 }
0x1385   : > { %v10056_v7 = vadd.f32 %v10028_v34, %v9910_v23  ;;  %v21551_v42 = vadd.f32 %v10065_v0, %v19793_v58 }
0x1386   : > { %v9887_v31 = vpop.f32.mrf.mxu1  ;;  %v14406_v22 = vpop.f32.mrf.mxu0 }
0x1387   : > { %v10066_v43 = vadd.f32 %v21522_v50, %v10056_v7  ;;  %v9911_v49 = vadd.f32 %v9887_v31, %v9765_v60  ;;  %v10089_v2 = vsel %vm2525_vm13, %v21551_v42, 0.0 }
0x1388   : > { %v14366_v46 = vpop.f32.mrf.mxu1  ;;  %10090 = vadd.xlane.f32.xlu1 %v10089_v2  ;;  %v10033_v11 = vpop.f32.mrf.mxu0 }
0x1389   : > { %v10057_v51 = vadd.f32 %v10033_v11, %v9911_v49  ;;  %v21560_v58 = vadd.f32 %v10066_v43, %v19786_v54 }
0x138a   : > { %v9892_v5 = vpop.f32.mrf.mxu1  ;;  %v14409_v30 = vpop.f32.mrf.mxu0 }
0x138b   : > { %v10067_v27 = vadd.f32 %v21522_v50, %v10057_v51  ;;  %v9912_v6 = vadd.f32 %v9892_v5, %v9766_v37  ;;  %v10092_v14 = vsel %vm2525_vm13, %v21560_v58, 0.0 }
0x138c   : > { %v14369_v53 = vpop.f32.mrf.mxu1  ;;  %10093 = vadd.xlane.f32.xlu0 %v10092_v14  ;;  %v10038_v19 = vpop.f32.mrf.mxu0 }
0x138d   : > { %v10058_v26 = vadd.f32 %v10038_v19, %v9912_v6  ;;  %v10076_v54 = vadd.f32 %v10067_v27, %v19780_v1  ;;  %v11998_v53 = vld [vmem:[%s22528_s7 + $0x1e8] sm:$0xff]  ;;  %v12000_v19 = vld [vmem:[%s22528_s7 + $0x1f8] sm:$0xff] }
0x138e   : > { %v9897_v17 = vpop.f32.mrf.mxu1  ;;  %v14412_v36 = vpop.f32.mrf.mxu0  ;;  %10316 = vmatprep.subr.mxu1 %v11998_v53  ;;  %10435 = vmatprep.subr.mxu0 %v12000_v19 }
0x138f   : > { %v10068_v45 = vadd.f32 %v21522_v50, %v10058_v26  ;;  %v9913_v33 = vadd.f32 %v9897_v17, %v9767_v48  ;;  %v10095_v39 = vsel %vm2525_vm13, %v10076_v54, 0.0  ;;  %v11999_v26 = vld [vmem:[%s22528_s7 + $0x1f0] sm:$0xff]  ;;  %10317 = vmatpush1.msra.mxu1 %v11997_v38  ;;  %v11994_v36 = vld [vmem:[%s22528_s7 + $0x1c8] sm:$0xff] }
0x1390   : > { %v14372_v21 = vpop.f32.mrf.mxu1  ;;  %10096 = vadd.xlane.f32.xlu1 %v10095_v39  ;;  %v10043_v25 = vpop.f32.mrf.mxu0  ;;  %10436 = vmatpush1.msra.mxu0 %v11999_v26  ;;  %v11995_v39 = vld [vmem:[%s22528_s7 + $0x1d0] sm:$0xff]  ;;  %v21737_v26 = vld [vmem:[%s22526_s5 + $0x5] ss:$0 sm:$0xff] }
0x1391   : > { %v10059_v59 = vadd.f32 %v10043_v25, %v9913_v33  ;;  %v10077_v32 = vadd.f32 %v10068_v45, %v19774_v47  ;;  %v11996_v45 = vld [vmem:[%s22528_s7 + $0x1d8] sm:$0xff]  ;;  %10318 = vmatprep.subr.mxu1 %v11994_v36  ;;  %v11993_v33 = vld [vmem:[%s22528_s7 + $0x1c0] sm:$0xff] }
0x1392   : > { %v9902_v41 = vpop.f32.mrf.mxu1  ;;  %v14415_v12 = vpop.f32.mrf.mxu0  ;;  %10437 = vmatprep.subr.mxu0 %v11996_v45  ;;  %10319 = vmatpush1.msra.mxu1 %v11993_v33  ;;  %v21743_v36 = vld [vmem:[%s22526_s5 + $0x7] ss:$0 sm:$0xff] }
0x1393   : > { %v10069_v18 = vadd.f32 %v21522_v50, %v10059_v59  ;;  %v9914_v1 = vadd.f32 %v9902_v41, %v9768_v24  ;;  %v10098_v9 = vsel %vm2525_vm13, %v10077_v32, 0.0  ;;  %v11990_v24 = vld [vmem:[%s22528_s7 + $0x1a8] sm:$0xff]  ;;  %v11992_v59 = vld [vmem:[%s22528_s7 + $0x1b8] sm:$0xff]  ;;  %10438 = vmatpush1.msra.mxu0 %v11995_v39  ;;  %v11989_v41 = vld [vmem:[%s22528_s7 + $0x1a0] sm:$0xff] }
0x1394   : > { %v14375_v56 = vpop.f32.mrf.mxu1  ;;  %10099 = vadd.xlane.f32.xlu0 %v10098_v9  ;;  %v10048_v29 = vpop.f32.mrf.mxu0  ;;  %v11991_v12 = vld [vmem:[%s22528_s7 + $0x1b0] sm:$0xff]  ;;  %10320 = vmatprep.subr.mxu1 %v11990_v24  ;;  %v11986_v9 = vld [vmem:[%s22528_s7 + $0x188] sm:$0xff] }
0x1395   : > { %v10060_v63 = vadd.f32 %v10048_v29, %v9914_v1  ;;  %v21576_v10 = vadd.f32 %v10069_v18, %v19769_v13  ;;  %10439 = vmatprep.subr.mxu0 %v11992_v59  ;;  %v11988_v56 = vld [vmem:[%s22528_s7 + $0x198] sm:$0xff]  ;;  %10321 = vmatpush1.msra.mxu1 %v11989_v41  ;;  %v11985_v29 = vld [vmem:[%s22528_s7 + $0x180] sm:$0xff] }
0x1396   : > { %v14418_v44 = vpop.f32.mrf.mxu0  ;;  %10440 = vmatpush1.msra.mxu0 %v11991_v12  ;;  %10322 = vmatprep.subr.mxu1 %v11986_v9 }
0x1397   : > { %v10070_v20 = vadd.f32 %v21522_v50, %v10060_v63  ;;  %v10101_v47 = vsel %vm2525_vm13, %v21576_v10, 0.0  ;;  %v11987_v63 = vld [vmem:[%s22528_s7 + $0x190] sm:$0xff]  ;;  %10441 = vmatprep.subr.mxu0 %v11988_v56  ;;  %10323 = vmatpush1.msra.mxu1 %v11985_v29 }
0x1398   : > { %10102 = vadd.xlane.f32.xlu1 %v10101_v47  ;;  %v11984_v47 = vld [vmem:[%s22528_s7 + $0x178] sm:$0xff]  ;;  %10442 = vmatpush1.msra.mxu0 %v11987_v63 }
0x1399   : > { %v21582_v4 = vadd.f32 %v10070_v20, %v19851_v35  ;;  %v11982_v20 = vld [vmem:[%s22528_s7 + $0x168] sm:$0xff]  ;;  %10443 = vmatprep.subr.mxu0 %v11984_v47 }
0x139a   : > { %10324 = vmatprep.subr.mxu1 %v11982_v20 }
0x139b   : > { %23184 = vst [vmem:[#allocation43_spill] sm:$0xff] %v21582_v4  ;;  %v10104_v16 = vsel %vm2525_vm13, %v21582_v4, 0.0 }
0x139c   : > { %10105 = vadd.xlane.f32.xlu0 %v10104_v16  ;;  %v11981_v16 = vld [vmem:[%s22528_s7 + $0x160] sm:$0xff] }
0x139d   : > { %10325 = vmatpush1.msra.mxu1 %v11981_v16 }
0x1405   : > { %v10082_v62 = vpop.xlane.xlu0 %10081 }
0x1406   : > { %v10107_v57 = vmul.f32 0.015625, %v10082_v62  ;;  %v11983_v62 = vld [vmem:[%s22528_s7 + $0x170] sm:$0xff] }
0x1407   : > { %10444 = vmatpush1.msra.mxu0 %v11983_v62 }
0x1408   : > { %v21587_v0 = vsub.f32 %v21528_v40, %v10107_v57 }
0x1409   : > { %v10085_v13 = vpop.xlane.xlu1 %10084 }
0x140a   : > { %v10108_v23 = vmul.f32 0.015625, %v10085_v13  ;;  %v10125_v50 = vmul.f32 %v21587_v0, %v21587_v0  ;;  %v11978_v13 = vld [vmem:[%s22528_s7 + $0x148] sm:$0xff] }
0x140b   : > { %10326 = vmatprep.subr.mxu1 %v11978_v13 }
0x140c   : > { %v21592_v55 = vsub.f32 %v21535_v28, %v10108_v23  ;;  %v10134_v35 = vsel %vm2525_vm13, %v10125_v50, 0.0  ;;  %v11980_v23 = vld [vmem:[%s22528_s7 + $0x158] sm:$0xff]  ;;  %v11977_v50 = vld [vmem:[%s22528_s7 + $0x140] sm:$0xff] }
0x140d   : > { %v10088_v8 = vpop.xlane.xlu0 %10087  ;;  %10135 = vadd.xlane.f32.xlu1 %v10134_v35  ;;  %v11979_v35 = vld [vmem:[%s22528_s7 + $0x150] sm:$0xff]  ;;  %10445 = vmatprep.subr.mxu0 %v11980_v23 }
0x140e   : > { %v10109_v34 = vmul.f32 0.015625, %v10088_v8  ;;  %v10126_v60 = vmul.f32 %v21592_v55, %v21592_v55  ;;  %10327 = vmatpush1.msra.mxu1 %v11977_v50  ;;  %10446 = vmatpush1.msra.mxu0 %v11979_v35 }
0x1410   : > { %v21598_v61 = vsub.f32 %v21542_v52, %v10109_v34  ;;  %v10137_v40 = vsel %vm2525_vm13, %v10126_v60, 0.0  ;;  %v11974_v34 = vld [vmem:[%s22528_s7 + $0x128] sm:$0xff]  ;;  %v11976_v60 = vld [vmem:[%s22528_s7 + $0x138] sm:$0xff] }
0x1411   : > { %v10091_v7 = vpop.xlane.xlu1 %10090  ;;  %10138 = vadd.xlane.f32.xlu0 %v10137_v40  ;;  %v11973_v40 = vld [vmem:[%s22528_s7 + $0x120] sm:$0xff]  ;;  %10328 = vmatprep.subr.mxu1 %v11974_v34 }
0x1412   : > { %v10110_v31 = vmul.f32 0.015625, %v10091_v7  ;;  %v10127_v28 = vmul.f32 %v21598_v61, %v21598_v61  ;;  %v11975_v7 = vld [vmem:[%s22528_s7 + $0x130] sm:$0xff]  ;;  %10447 = vmatprep.subr.mxu0 %v11976_v60  ;;  %10329 = vmatpush1.msra.mxu1 %v11973_v40 }
0x1413   : > { %10448 = vmatpush1.msra.mxu0 %v11975_v7 }
0x1414   : > { %v21604_v22 = vsub.f32 %v21551_v42, %v10110_v31  ;;  %v10140_v43 = vsel %vm2525_vm13, %v10127_v28, 0.0  ;;  %v11970_v31 = vld [vmem:[%s22528_s7 + $0x108] sm:$0xff]  ;;  %v11972_v28 = vld [vmem:[%s22528_s7 + $0x118] sm:$0xff] }
0x1415   : > { %v10094_v49 = vpop.xlane.xlu0 %10093  ;;  %10141 = vadd.xlane.f32.xlu1 %v10140_v43  ;;  %v11969_v43 = vld [vmem:[%s22528_s7 + $0x100] sm:$0xff]  ;;  %10330 = vmatprep.subr.mxu1 %v11970_v31 }
0x1416   : > { %v10111_v2 = vmul.f32 0.015625, %v10094_v49  ;;  %v10128_v52 = vmul.f32 %v21604_v22, %v21604_v22  ;;  %v11971_v49 = vld [vmem:[%s22528_s7 + $0x110] sm:$0xff]  ;;  %10449 = vmatprep.subr.mxu0 %v11972_v28  ;;  %10331 = vmatpush1.msra.mxu1 %v11969_v43 }
0x1417   : > { %10450 = vmatpush1.msra.mxu0 %v11971_v49 }
0x1418   : > { %v21610_v46 = vsub.f32 %v21560_v58, %v10111_v2  ;;  %v10143_v11 = vsel %vm2525_vm13, %v10128_v52, 0.0 }
0x1419   : > { %v10097_v37 = vpop.xlane.xlu1 %10096  ;;  %10144 = vadd.xlane.f32.xlu0 %v10143_v11 }
0x141a   : > { %v10112_v3 = vmul.f32 0.015625, %v10097_v37  ;;  %v10129_v42 = vmul.f32 %v21610_v46, %v21610_v46 }
0x141c   : > { %v21615_v51 = vsub.f32 %v10076_v54, %v10112_v3  ;;  %v10146_v5 = vsel %vm2525_vm13, %v10129_v42, 0.0 }
0x141d   : > { %v10100_v30 = vpop.xlane.xlu0 %10099  ;;  %10147 = vadd.xlane.f32.xlu1 %v10146_v5 }
0x141e   : > { %v10113_v27 = vmul.f32 0.015625, %v10100_v30  ;;  %v10130_v6 = vmul.f32 %v21615_v51, %v21615_v51 }
0x1420   : > { %v21620_v58 = vsub.f32 %v10077_v32, %v10113_v27  ;;  %v10149_v14 = vsel %vm2525_vm13, %v10130_v6, 0.0 }
0x1421   : > { %v10103_v48 = vpop.xlane.xlu1 %10102  ;;  %10150 = vadd.xlane.f32.xlu0 %v10149_v14 }
0x1422   : > { %v10114_v54 = vmul.f32 0.015625, %v10103_v48  ;;  %v10131_v17 = vmul.f32 %v21620_v58, %v21620_v58 }
0x1424   : > { %v21650_v21 = vsub.f32 %v21576_v10, %v10114_v54  ;;  %v10152_v25 = vsel %vm2525_vm13, %v10131_v17, 0.0 }
0x1425   : > { %10153 = vadd.xlane.f32.xlu1 %v10152_v25  ;;  %v10106_v32 = vpop.xlane.xlu0 %10105 }
0x1426   : > { %v10115_v18 = vmul.f32 0.015625, %v10106_v32  ;;  %v10132_v1 = vmul.f32 %v21650_v21, %v21650_v21 }
0x1428   : > { %v21680_v10 = vsub.f32 %v21582_v4, %v10115_v18  ;;  %v10155_v44 = vsel %vm2525_vm13, %v10132_v1, 0.0 }
0x1429   : > { %10156 = vadd.xlane.f32.xlu0 %v10155_v44 }
0x142a   : > { %v10133_v57 = vmul.f32 %v21680_v10, %v21680_v10 }
0x142c   : > { %v10158_v8 = vsel %vm2525_vm13, %v10133_v57, 0.0 }
0x142d   : > { %10159 = vadd.xlane.f32.xlu1 %v10158_v8 }
0x1496   : > { %v10136_v2 = vpop.xlane.xlu1 %10135 }
0x1497   : > { %v10161_v52 = vmul.f32 0.015625, %v10136_v2 }
0x1499   : > { %v10170_v11 = vadd.f32 1e-06, %v10161_v52 }
0x149a   : > { %v10139_v37 = vpop.xlane.xlu0 %10138 }
0x149b   : > { %14641 = vrsqrt.f32 %v10170_v11  ;;  %v10162_v3 = vmul.f32 0.015625, %v10139_v37 }
0x149d   : > { %v10171_v42 = vadd.f32 1e-06, %v10162_v3  ;;  %v12083_v3 = vld [vmem:[%s22529_s8 + $0x3f8] sm:$0xff] }
0x149e   : > { %v10142_v5 = vpop.xlane.xlu1 %10141  ;;  %12931 = vmatprep.subr.mxu0 %v12083_v3  ;;  %v12052_v3 = vld [vmem:[%s22529_s8 + $0x300] sm:$0xff] }
0x149f   : > { %14643 = vrsqrt.f32 %v10171_v42  ;;  %v10163_v30 = vmul.f32 0.015625, %v10142_v5  ;;  %v12035_v42 = vld [vmem:[%s22529_s8 + $0x278] sm:$0xff] }
0x14a0   : > { %v12067_v5 = vld [vmem:[%s22529_s8 + $0x378] sm:$0xff] }
0x14a1   : > { %v10172_v27 = vadd.f32 1e-06, %v10163_v30  ;;  %v12050_v30 = vld [vmem:[%s22529_s8 + $0x2f0] sm:$0xff] }
0x14a2   : > { %v10145_v6 = vpop.xlane.xlu0 %10144 }
0x14a3   : > { %14645 = vrsqrt.f32 %v10172_v27  ;;  %v10164_v14 = vmul.f32 0.015625, %v10145_v6  ;;  %v12082_v27 = vld [vmem:[%s22529_s8 + $0x3f0] sm:$0xff] }
0x14a4   : > { %v12034_v6 = vld [vmem:[%s22529_s8 + $0x270] sm:$0xff] }
0x14a5   : > { %v10173_v53 = vadd.f32 1e-06, %v10164_v14  ;;  %v12066_v14 = vld [vmem:[%s22529_s8 + $0x370] sm:$0xff] }
0x14a6   : > { %v10148_v19 = vpop.xlane.xlu1 %10147 }
0x14a7   : > { %14647 = vrsqrt.f32 %v10173_v53  ;;  %v10165_v48 = vmul.f32 0.015625, %v10148_v19  ;;  %v12049_v53 = vld [vmem:[%s22529_s8 + $0x2e8] sm:$0xff] }
0x14a8   : > { %v14642_v38 = vpop.eup %14641  ;;  %v12081_v19 = vld [vmem:[%s22529_s8 + $0x3e8] sm:$0xff] }
0x14a9   : > { %v10188_v54 = vmul.f32 %v14642_v38, %v21587_v0  ;;  %v10174_v17 = vadd.f32 1e-06, %v10165_v48  ;;  %v12033_v48 = vld [vmem:[%s22529_s8 + $0x268] sm:$0xff] }
0x14aa   : > { %v10151_v45 = vpop.xlane.xlu0 %10150  ;;  %v12065_v38 = vld [vmem:[%s22529_s8 + $0x368] sm:$0xff] }
0x14ab   : > { %v10198_v33 = vmul.f32 %v21737_v26, %v10188_v54  ;;  %14649 = vrsqrt.f32 %v10174_v17  ;;  %v10166_v39 = vmul.f32 0.015625, %v10151_v45  ;;  %v12080_v54 = vld [vmem:[%s22529_s8 + $0x3e0] sm:$0xff]  ;;  %v12047_v45 = vld [vmem:[%s22529_s8 + $0x2d8] sm:$0xff] }
0x14ac   : > { %v14644_v25 = vpop.eup %14643  ;;  %v12032_v17 = vld [vmem:[%s22529_s8 + $0x260] sm:$0xff] }
0x14ad   : > { %v10208_v24 = vadd.f32 %v21743_v36, %v10198_v33  ;;  %v10189_v59 = vmul.f32 %v14644_v25, %v21592_v55  ;;  %v10175_v32 = vadd.f32 1e-06, %v10166_v39  ;;  %v12079_v33 = vld [vmem:[%s22529_s8 + $0x3d8] sm:$0xff] }
0x14ae   : > { %v10154_v41 = vpop.xlane.xlu1 %10153  ;;  %v12031_v39 = vld [vmem:[%s22529_s8 + $0x258] sm:$0xff] }
0x14af   : > { %14651 = vrsqrt.f32 %v10175_v32  ;;  %v10167_v0 = vmul.f32 0.015625, %v10154_v41  ;;  %12002 = vmatmul.mubr.msk.f32.vlgmr.msra.gmra.mxu1 %vm2525_vm13, %v10208_v24  ;;  %12011 = vmatmul.mubr.msk.f32.vlgmr.msra.gmra.mxu0 %vm2525_vm13, %v10208_v24  ;;  %v10199_v12 = vmul.f32 %v21737_v26, %v10189_v59  ;;  %v12063_v25 = vld [vmem:[%s22529_s8 + $0x358] sm:$0xff]  ;;  %v12046_v24 = vld [vmem:[%s22529_s8 + $0x2d0] sm:$0xff] }
0x14b0   : > { %v14646_v18 = vpop.eup %14645  ;;  %10370 = vmatprep.mubr.f32.mxu1 %v23183_v15  ;;  %10489 = vmatprep.mubr.f32.mxu0 %v23183_v15  ;;  %v12078_v59 = vld [vmem:[%s22529_s8 + $0x3d0] sm:$0xff] }
0x14b1   : > { %v10190_v1 = vmul.f32 %v14646_v18, %v21598_v61  ;;  %v10176_v9 = vadd.f32 1e-06, %v10167_v0  ;;  %v10209_v55 = vadd.f32 %v21743_v36, %v10199_v12  ;;  %12932 = vmatpush3.msra.mxu0 %v12067_v5  ;;  %v12030_v32 = vld [vmem:[%s22529_s8 + $0x250] sm:$0xff]  ;;  %v12045_v0 = vld [vmem:[%s22529_s8 + $0x2c8] sm:$0xff] }
0x14b2   : > { %v10157_v56 = vpop.xlane.xlu0 %10156  ;;  %12933 = vmatprep.subr.mxu0 %v12082_v27  ;;  %v12062_v41 = vld [vmem:[%s22529_s8 + $0x350] sm:$0xff]  ;;  %v12077_v12 = vld [vmem:[%s22529_s8 + $0x3c8] sm:$0xff] }
0x14b3   : > { %14653 = vrsqrt.f32 %v10176_v9  ;;  %v10168_v29 = vmul.f32 0.015625, %v10157_v56  ;;  %12003 = vmatmul.mubr.msk.f32.gmra.mxu1 %vm2525_vm13, %v10209_v55  ;;  %12012 = vmatmul.mubr.msk.f32.gmra.mxu0 %vm2525_vm13, %v10209_v55  ;;  %v10200_v63 = vmul.f32 %v21737_v26, %v10190_v1  ;;  %v12029_v18 = vld [vmem:[%s22529_s8 + $0x248] sm:$0xff]  ;;  %v12044_v9 = vld [vmem:[%s22529_s8 + $0x2c0] sm:$0xff] }
0x14b4   : > { %v14648_v44 = vpop.eup %14647  ;;  %10376 = vmatprep.mubr.f32.mxu1 %v23183_v15  ;;  %10495 = vmatprep.mubr.f32.mxu0 %v23183_v15  ;;  %v12061_v1 = vld [vmem:[%s22529_s8 + $0x348] sm:$0xff]  ;;  %v12076_v55 = vld [vmem:[%s22529_s8 + $0x3c0] sm:$0xff] }
0x14b5   : > { %v10191_v20 = vmul.f32 %v14648_v44, %v21604_v22  ;;  %v10177_v61 = vadd.f32 1e-06, %v10168_v29  ;;  %v10210_v47 = vadd.f32 %v21743_v36, %v10200_v63  ;;  %12934 = vmatpush3.msra.mxu0 %v12066_v14  ;;  %v12028_v56 = vld [vmem:[%s22529_s8 + $0x240] sm:$0xff]  ;;  %v12043_v63 = vld [vmem:[%s22529_s8 + $0x2b8] sm:$0xff] }
0x14b6   : > { %v10160_v16 = vpop.xlane.xlu1 %10159  ;;  %12935 = vmatprep.subr.mxu0 %v12081_v19  ;;  %v12060_v29 = vld [vmem:[%s22529_s8 + $0x340] sm:$0xff]  ;;  %v12075_v44 = vld [vmem:[%s22529_s8 + $0x3b8] sm:$0xff] }
0x14b7   : > { %14655 = vrsqrt.f32 %v10177_v61  ;;  %v10169_v62 = vmul.f32 0.015625, %v10160_v16  ;;  %12004 = vmatmul.mubr.msk.f32.gmra.mxu1 %vm2525_vm13, %v10210_v47  ;;  %12013 = vmatmul.mubr.msk.f32.gmra.mxu0 %vm2525_vm13, %v10210_v47  ;;  %v10201_v57 = vmul.f32 %v21737_v26, %v10191_v20  ;;  %v12027_v20 = vld [vmem:[%s22529_s8 + $0x238] sm:$0xff]  ;;  %v12042_v47 = vld [vmem:[%s22529_s8 + $0x2b0] sm:$0xff]  ;;  %v23185_v5 = vld [vmem:[#allocation6_spill] sm:$0xff] }
0x14b8   : > { %v14650_v13 = vpop.eup %14649  ;;  %10382 = vmatprep.mubr.f32.mxu1 %v23183_v15  ;;  %10501 = vmatprep.mubr.f32.mxu0 %v23183_v15  ;;  %v12059_v61 = vld [vmem:[%s22529_s8 + $0x338] sm:$0xff]  ;;  %v12074_v16 = vld [vmem:[%s22529_s8 + $0x3b0] sm:$0xff] }
0x14b9   : > { %v10192_v23 = vmul.f32 %v14650_v13, %v21610_v46  ;;  %v10178_v22 = vadd.f32 1e-06, %v10169_v62  ;;  %v10211_v50 = vadd.f32 %v21743_v36, %v10201_v57  ;;  %12936 = vmatpush3.msra.mxu0 %v12065_v38  ;;  %v12026_v62 = vld [vmem:[%s22529_s8 + $0x230] sm:$0xff]  ;;  %v12041_v13 = vld [vmem:[%s22529_s8 + $0x2a8] sm:$0xff] }
0x14ba   : > { %12937 = vmatprep.subr.mxu0 %v12080_v54  ;;  %v12058_v57 = vld [vmem:[%s22529_s8 + $0x330] sm:$0xff] }
0x14bb   : > { %14657 = vrsqrt.f32 %v10178_v22  ;;  %12005 = vmatmul.mubr.msk.f32.gmra.mxu1 %vm2525_vm13, %v10211_v50  ;;  %12014 = vmatmul.mubr.msk.f32.gmra.mxu0 %vm2525_vm13, %v10211_v50  ;;  %v10202_v35 = vmul.f32 %v21737_v26, %v10192_v23  ;;  %v12073_v23 = vld [vmem:[%s22529_s8 + $0x3a8] sm:$0xff] }
0x14bc   : > { %v14652_v8 = vpop.eup %14651  ;;  %10388 = vmatprep.mubr.f32.mxu1 %v23183_v15  ;;  %10507 = vmatprep.mubr.f32.mxu0 %v23183_v15  ;;  %v12025_v22 = vld [vmem:[%s22529_s8 + $0x228] sm:$0xff] }
0x14bd   : > { %v10193_v34 = vmul.f32 %v14652_v8, %v21615_v51  ;;  %v10212_v60 = vadd.f32 %v21743_v36, %v10202_v35  ;;  %v12057_v50 = vld [vmem:[%s22529_s8 + $0x328] sm:$0xff]  ;;  %v12040_v35 = vld [vmem:[%s22529_s8 + $0x2a0] sm:$0xff] }
0x14be   : > { %v12072_v8 = vld [vmem:[%s22529_s8 + $0x3a0] sm:$0xff] }
0x14bf   : > { %12006 = vmatmul.mubr.msk.f32.gmra.mxu1 %vm2525_vm13, %v10212_v60  ;;  %12015 = vmatmul.mubr.msk.f32.gmra.mxu0 %vm2525_vm13, %v10212_v60  ;;  %v10203_v46 = vmul.f32 %v21737_v26, %v10193_v34  ;;  %v12024_v34 = vld [vmem:[%s22529_s8 + $0x220] sm:$0xff] }
0x14c0   : > { %v14654_v40 = vpop.eup %14653  ;;  %10394 = vmatprep.mubr.f32.mxu1 %v23183_v15  ;;  %10513 = vmatprep.mubr.f32.mxu0 %v23183_v15  ;;  %v12056_v60 = vld [vmem:[%s22529_s8 + $0x320] sm:$0xff] }
0x14c1   : > { %v10194_v7 = vmul.f32 %v14654_v40, %v21620_v58  ;;  %v10213_v31 = vadd.f32 %v21743_v36, %v10203_v46  ;;  %v12039_v46 = vld [vmem:[%s22529_s8 + $0x298] sm:$0xff] }
0x14c2   : > { %v12071_v40 = vld [vmem:[%s22529_s8 + $0x398] sm:$0xff] }
0x14c3   : > { %12007 = vmatmul.mubr.msk.f32.gmra.mxu1 %vm2525_vm13, %v10213_v31  ;;  %12016 = vmatmul.mubr.msk.f32.gmra.mxu0 %vm2525_vm13, %v10213_v31  ;;  %v10204_v51 = vmul.f32 %v21737_v26, %v10194_v7  ;;  %v12023_v7 = vld [vmem:[%s22529_s8 + $0x218] sm:$0xff] }
0x14c4   : > { %v14656_v28 = vpop.eup %14655  ;;  %10400 = vmatprep.mubr.f32.mxu1 %v23183_v15  ;;  %10519 = vmatprep.mubr.f32.mxu0 %v23183_v15  ;;  %v12055_v31 = vld [vmem:[%s22529_s8 + $0x318] sm:$0xff] }
0x14c5   : > { %v10195_v43 = vmul.f32 %v14656_v28, %v21650_v21  ;;  %v10214_v49 = vadd.f32 %v21743_v36, %v10204_v51  ;;  %v12038_v51 = vld [vmem:[%s22529_s8 + $0x290] sm:$0xff] }
0x14c6   : > { %v12070_v28 = vld [vmem:[%s22529_s8 + $0x390] sm:$0xff] }
0x14c7   : > { %12008 = vmatmul.mubr.msk.f32.gmra.mxu1 %vm2525_vm13, %v10214_v49  ;;  %12017 = vmatmul.mubr.msk.f32.gmra.mxu0 %vm2525_vm13, %v10214_v49  ;;  %v10205_v58 = vmul.f32 %v21737_v26, %v10195_v43  ;;  %v12022_v43 = vld [vmem:[%s22529_s8 + $0x210] sm:$0xff] }
0x14c8   : > { %v14658_v2 = vpop.eup %14657  ;;  %10406 = vmatprep.mubr.f32.mxu1 %v23183_v15  ;;  %10525 = vmatprep.mubr.f32.mxu0 %v23183_v15  ;;  %v12054_v49 = vld [vmem:[%s22529_s8 + $0x310] sm:$0xff] }
0x14c9   : > { %v10196_v52 = vmul.f32 %v14658_v2, %v21680_v10  ;;  %v10215_v11 = vadd.f32 %v21743_v36, %v10205_v58  ;;  %v12051_v10 = vld [vmem:[%s22529_s8 + $0x2f8] sm:$0xff]  ;;  %v12037_v58 = vld [vmem:[%s22529_s8 + $0x288] sm:$0xff] }
0x14ca   : > { %12872 = vmatprep.subr.mxu1 %v12051_v10  ;;  %v12069_v2 = vld [vmem:[%s22529_s8 + $0x388] sm:$0xff]  ;;  %v12020_v10 = vld [vmem:[%s22529_s8 + $0x200] sm:$0xff] }
0x14cb   : > { %12009 = vmatmul.mubr.msk.f32.gmra.mxu1 %vm2525_vm13, %v10215_v11  ;;  %12018 = vmatmul.mubr.msk.f32.gmra.mxu0 %vm2525_vm13, %v10215_v11  ;;  %v10206_v21 = vmul.f32 %v21737_v26, %v10196_v52  ;;  %v12048_v26 = vld [vmem:[%s22529_s8 + $0x2e0] sm:$0xff]  ;;  %v12021_v52 = vld [vmem:[%s22529_s8 + $0x208] sm:$0xff] }
0x14cc   : > { %10412 = vmatprep.mubr.f32.mxu1 %v23183_v15  ;;  %10531 = vmatprep.mubr.f32.mxu0 %v23183_v15  ;;  %v12053_v11 = vld [vmem:[%s22529_s8 + $0x308] sm:$0xff] }
0x14cd   : > { %v10216_v37 = vadd.f32 %v21743_v36, %v10206_v21  ;;  %12873 = vmatpush3.msra.mxu1 %v12035_v42  ;;  %v12064_v36 = vld [vmem:[%s22529_s8 + $0x360] sm:$0xff] }
0x14ce   : > { %12874 = vmatprep.subr.mxu1 %v12050_v30  ;;  %12938 = vmatpush3.msra.mxu0 %v12064_v36  ;;  %v12036_v21 = vld [vmem:[%s22529_s8 + $0x280] sm:$0xff]  ;;  %v23186_v30 = vsub.s32 0, %v23185_v5  ;;  %v23189_v36 = vsub.s32 3, %v23185_v5 }
0x14cf   : > { %12010 = vmatmul.mubr.msk.f32.gmra.mxu1 %vm2525_vm13, %v10216_v37  ;;  %12019 = vmatmul.mubr.msk.f32.gmra.mxu0 %vm2525_vm13, %v10216_v37  ;;  %v12068_v37 = vld [vmem:[%s22529_s8 + $0x380] sm:$0xff] }
0x14d0   : > { %12875 = vmatpush3.msra.mxu1 %v12034_v6  ;;  %12939 = vmatprep.subr.mxu0 %v12079_v33  ;;  %v12001_v42 = vld [vmem:[%s22526_s5 + $0x21] ss:$8 sm:$0xf]  ;;  %v23187_v6 = vsub.s32 2, %v23185_v5 }
0x14d1   : > { %12876 = vmatprep.subr.mxu1 %v12049_v53  ;;  %12940 = vmatpush3.msra.mxu0 %v12063_v25  ;;  %v22003_v27 = vrot.slane %v12001_v42, %v23186_v30 }
0x14d2   : > { %12877 = vmatpush3.msra.mxu1 %v12033_v48  ;;  %12941 = vmatprep.subr.mxu0 %v12078_v59  ;;  %v22007_v14 = vrot.slane %v12001_v42, %v23187_v6  ;;  %v23188_v48 = vsub.s32 1, %v23185_v5 }
0x14d3   : > { %12878 = vmatprep.subr.mxu1 %v12048_v26  ;;  %12942 = vmatpush3.msra.mxu0 %v12062_v41 }
0x14d4   : > { %12879 = vmatpush3.msra.mxu1 %v12032_v17  ;;  %12943 = vmatprep.subr.mxu0 %v12077_v12  ;;  %v22011_v38 = vrot.slane %v12001_v42, %v23188_v48 }
0x14d5   : > { %12880 = vmatprep.subr.mxu1 %v12047_v45  ;;  %12944 = vmatpush3.msra.mxu0 %v12061_v1  ;;  %v22017_v45 = vrot.slane %v12001_v42, %v23189_v36 }
0x14d6   : > { %12881 = vmatpush3.msra.mxu1 %v12031_v39  ;;  %12945 = vmatprep.subr.mxu0 %v12076_v55 }
0x14d7   : > { %12882 = vmatprep.subr.mxu1 %v12046_v24  ;;  %12946 = vmatpush3.msra.mxu0 %v12060_v29 }
0x14d8   : > { %12883 = vmatpush3.msra.mxu1 %v12030_v32  ;;  %12947 = vmatprep.subr.mxu0 %v12075_v44 }
0x14d9   : > { %12884 = vmatprep.subr.mxu1 %v12045_v0  ;;  %12948 = vmatpush3.msra.mxu0 %v12059_v61 }
0x14da   : > { %12885 = vmatpush3.msra.mxu1 %v12029_v18  ;;  %12949 = vmatprep.subr.mxu0 %v12074_v16 }
0x14db   : > { %12886 = vmatprep.subr.mxu1 %v12044_v9  ;;  %12950 = vmatpush3.msra.mxu0 %v12058_v57 }
0x14dc   : > { %12887 = vmatpush3.msra.mxu1 %v12028_v56  ;;  %12951 = vmatprep.subr.mxu0 %v12073_v23 }
0x14dd   : > { %12888 = vmatprep.subr.mxu1 %v12043_v63  ;;  %12952 = vmatpush3.msra.mxu0 %v12057_v50 }
0x14de   : > { %12889 = vmatpush3.msra.mxu1 %v12027_v20  ;;  %12953 = vmatprep.subr.mxu0 %v12072_v8 }
0x14df   : > { %12890 = vmatprep.subr.mxu1 %v12042_v47  ;;  %12954 = vmatpush3.msra.mxu0 %v12056_v60 }
0x14e0   : > { %12891 = vmatpush3.msra.mxu1 %v12026_v62  ;;  %12955 = vmatprep.subr.mxu0 %v12071_v40 }
0x14e1   : > { %12892 = vmatprep.subr.mxu1 %v12041_v13  ;;  %12956 = vmatpush3.msra.mxu0 %v12055_v31 }
0x14e2   : > { %12893 = vmatpush3.msra.mxu1 %v12025_v22  ;;  %12957 = vmatprep.subr.mxu0 %v12070_v28 }
0x14e3   : > { %12894 = vmatprep.subr.mxu1 %v12040_v35  ;;  %12958 = vmatpush3.msra.mxu0 %v12054_v49 }
0x14e4   : > { %12895 = vmatpush3.msra.mxu1 %v12024_v34  ;;  %12959 = vmatprep.subr.mxu0 %v12069_v2 }
0x14e5   : > { %12896 = vmatprep.subr.mxu1 %v12039_v46  ;;  %12960 = vmatpush3.msra.mxu0 %v12053_v11 }
0x14e6   : > { %12897 = vmatpush3.msra.mxu1 %v12023_v7  ;;  %12961 = vmatprep.subr.mxu0 %v12068_v37 }
0x14e7   : > { %12898 = vmatprep.subr.mxu1 %v12038_v51  ;;  %12962 = vmatpush3.msra.mxu0 %v12052_v3 }
0x14e8   : > { %12899 = vmatpush3.msra.mxu1 %v12022_v43 }
0x14e9   : > { %12900 = vmatprep.subr.mxu1 %v12037_v58 }
0x14ea   : > { %12901 = vmatpush3.msra.mxu1 %v12021_v52 }
0x14eb   : > { %12902 = vmatprep.subr.mxu1 %v12036_v21 }
0x14ec   : > { %12903 = vmatpush3.msra.mxu1 %v12020_v10 }
0x14ed   : > { %14419 = vmatprep.subr.mxu1 %v23183_v15 }
0x156f   : > { %v10366_v53 = vpop.f32.mrf.mxu1  ;;  %v10485_v19 = vpop.f32.mrf.mxu0 }
0x1570   : > { %v10367_v26 = vadd.f32 %v10366_v53, %v22003_v27  ;;  %v10486_v54 = vadd.f32 %v10485_v19, %v22007_v14 }
0x1571   : > { %v10368_v17 = vpop.f32.mrf.mxu1  ;;  %v10487_v33 = vpop.f32.mrf.mxu0 }
0x1572   : > { %v10574_v39 = vmul.f32 0.044715, %v10367_v26  ;;  %v10576_v25 = vmul.f32 0.044715, %v10486_v54  ;;  %v22020_v24 = vadd.f32 %v10368_v17, %v22011_v38  ;;  %v22029_v1 = vadd.f32 %v10487_v33, %v22017_v45 }
0x1573   : > { %v10372_v59 = vpop.f32.mrf.mxu1  ;;  %v10491_v32 = vpop.f32.mrf.mxu0  ;;  %v22033_v20 = vmul.f32 0.5, %v10367_v26  ;;  %v22054_v58 = vmul.f32 0.5, %v10486_v54 }
0x1574   : > { %v10610_v41 = vmul.f32 %v10574_v39, %v10367_v26  ;;  %v10612_v0 = vmul.f32 %v10576_v25, %v10486_v54  ;;  %v22023_v12 = vadd.f32 %v10372_v59, %v22003_v27  ;;  %v22026_v18 = vadd.f32 %v10491_v32, %v22007_v14 }
0x1575   : > { %v10374_v9 = vpop.f32.mrf.mxu1  ;;  %v10493_v55 = vpop.f32.mrf.mxu0  ;;  %v10575_v13 = vmul.f32 0.044715, %v22020_v24  ;;  %v10577_v7 = vmul.f32 0.044715, %v22029_v1  ;;  %v22058_v52 = vmul.f32 0.5, %v22020_v24  ;;  %v22083_v17 = vmul.f32 0.5, %v22029_v1 }
0x1576   : > { %v10646_v56 = vmul.f32 %v10610_v41, %v10367_v26  ;;  %v10648_v29 = vmul.f32 %v10612_v0, %v10486_v54  ;;  %v10578_v63 = vmul.f32 0.044715, %v22023_v12  ;;  %v10580_v44 = vmul.f32 0.044715, %v22026_v18 }
0x1577   : > { %v22036_v61 = vadd.f32 %v10374_v9, %v22011_v38  ;;  %v10378_v47 = vpop.f32.mrf.mxu1  ;;  %v10497_v16 = vpop.f32.mrf.mxu0  ;;  %v22040_v23 = vadd.f32 %v10493_v55, %v22017_v45  ;;  %23192 = vst [vmem:[#allocation41_spill] sm:$0xff] %v22058_v52  ;;  %v22074_v53 = vmul.f32 %v10575_v13, %v22020_v24  ;;  %v22077_v19 = vmul.f32 %v10577_v7, %v22029_v1 }
0x1578   : > { %v10682_v62 = vadd.f32 %v10646_v56, %v10367_v26  ;;  %v10684_v57 = vadd.f32 %v10648_v29, %v10486_v54  ;;  %v10614_v22 = vmul.f32 %v10578_v63, %v22023_v12  ;;  %v10616_v50 = vmul.f32 %v10580_v44, %v22026_v18  ;;  %23195 = vst [vmem:[#allocation39_spill] sm:$0xff] %v22083_v17 }
0x1579   : > { %v22045_v35 = vadd.f32 %v10378_v47, %v22003_v27  ;;  %v22048_v8 = vadd.f32 %v10497_v16, %v22007_v14  ;;  %v10380_v34 = vpop.f32.mrf.mxu1  ;;  %v10499_v60 = vpop.f32.mrf.mxu0  ;;  %v10579_v31 = vmul.f32 0.044715, %v22036_v61  ;;  %v10581_v2 = vmul.f32 0.044715, %v22040_v23 }
0x157a   : > { %v10718_v46 = vmul.f32 0.7978846, %v10682_v62  ;;  %v10720_v40 = vmul.f32 0.7978846, %v10684_v57  ;;  %v10650_v11 = vmul.f32 %v10614_v22, %v22023_v12  ;;  %v10652_v21 = vmul.f32 %v10616_v50, %v22026_v18 }
0x157b   : > { %23190 = vst [vmem:[#allocation17_spill] sm:$0xff] %v22045_v35  ;;  %23191 = vst [vmem:[#allocation18_spill] sm:$0xff] %v22048_v8  ;;  %v10582_v51 = vmul.f32 0.044715, %v22045_v35  ;;  %v10584_v28 = vmul.f32 0.044715, %v22048_v8  ;;  %v10384_v43 = vpop.f32.mrf.mxu1  ;;  %v10503_v49 = vpop.f32.mrf.mxu0  ;;  %v22063_v37 = vadd.f32 %v10380_v34, %v22011_v38  ;;  %v22080_v48 = vmul.f32 %v10579_v31, %v22036_v61 }
0x157c   : > { %14659 = vtanh.f32 %v10718_v46  ;;  %v22068_v30 = vadd.f32 %v10384_v43, %v22003_v27  ;;  %v22071_v6 = vadd.f32 %v10503_v49, %v22007_v14  ;;  %v22086_v36 = vmul.f32 %v10581_v2, %v22040_v23 }
0x157d   : > { %14661 = vtanh.f32 %v10720_v40  ;;  %v10386_v10 = vpop.f32.mrf.mxu1  ;;  %v10505_v3 = vpop.f32.mrf.mxu0  ;;  %v10618_v42 = vmul.f32 %v10582_v51, %v22045_v35  ;;  %v10620_v5 = vmul.f32 %v10584_v28, %v22048_v8  ;;  %v22089_v33 = vadd.f32 %v10499_v60, %v22017_v45 }
0x157e   : > { %23193 = vst [vmem:[#allocation15_spill] sm:$0xff] %v22068_v30  ;;  %23194 = vst [vmem:[#allocation21_spill] sm:$0xff] %v22071_v6  ;;  %v10586_v39 = vmul.f32 0.044715, %v22068_v30  ;;  %v10588_v25 = vmul.f32 0.044715, %v22071_v6  ;;  %v22094_v59 = vadd.f32 %v10650_v11, %v22023_v12  ;;  %v22097_v32 = vadd.f32 %v10652_v21, %v22026_v18 }
0x157f   : > { %v10390_v26 = vpop.f32.mrf.mxu1  ;;  %v10509_v54 = vpop.f32.mrf.mxu0  ;;  %v10583_v41 = vmul.f32 0.044715, %v22063_v37  ;;  %v22101_v0 = vadd.f32 %v10386_v10, %v22011_v38  ;;  %v10654_v56 = vmul.f32 %v10618_v42, %v22045_v35  ;;  %v10656_v29 = vmul.f32 %v10620_v5, %v22048_v8 }
0x1580   : > { %v22106_v63 = vadd.f32 %v10505_v3, %v22017_v45  ;;  %v22109_v44 = vadd.f32 %v10390_v26, %v22003_v27  ;;  %v10622_v47 = vmul.f32 %v10586_v39, %v22068_v30  ;;  %v10624_v16 = vmul.f32 %v10588_v25, %v22071_v6 }
0x1581   : > { %v10392_v9 = vpop.f32.mrf.mxu1  ;;  %v10511_v55 = vpop.f32.mrf.mxu0  ;;  %v22114_v62 = vadd.f32 %v10509_v54, %v22007_v14  ;;  %v10585_v50 = vmul.f32 0.044715, %v22089_v33  ;;  %v22128_v40 = vmul.f32 %v10583_v41, %v22063_v37  ;;  %v10587_v7 = vmul.f32 0.044715, %v22101_v0 }
0x1582   : > { %23196 = vst [vmem:[#allocation45_spill] sm:$0xff] %v22109_v44  ;;  %v22117_v57 = vadd.f32 %v10392_v9, %v22011_v38  ;;  %v10590_v34 = vmul.f32 0.044715, %v22109_v44  ;;  %v22122_v60 = vadd.f32 %v10511_v55, %v22017_v45  ;;  %v22136_v49 = vadd.f32 %v10654_v56, %v22045_v35 }
0x1583   : > { %23197 = vst [vmem:[#allocation20_spill] sm:$0xff] %v22114_v62  ;;  %v10396_v13 = vpop.f32.mrf.mxu1  ;;  %v10515_v22 = vpop.f32.mrf.mxu0  ;;  %v10592_v31 = vmul.f32 0.044715, %v22114_v62  ;;  %v10589_v2 = vmul.f32 0.044715, %v22106_v63  ;;  %v10658_v10 = vmul.f32 %v10622_v47, %v22068_v30  ;;  %v10660_v3 = vmul.f32 %v10624_v16, %v22071_v6 }
0x1584   : > { %23198 = vst [vmem:[#allocation26_spill] sm:$0xff] %v22122_v60  ;;  %v22125_v46 = vadd.f32 %v10396_v13, %v22003_v27  ;;  %v22133_v51 = vadd.f32 %v10515_v22, %v22007_v14  ;;  %v10626_v11 = vmul.f32 %v10590_v34, %v22109_v44  ;;  %v10591_v42 = vmul.f32 0.044715, %v22117_v57 }
0x1585   : > { %v10398_v28 = vpop.f32.mrf.mxu1  ;;  %v10517_v43 = vpop.f32.mrf.mxu0  ;;  %v22146_v39 = vadd.f32 %v10656_v29, %v22048_v8  ;;  %v10628_v25 = vmul.f32 %v10592_v31, %v22114_v62  ;;  %v10593_v41 = vmul.f32 0.044715, %v22122_v60  ;;  %v22162_v31 = vmul.f32 %v10585_v50, %v22089_v33 }
0x1586   : > { %23199 = vst [vmem:[#allocation19_spill] sm:$0xff] %v22125_v46  ;;  %23200 = vst [vmem:[#allocation50_spill] sm:$0xff] %v22133_v51  ;;  %v10594_v21 = vmul.f32 0.044715, %v22125_v46  ;;  %v10596_v5 = vmul.f32 0.044715, %v22133_v51  ;;  %v10662_v56 = vmul.f32 %v10626_v11, %v22109_v44  ;;  %v22153_v47 = vadd.f32 %v10398_v28, %v22011_v38 }
0x1587   : > { %v10402_v26 = vpop.f32.mrf.mxu1  ;;  %v10521_v54 = vpop.f32.mrf.mxu0  ;;  %v22168_v11 = vmul.f32 %v10589_v2, %v22106_v63  ;;  %v22178_v4 = vmul.f32 %v10591_v42, %v22117_v57  ;;  %v22181_v50 = vadd.f32 %v10517_v43, %v22017_v45  ;;  %v10664_v2 = vmul.f32 %v10628_v25, %v22114_v62 }
0x1588   : > { %v10630_v9 = vmul.f32 %v10594_v21, %v22125_v46  ;;  %v22156_v16 = vadd.f32 %v10402_v26, %v22003_v27  ;;  %v22159_v13 = vadd.f32 %v10521_v54, %v22007_v14  ;;  %v22165_v21 = vmul.f32 %v10587_v7, %v22101_v0 }
0x1589   : > { %v14660_v55 = vpop.eup %14659  ;;  %v10404_v29 = vpop.f32.mrf.mxu1  ;;  %v10632_v28 = vmul.f32 %v10596_v5, %v22133_v51  ;;  %v22172_v26 = vadd.f32 %v10658_v10, %v22068_v30  ;;  %v22175_v54 = vadd.f32 %v10660_v3, %v22071_v6  ;;  %v22187_v10 = vadd.f32 %v10662_v56, %v22109_v44 }
0x158a   : > { %v10523_v22 = vpop.f32.mrf.mxu0  ;;  %v14662_v34 = vpop.eup %14661  ;;  %v10790_v8 = vadd.f32 1.0, %v14660_v55  ;;  %v10666_v35 = vmul.f32 %v10630_v9, %v22125_v46  ;;  %v10598_v5 = vmul.f32 0.044715, %v22156_v16  ;;  %v22190_v3 = vmul.f32 %v10593_v41, %v22122_v60 }
0x158b   : > { %v10408_v15 = vpop.f32.mrf.mxu1  ;;  %23201 = vst [vmem:[#allocation23_spill] sm:$0xff] %v22187_v10  ;;  %v10595_v42 = vmul.f32 0.044715, %v22153_v47  ;;  %v10600_v43 = vmul.f32 0.044715, %v22159_v13  ;;  %v10792_v17 = vadd.f32 1.0, %v14662_v34  ;;  %v10668_v55 = vmul.f32 %v10632_v28, %v22133_v51 }
0x158c   : > { %v10527_v7 = vpop.f32.mrf.mxu0  ;;  %23202 = vst [vmem:[#allocation29_spill] sm:$0xff] %v22190_v3  ;;  %v10634_v25 = vmul.f32 %v10598_v5, %v22156_v16  ;;  %v22197_v9 = vadd.f32 %v10408_v15, %v22003_v27  ;;  %v10597_v56 = vmul.f32 0.044715, %v22181_v50  ;;  %v22201_v44 = vadd.f32 %v10404_v29, %v22011_v38 }
0x158d   : > { %v10410_v6 = vpop.f32.mrf.mxu1  ;;  %v22204_v41 = vadd.f32 %v10523_v22, %v22017_v45  ;;  %v22207_v52 = vadd.f32 %v10527_v7, %v22007_v14  ;;  %v22210_v34 = vmul.f32 %v10790_v8, %v22033_v20  ;;  %v22213_v28 = vadd.f32 %v10664_v2, %v22114_v62 }
0x158e   : > { %v10529_v30 = vpop.f32.mrf.mxu0  ;;  %v22216_v15 = vadd.f32 %v10666_v35, %v22125_v46  ;;  %v10602_v5 = vmul.f32 0.044715, %v22197_v9  ;;  %v10636_v3 = vmul.f32 %v10600_v43, %v22159_v13  ;;  %v22222_v7 = vadd.f32 %v10410_v6, %v22011_v38 }
0x158f   : > { %v10414_v10 = vpop.f32.mrf.mxu1  ;;  %v10604_v22 = vmul.f32 0.044715, %v22207_v52  ;;  %v22225_v60 = vadd.f32 %v10529_v30, %v22017_v45  ;;  %v22228_v20 = vmul.f32 %v10792_v17, %v22054_v58  ;;  %v22231_v8 = vmul.f32 %v10595_v42, %v22153_v47 }
0x1590   : > { %v10533_v29 = vpop.f32.mrf.mxu0  ;;  %v10670_v35 = vmul.f32 %v10634_v25, %v22156_v16  ;;  %v10638_v2 = vmul.f32 %v10602_v5, %v22197_v9  ;;  %v22236_v43 = vadd.f32 %v10668_v55, %v22133_v51  ;;  %v22239_v46 = vmul.f32 %v10597_v56, %v22181_v50 }
0x1591   : > { %v10599_v6 = vmul.f32 0.044715, %v22201_v44  ;;  %v10601_v30 = vmul.f32 0.044715, %v22204_v41  ;;  %v10416_v62 = vpop.f32.mrf.mxu1  ;;  %v10640_v58 = vmul.f32 %v10604_v22, %v22207_v52  ;;  %v22245_v17 = vadd.f32 %v10414_v10, %v22003_v27 }
0x1592   : > { %23203 = vst [vmem:[#allocation36_spill] sm:$0xff] %v22236_v43  ;;  %v22248_v42 = vadd.f32 %v10533_v29, %v22007_v14  ;;  %v10647_v55 = vmul.f32 %v22074_v53, %v22020_v24  ;;  %v10535_v25 = vpop.f32.mrf.mxu0  ;;  %v10672_v56 = vmul.f32 %v10636_v3, %v22159_v13  ;;  %v10603_v5 = vmul.f32 0.044715, %v22222_v7 }
0x1593   : > { %v10605_v51 = vmul.f32 0.044715, %v22225_v60  ;;  %v10649_v43 = vmul.f32 %v22077_v19, %v22029_v1  ;;  %v22258_v22 = vadd.f32 %v10670_v35, %v22156_v16  ;;  %v10674_v27 = vmul.f32 %v10638_v2, %v22197_v9 }
0x1594   : > { %v10683_v14 = vadd.f32 %v10647_v55, %v22020_v24  ;;  %v22263_v10 = vadd.f32 %v10416_v62, %v22011_v38  ;;  %v22266_v53 = vmul.f32 %v10599_v6, %v22201_v44  ;;  %v22269_v3 = vmul.f32 %v10601_v30, %v22204_v41 }
0x1595   : > { %v10685_v29 = vadd.f32 %v10649_v43, %v22029_v1  ;;  %v22273_v19 = vadd.f32 %v10535_v25, %v22017_v45  ;;  %v10676_v35 = vmul.f32 %v10640_v58, %v22207_v52  ;;  %v10606_v2 = vmul.f32 0.044715, %v22245_v17 }
0x1596   : > { %v10608_v24 = vmul.f32 0.044715, %v22248_v42  ;;  %v10719_v55 = vmul.f32 0.7978846, %v10683_v14  ;;  %v22279_v38 = vadd.f32 %v10672_v56, %v22159_v13  ;;  %v22282_v62 = vmul.f32 %v10603_v5, %v22222_v7 }
0x1597   : > { %v10721_v6 = vmul.f32 0.7978846, %v10685_v29  ;;  %v10651_v1 = vmul.f32 %v22080_v48, %v22036_v61  ;;  %v22287_v45 = vadd.f32 %v10674_v27, %v22197_v9  ;;  %v22290_v43 = vmul.f32 %v10605_v51, %v22225_v60 }
0x1598   : > { %14663 = vtanh.f32 %v10719_v55  ;;  %v10607_v30 = vmul.f32 0.044715, %v22263_v10  ;;  %v10609_v58 = vmul.f32 0.044715, %v22273_v19  ;;  %v10653_v56 = vmul.f32 %v22086_v36, %v22040_v23 }
0x1599   : > { %14665 = vtanh.f32 %v10721_v6  ;;  %v10687_v25 = vadd.f32 %v10651_v1, %v22036_v61  ;;  %v22298_v5 = vadd.f32 %v10676_v35, %v22207_v52  ;;  %v10642_v48 = vmul.f32 %v10606_v2, %v22245_v17 }
0x159a   : > { %v10644_v27 = vmul.f32 %v10608_v24, %v22248_v42  ;;  %v10722_v51 = vmul.f32 0.7978846, %v22094_v59  ;;  %v22304_v14 = vmul.f32 0.5, %v22036_v61  ;;  %v10689_v55 = vadd.f32 %v10653_v56, %v22040_v23 }
0x159b   : > { %v10723_v29 = vmul.f32 0.7978846, %v10687_v25  ;;  %v10724_v6 = vmul.f32 0.7978846, %v22097_v32  ;;  %v22309_v1 = vmul.f32 %v10607_v30, %v22263_v10  ;;  %v10655_v36 = vmul.f32 %v22128_v40, %v22063_v37 }
0x159c   : > { %14667 = vtanh.f32 %v10722_v51  ;;  %v10657_v35 = vmul.f32 %v22162_v31, %v22089_v33  ;;  %v22316_v59 = vmul.f32 %v10609_v58, %v22273_v19  ;;  %v10725_v61 = vmul.f32 0.7978846, %v10689_v55 }
0x159d   : > { %14669 = vtanh.f32 %v10723_v29  ;;  %v10726_v2 = vmul.f32 0.7978846, %v22136_v49  ;;  %v10678_v24 = vmul.f32 %v10642_v48, %v22245_v17  ;;  %v10691_v32 = vadd.f32 %v10655_v36, %v22063_v37  ;;  %v23204_v36 = vld [vmem:[#allocation26_spill] sm:$0xff] }
0x159e   : > { %14671 = vtanh.f32 %v10724_v6  ;;  %v10693_v30 = vadd.f32 %v10657_v35, %v22089_v33  ;;  %v10680_v25 = vmul.f32 %v10644_v27, %v22248_v42  ;;  %v10728_v40 = vmul.f32 0.7978846, %v22146_v39  ;;  %v23205_v35 = vld [vmem:[#allocation29_spill] sm:$0xff] }
0x159f   : > { %14673 = vtanh.f32 %v10725_v61  ;;  %v10659_v31 = vmul.f32 %v22165_v21, %v22101_v0  ;;  %v22327_v58 = vmul.f32 0.5, %v22040_v23  ;;  %v10727_v56 = vmul.f32 0.7978846, %v10691_v32 }
0x15a0   : > { %v10729_v49 = vmul.f32 0.7978846, %v10693_v30  ;;  %14675 = vtanh.f32 %v10726_v2  ;;  %v22330_v48 = vmul.f32 0.5, %v22023_v12  ;;  %v10661_v27 = vmul.f32 %v22168_v11, %v22106_v63 }
0x15a1   : > { %14677 = vtanh.f32 %v10728_v40  ;;  %v10695_v51 = vadd.f32 %v10659_v31, %v22101_v0  ;;  %v22336_v39 = vadd.f32 %v10678_v24, %v22245_v17  ;;  %v10730_v21 = vmul.f32 0.7978846, %v22172_v26  ;;  %v23206_v24 = vld [vmem:[#allocation23_spill] sm:$0xff] }
0x15a2   : > { %14679 = vtanh.f32 %v10727_v56  ;;  %v10732_v23 = vmul.f32 0.7978846, %v22175_v54  ;;  %v22341_v29 = vadd.f32 %v10680_v25, %v22248_v42  ;;  %v10697_v55 = vadd.f32 %v10661_v27, %v22106_v63 }
0x15a3   : > { %14681 = vtanh.f32 %v10729_v49  ;;  %v10731_v12 = vmul.f32 0.7978846, %v10695_v51  ;;  %v22345_v6 = vmul.f32 0.5, %v22026_v18  ;;  %v10663_v11 = vmul.f32 %v22178_v4, %v22117_v57 }
0x15a4   : > { %14683 = vtanh.f32 %v10730_v21  ;;  %v10665_v61 = vmul.f32 %v23205_v35, %v23204_v36  ;;  %v22352_v54 = vmul.f32 0.5, %v22063_v37  ;;  %v10733_v2 = vmul.f32 0.7978846, %v10697_v55  ;;  %v23207_v37 = vld [vmem:[#allocation41_spill] sm:$0xff] }
0x15a5   : > { %v14664_v26 = vpop.eup %14663  ;;  %14685 = vtanh.f32 %v10731_v12  ;;  %v10734_v32 = vmul.f32 0.7978846, %v23206_v24  ;;  %v10699_v18 = vadd.f32 %v10663_v11, %v22117_v57  ;;  %v22358_v4 = vmul.f32 0.5, %v22089_v33  ;;  %v23208_v12 = vld [vmem:[#allocation39_spill] sm:$0xff] }
0x15a6   : > { %v14666_v30 = vpop.eup %14665  ;;  %v10791_v25 = vadd.f32 1.0, %v14664_v26  ;;  %14687 = vtanh.f32 %v10732_v23  ;;  %v10701_v40 = vadd.f32 %v10665_v61, %v23204_v36  ;;  %v10736_v56 = vmul.f32 0.7978846, %v22213_v28  ;;  %v23209_v23 = vld [vmem:[#allocation17_spill] sm:$0xff]  ;;  %v23210_v26 = vld [vmem:[#allocation18_spill] sm:$0xff] }
0x15a7   : > { %v10793_v31 = vadd.f32 1.0, %v14666_v30  ;;  %14689 = vtanh.f32 %v10733_v2  ;;  %v10735_v51 = vmul.f32 0.7978846, %v10699_v18  ;;  %v10546_v35 = vmul.f32 0.5, %v23209_v23 }
0x15a8   : > { %v10827_v49 = vmul.f32 %v10791_v25, %v23207_v37  ;;  %v10737_v27 = vmul.f32 0.7978846, %v10701_v40  ;;  %14691 = vtanh.f32 %v10734_v32  ;;  %v10667_v11 = vmul.f32 %v22231_v8, %v22153_v47 }
0x15a9   : > { %v14668_v21 = vpop.eup %14667  ;;  %v10829_v55 = vmul.f32 %v10793_v31, %v23208_v12  ;;  %14693 = vtanh.f32 %v10736_v56  ;;  %v10548_v2 = vmul.f32 0.5, %v23210_v26  ;;  %v10669_v28 = vmul.f32 %v22239_v46, %v22181_v50  ;;  %v23212_v12 = vld [vmem:[#allocation21_spill] sm:$0xff] }
0x15aa   : > { %v14670_v61 = vpop.eup %14669  ;;  %10992 = vmatprep.mubr.f32.mxu1 %v10827_v49  ;;  %v10794_v33 = vadd.f32 1.0, %v14668_v21  ;;  %14695 = vtanh.f32 %v10735_v51  ;;  %v10551_v30 = vmul.f32 0.5, %v22101_v0  ;;  %v10703_v25 = vadd.f32 %v10667_v11, %v22153_v47  ;;  %v23211_v49 = vld [vmem:[#allocation15_spill] sm:$0xff] }
0x15ab   : > { %v14672_v24 = vpop.eup %14671  ;;  %11094 = vmatprep.mubr.f32.mxu0 %v10829_v55  ;;  %10993 = vmatmul.mubr.f32.vlgmr.msra.gmra.mxu1 %v22210_v34  ;;  %v10795_v32 = vadd.f32 1.0, %v14670_v61  ;;  %14697 = vtanh.f32 %v10737_v27  ;;  %v22374_v40 = vmul.f32 0.5, %v22106_v63  ;;  %v10705_v31 = vadd.f32 %v10669_v28, %v22181_v50 }
0x15ac   : > { %v14674_v8 = vpop.eup %14673  ;;  %11095 = vmatmul.mubr.f32.vlgmr.msra.gmra.mxu0 %v22228_v20  ;;  %v10796_v18 = vadd.f32 1.0, %v14672_v24  ;;  %v10738_v46 = vmul.f32 0.7978846, %v22216_v15  ;;  %v10550_v0 = vmul.f32 0.5, %v23211_v49  ;;  %v10739_v51 = vmul.f32 0.7978846, %v10703_v25 }
0x15ad   : > { %v14676_v56 = vpop.eup %14675  ;;  %v10831_v34 = vmul.f32 %v10795_v32, %v22304_v14  ;;  %v10797_v37 = vadd.f32 1.0, %v14674_v8  ;;  %v10830_v21 = vmul.f32 %v10794_v33, %v22330_v48  ;;  %v10552_v20 = vmul.f32 0.5, %v23212_v12  ;;  %v23213_v15 = vld [vmem:[#allocation36_spill] sm:$0xff]  ;;  %v23214_v12 = vld [vmem:[#allocation45_spill] sm:$0xff] }
0x15ae   : > { %v14678_v27 = vpop.eup %14677  ;;  %v10741_v55 = vmul.f32 0.7978846, %v10705_v31  ;;  %14699 = vtanh.f32 %v10738_v46  ;;  %v10798_v11 = vadd.f32 1.0, %v14676_v56  ;;  %v10740_v61 = vmul.f32 0.7978846, %v23213_v15 }
0x15af   : > { %v14680_v63 = vpop.eup %14679  ;;  %10996 = vmatprep.mubr.f32.mxu1 %v10831_v34  ;;  %v10833_v23 = vmul.f32 %v10797_v37, %v22327_v58  ;;  %14701 = vtanh.f32 %v10739_v51  ;;  %v10832_v26 = vmul.f32 %v10796_v18, %v22345_v6  ;;  %v10800_v24 = vadd.f32 1.0, %v14678_v27 }
0x15b0   : > { %v14682_v14 = vpop.eup %14681  ;;  %10997 = vmatmul.mubr.f32.gmra.mxu1 %v10830_v21  ;;  %v10799_v28 = vadd.f32 1.0, %v14680_v63  ;;  %14703 = vtanh.f32 %v10741_v55  ;;  %v10555_v32 = vmul.f32 0.5, %v22117_v57  ;;  %v10671_v58 = vmul.f32 %v22266_v53, %v22201_v44 }
0x15b1   : > { %v14684_v48 = vpop.eup %14683  ;;  %11098 = vmatprep.mubr.f32.mxu0 %v10833_v23  ;;  %v10801_v33 = vadd.f32 1.0, %v14682_v14  ;;  %14705 = vtanh.f32 %v10740_v61  ;;  %v10557_v46 = vmul.f32 0.5, %v23204_v36  ;;  %v10673_v6 = vmul.f32 %v22269_v3, %v22204_v41  ;;  %v23215_v23 = vld [vmem:[#allocation20_spill] sm:$0xff] }
0x15b2   : > { %v14686_v25 = vpop.eup %14685  ;;  %11099 = vmatmul.mubr.f32.gmra.mxu0 %v10832_v26  ;;  %v10835_v8 = vmul.f32 %v10799_v28, %v22352_v54  ;;  %v10802_v31 = vadd.f32 1.0, %v14684_v48  ;;  %v10834_v34 = vmul.f32 %v10798_v11, %v10546_v35  ;;  %v10707_v57 = vadd.f32 %v10671_v58, %v22201_v44 }
0x15b3   : > { %v14688_v18 = vpop.eup %14687  ;;  %v10837_v56 = vmul.f32 %v10801_v33, %v22358_v4  ;;  %v10803_v37 = vadd.f32 1.0, %v14686_v25  ;;  %v10836_v53 = vmul.f32 %v10800_v24, %v10548_v2  ;;  %v10709_v27 = vadd.f32 %v10673_v6, %v22204_v41  ;;  %v23216_v25 = vld [vmem:[#allocation19_spill] sm:$0xff] }
0x15b4   : > { %v14690_v49 = vpop.eup %14689  ;;  %11000 = vmatprep.mubr.f32.mxu1 %v10835_v8  ;;  %v10804_v51 = vadd.f32 1.0, %v14688_v18  ;;  %v10742_v54 = vmul.f32 0.7978846, %v22258_v22  ;;  %v10554_v55 = vmul.f32 0.5, %v23214_v12  ;;  %v10743_v4 = vmul.f32 0.7978846, %v10707_v57 }
0x15b5   : > { %v14692_v21 = vpop.eup %14691  ;;  %11102 = vmatprep.mubr.f32.mxu0 %v10837_v56  ;;  %11001 = vmatmul.mubr.f32.gmra.mxu1 %v10834_v34  ;;  %v10839_v36 = vmul.f32 %v10803_v37, %v10551_v30  ;;  %v10805_v3 = vadd.f32 1.0, %v14690_v49  ;;  %v10838_v63 = vmul.f32 %v10802_v31, %v10550_v0  ;;  %v10556_v11 = vmul.f32 0.5, %v23215_v23 }
0x15b6   : > { %v14694_v35 = vpop.eup %14693  ;;  %11103 = vmatmul.mubr.f32.gmra.mxu0 %v10836_v53  ;;  %v10745_v15 = vmul.f32 0.7978846, %v10709_v27  ;;  %14707 = vtanh.f32 %v10742_v54  ;;  %v10806_v22 = vadd.f32 1.0, %v14692_v21  ;;  %v10744_v14 = vmul.f32 0.7978846, %v22279_v38  ;;  %v23217_v53 = vld [vmem:[#allocation50_spill] sm:$0xff] }
0x15b7   : > { %v14696_v2 = vpop.eup %14695  ;;  %11004 = vmatprep.mubr.f32.mxu1 %v10839_v36  ;;  %v10841_v61 = vmul.f32 %v10805_v3, %v22374_v40  ;;  %14709 = vtanh.f32 %v10743_v4  ;;  %v10840_v26 = vmul.f32 %v10804_v51, %v10552_v20  ;;  %v10808_v24 = vadd.f32 1.0, %v14694_v35 }
0x15b8   : > { %v14698_v30 = vpop.eup %14697  ;;  %v10807_v28 = vadd.f32 1.0, %v14696_v2  ;;  %14711 = vtanh.f32 %v10745_v15  ;;  %v10559_v48 = vmul.f32 0.5, %v22153_v47  ;;  %v10675_v33 = vmul.f32 %v22282_v62, %v22222_v7 }
0x15b9   : > { %11106 = vmatprep.mubr.f32.mxu0 %v10841_v61  ;;  %11005 = vmatmul.mubr.f32.gmra.mxu1 %v10838_v63  ;;  %v10809_v0 = vadd.f32 1.0, %v14698_v30  ;;  %14713 = vtanh.f32 %v10744_v14  ;;  %v10561_v58 = vmul.f32 0.5, %v22181_v50  ;;  %v10558_v38 = vmul.f32 0.5, %v23216_v25 }
0x15ba   : > { %11107 = vmatmul.mubr.f32.gmra.mxu0 %v10840_v26  ;;  %v10843_v40 = vmul.f32 %v10807_v28, %v10555_v32  ;;  %v10677_v20 = vmul.f32 %v22290_v43, %v22225_v60  ;;  %v10842_v6 = vmul.f32 %v10806_v22, %v10554_v55  ;;  %v10711_v18 = vadd.f32 %v10675_v33, %v22222_v7 }
0x15bb   : > { %v14700_v8 = vpop.eup %14699  ;;  %v10845_v31 = vmul.f32 %v10809_v0, %v10557_v46  ;;  %v10746_v47 = vmul.f32 0.7978846, %v22287_v45  ;;  %v10844_v34 = vmul.f32 %v10808_v24, %v10556_v11  ;;  %v10748_v50 = vmul.f32 0.7978846, %v22298_v5 }
0x15bc   : > { %v14702_v56 = vpop.eup %14701  ;;  %11008 = vmatprep.mubr.f32.mxu1 %v10843_v40  ;;  %v10810_v62 = vadd.f32 1.0, %v14700_v8  ;;  %v10713_v32 = vadd.f32 %v10677_v20, %v22225_v60  ;;  %v10747_v43 = vmul.f32 0.7978846, %v10711_v18  ;;  %v10679_v46 = vmul.f32 %v22309_v1, %v22263_v10 }
0x15bd   : > { %v14704_v37 = vpop.eup %14703  ;;  %11110 = vmatprep.mubr.f32.mxu0 %v10845_v31  ;;  %11009 = vmatmul.mubr.f32.gmra.mxu1 %v10842_v6  ;;  %v10811_v57 = vadd.f32 1.0, %v14702_v56  ;;  %14715 = vtanh.f32 %v10746_v47  ;;  %v10560_v51 = vmul.f32 0.5, %v23217_v53  ;;  %v10681_v12 = vmul.f32 %v22316_v59, %v22273_v19 }
0x15be   : > { %v14706_v49 = vpop.eup %14705  ;;  %11111 = vmatmul.mubr.f32.gmra.mxu0 %v10844_v34  ;;  %v10813_v45 = vadd.f32 1.0, %v14704_v37  ;;  %v10749_v27 = vmul.f32 0.7978846, %v10713_v32  ;;  %14717 = vtanh.f32 %v10748_v50  ;;  %v10715_v5 = vadd.f32 %v10679_v46, %v22263_v10 }
0x15bf   : > { %v10847_v54 = vmul.f32 %v10811_v57, %v10559_v48  ;;  %v10812_v21 = vadd.f32 1.0, %v14706_v49  ;;  %14719 = vtanh.f32 %v10747_v43  ;;  %v10846_v3 = vmul.f32 %v10810_v62, %v10558_v38 }
0x15c0   : > { %v10849_v36 = vmul.f32 %v10813_v45, %v10561_v58  ;;  %14721 = vtanh.f32 %v10749_v27  ;;  %v10751_v55 = vmul.f32 0.7978846, %v10715_v5  ;;  %v10750_v4 = vmul.f32 0.7978846, %v22336_v39 }
0x15c1   : > { %11012 = vmatprep.mubr.f32.mxu1 %v10847_v54  ;;  %v10848_v1 = vmul.f32 %v10812_v21, %v10560_v51  ;;  %v10717_v35 = vadd.f32 %v10681_v12, %v22273_v19  ;;  %v10752_v63 = vmul.f32 0.7978846, %v22341_v29  ;;  %v10563_v59 = vmul.f32 0.5, %v22201_v44 }
0x15c2   : > { %11114 = vmatprep.mubr.f32.mxu0 %v10849_v36  ;;  %11013 = vmatmul.mubr.f32.gmra.mxu1 %v10846_v3  ;;  %14723 = vtanh.f32 %v10751_v55  ;;  %v10565_v39 = vmul.f32 0.5, %v22204_v41  ;;  %v10562_v26 = vmul.f32 0.5, %v22156_v16  ;;  %v10564_v28 = vmul.f32 0.5, %v22159_v13 }
0x15c3   : > { %v14708_v23 = vpop.eup %14707  ;;  %11115 = vmatmul.mubr.f32.gmra.mxu0 %v10848_v1  ;;  %v10753_v2 = vmul.f32 0.7978846, %v10717_v35  ;;  %14725 = vtanh.f32 %v10750_v4  ;;  %v10567_v38 = vmul.f32 0.5, %v22222_v7  ;;  %v10569_v8 = vmul.f32 0.5, %v22225_v60 }
0x15c4   : > { %v14710_v11 = vpop.eup %14709  ;;  %v10814_v15 = vadd.f32 1.0, %v14708_v23  ;;  %14727 = vtanh.f32 %v10752_v63  ;;  %v10566_v31 = vmul.f32 0.5, %v22197_v9  ;;  %v10568_v18 = vmul.f32 0.5, %v22207_v52 }
0x15c5   : > { %v14712_v61 = vpop.eup %14711  ;;  %v10815_v22 = vadd.f32 1.0, %v14710_v11  ;;  %14729 = vtanh.f32 %v10753_v2  ;;  %v10571_v50 = vmul.f32 0.5, %v22263_v10  ;;  %v10570_v60 = vmul.f32 0.5, %v22245_v17 }
0x15c6   : > { %v14714_v14 = vpop.eup %14713  ;;  %v10817_v30 = vadd.f32 1.0, %v14712_v61  ;;  %v10850_v48 = vmul.f32 %v10814_v15, %v10562_v26  ;;  %v10573_v52 = vmul.f32 0.5, %v22273_v19  ;;  %v10572_v53 = vmul.f32 0.5, %v22248_v42 }
0x15c7   : > { %v10851_v29 = vmul.f32 %v10815_v22, %v10563_v59  ;;  %v10816_v24 = vadd.f32 1.0, %v14714_v14  ;;  %v23218_v27 = vmov 0.0  }
0x15c8   : > { %v10853_v0 = vmul.f32 %v10817_v30, %v10565_v39 }
0x15c9   : > { %11016 = vmatprep.mubr.f32.mxu1 %v10851_v29  ;;  %v10852_v33 = vmul.f32 %v10816_v24, %v10564_v28 }
0x15ca   : > { %v14716_v40 = vpop.eup %14715  ;;  %11118 = vmatprep.mubr.f32.mxu0 %v10853_v0  ;;  %11017 = vmatmul.mubr.f32.gmra.mxu1 %v10850_v48 }
0x15cb   : > { %v14718_v44 = vpop.eup %14717  ;;  %11119 = vmatmul.mubr.f32.gmra.mxu0 %v10852_v33  ;;  %v10818_v25 = vadd.f32 1.0, %v14716_v40 }
0x15cc   : > { %v14720_v58 = vpop.eup %14719  ;;  %v10820_v20 = vadd.f32 1.0, %v14718_v44 }
0x15cd   : > { %v14722_v41 = vpop.eup %14721  ;;  %v10819_v16 = vadd.f32 1.0, %v14720_v58  ;;  %v10854_v34 = vmul.f32 %v10818_v25, %v10566_v31  ;;  %v10927_v58 = vld [vmem:[%s22526_s5 + $0x23] ss:$0 sm:$0xff]  ;;  %v23219_v31 = vld [vmem:[#allocation43_spill] sm:$0xff] }
0x15ce   : > { %v10821_v13 = vadd.f32 1.0, %v14722_v41  ;;  %v10856_v32 = vmul.f32 %v10820_v20, %v10568_v18 }
0x15cf   : > { %v10855_v6 = vmul.f32 %v10819_v16, %v10567_v38  ;;  %v14724_v47 = vpop.eup %14723 }
0x15d0   : > { %v10857_v56 = vmul.f32 %v10821_v13, %v10569_v8  ;;  %v14726_v62 = vpop.eup %14725  ;;  %v10823_v37 = vadd.f32 1.0, %v14724_v47 }
0x15d1   : > { %11020 = vmatprep.mubr.f32.mxu1 %v10855_v6  ;;  %v14728_v7 = vpop.eup %14727  ;;  %v10822_v57 = vadd.f32 1.0, %v14726_v62 }
0x15d2   : > { %11122 = vmatprep.mubr.f32.mxu0 %v10857_v56  ;;  %11021 = vmatmul.mubr.f32.gmra.mxu1 %v10854_v34  ;;  %v14730_v43 = vpop.eup %14729  ;;  %v10859_v9 = vmul.f32 %v10823_v37, %v10571_v50  ;;  %v10824_v46 = vadd.f32 1.0, %v14728_v7  ;;  %v11158_v50 = vld [vmem:[%s22525_s4 + $0x150] sm:$0xff]  ;;  %v11157_v37 = vld [vmem:[%s22525_s4 + $0x148] sm:$0xff]  ;;  %v11156_v7 = vld [vmem:[%s22525_s4 + $0x140] sm:$0xff] }
0x15d3   : > { %11123 = vmatmul.mubr.f32.gmra.mxu0 %v10856_v32  ;;  %v10825_v49 = vadd.f32 1.0, %v14730_v43  ;;  %v10858_v45 = vmul.f32 %v10822_v57, %v10570_v60  ;;  %14420 = vmatpush3.msra.mxu1 %v11158_v50  ;;  %v11155_v60 = vld [vmem:[%s22525_s4 + $0x138] sm:$0xff]  ;;  %v11154_v57 = vld [vmem:[%s22525_s4 + $0x130] sm:$0xff]  ;;  %v11153_v43 = vld [vmem:[%s22525_s4 + $0x128] sm:$0xff] }
0x15d4   : > { %11024 = vmatprep.mubr.f32.mxu1 %v10859_v9  ;;  %v10860_v10 = vmul.f32 %v10824_v46, %v10572_v53  ;;  %14421 = vmatprep.subr.mxu1 %v23218_v27  ;;  %v11152_v9 = vld [vmem:[%s22525_s4 + $0x120] sm:$0xff]  ;;  %v11151_v46 = vld [vmem:[%s22525_s4 + $0x118] sm:$0xff] }
0x15d5   : > { %v10861_v51 = vmul.f32 %v10825_v49, %v10573_v52  ;;  %14422 = vmatpush3.msra.mxu1 %v11157_v37 }
0x15d6   : > { %11025 = vmatmul.mubr.f32.gmra.mxu1 %v10858_v45  ;;  %14423 = vmatprep.subr.mxu1 %v23218_v27 }
0x15d7   : > { %14435 = vmatprep.mubr.msk.f32.mxu1 %vm14967_vm6, %v23218_v27  ;;  %11126 = vmatprep.mubr.f32.mxu0 %v10861_v51  ;;  %v11147_v51 = vld [vmem:[%s22526_s5 + $0x24] ss:$0 sm:$0xff] }
0x15d8   : > { %11127 = vmatmul.mubr.f32.gmra.mxu0 %v10860_v10  ;;  %14424 = vmatpush3.msra.mxu1 %v11156_v7 }
0x15d9   : > { %14425 = vmatprep.subr.mxu1 %v23218_v27 }
0x15da   : > { %14426 = vmatpush3.msra.mxu1 %v11155_v60 }
0x15db   : > { %14427 = vmatprep.subr.mxu1 %v23218_v27 }
0x15dc   : > { %14428 = vmatpush3.msra.mxu1 %v11154_v57 }
0x15dd   : > { %14429 = vmatprep.subr.mxu1 %v23218_v27 }
0x15de   : > { %14430 = vmatpush3.msra.mxu1 %v11153_v43 }
0x15df   : > { %14431 = vmatprep.subr.mxu1 %v23218_v27 }
0x15e0   : > { %14432 = vmatpush3.msra.mxu1 %v11152_v9 }
0x15e1   : > { %14433 = vmatprep.subr.mxu1 %v23218_v27  ;;  %v11159_v27 = vld [vmem:[%s22526_s5 + $0x26] ss:$0 sm:$0xff] }
0x15e2   : > { %14434 = vmatpush3.msra.mxu1 %v11151_v46 }
0x166b   : > { %v12904_v17 = vpop.f32.mrf.mxu1 }
0x166c   : > { %v12963_v54 = vpop.f32.mrf.mxu0  ;;  %v11149_v17 = vld [vmem:[%s22526_s5 + $0x25] ss:$0 sm:$0xff] }
0x166d   : > { %v12905_v21 = vpop.f32.mrf.mxu1 }
0x166e   : > { %v12964_v5 = vpop.f32.mrf.mxu0 }
0x1670   : > { %v12907_v36 = vpop.f32.mrf.mxu1 }
0x1672   : > { %v12966_v3 = vpop.f32.mrf.mxu0  ;;  %v12908_v19 = vpop.f32.mrf.mxu1 }
0x1674   : > { %v12967_v12 = vpop.f32.mrf.mxu0 }
0x1675   : > { %v12910_v1 = vpop.f32.mrf.mxu1 }
0x1676   : > { %v12969_v55 = vpop.f32.mrf.mxu0 }
0x1677   : > { %v12911_v4 = vpop.f32.mrf.mxu1 }
0x1678   : > { %v12970_v42 = vpop.f32.mrf.mxu0 }
0x1679   : > { %v12913_v35 = vpop.f32.mrf.mxu1 }
0x167a   : > { %v12972_v63 = vpop.f32.mrf.mxu0 }
0x167b   : > { %v12914_v23 = vpop.f32.mrf.mxu1 }
0x167c   : > { %v12973_v11 = vpop.f32.mrf.mxu0 }
0x167d   : > { %v12916_v15 = vpop.f32.mrf.mxu1 }
0x167e   : > { %v12975_v2 = vpop.f32.mrf.mxu0 }
0x167f   : > { %v12917_v61 = vpop.f32.mrf.mxu1 }
0x1680   : > { %v12976_v59 = vpop.f32.mrf.mxu0 }
0x1682   : > { %v12919_v22 = vpop.f32.mrf.mxu1 }
0x1683   : > { %v12978_v14 = vpop.f32.mrf.mxu0 }
0x1684   : > { %v12920_v39 = vpop.f32.mrf.mxu1 }
0x1685   : > { %v12979_v30 = vpop.f32.mrf.mxu0 }
0x168a   : > { %v12922_v26 = vpop.f32.mrf.mxu1 }
0x168b   : > { %v12981_v29 = vpop.f32.mrf.mxu0 }
0x168c   : > { %v12923_v28 = vpop.f32.mrf.mxu1 }
0x168d   : > { %v12982_v24 = vpop.f32.mrf.mxu0 }
0x1692   : > { %v12925_v0 = vpop.f32.mrf.mxu1 }
0x1693   : > { %v12984_v48 = vpop.f32.mrf.mxu0 }
0x1694   : > { %v12926_v33 = vpop.f32.mrf.mxu1 }
0x1695   : > { %v12985_v40 = vpop.f32.mrf.mxu0 }
0x1696   : > { %v12928_v44 = vpop.f32.mrf.mxu1 }
0x1698   : > { %v12929_v25 = vpop.f32.mrf.mxu1  ;;  %v12987_v41 = vpop.f32.mrf.mxu0 }
0x1699   : > { %v12930_v38 = vadd.f32 %v12929_v25, %v12928_v44 }
0x169a   : > { %v12988_v20 = vpop.f32.mrf.mxu0 }
0x169b   : > { %v11027_v16 = vadd.f32 %v12930_v38, %v10927_v58  ;;  %v12989_v8 = vadd.f32 %v12988_v20, %v12987_v41 }
0x169d   : > { %v11129_v13 = vadd.f32 %v12989_v8, %v11027_v16 }
0x169f   : > { %v11132_v6 = vadd.f32 %v11129_v13, %v23219_v31 }
0x16a1   : > { %v11134_v18 = vsel %vm11133_vm5, %v11132_v6, 0.0 }
0x16a2   : > { %11135 = vadd.xlane.f32.xlu0 %v11134_v18 }
0x172b   : > { %v11136_v47 = vpop.xlane.xlu0 %11135 }
0x172c   : > { %v11137_v56 = vmul.f32 0.015625, %v11136_v47 }
0x172e   : > { %v11138_v34 = vsub.f32 %v11132_v6, %v11137_v56 }
0x1730   : > { %v11139_v62 = vmul.f32 %v11138_v34, %v11138_v34 }
0x1732   : > { %v11140_v32 = vsel %vm11133_vm5, %v11139_v62, 0.0 }
0x1733   : > { %11141 = vadd.xlane.f32.xlu1 %v11140_v32 }
0x17bc   : > { %v11142_v52 = vpop.xlane.xlu1 %11141 }
0x17bd   : > { %v11143_v49 = vmul.f32 0.015625, %v11142_v52 }
0x17bf   : > { %v11144_v45 = vadd.f32 1e-06, %v11143_v49 }
0x17c1   : > { %14731 = vrsqrt.f32 %v11144_v45 }
0x17ce   : > { %v14732_v53 = vpop.eup %14731 }
0x17cf   : > { %v11146_v10 = vmul.f32 %v14732_v53, %v11138_v34 }
0x17d1   : > { %v11148_v54 = vmul.f32 %v11147_v51, %v11146_v10 }
0x17d3   : > { %v11150_v21 = vadd.f32 %v11149_v17, %v11148_v54 }
0x17d5   : > { %14436 = vmatmul.mubr.msk.f32.vlgmr.msra.gmra.mxu1 %vm2525_vm13, %v11150_v21 }
0x1895   : > { %v11229_v5 = vpop.f32.mrf.mxu1 }
0x1896   : > { %v11230_v36 = vadd.f32 %v11229_v5, %v11159_v27 }
0x1897   : > { %v14437_v3 = vpop.f32.mrf.mxu1 }
0x1898   : > { %11234 = vst.msk [vmem:[%s440_s16] sm:$0x1] %vm11233_vm4, %v11230_v36 }
0x1899   : > { %14917 = shalt.err (!%p14914_p7)
}
0x189a   : > { %s14918_s29 = scalar_lea.hbm %s22484_s23, 16  ;;  %s14922_s16 = scalar_lea.hbm %s22530_s9, 32 }
0x189b   : > { %p14919_p10 = scmp.ne.s32.totalorder %s22484_s23, %s14918_s29  ;;  %p14923_p13 = scmp.lt.s32.totalorder %s22484_s23, %s22530_s9 }
0x189c   : > { %p14924_p0 = scmp.lt.s32.totalorder %s14922_s16, %s14918_s29 }
0x189d   : > { %p14920_p11 = pnand %p14919_p10, %p15058_p6 }
0x189e   : > { %p14925_p1 = por %p14924_p0, %p14923_p13 }
0x189f   : > { %p14921_p12 = pneg %p14920_p11 }
0x18a1   : > { %p14926_p2 = pnand %p14925_p1, %p14921_p12 }
0x18a3   : > { %14929 = shalt.err (!%p14926_p2)
}
0x18a4   : > { %14438 = dma.vmem_to_hbm [thread:$0]  (%p15058_p6), %s11249_s17, 16, %s22484_s23, %s11236_s24  }
0x18a5 PF: > { %s11260_s25 = sand.u32 1, %s14952_s30   ;;  %p14441_p3 = pnand %p11323_p9, %p15062_p8 }
0x18a6   : > { %s11261_s13 = scalar_lea.sflag [#allocation4], %s11260_s25 }
0x18a7   : > { %p14442_p4 = pneg %p14441_p3 }
0x18a9   : > { %14947 = dma.done.wait (%p14442_p4), %s11261_s13, 16  }
0x18aa   : > { %14949 = vsyncadd (%p14442_p4), %s11261_s13, 4294967280  ;;  %p19_p5 = scmp.ge.s32.totalorder %s15044_s15, 4   ;;  %s23220_s30 = smov %s14956_s10 }
0x18ab   : > { %s23221_s10 = smov %s14960_s11  ;;  %s23222_s11 = smov %s15056_s18 }
0x18ac   : > { %s23223_s12 = smov %s15044_s15  ;;  %21 = sbr.rel (!%p19_p5) target bundleno = 3 (0x3), region = 143 }
0x18b1   :  { %11265 = vsyncpa [#allocation4], 1 }
0x18b2   :  { %11267 = vsyncpa [#allocation4 + $0x1], 1 }

</bundles_post_ra>
